<compile_context>
chip_gen: v7x
topology: tpu7x:2x2x1
jax: 0.10.0
libtpu: 0.0.40
codegen_flags: <defaults>
</compile_context>

<pallas_src>
import math

import jax
import jax.numpy as jnp
from jax import lax
from jax.experimental import pallas as pl
from jax.experimental.pallas import tpu as pltpu

# ----- demo sizes (scaled down from d_model=2048 / dim_feedforward=8192) ----
D_MODEL = 128        # kept at 128 so the lane axis is dense
N_HEAD = 4
D_HEAD = D_MODEL // N_HEAD
D_FF = 256
NUM_LAYERS = 2
LN_EPS = 1e-5

SQ = 8               # tgt length
SM = 16              # image-memory length
SG = 8               # graph-memory length
BATCH = 2

_INV_SQRT_DH = 1.0 / math.sqrt(D_HEAD)


# --------------------- shared math (kernel and reference) -------------------
def _layer_norm(x, gamma, beta):
    mu = jnp.mean(x, axis=-1, keepdims=True)
    var = jnp.mean((x - mu) ** 2, axis=-1, keepdims=True)
    return (x - mu) * lax.rsqrt(var + LN_EPS) * gamma + beta


def _mm(x, w):
    # bf16 operands on the MXU, f32 accumulation.
    return jnp.dot(x.astype(jnp.bfloat16), w.astype(jnp.bfloat16),
                   preferred_element_type=jnp.float32)


def _ffn(x, w1, b1, w2, b2):
    h = jnp.maximum(_mm(x, w1) + b1, 0.0)
    return _mm(h, w2) + b2


def _kv_heads(kv, wk, bk, wv, bv):
    """kv: (s_kv, D) -> K, V as (s_kv, H, D_HEAD) bf16 (one batch element)."""
    s_kv = kv.shape[0]
    k = _mm(kv, wk) + bk
    v = _mm(kv, wv) + bv
    k = k.reshape(s_kv, N_HEAD, D_HEAD).astype(jnp.bfloat16)
    v = v.reshape(s_kv, N_HEAD, D_HEAD).astype(jnp.bfloat16)
    return k, v


def _attend(x, k, v, wq, bq, wo, bo, recip):
    """Multi-head attention with all heads in one batched einsum pair.

    x: (s_q, D);  k/v: (s_kv, H, D_HEAD).
    """
    s_q = x.shape[0]
    # fold 1/sqrt(d_head) into q (saves a full-tile mul on the score tile)
    q = (_mm(x, wq) + bq) * _INV_SQRT_DH
    q = q.reshape(s_q, N_HEAD, D_HEAD).astype(jnp.bfloat16)
    # one MXU contraction for all heads' scores: (H, s_q, s_kv)
    s = jnp.einsum('qhd,khd->hqk', q, k, preferred_element_type=jnp.float32)
    s = s - jnp.max(s, axis=-1, keepdims=True)
    p = jnp.exp(s)
    inv_l = recip(jnp.sum(p, axis=-1, keepdims=True))          # (H, s_q, 1)
    # one MXU contraction for all heads' A@V: (s_q, H, D_HEAD)
    o = jnp.einsum('hqk,khd->qhd', p.astype(jnp.bfloat16), v,
                   preferred_element_type=jnp.float32)
    o = o * jnp.swapaxes(inv_l, 0, 1)                          # scale AV, not scores
    o = o.reshape(s_q, D_MODEL)                                # merge heads (lane-dense)
    # single Wo GEMM with K = D_MODEL (no per-head accumulation / lane concat)
    return _mm(o, wo) + bo


def _decoder_stack(x, mem_img, mem_graph,
                   attn_w, attn_b, w1, b1, w2, b2, ln_w, ln_b, recip):
    """Shared-weight NUM_LAYERS decoder stack for ONE batch element.

    attn_w/attn_b index: [attn_idx(self,img,graph), proj(q,k,v,o)].
    """
    def qo(i):
        return attn_w[i, 0], attn_b[i, 0], attn_w[i, 3], attn_b[i, 3]

    # Cross-attention K/V are loop-invariant (shared weights; memories pass
    # through every layer unchanged) -> computed once, reused every layer.
    k_img, v_img = _kv_heads(mem_img, attn_w[1, 1], attn_b[1, 1],
                             attn_w[1, 2], attn_b[1, 2])
    k_gr, v_gr = _kv_heads(mem_graph, attn_w[2, 1], attn_b[2, 1],
                           attn_w[2, 2], attn_b[2, 2])

    def layer(_, x):
        # self-attention K/V depend on x -> recomputed per layer
        k_s, v_s = _kv_heads(x, attn_w[0, 1], attn_b[0, 1],
                             attn_w[0, 2], attn_b[0, 2])
        x = _layer_norm(x + _attend(x, k_s, v_s, *qo(0), recip), ln_w[0], ln_b[0])
        x = _layer_norm(x + _attend(x, k_img, v_img, *qo(1), recip), ln_w[1], ln_b[1])
        x = _layer_norm(x + _attend(x, k_gr, v_gr, *qo(2), recip), ln_w[2], ln_b[2])
        x = _layer_norm(x + _ffn(x, w1, b1, w2, b2), ln_w[3], ln_b[3])
        return x

    # fori_loop (weights shared; only x is loop-carried) bounds vreg live
    # ranges and compile time vs a static unroll.
    return lax.fori_loop(0, NUM_LAYERS, layer, x)


# ------------------------------ Pallas kernel --------------------------------
def llcd_decoder_kernel(x_ref, mi_ref, mg_ref,
                        attn_w_ref, attn_b_ref,
                        w1_ref, b1_ref, w2_ref, b2_ref,
                        ln_w_ref, ln_b_ref,
                        out_ref):
    # TODO(synk): tgt_mask / memory_mask / key_padding_masks are always None in
    # this forward path and are not implemented.
    x = x_ref[...].astype(jnp.float32)      # (SQ, D)  one batch element
    mi = mi_ref[...].astype(jnp.float32)    # (SM, D)
    mg = mg_ref[...].astype(jnp.float32)    # (SG, D)

    y = _decoder_stack(
        x, mi, mg,
        attn_w_ref[...], attn_b_ref[...],
        w1_ref[...], b1_ref[...], w2_ref[...], b2_ref[...],
        ln_w_ref[...], ln_b_ref[...],
        recip=lambda l: pl.reciprocal(l, approx=True))   # EUP slot

    out_ref[...] = y.astype(out_ref.dtype)


def _run_decoder(x3d, mi3d, mg3d, params):
    batch, s_q, d = x3d.shape
    s_m = mi3d.shape[1]
    s_g = mg3d.shape[1]

    def act_spec(s_len):
        # one batch element per grid step; batch dim squeezed out of the ref
        return pl.BlockSpec((None, s_len, d), lambda b: (b, 0, 0))

    def resident_spec(shape):
        nd = len(shape)
        # same block index every grid step -> stays resident in VMEM, no
        # per-batch-block re-DMA (loop-invariant operand)
        return pl.BlockSpec(shape, lambda b, _nd=nd: (0,) * _nd)

    weights = (params["attn_w"], params["attn_b"],
               params["w1"], params["b1"], params["w2"], params["b2"],
               params["ln_w"], params["ln_b"])

    return pl.pallas_call(
        llcd_decoder_kernel,
        out_shape=jax.ShapeDtypeStruct(x3d.shape, x3d.dtype),
        grid_spec=pltpu.PrefetchScalarGridSpec(
            num_scalar_prefetch=0,
            grid=(batch,),
            in_specs=[act_spec(s_q), act_spec(s_m), act_spec(s_g)]
                     + [resident_spec(w.shape) for w in weights],
            out_specs=act_spec(s_q),
        ),
        compiler_params=pltpu.CompilerParams(
            # independent batch blocks -> megacore-shardable on v7x (2 TCs);
            # harmless on v5e/v6e (1 TC)
            dimension_semantics=("parallel",),
            # demo dims need <1 MiB; raised above v5e's 16 MiB scoped default
            # so larger tiles (real-dims work) don't spuriously VMEM-OOM
            vmem_limit_bytes=32 * 1024 * 1024,
        ),
    )(x3d, mi3d, mg3d, *weights)


@jax.jit
def llcd_decoder_forward(tgt, memory_image, memory_graph, params):
    """tgt / memory_*: [S, B, D] (PyTorch nn.Transformer convention)."""
    x3d = jnp.transpose(tgt, (1, 0, 2))
    mi3d = jnp.transpose(memory_image, (1, 0, 2))
    mg3d = jnp.transpose(memory_graph, (1, 0, 2))
    out3d = _run_decoder(x3d, mi3d, mg3d, params)
    return jnp.transpose(out3d, (1, 0, 2))


# ---------------------------- pure-JAX reference ------------------------------
def reference_forward(tgt, memory_image, memory_graph, params):
    batch = tgt.shape[1]
    outs = []
    for b in range(batch):
        y = _decoder_stack(
            tgt[:, b, :].astype(jnp.float32),
            memory_image[:, b, :].astype(jnp.float32),
            memory_graph[:, b, :].astype(jnp.float32),
            params["attn_w"], params["attn_b"],
            params["w1"], params["b1"], params["w2"], params["b2"],
            params["ln_w"], params["ln_b"],
            recip=lambda l: 1.0 / l)            # exact denom in the reference
        outs.append(y)
    return jnp.stack(outs, axis=1).astype(tgt.dtype)


# ---------------------------------- params ------------------------------------
def init_params(key):
    ks = jax.random.split(key, 6)
    scale = 0.05
    return {
        # 3 attentions (self, cross-image, cross-graph) x [Wq, Wk, Wv, Wo],
        # stored PRE-TRANSPOSED as (d_in, d_out) so the kernel computes x @ W
        # directly (no .T / XLU transpose in the body), in bf16 so weight DMA
        # bytes are halved and the MXU takes the bf16 path.
        "attn_w": (scale * jax.random.normal(
            ks[0], (3, 4, D_MODEL, D_MODEL), jnp.float32)).astype(jnp.bfloat16),
        # biases / LN params stay f32 (VPU-side math is f32 on all gens) and
        # are pre-shaped (1, D) so no reshape/broadcast inside the kernel.
        "attn_b": scale * jax.random.normal(ks[1], (3, 4, 1, D_MODEL), jnp.float32),
        "w1": (scale * jax.random.normal(
            ks[2], (D_MODEL, D_FF), jnp.float32)).astype(jnp.bfloat16),
        "b1": scale * jax.random.normal(ks[3], (1, D_FF), jnp.float32),
        "w2": (scale * jax.random.normal(
            ks[4], (D_FF, D_MODEL), jnp.float32)).astype(jnp.bfloat16),
        "b2": scale * jax.random.normal(ks[5], (1, D_MODEL), jnp.float32),
        "ln_w": jnp.ones((4, 1, D_MODEL), jnp.float32),
        "ln_b": jnp.zeros((4, 1, D_MODEL), jnp.float32),
    }


if __name__ == "__main__":
    key = jax.random.PRNGKey(0)
    k_tgt, k_img, k_graph, k_par = jax.random.split(key, 4)

    tgt = jax.random.normal(k_tgt, (SQ, BATCH, D_MODEL), jnp.float32)
    memory_image = jax.random.normal(k_img, (SM, BATCH, D_MODEL), jnp.float32)
    memory_graph = jax.random.normal(k_graph, (SG, BATCH, D_MODEL), jnp.float32)
    params = init_params(k_par)

    out = llcd_decoder_forward(tgt, memory_image, memory_graph, params)
    out = jax.block_until_ready(out)

    ref = reference_forward(tgt, memory_image, memory_graph, params)
    assert out.shape == (SQ, BATCH, D_MODEL)
    assert bool(jnp.all(jnp.isfinite(out)))
    # bf16 matmul operands in both paths; kernel additionally uses the EUP
    # approx-reciprocal for the softmax denominator -> loose-ish tolerance.
    assert jnp.allclose(out, ref, atol=2e-2, rtol=2e-2), "mismatch vs pure-JAX reference"

    print("KERNEL_OK")
</pallas_src>

<mosaic_0001>
module attributes {stable_mosaic.version = 11 : i64} {
  func.func @llcd_decoder_kernel(%arg0: i32, %arg1: memref<1x8x128xf32, #tpu.memory_space<vmem>>, %arg2: memref<1x16x128xf32, #tpu.memory_space<vmem>>, %arg3: memref<1x8x128xf32, #tpu.memory_space<vmem>>, %arg4: memref<3x4x128x128xbf16, #tpu.memory_space<vmem>>, %arg5: memref<3x4x1x128xf32, #tpu.memory_space<vmem>>, %arg6: memref<128x256xbf16, #tpu.memory_space<vmem>>, %arg7: memref<1x256xf32, #tpu.memory_space<vmem>>, %arg8: memref<256x128xbf16, #tpu.memory_space<vmem>>, %arg9: memref<1x128xf32, #tpu.memory_space<vmem>>, %arg10: memref<4x1x128xf32, #tpu.memory_space<vmem>>, %arg11: memref<4x1x128xf32, #tpu.memory_space<vmem>>, %arg12: memref<1x8x128xf32, #tpu.memory_space<vmem>>) attributes {dimension_semantics = [#tpu.dimension_semantics<parallel>], iteration_bounds = array<i64: 2>, scalar_prefetch = 0 : i64, scratch_operands = 0 : i64, tpu.core_type = #tpu.core_type<tc>, window_params = [{transform_indices = @transform_0, window_bounds = array<i64: 1, 8, 128>}, {transform_indices = @transform_1, window_bounds = array<i64: 1, 16, 128>}, {transform_indices = @transform_2, window_bounds = array<i64: 1, 8, 128>}, {pipeline_mode = #tpu.pipeline_mode<synchronous>, transform_indices = @transform_3, window_bounds = array<i64: 3, 4, 128, 128>}, {pipeline_mode = #tpu.pipeline_mode<synchronous>, transform_indices = @transform_4, window_bounds = array<i64: 3, 4, 1, 128>}, {pipeline_mode = #tpu.pipeline_mode<synchronous>, transform_indices = @transform_5, window_bounds = array<i64: 128, 256>}, {pipeline_mode = #tpu.pipeline_mode<synchronous>, transform_indices = @transform_6, window_bounds = array<i64: 1, 256>}, {pipeline_mode = #tpu.pipeline_mode<synchronous>, transform_indices = @transform_7, window_bounds = array<i64: 256, 128>}, {pipeline_mode = #tpu.pipeline_mode<synchronous>, transform_indices = @transform_8, window_bounds = array<i64: 1, 128>}, {pipeline_mode = #tpu.pipeline_mode<synchronous>, transform_indices = @transform_9, window_bounds = array<i64: 4, 1, 128>}, {pipeline_mode = #tpu.pipeline_mode<synchronous>, transform_indices = @transform_10, window_bounds = array<i64: 4, 1, 128>}, {transform_indices = @transform_11, window_bounds = array<i64: 1, 8, 128>}]} {
    %c0 = arith.constant 0 : index
    %c0_0 = arith.constant 0 : index
    %c0_1 = arith.constant 0 : index
    %0 = vector.load %arg1[%c0, %c0_0, %c0_1] : memref<1x8x128xf32, #tpu.memory_space<vmem>>, vector<1x8x128xf32>
    %1 = vector.shape_cast %0 : vector<1x8x128xf32> to vector<8x128xf32>
    %c0_2 = arith.constant 0 : index
    %c0_3 = arith.constant 0 : index
    %c0_4 = arith.constant 0 : index
    %2 = vector.load %arg2[%c0_2, %c0_3, %c0_4] : memref<1x16x128xf32, #tpu.memory_space<vmem>>, vector<1x16x128xf32>
    %3 = vector.shape_cast %2 : vector<1x16x128xf32> to vector<16x128xf32>
    %c0_5 = arith.constant 0 : index
    %c0_6 = arith.constant 0 : index
    %c0_7 = arith.constant 0 : index
    %4 = vector.load %arg3[%c0_5, %c0_6, %c0_7] : memref<1x8x128xf32, #tpu.memory_space<vmem>>, vector<1x8x128xf32>
    %5 = vector.shape_cast %4 : vector<1x8x128xf32> to vector<8x128xf32>
    %c0_8 = arith.constant 0 : index
    %c0_9 = arith.constant 0 : index
    %c0_10 = arith.constant 0 : index
    %c0_11 = arith.constant 0 : index
    %6 = vector.load %arg4[%c0_8, %c0_9, %c0_10, %c0_11] : memref<3x4x128x128xbf16, #tpu.memory_space<vmem>>, vector<3x4x128x128xbf16>
    %c0_12 = arith.constant 0 : index
    %c0_13 = arith.constant 0 : index
    %c0_14 = arith.constant 0 : index
    %c0_15 = arith.constant 0 : index
    %7 = vector.load %arg5[%c0_12, %c0_13, %c0_14, %c0_15] : memref<3x4x1x128xf32, #tpu.memory_space<vmem>>, vector<3x4x1x128xf32>
    %c0_16 = arith.constant 0 : index
    %c0_17 = arith.constant 0 : index
    %8 = vector.load %arg6[%c0_16, %c0_17] : memref<128x256xbf16, #tpu.memory_space<vmem>>, vector<128x256xbf16>
    %c0_18 = arith.constant 0 : index
    %c0_19 = arith.constant 0 : index
    %9 = vector.load %arg7[%c0_18, %c0_19] : memref<1x256xf32, #tpu.memory_space<vmem>>, vector<1x256xf32>
    %c0_20 = arith.constant 0 : index
    %c0_21 = arith.constant 0 : index
    %10 = vector.load %arg8[%c0_20, %c0_21] : memref<256x128xbf16, #tpu.memory_space<vmem>>, vector<256x128xbf16>
    %c0_22 = arith.constant 0 : index
    %c0_23 = arith.constant 0 : index
    %11 = vector.load %arg9[%c0_22, %c0_23] : memref<1x128xf32, #tpu.memory_space<vmem>>, vector<1x128xf32>
    %c0_24 = arith.constant 0 : index
    %c0_25 = arith.constant 0 : index
    %c0_26 = arith.constant 0 : index
    %12 = vector.load %arg10[%c0_24, %c0_25, %c0_26] : memref<4x1x128xf32, #tpu.memory_space<vmem>>, vector<4x1x128xf32>
    %c0_27 = arith.constant 0 : index
    %c0_28 = arith.constant 0 : index
    %c0_29 = arith.constant 0 : index
    %13 = vector.load %arg11[%c0_27, %c0_28, %c0_29] : memref<4x1x128xf32, #tpu.memory_space<vmem>>, vector<4x1x128xf32>
    %14 = vector.extract_strided_slice %6 {offsets = [1, 1, 0, 0], sizes = [1, 1, 128, 128], strides = [1, 1, 1, 1]} : vector<3x4x128x128xbf16> to vector<1x1x128x128xbf16>
    %15 = vector.shape_cast %14 : vector<1x1x128x128xbf16> to vector<128x128xbf16>
    %16 = vector.extract_strided_slice %7 {offsets = [1, 1, 0, 0], sizes = [1, 1, 1, 128], strides = [1, 1, 1, 1]} : vector<3x4x1x128xf32> to vector<1x1x1x128xf32>
    %17 = vector.shape_cast %16 : vector<1x1x1x128xf32> to vector<1x128xf32>
    %18 = vector.extract_strided_slice %6 {offsets = [1, 2, 0, 0], sizes = [1, 1, 128, 128], strides = [1, 1, 1, 1]} : vector<3x4x128x128xbf16> to vector<1x1x128x128xbf16>
    %19 = vector.shape_cast %18 : vector<1x1x128x128xbf16> to vector<128x128xbf16>
    %20 = vector.extract_strided_slice %7 {offsets = [1, 2, 0, 0], sizes = [1, 1, 1, 128], strides = [1, 1, 1, 1]} : vector<3x4x1x128xf32> to vector<1x1x1x128xf32>
    %21 = vector.shape_cast %20 : vector<1x1x1x128xf32> to vector<1x128xf32>
    %22 = arith.truncf %3 : vector<16x128xf32> to vector<16x128xbf16>
    %cst = arith.constant dense<0.000000e+00> : vector<16x128xf32>
    %23 = tpu.matmul %22, %15, %cst {dimension_numbers = #tpu.dot_dimension_numbers<[1], [0], [0], [1], [0, 0, 1, 1], [], []>} : vector<16x128xbf16>, vector<128x128xbf16>, vector<16x128xf32> -> vector<16x128xf32>
    %24 = vector.broadcast %17 : vector<1x128xf32> to vector<16x128xf32>
    %25 = arith.addf %23, %24 : vector<16x128xf32>
    %26 = arith.truncf %3 : vector<16x128xf32> to vector<16x128xbf16>
    %cst_30 = arith.constant dense<0.000000e+00> : vector<16x128xf32>
    %27 = tpu.matmul %26, %19, %cst_30 {dimension_numbers = #tpu.dot_dimension_numbers<[1], [0], [0], [1], [0, 0, 1, 1], [], []>} : vector<16x128xbf16>, vector<128x128xbf16>, vector<16x128xf32> -> vector<16x128xf32>
    %28 = vector.broadcast %21 : vector<1x128xf32> to vector<16x128xf32>
    %29 = arith.addf %27, %28 : vector<16x128xf32>
    %30 = vector.shape_cast %25 : vector<16x128xf32> to vector<16x4x32xf32>
    %31 = arith.truncf %30 : vector<16x4x32xf32> to vector<16x4x32xbf16>
    %32 = vector.shape_cast %29 : vector<16x128xf32> to vector<16x4x32xf32>
    %33 = arith.truncf %32 : vector<16x4x32xf32> to vector<16x4x32xbf16>
    %34 = vector.extract_strided_slice %6 {offsets = [2, 1, 0, 0], sizes = [1, 1, 128, 128], strides = [1, 1, 1, 1]} : vector<3x4x128x128xbf16> to vector<1x1x128x128xbf16>
    %35 = vector.shape_cast %34 : vector<1x1x128x128xbf16> to vector<128x128xbf16>
    %36 = vector.extract_strided_slice %7 {offsets = [2, 1, 0, 0], sizes = [1, 1, 1, 128], strides = [1, 1, 1, 1]} : vector<3x4x1x128xf32> to vector<1x1x1x128xf32>
    %37 = vector.shape_cast %36 : vector<1x1x1x128xf32> to vector<1x128xf32>
    %38 = vector.extract_strided_slice %6 {offsets = [2, 2, 0, 0], sizes = [1, 1, 128, 128], strides = [1, 1, 1, 1]} : vector<3x4x128x128xbf16> to vector<1x1x128x128xbf16>
    %39 = vector.shape_cast %38 : vector<1x1x128x128xbf16> to vector<128x128xbf16>
    %40 = vector.extract_strided_slice %7 {offsets = [2, 2, 0, 0], sizes = [1, 1, 1, 128], strides = [1, 1, 1, 1]} : vector<3x4x1x128xf32> to vector<1x1x1x128xf32>
    %41 = vector.shape_cast %40 : vector<1x1x1x128xf32> to vector<1x128xf32>
    %42 = arith.truncf %5 : vector<8x128xf32> to vector<8x128xbf16>
    %cst_31 = arith.constant dense<0.000000e+00> : vector<8x128xf32>
    %43 = tpu.matmul %42, %35, %cst_31 {dimension_numbers = #tpu.dot_dimension_numbers<[1], [0], [0], [1], [0, 0, 1, 1], [], []>} : vector<8x128xbf16>, vector<128x128xbf16>, vector<8x128xf32> -> vector<8x128xf32>
    %44 = vector.broadcast %37 : vector<1x128xf32> to vector<8x128xf32>
    %45 = arith.addf %43, %44 : vector<8x128xf32>
    %46 = arith.truncf %5 : vector<8x128xf32> to vector<8x128xbf16>
    %cst_32 = arith.constant dense<0.000000e+00> : vector<8x128xf32>
    %47 = tpu.matmul %46, %39, %cst_32 {dimension_numbers = #tpu.dot_dimension_numbers<[1], [0], [0], [1], [0, 0, 1, 1], [], []>} : vector<8x128xbf16>, vector<128x128xbf16>, vector<8x128xf32> -> vector<8x128xf32>
    %48 = vector.broadcast %41 : vector<1x128xf32> to vector<8x128xf32>
    %49 = arith.addf %47, %48 : vector<8x128xf32>
    %50 = vector.shape_cast %45 : vector<8x128xf32> to vector<8x4x32xf32>
    %51 = arith.truncf %50 : vector<8x4x32xf32> to vector<8x4x32xbf16>
    %52 = vector.shape_cast %49 : vector<8x128xf32> to vector<8x4x32xf32>
    %53 = arith.truncf %52 : vector<8x4x32xf32> to vector<8x4x32xbf16>
    %c0_i32 = arith.constant 0 : i32
    %c2_i32 = arith.constant 2 : i32
    %54 = arith.addi %c0_i32, %c2_i32 : i32
    %c1_i32 = arith.constant 1 : i32
    %55 = scf.for %arg13 = %c0_i32 to %54 step %c1_i32 iter_args(%arg14 = %1) -> (vector<8x128xf32>)  : i32 {
      %59 = vector.extract_strided_slice %6 {offsets = [0, 1, 0, 0], sizes = [1, 1, 128, 128], strides = [1, 1, 1, 1]} : vector<3x4x128x128xbf16> to vector<1x1x128x128xbf16>
      %60 = vector.shape_cast %59 : vector<1x1x128x128xbf16> to vector<128x128xbf16>
      %61 = vector.extract_strided_slice %7 {offsets = [0, 1, 0, 0], sizes = [1, 1, 1, 128], strides = [1, 1, 1, 1]} : vector<3x4x1x128xf32> to vector<1x1x1x128xf32>
      %62 = vector.shape_cast %61 : vector<1x1x1x128xf32> to vector<1x128xf32>
      %63 = vector.extract_strided_slice %6 {offsets = [0, 2, 0, 0], sizes = [1, 1, 128, 128], strides = [1, 1, 1, 1]} : vector<3x4x128x128xbf16> to vector<1x1x128x128xbf16>
      %64 = vector.shape_cast %63 : vector<1x1x128x128xbf16> to vector<128x128xbf16>
      %65 = vector.extract_strided_slice %7 {offsets = [0, 2, 0, 0], sizes = [1, 1, 1, 128], strides = [1, 1, 1, 1]} : vector<3x4x1x128xf32> to vector<1x1x1x128xf32>
      %66 = vector.shape_cast %65 : vector<1x1x1x128xf32> to vector<1x128xf32>
      %67 = arith.truncf %arg14 : vector<8x128xf32> to vector<8x128xbf16>
      %cst_36 = arith.constant dense<0.000000e+00> : vector<8x128xf32>
      %68 = tpu.matmul %67, %60, %cst_36 {dimension_numbers = #tpu.dot_dimension_numbers<[1], [0], [0], [1], [0, 0, 1, 1], [], []>} : vector<8x128xbf16>, vector<128x128xbf16>, vector<8x128xf32> -> vector<8x128xf32>
      %69 = vector.broadcast %62 : vector<1x128xf32> to vector<8x128xf32>
      %70 = arith.addf %68, %69 : vector<8x128xf32>
      %71 = arith.truncf %arg14 : vector<8x128xf32> to vector<8x128xbf16>
      %cst_37 = arith.constant dense<0.000000e+00> : vector<8x128xf32>
      %72 = tpu.matmul %71, %64, %cst_37 {dimension_numbers = #tpu.dot_dimension_numbers<[1], [0], [0], [1], [0, 0, 1, 1], [], []>} : vector<8x128xbf16>, vector<128x128xbf16>, vector<8x128xf32> -> vector<8x128xf32>
      %73 = vector.broadcast %66 : vector<1x128xf32> to vector<8x128xf32>
      %74 = arith.addf %72, %73 : vector<8x128xf32>
      %75 = vector.shape_cast %70 : vector<8x128xf32> to vector<8x4x32xf32>
      %76 = arith.truncf %75 : vector<8x4x32xf32> to vector<8x4x32xbf16>
      %77 = vector.shape_cast %74 : vector<8x128xf32> to vector<8x4x32xf32>
      %78 = arith.truncf %77 : vector<8x4x32xf32> to vector<8x4x32xbf16>
      %79 = vector.extract_strided_slice %6 {offsets = [0, 0, 0, 0], sizes = [1, 1, 128, 128], strides = [1, 1, 1, 1]} : vector<3x4x128x128xbf16> to vector<1x1x128x128xbf16>
      %80 = vector.shape_cast %79 : vector<1x1x128x128xbf16> to vector<128x128xbf16>
      %81 = vector.extract_strided_slice %7 {offsets = [0, 0, 0, 0], sizes = [1, 1, 1, 128], strides = [1, 1, 1, 1]} : vector<3x4x1x128xf32> to vector<1x1x1x128xf32>
      %82 = vector.shape_cast %81 : vector<1x1x1x128xf32> to vector<1x128xf32>
      %83 = vector.extract_strided_slice %6 {offsets = [0, 3, 0, 0], sizes = [1, 1, 128, 128], strides = [1, 1, 1, 1]} : vector<3x4x128x128xbf16> to vector<1x1x128x128xbf16>
      %84 = vector.shape_cast %83 : vector<1x1x128x128xbf16> to vector<128x128xbf16>
      %85 = vector.extract_strided_slice %7 {offsets = [0, 3, 0, 0], sizes = [1, 1, 1, 128], strides = [1, 1, 1, 1]} : vector<3x4x1x128xf32> to vector<1x1x1x128xf32>
      %86 = vector.shape_cast %85 : vector<1x1x1x128xf32> to vector<1x128xf32>
      %87 = arith.truncf %arg14 : vector<8x128xf32> to vector<8x128xbf16>
      %cst_38 = arith.constant dense<0.000000e+00> : vector<8x128xf32>
      %88 = tpu.matmul %87, %80, %cst_38 {dimension_numbers = #tpu.dot_dimension_numbers<[1], [0], [0], [1], [0, 0, 1, 1], [], []>} : vector<8x128xbf16>, vector<128x128xbf16>, vector<8x128xf32> -> vector<8x128xf32>
      %89 = vector.broadcast %82 : vector<1x128xf32> to vector<8x128xf32>
      %90 = arith.addf %88, %89 : vector<8x128xf32>
      %cst_39 = arith.constant 0.176776692 : f32
      %91 = vector.broadcast %cst_39 : f32 to vector<8x128xf32>
      %92 = arith.mulf %90, %91 : vector<8x128xf32>
      %93 = vector.shape_cast %92 : vector<8x128xf32> to vector<8x4x32xf32>
      %94 = arith.truncf %93 : vector<8x4x32xf32> to vector<8x4x32xbf16>
      "tpu.trace_start"() <{level = 10 : i32, message = "qhd,khd->hqk"}> : () -> ()
      %cst_40 = arith.constant dense<0.000000e+00> : vector<4x8x8xf32>
      %95 = tpu.matmul %94, %76, %cst_40 {dimension_numbers = #tpu.dot_dimension_numbers<[2], [2], [0], [0], [0, 1, 0, 0, 1, 0], [1], [1]>} : vector<8x4x32xbf16>, vector<8x4x32xbf16>, vector<4x8x8xf32> -> vector<4x8x8xf32>
      "tpu.trace_stop"() : () -> ()
      %cst_41 = arith.constant dense<0xFF800000> : vector<4x8xf32>
      %96 = vector.multi_reduction <maximumf>, %95, %cst_41 [2] : vector<4x8x8xf32> to vector<4x8xf32>
      %97 = vector.shape_cast %96 : vector<4x8xf32> to vector<4x8x1xf32>
      %98 = vector.broadcast %97 : vector<4x8x1xf32> to vector<4x8x8xf32>
      %99 = arith.subf %95, %98 : vector<4x8x8xf32>
      %100 = math.exp %99 : vector<4x8x8xf32>
      %cst_42 = arith.constant dense<0.000000e+00> : vector<4x8xf32>
      %101 = vector.multi_reduction <add>, %100, %cst_42 [2] : vector<4x8x8xf32> to vector<4x8xf32>
      %102 = vector.shape_cast %101 : vector<4x8xf32> to vector<4x8x1xf32>
      %103 = tpu.reciprocal %102 {approx = true} : vector<4x8x1xf32> -> vector<4x8x1xf32>
      %104 = arith.truncf %100 : vector<4x8x8xf32> to vector<4x8x8xbf16>
      "tpu.trace_start"() <{level = 10 : i32, message = "hqk,khd->qhd"}> : () -> ()
      %cst_43 = arith.constant dense<0.000000e+00> : vector<4x32x8xf32>
      %105 = tpu.matmul %78, %104, %cst_43 {dimension_numbers = #tpu.dot_dimension_numbers<[0], [2], [2], [1], [0, 1, 0, 2, 1, 1], [1], [0]>} : vector<8x4x32xbf16>, vector<4x8x8xbf16>, vector<4x32x8xf32> -> vector<4x32x8xf32>
      %106 = tpu.transpose %105, [2, 0, 1] : vector<4x32x8xf32> -> vector<8x4x32xf32>
      "tpu.trace_stop"() : () -> ()
      %107 = tpu.transpose %103, [1, 0, 2] : vector<4x8x1xf32> -> vector<8x4x1xf32>
      %108 = vector.broadcast %107 : vector<8x4x1xf32> to vector<8x4x32xf32>
      %109 = arith.mulf %106, %108 : vector<8x4x32xf32>
      %110 = vector.shape_cast %109 : vector<8x4x32xf32> to vector<8x128xf32>
      %111 = arith.truncf %110 : vector<8x128xf32> to vector<8x128xbf16>
      %cst_44 = arith.constant dense<0.000000e+00> : vector<8x128xf32>
      %112 = tpu.matmul %111, %84, %cst_44 {dimension_numbers = #tpu.dot_dimension_numbers<[1], [0], [0], [1], [0, 0, 1, 1], [], []>} : vector<8x128xbf16>, vector<128x128xbf16>, vector<8x128xf32> -> vector<8x128xf32>
      %113 = vector.broadcast %86 : vector<1x128xf32> to vector<8x128xf32>
      %114 = arith.addf %112, %113 : vector<8x128xf32>
      %115 = arith.addf %arg14, %114 : vector<8x128xf32>
      %116 = vector.extract_strided_slice %12 {offsets = [0, 0, 0], sizes = [1, 1, 128], strides = [1, 1, 1]} : vector<4x1x128xf32> to vector<1x1x128xf32>
      %117 = vector.shape_cast %116 : vector<1x1x128xf32> to vector<1x128xf32>
      %118 = vector.extract_strided_slice %13 {offsets = [0, 0, 0], sizes = [1, 1, 128], strides = [1, 1, 1]} : vector<4x1x128xf32> to vector<1x1x128xf32>
      %119 = vector.shape_cast %118 : vector<1x1x128xf32> to vector<1x128xf32>
      %cst_45 = arith.constant dense<0.000000e+00> : vector<8xf32>
      %120 = vector.multi_reduction <add>, %115, %cst_45 [1] : vector<8x128xf32> to vector<8xf32>
      %121 = vector.shape_cast %120 : vector<8xf32> to vector<8x1xf32>
      %cst_46 = arith.constant 1.280000e+02 : f32
      %122 = vector.broadcast %cst_46 : f32 to vector<8x1xf32>
      %123 = arith.divf %121, %122 : vector<8x1xf32>
      %124 = vector.broadcast %123 : vector<8x1xf32> to vector<8x128xf32>
      %125 = arith.subf %115, %124 : vector<8x128xf32>
      %126 = arith.mulf %125, %125 : vector<8x128xf32>
      %cst_47 = arith.constant dense<0.000000e+00> : vector<8xf32>
      %127 = vector.multi_reduction <add>, %126, %cst_47 [1] : vector<8x128xf32> to vector<8xf32>
      %128 = vector.shape_cast %127 : vector<8xf32> to vector<8x1xf32>
      %cst_48 = arith.constant 1.280000e+02 : f32
      %129 = vector.broadcast %cst_48 : f32 to vector<8x1xf32>
      %130 = arith.divf %128, %129 : vector<8x1xf32>
      %131 = vector.broadcast %123 : vector<8x1xf32> to vector<8x128xf32>
      %132 = arith.subf %115, %131 : vector<8x128xf32>
      %cst_49 = arith.constant 9.99999974E-6 : f32
      %133 = vector.broadcast %cst_49 : f32 to vector<8x1xf32>
      %134 = arith.addf %130, %133 : vector<8x1xf32>
      %135 = math.rsqrt %134 : vector<8x1xf32>
      %136 = vector.broadcast %135 : vector<8x1xf32> to vector<8x128xf32>
      %137 = arith.mulf %132, %136 : vector<8x128xf32>
      %138 = vector.broadcast %117 : vector<1x128xf32> to vector<8x128xf32>
      %139 = arith.mulf %137, %138 : vector<8x128xf32>
      %140 = vector.broadcast %119 : vector<1x128xf32> to vector<8x128xf32>
      %141 = arith.addf %139, %140 : vector<8x128xf32>
      %142 = vector.extract_strided_slice %6 {offsets = [1, 0, 0, 0], sizes = [1, 1, 128, 128], strides = [1, 1, 1, 1]} : vector<3x4x128x128xbf16> to vector<1x1x128x128xbf16>
      %143 = vector.shape_cast %142 : vector<1x1x128x128xbf16> to vector<128x128xbf16>
      %144 = vector.extract_strided_slice %7 {offsets = [1, 0, 0, 0], sizes = [1, 1, 1, 128], strides = [1, 1, 1, 1]} : vector<3x4x1x128xf32> to vector<1x1x1x128xf32>
      %145 = vector.shape_cast %144 : vector<1x1x1x128xf32> to vector<1x128xf32>
      %146 = vector.extract_strided_slice %6 {offsets = [1, 3, 0, 0], sizes = [1, 1, 128, 128], strides = [1, 1, 1, 1]} : vector<3x4x128x128xbf16> to vector<1x1x128x128xbf16>
      %147 = vector.shape_cast %146 : vector<1x1x128x128xbf16> to vector<128x128xbf16>
      %148 = vector.extract_strided_slice %7 {offsets = [1, 3, 0, 0], sizes = [1, 1, 1, 128], strides = [1, 1, 1, 1]} : vector<3x4x1x128xf32> to vector<1x1x1x128xf32>
      %149 = vector.shape_cast %148 : vector<1x1x1x128xf32> to vector<1x128xf32>
      %150 = arith.truncf %141 : vector<8x128xf32> to vector<8x128xbf16>
      %cst_50 = arith.constant dense<0.000000e+00> : vector<8x128xf32>
      %151 = tpu.matmul %150, %143, %cst_50 {dimension_numbers = #tpu.dot_dimension_numbers<[1], [0], [0], [1], [0, 0, 1, 1], [], []>} : vector<8x128xbf16>, vector<128x128xbf16>, vector<8x128xf32> -> vector<8x128xf32>
      %152 = vector.broadcast %145 : vector<1x128xf32> to vector<8x128xf32>
      %153 = arith.addf %151, %152 : vector<8x128xf32>
      %cst_51 = arith.constant 0.176776692 : f32
      %154 = vector.broadcast %cst_51 : f32 to vector<8x128xf32>
      %155 = arith.mulf %153, %154 : vector<8x128xf32>
      %156 = vector.shape_cast %155 : vector<8x128xf32> to vector<8x4x32xf32>
      %157 = arith.truncf %156 : vector<8x4x32xf32> to vector<8x4x32xbf16>
      "tpu.trace_start"() <{level = 10 : i32, message = "qhd,khd->hqk"}> : () -> ()
      %cst_52 = arith.constant dense<0.000000e+00> : vector<4x8x16xf32>
      %158 = tpu.matmul %157, %31, %cst_52 {dimension_numbers = #tpu.dot_dimension_numbers<[2], [2], [0], [0], [0, 1, 0, 0, 1, 0], [1], [1]>} : vector<8x4x32xbf16>, vector<16x4x32xbf16>, vector<4x8x16xf32> -> vector<4x8x16xf32>
      "tpu.trace_stop"() : () -> ()
      %cst_53 = arith.constant dense<0xFF800000> : vector<4x8xf32>
      %159 = vector.multi_reduction <maximumf>, %158, %cst_53 [2] : vector<4x8x16xf32> to vector<4x8xf32>
      %160 = vector.shape_cast %159 : vector<4x8xf32> to vector<4x8x1xf32>
      %161 = vector.broadcast %160 : vector<4x8x1xf32> to vector<4x8x16xf32>
      %162 = arith.subf %158, %161 : vector<4x8x16xf32>
      %163 = math.exp %162 : vector<4x8x16xf32>
      %cst_54 = arith.constant dense<0.000000e+00> : vector<4x8xf32>
      %164 = vector.multi_reduction <add>, %163, %cst_54 [2] : vector<4x8x16xf32> to vector<4x8xf32>
      %165 = vector.shape_cast %164 : vector<4x8xf32> to vector<4x8x1xf32>
      %166 = tpu.reciprocal %165 {approx = true} : vector<4x8x1xf32> -> vector<4x8x1xf32>
      %167 = arith.truncf %163 : vector<4x8x16xf32> to vector<4x8x16xbf16>
      "tpu.trace_start"() <{level = 10 : i32, message = "hqk,khd->qhd"}> : () -> ()
      %cst_55 = arith.constant dense<0.000000e+00> : vector<4x32x8xf32>
      %168 = tpu.matmul %33, %167, %cst_55 {dimension_numbers = #tpu.dot_dimension_numbers<[0], [2], [2], [1], [0, 1, 0, 2, 1, 1], [1], [0]>} : vector<16x4x32xbf16>, vector<4x8x16xbf16>, vector<4x32x8xf32> -> vector<4x32x8xf32>
      %169 = tpu.transpose %168, [2, 0, 1] : vector<4x32x8xf32> -> vector<8x4x32xf32>
      "tpu.trace_stop"() : () -> ()
      %170 = tpu.transpose %166, [1, 0, 2] : vector<4x8x1xf32> -> vector<8x4x1xf32>
      %171 = vector.broadcast %170 : vector<8x4x1xf32> to vector<8x4x32xf32>
      %172 = arith.mulf %169, %171 : vector<8x4x32xf32>
      %173 = vector.shape_cast %172 : vector<8x4x32xf32> to vector<8x128xf32>
      %174 = arith.truncf %173 : vector<8x128xf32> to vector<8x128xbf16>
      %cst_56 = arith.constant dense<0.000000e+00> : vector<8x128xf32>
      %175 = tpu.matmul %174, %147, %cst_56 {dimension_numbers = #tpu.dot_dimension_numbers<[1], [0], [0], [1], [0, 0, 1, 1], [], []>} : vector<8x128xbf16>, vector<128x128xbf16>, vector<8x128xf32> -> vector<8x128xf32>
      %176 = vector.broadcast %149 : vector<1x128xf32> to vector<8x128xf32>
      %177 = arith.addf %175, %176 : vector<8x128xf32>
      %178 = arith.addf %141, %177 : vector<8x128xf32>
      %179 = vector.extract_strided_slice %12 {offsets = [1, 0, 0], sizes = [1, 1, 128], strides = [1, 1, 1]} : vector<4x1x128xf32> to vector<1x1x128xf32>
      %180 = vector.shape_cast %179 : vector<1x1x128xf32> to vector<1x128xf32>
      %181 = vector.extract_strided_slice %13 {offsets = [1, 0, 0], sizes = [1, 1, 128], strides = [1, 1, 1]} : vector<4x1x128xf32> to vector<1x1x128xf32>
      %182 = vector.shape_cast %181 : vector<1x1x128xf32> to vector<1x128xf32>
      %cst_57 = arith.constant dense<0.000000e+00> : vector<8xf32>
      %183 = vector.multi_reduction <add>, %178, %cst_57 [1] : vector<8x128xf32> to vector<8xf32>
      %184 = vector.shape_cast %183 : vector<8xf32> to vector<8x1xf32>
      %cst_58 = arith.constant 1.280000e+02 : f32
      %185 = vector.broadcast %cst_58 : f32 to vector<8x1xf32>
      %186 = arith.divf %184, %185 : vector<8x1xf32>
      %187 = vector.broadcast %186 : vector<8x1xf32> to vector<8x128xf32>
      %188 = arith.subf %178, %187 : vector<8x128xf32>
      %189 = arith.mulf %188, %188 : vector<8x128xf32>
      %cst_59 = arith.constant dense<0.000000e+00> : vector<8xf32>
      %190 = vector.multi_reduction <add>, %189, %cst_59 [1] : vector<8x128xf32> to vector<8xf32>
      %191 = vector.shape_cast %190 : vector<8xf32> to vector<8x1xf32>
      %cst_60 = arith.constant 1.280000e+02 : f32
      %192 = vector.broadcast %cst_60 : f32 to vector<8x1xf32>
      %193 = arith.divf %191, %192 : vector<8x1xf32>
      %194 = vector.broadcast %186 : vector<8x1xf32> to vector<8x128xf32>
      %195 = arith.subf %178, %194 : vector<8x128xf32>
      %cst_61 = arith.constant 9.99999974E-6 : f32
      %196 = vector.broadcast %cst_61 : f32 to vector<8x1xf32>
      %197 = arith.addf %193, %196 : vector<8x1xf32>
      %198 = math.rsqrt %197 : vector<8x1xf32>
      %199 = vector.broadcast %198 : vector<8x1xf32> to vector<8x128xf32>
      %200 = arith.mulf %195, %199 : vector<8x128xf32>
      %201 = vector.broadcast %180 : vector<1x128xf32> to vector<8x128xf32>
      %202 = arith.mulf %200, %201 : vector<8x128xf32>
      %203 = vector.broadcast %182 : vector<1x128xf32> to vector<8x128xf32>
      %204 = arith.addf %202, %203 : vector<8x128xf32>
      %205 = vector.extract_strided_slice %6 {offsets = [2, 0, 0, 0], sizes = [1, 1, 128, 128], strides = [1, 1, 1, 1]} : vector<3x4x128x128xbf16> to vector<1x1x128x128xbf16>
      %206 = vector.shape_cast %205 : vector<1x1x128x128xbf16> to vector<128x128xbf16>
      %207 = vector.extract_strided_slice %7 {offsets = [2, 0, 0, 0], sizes = [1, 1, 1, 128], strides = [1, 1, 1, 1]} : vector<3x4x1x128xf32> to vector<1x1x1x128xf32>
      %208 = vector.shape_cast %207 : vector<1x1x1x128xf32> to vector<1x128xf32>
      %209 = vector.extract_strided_slice %6 {offsets = [2, 3, 0, 0], sizes = [1, 1, 128, 128], strides = [1, 1, 1, 1]} : vector<3x4x128x128xbf16> to vector<1x1x128x128xbf16>
      %210 = vector.shape_cast %209 : vector<1x1x128x128xbf16> to vector<128x128xbf16>
      %211 = vector.extract_strided_slice %7 {offsets = [2, 3, 0, 0], sizes = [1, 1, 1, 128], strides = [1, 1, 1, 1]} : vector<3x4x1x128xf32> to vector<1x1x1x128xf32>
      %212 = vector.shape_cast %211 : vector<1x1x1x128xf32> to vector<1x128xf32>
      %213 = arith.truncf %204 : vector<8x128xf32> to vector<8x128xbf16>
      %cst_62 = arith.constant dense<0.000000e+00> : vector<8x128xf32>
      %214 = tpu.matmul %213, %206, %cst_62 {dimension_numbers = #tpu.dot_dimension_numbers<[1], [0], [0], [1], [0, 0, 1, 1], [], []>} : vector<8x128xbf16>, vector<128x128xbf16>, vector<8x128xf32> -> vector<8x128xf32>
      %215 = vector.broadcast %208 : vector<1x128xf32> to vector<8x128xf32>
      %216 = arith.addf %214, %215 : vector<8x128xf32>
      %cst_63 = arith.constant 0.176776692 : f32
      %217 = vector.broadcast %cst_63 : f32 to vector<8x128xf32>
      %218 = arith.mulf %216, %217 : vector<8x128xf32>
      %219 = vector.shape_cast %218 : vector<8x128xf32> to vector<8x4x32xf32>
      %220 = arith.truncf %219 : vector<8x4x32xf32> to vector<8x4x32xbf16>
      "tpu.trace_start"() <{level = 10 : i32, message = "qhd,khd->hqk"}> : () -> ()
      %cst_64 = arith.constant dense<0.000000e+00> : vector<4x8x8xf32>
      %221 = tpu.matmul %220, %51, %cst_64 {dimension_numbers = #tpu.dot_dimension_numbers<[2], [2], [0], [0], [0, 1, 0, 0, 1, 0], [1], [1]>} : vector<8x4x32xbf16>, vector<8x4x32xbf16>, vector<4x8x8xf32> -> vector<4x8x8xf32>
      "tpu.trace_stop"() : () -> ()
      %cst_65 = arith.constant dense<0xFF800000> : vector<4x8xf32>
      %222 = vector.multi_reduction <maximumf>, %221, %cst_65 [2] : vector<4x8x8xf32> to vector<4x8xf32>
      %223 = vector.shape_cast %222 : vector<4x8xf32> to vector<4x8x1xf32>
      %224 = vector.broadcast %223 : vector<4x8x1xf32> to vector<4x8x8xf32>
      %225 = arith.subf %221, %224 : vector<4x8x8xf32>
      %226 = math.exp %225 : vector<4x8x8xf32>
      %cst_66 = arith.constant dense<0.000000e+00> : vector<4x8xf32>
      %227 = vector.multi_reduction <add>, %226, %cst_66 [2] : vector<4x8x8xf32> to vector<4x8xf32>
      %228 = vector.shape_cast %227 : vector<4x8xf32> to vector<4x8x1xf32>
      %229 = tpu.reciprocal %228 {approx = true} : vector<4x8x1xf32> -> vector<4x8x1xf32>
      %230 = arith.truncf %226 : vector<4x8x8xf32> to vector<4x8x8xbf16>
      "tpu.trace_start"() <{level = 10 : i32, message = "hqk,khd->qhd"}> : () -> ()
      %cst_67 = arith.constant dense<0.000000e+00> : vector<4x32x8xf32>
      %231 = tpu.matmul %53, %230, %cst_67 {dimension_numbers = #tpu.dot_dimension_numbers<[0], [2], [2], [1], [0, 1, 0, 2, 1, 1], [1], [0]>} : vector<8x4x32xbf16>, vector<4x8x8xbf16>, vector<4x32x8xf32> -> vector<4x32x8xf32>
      %232 = tpu.transpose %231, [2, 0, 1] : vector<4x32x8xf32> -> vector<8x4x32xf32>
      "tpu.trace_stop"() : () -> ()
      %233 = tpu.transpose %229, [1, 0, 2] : vector<4x8x1xf32> -> vector<8x4x1xf32>
      %234 = vector.broadcast %233 : vector<8x4x1xf32> to vector<8x4x32xf32>
      %235 = arith.mulf %232, %234 : vector<8x4x32xf32>
      %236 = vector.shape_cast %235 : vector<8x4x32xf32> to vector<8x128xf32>
      %237 = arith.truncf %236 : vector<8x128xf32> to vector<8x128xbf16>
      %cst_68 = arith.constant dense<0.000000e+00> : vector<8x128xf32>
      %238 = tpu.matmul %237, %210, %cst_68 {dimension_numbers = #tpu.dot_dimension_numbers<[1], [0], [0], [1], [0, 0, 1, 1], [], []>} : vector<8x128xbf16>, vector<128x128xbf16>, vector<8x128xf32> -> vector<8x128xf32>
      %239 = vector.broadcast %212 : vector<1x128xf32> to vector<8x128xf32>
      %240 = arith.addf %238, %239 : vector<8x128xf32>
      %241 = arith.addf %204, %240 : vector<8x128xf32>
      %242 = vector.extract_strided_slice %12 {offsets = [2, 0, 0], sizes = [1, 1, 128], strides = [1, 1, 1]} : vector<4x1x128xf32> to vector<1x1x128xf32>
      %243 = vector.shape_cast %242 : vector<1x1x128xf32> to vector<1x128xf32>
      %244 = vector.extract_strided_slice %13 {offsets = [2, 0, 0], sizes = [1, 1, 128], strides = [1, 1, 1]} : vector<4x1x128xf32> to vector<1x1x128xf32>
      %245 = vector.shape_cast %244 : vector<1x1x128xf32> to vector<1x128xf32>
      %cst_69 = arith.constant dense<0.000000e+00> : vector<8xf32>
      %246 = vector.multi_reduction <add>, %241, %cst_69 [1] : vector<8x128xf32> to vector<8xf32>
      %247 = vector.shape_cast %246 : vector<8xf32> to vector<8x1xf32>
      %cst_70 = arith.constant 1.280000e+02 : f32
      %248 = vector.broadcast %cst_70 : f32 to vector<8x1xf32>
      %249 = arith.divf %247, %248 : vector<8x1xf32>
      %250 = vector.broadcast %249 : vector<8x1xf32> to vector<8x128xf32>
      %251 = arith.subf %241, %250 : vector<8x128xf32>
      %252 = arith.mulf %251, %251 : vector<8x128xf32>
      %cst_71 = arith.constant dense<0.000000e+00> : vector<8xf32>
      %253 = vector.multi_reduction <add>, %252, %cst_71 [1] : vector<8x128xf32> to vector<8xf32>
      %254 = vector.shape_cast %253 : vector<8xf32> to vector<8x1xf32>
      %cst_72 = arith.constant 1.280000e+02 : f32
      %255 = vector.broadcast %cst_72 : f32 to vector<8x1xf32>
      %256 = arith.divf %254, %255 : vector<8x1xf32>
      %257 = vector.broadcast %249 : vector<8x1xf32> to vector<8x128xf32>
      %258 = arith.subf %241, %257 : vector<8x128xf32>
      %cst_73 = arith.constant 9.99999974E-6 : f32
      %259 = vector.broadcast %cst_73 : f32 to vector<8x1xf32>
      %260 = arith.addf %256, %259 : vector<8x1xf32>
      %261 = math.rsqrt %260 : vector<8x1xf32>
      %262 = vector.broadcast %261 : vector<8x1xf32> to vector<8x128xf32>
      %263 = arith.mulf %258, %262 : vector<8x128xf32>
      %264 = vector.broadcast %243 : vector<1x128xf32> to vector<8x128xf32>
      %265 = arith.mulf %263, %264 : vector<8x128xf32>
      %266 = vector.broadcast %245 : vector<1x128xf32> to vector<8x128xf32>
      %267 = arith.addf %265, %266 : vector<8x128xf32>
      %268 = arith.truncf %267 : vector<8x128xf32> to vector<8x128xbf16>
      %cst_74 = arith.constant dense<0.000000e+00> : vector<8x256xf32>
      %269 = tpu.matmul %268, %8, %cst_74 {dimension_numbers = #tpu.dot_dimension_numbers<[1], [0], [0], [1], [0, 0, 1, 1], [], []>} : vector<8x128xbf16>, vector<128x256xbf16>, vector<8x256xf32> -> vector<8x256xf32>
      %270 = vector.broadcast %9 : vector<1x256xf32> to vector<8x256xf32>
      %271 = arith.addf %269, %270 : vector<8x256xf32>
      %cst_75 = arith.constant 0.000000e+00 : f32
      %272 = vector.broadcast %cst_75 : f32 to vector<8x256xf32>
      %273 = arith.maximumf %271, %272 : vector<8x256xf32>
      %274 = arith.truncf %273 : vector<8x256xf32> to vector<8x256xbf16>
      %cst_76 = arith.constant dense<0.000000e+00> : vector<8x128xf32>
      %275 = tpu.matmul %274, %10, %cst_76 {dimension_numbers = #tpu.dot_dimension_numbers<[1], [0], [0], [1], [0, 0, 1, 1], [], []>} : vector<8x256xbf16>, vector<256x128xbf16>, vector<8x128xf32> -> vector<8x128xf32>
      %276 = vector.broadcast %11 : vector<1x128xf32> to vector<8x128xf32>
      %277 = arith.addf %275, %276 : vector<8x128xf32>
      %278 = arith.addf %267, %277 : vector<8x128xf32>
      %279 = vector.extract_strided_slice %12 {offsets = [3, 0, 0], sizes = [1, 1, 128], strides = [1, 1, 1]} : vector<4x1x128xf32> to vector<1x1x128xf32>
      %280 = vector.shape_cast %279 : vector<1x1x128xf32> to vector<1x128xf32>
      %281 = vector.extract_strided_slice %13 {offsets = [3, 0, 0], sizes = [1, 1, 128], strides = [1, 1, 1]} : vector<4x1x128xf32> to vector<1x1x128xf32>
      %282 = vector.shape_cast %281 : vector<1x1x128xf32> to vector<1x128xf32>
      %cst_77 = arith.constant dense<0.000000e+00> : vector<8xf32>
      %283 = vector.multi_reduction <add>, %278, %cst_77 [1] : vector<8x128xf32> to vector<8xf32>
      %284 = vector.shape_cast %283 : vector<8xf32> to vector<8x1xf32>
      %cst_78 = arith.constant 1.280000e+02 : f32
      %285 = vector.broadcast %cst_78 : f32 to vector<8x1xf32>
      %286 = arith.divf %284, %285 : vector<8x1xf32>
      %287 = vector.broadcast %286 : vector<8x1xf32> to vector<8x128xf32>
      %288 = arith.subf %278, %287 : vector<8x128xf32>
      %289 = arith.mulf %288, %288 : vector<8x128xf32>
      %cst_79 = arith.constant dense<0.000000e+00> : vector<8xf32>
      %290 = vector.multi_reduction <add>, %289, %cst_79 [1] : vector<8x128xf32> to vector<8xf32>
      %291 = vector.shape_cast %290 : vector<8xf32> to vector<8x1xf32>
      %cst_80 = arith.constant 1.280000e+02 : f32
      %292 = vector.broadcast %cst_80 : f32 to vector<8x1xf32>
      %293 = arith.divf %291, %292 : vector<8x1xf32>
      %294 = vector.broadcast %286 : vector<8x1xf32> to vector<8x128xf32>
      %295 = arith.subf %278, %294 : vector<8x128xf32>
      %cst_81 = arith.constant 9.99999974E-6 : f32
      %296 = vector.broadcast %cst_81 : f32 to vector<8x1xf32>
      %297 = arith.addf %293, %296 : vector<8x1xf32>
      %298 = math.rsqrt %297 : vector<8x1xf32>
      %299 = vector.broadcast %298 : vector<8x1xf32> to vector<8x128xf32>
      %300 = arith.mulf %295, %299 : vector<8x128xf32>
      %301 = vector.broadcast %280 : vector<1x128xf32> to vector<8x128xf32>
      %302 = arith.mulf %300, %301 : vector<8x128xf32>
      %303 = vector.broadcast %282 : vector<1x128xf32> to vector<8x128xf32>
      %304 = arith.addf %302, %303 : vector<8x128xf32>
      scf.yield %304 : vector<8x128xf32>
    }
    %c0_33 = arith.constant 0 : index
    %c0_34 = arith.constant 0 : index
    %c0_35 = arith.constant 0 : index
    %56 = vector.load %arg12[%c0_33, %c0_34, %c0_35] : memref<1x8x128xf32, #tpu.memory_space<vmem>>, vector<1x8x128xf32>
    %57 = vector.shape_cast %56 : vector<1x8x128xf32> to vector<8x128xf32>
    %58 = vector.shape_cast %55 : vector<8x128xf32> to vector<1x8x128xf32>
    tpu.vector_store %arg12[%c0_33, %c0_34, %c0_35], %58 {strides = array<i32>} : memref<1x8x128xf32, #tpu.memory_space<vmem>>, vector<1x8x128xf32>,
    return
  }
  func.func @transform_0(%arg0: i32) -> (i32, i32, i32) {
    %c0_i32 = arith.constant 0 : i32
    %c0_i32_0 = arith.constant 0 : i32
    %c0_i32_1 = arith.constant 0 : i32
    return %arg0, %c0_i32, %c0_i32_0 : i32, i32, i32
  }
  func.func @transform_1(%arg0: i32) -> (i32, i32, i32) {
    %c0_i32 = arith.constant 0 : i32
    %c0_i32_0 = arith.constant 0 : i32
    %c0_i32_1 = arith.constant 0 : i32
    return %arg0, %c0_i32, %c0_i32_0 : i32, i32, i32
  }
  func.func @transform_2(%arg0: i32) -> (i32, i32, i32) {
    %c0_i32 = arith.constant 0 : i32
    %c0_i32_0 = arith.constant 0 : i32
    %c0_i32_1 = arith.constant 0 : i32
    return %arg0, %c0_i32, %c0_i32_0 : i32, i32, i32
  }
  func.func @transform_3(%arg0: i32) -> (i32, i32, i32, i32) {
    %c0_i32 = arith.constant 0 : i32
    %c0_i32_0 = arith.constant 0 : i32
    %c0_i32_1 = arith.constant 0 : i32
    %c0_i32_2 = arith.constant 0 : i32
    %c0_i32_3 = arith.constant 0 : i32
    return %c0_i32, %c0_i32_0, %c0_i32_1, %c0_i32_2 : i32, i32, i32, i32
  }
  func.func @transform_4(%arg0: i32) -> (i32, i32, i32, i32) {
    %c0_i32 = arith.constant 0 : i32
    %c0_i32_0 = arith.constant 0 : i32
    %c0_i32_1 = arith.constant 0 : i32
    %c0_i32_2 = arith.constant 0 : i32
    %c0_i32_3 = arith.constant 0 : i32
    return %c0_i32, %c0_i32_0, %c0_i32_1, %c0_i32_2 : i32, i32, i32, i32
  }
  func.func @transform_5(%arg0: i32) -> (i32, i32) {
    %c0_i32 = arith.constant 0 : i32
    %c0_i32_0 = arith.constant 0 : i32
    %c0_i32_1 = arith.constant 0 : i32
    return %c0_i32, %c0_i32_0 : i32, i32
  }
  func.func @transform_6(%arg0: i32) -> (i32, i32) {
    %c0_i32 = arith.constant 0 : i32
    %c0_i32_0 = arith.constant 0 : i32
    %c0_i32_1 = arith.constant 0 : i32
    return %c0_i32, %c0_i32_0 : i32, i32
  }
  func.func @transform_7(%arg0: i32) -> (i32, i32) {
    %c0_i32 = arith.constant 0 : i32
    %c0_i32_0 = arith.constant 0 : i32
    %c0_i32_1 = arith.constant 0 : i32
    return %c0_i32, %c0_i32_0 : i32, i32
  }
  func.func @transform_8(%arg0: i32) -> (i32, i32) {
    %c0_i32 = arith.constant 0 : i32
    %c0_i32_0 = arith.constant 0 : i32
    %c0_i32_1 = arith.constant 0 : i32
    return %c0_i32, %c0_i32_0 : i32, i32
  }
  func.func @transform_9(%arg0: i32) -> (i32, i32, i32) {
    %c0_i32 = arith.constant 0 : i32
    %c0_i32_0 = arith.constant 0 : i32
    %c0_i32_1 = arith.constant 0 : i32
    %c0_i32_2 = arith.constant 0 : i32
    return %c0_i32, %c0_i32_0, %c0_i32_1 : i32, i32, i32
  }
  func.func @transform_10(%arg0: i32) -> (i32, i32, i32) {
    %c0_i32 = arith.constant 0 : i32
    %c0_i32_0 = arith.constant 0 : i32
    %c0_i32_1 = arith.constant 0 : i32
    %c0_i32_2 = arith.constant 0 : i32
    return %c0_i32, %c0_i32_0, %c0_i32_1 : i32, i32, i32
  }
  func.func @transform_11(%arg0: i32) -> (i32, i32, i32) {
    %c0_i32 = arith.constant 0 : i32
    %c0_i32_0 = arith.constant 0 : i32
    %c0_i32_1 = arith.constant 0 : i32
    return %arg0, %c0_i32, %c0_i32_0 : i32, i32, i32
  }
}

</mosaic_0001>

<bundles_post_ra>
// kernel: llcd_decoder_forward.1
= control target key start
LH: loop header
LB: loop body
LE: loop exit
PB: predicated region body
PF: predicated region fallthrough
CT: control target
= control target key end

     0   :  { %16 = vsyncpa [#allocation3], 0  ;;  %s18310_s0 = inlined_call_operand.vmem [shape: f32[2,8,128], index: 0, kind: input, shape index: {}]   ;;  %s18311_s1 = inlined_call_operand.vmem [shape: f32[2,16,128], index: 1, kind: input, shape index: {}]   ;;  %s18312_s2 = inlined_call_operand.vmem [shape: f32[2,8,128], index: 2, kind: input, shape index: {}]   ;;  %s18313_s3 = inlined_call_operand.hbm [shape: bf16[3,4,128,128], index: 3, kind: input, shape index: {}]   ;;  %s18314_s4 = inlined_call_operand.vmem [shape: f32[3,4,1,128], index: 4, kind: input, shape index: {}]   ;;  %s18315_s5 = inlined_call_operand.vmem [shape: bf16[128,256], index: 5, kind: input, shape index: {}]   ;;  %s18316_s6 = inlined_call_operand.vmem [shape: f32[1,256], index: 6, kind: input, shape index: {}]   ;;  %s18317_s7 = inlined_call_operand.hbm [shape: bf16[256,128], index: 7, kind: input, shape index: {}]   ;;  %s18318_s8 = inlined_call_operand.vmem [shape: f32[1,128], index: 8, kind: input, shape index: {}]   ;;  %s18319_s9 = inlined_call_operand.vmem [shape: f32[4,1,128], index: 9, kind: input, shape index: {}]   ;;  %s18320_s10 = inlined_call_operand.vmem [shape: f32[4,1,128], index: 10, kind: input, shape index: {}]   ;;  %s18321_s11 = inlined_call_operand.vmem [shape: f32[2,8,128], index: 11, kind: output, shape index: {}]  }
   0x1   :  { %17 = vsyncpa [#allocation5], 0  ;;  %s15325_s17 = smov 0  }
   0x2 LB: > { %s15331_s18 = sadd.s32 4294967295, %s15238_s17   ;;  %p14176_p0 = scmp.ge.s32.totalorder %s15238_s17, 1  ;;  %s15238_s17 = sphi %s15325_s17, %s23_s17  }
   0x3   : > { %p300_p1 = scmp.lt.s32.totalorder %s15238_s17, 3  ;;  %s15248_s19 = smov [#allocation2]  }
   0x4   : > { %s312_s20 = sshll.u32 %s15248_s19, 4  ;;  %p18322_p3 = scmp.eq.s32.totalorder %s15331_s18, 0  ;;  %s313_s20 = int_to_ptr.vmem [resolvable:$true] %s312_s20 }
   0x5   : > { %p15335_p2 = pnand %p14176_p0, %p300_p1  ;;  %s15249_s22 = smov [#allocation4]  }
   0x6   : > { %s334_s23 = sshll.u32 %s15249_s22, 4  ;;  %s15160_s27 = scalar_lea.hbm %s18313_s3, 12288  ;;  %s15348_s23 = int_to_ptr.vmem [resolvable:$true] %s334_s23 }
   0x7   : > { %s18468_s21 = scalar_select %p15335_p2, 1, 0 }
   0x8   : > { %p15018_p4 = pneg %p15335_p2  ;;  %p15161_p6 = scmp.ne.s32.totalorder %s18313_s3, %s15160_s27 }
   0x9   : > { %p15167_p10 = scmp.lt.u32.totalorder %s15160_s27, %s18313_s3 }
   0xa   : > { %p15344_p5 = pnand %p18322_p3, %p15018_p4 }
   0xc   : > { %p15162_p7 = pneg %p15344_p5 }
   0xe   : > { %p15163_p8 = pnand %p15162_p7, %p15161_p6 }
  0x10   : > { %p15164_p9 = pneg %p15163_p8 }
  0x12   : > { %p15169_p11 = pnand %p15167_p10, %p15164_p9 }
  0x14   : > { %15172 = shalt.err (!%p15169_p11)
}
  0x15   : > { %s15173_s13 = scalar_lea.vmem %s313_s20, 12288  ;;  %p15181_p1 = scmp.lt.s32.totalorder %s313_s20, %s313_s20 }
  0x16   : > { %p15174_p12 = scmp.ne.s32.totalorder %s313_s20, %s15173_s13  ;;  %p15182_p4 = scmp.lt.s32.totalorder %s15173_s13, %s15173_s13 }
  0x18   : > { %p15176_p13 = pnand %p15174_p12, %p15162_p7  ;;  %p15183_p3 = por %p15182_p4, %p15181_p1 }
  0x1a   : > { %p15177_p0 = pneg %p15176_p13 }
  0x1c   : > { %p15184_p2 = pnand %p15183_p3, %p15177_p0 }
  0x1e   : > { %15187 = shalt.err (!%p15184_p2)
}
  0x1f   : > { %s15250_s14 = smov 64   ;;  %s15251_s15 = smov 4  }
  0x20   : > { %15021 = dma.hbm_to_vmem [thread:$0]  (!%p15344_p5), %s18313_s3, 12288, %s313_s20, [#allocation3], %s15250_s14, %s15250_s14, %s15251_s15  }
  0x21   : > { %s15188_s26 = scalar_lea.hbm %s18317_s7, 2048 }
  0x22   : > { %p15189_p6 = scmp.ne.s32.totalorder %s18317_s7, %s15188_s26  ;;  %p15195_p8 = scmp.lt.u32.totalorder %s15188_s26, %s18317_s7 }
  0x24   : > { %p15191_p2 = pnand %p15189_p6, %p15162_p7 }
  0x26   : > { %p15192_p3 = pneg %p15191_p2 }
  0x28   : > { %p15197_p9 = pnand %p15195_p8, %p15192_p3 }
  0x2a   : > { %15200 = shalt.err (!%p15197_p9)
}
  0x2b   : > { %s15201_s20 = scalar_lea.vmem %s15348_s23, 2048  ;;  %p15209_p13 = scmp.lt.s32.totalorder %s15348_s23, %s15348_s23 }
  0x2c   : > { %p15202_p10 = scmp.ne.s32.totalorder %s15348_s23, %s15201_s20  ;;  %p15210_p0 = scmp.lt.s32.totalorder %s15201_s20, %s15201_s20 }
  0x2e   : > { %p15204_p11 = pnand %p15202_p10, %p15162_p7  ;;  %p15211_p1 = por %p15210_p0, %p15209_p13 }
  0x30   : > { %p15205_p12 = pneg %p15204_p11 }
  0x32   : > { %p15212_p4 = pnand %p15211_p1, %p15205_p12 }
  0x34   : > { %15215 = shalt.err (!%p15212_p4)
}
  0x35   : > { %15024 = dma.hbm_to_vmem [thread:$0]  (!%p15344_p5), %s18317_s7, 2048, %s15348_s23, [#allocation5], %s15250_s14, %s15250_s14, %s15251_s15  }
  0x36   : > { %p18470_p6 = scmp.ne.s32.totalorder %s18468_s21, 0 }
  0x38   : > { %381 = sbr.rel (%p18470_p6) target bundleno = 7049 (0x1b89), region = 64 }
  0x3f   : > { %p18471_p2 = scmp.eq.s32.totalorder %s15331_s18, 0 }
  0x41   : > { %15229 = dma.done.wait (%p18471_p2), [#allocation3], 12288   ;;  %p18472_p7 = pmov %p18471_p2 }
  0x42   : > { %p18473_p3 = pmov %p18471_p2 }
  0x43   : > { %15231 = vsyncadd (%p18472_p7), [#allocation3], 4294955008 }
  0x44   : > { %15233 = dma.done.wait (%p18473_p3), [#allocation5], 2048   ;;  %p18474_p8 = pmov %p18471_p2 }
  0x45   : > { %p432_p9 = scmp.lt.s32.totalorder %s15331_s18, 1  ;;  %v18324_v0 = vmov 0.0   ;;  %vm15253_vm0 = vmmov 0   ;;  %v15424_v1 = vld [vmem:[#allocation2] sm:$0xf]  ;;  %s15254_s25 = smov 64  }
  0x46   : > { %15235 = vsyncadd (%p18474_p8), [#allocation5], 4294965248  ;;  %14590 = vmatprep.subr.bf16.mxu0 %v18324_v0  ;;  %14610 = vmatprep.subr.bf16.mxu1 %v18324_v0  ;;  %18475 = vst [vmem:[#allocation8_spill] sm:$0xff] %v15424_v1  ;;  %v15426_v2 = vld [vmem:[#allocation2 + $0x4] sm:$0xf]  ;;  %s15255_s26 = smov 96  }
  0x47   : > { %14606 = vmatprep.mubr.msk.bf16.mxu0 %vm15253_vm0, %v18324_v0  ;;  %14626 = vmatprep.mubr.msk.bf16.mxu1 %vm15253_vm0, %v18324_v0  ;;  %s19017_s18 = smov (!%p432_p9, %s15331_s18), 1  ;;  %18476 = vst [vmem:[#allocation9_spill] sm:$0xff] %v15426_v2  ;;  %v15428_v3 = vld [vmem:[#allocation2 + $0x8] sm:$0xf]  ;;  %v15430_v4 = vld [vmem:[#allocation2 + $0xc] sm:$0xf] }
  0x48   : > { %s15418_s21 = sshll.u32 %s19017_s18, 3  ;;  %18477 = vst [vmem:[#allocation10_spill] sm:$0xff] %v15428_v3  ;;  %18478 = vst [vmem:[#allocation11_spill] sm:$0xff] %v15430_v4  ;;  %v15432_v5 = vld [vmem:[#allocation2 + $0x10] sm:$0xf]  ;;  %s14387_s12 = sshll.u32 %s19017_s18, 4 }
  0x49   : > { %s448_s14 = scalar_lea.vmem %s18321_s11, %s15418_s21  ;;  %18479 = vst [vmem:[#allocation12_spill] sm:$0xff] %v15432_v5  ;;  %v15434_v6 = vld [vmem:[#allocation2 + $0x14] sm:$0xf]  ;;  %v15436_v7 = vld [vmem:[#allocation2 + $0x18] sm:$0xf]  ;;  %s435_s20 = scalar_lea.vmem %s18310_s0, %s15418_s21 }
  0x4a   : > { %18480 = vst [vmem:[#allocation13_spill] sm:$0xff] %v15434_v6  ;;  %18481 = vst [vmem:[#allocation14_spill] sm:$0xff] %v15436_v7  ;;  %v15438_v8 = vld [vmem:[#allocation2 + $0x1c] sm:$0xf]  ;;  %v15440_v9 = vld [vmem:[#allocation2 + $0x20] sm:$0xf]  ;;  %s440_s24 = scalar_lea.vmem %s18311_s1, %s14387_s12  ;;  %s444_s16 = scalar_lea.vmem %s18312_s2, %s15418_s21 }
  0x4b   : > { %18482 = vst [vmem:[#allocation15_spill] sm:$0xff] %v15438_v8  ;;  %18483 = vst [vmem:[#allocation16_spill] sm:$0xff] %v15440_v9  ;;  %v15442_v10 = vld [vmem:[#allocation2 + $0x24] sm:$0xf]  ;;  %v15444_v11 = vld [vmem:[#allocation2 + $0x28] sm:$0xf] }
  0x4c   : > { %18484 = vst [vmem:[#allocation17_spill] sm:$0xff] %v15442_v10  ;;  %18485 = vst [vmem:[#allocation18_spill] sm:$0xff] %v15444_v11  ;;  %v15446_v12 = vld [vmem:[#allocation2 + $0x2c] sm:$0xf]  ;;  %v15448_v13 = vld [vmem:[#allocation2 + $0x30] sm:$0xf] }
  0x4d   : > { %18486 = vst [vmem:[#allocation19_spill] sm:$0xff] %v15446_v12  ;;  %18487 = vst [vmem:[#allocation20_spill] sm:$0xff] %v15448_v13  ;;  %v15450_v14 = vld [vmem:[#allocation2 + $0x34] sm:$0xf]  ;;  %v15452_v15 = vld [vmem:[#allocation2 + $0x38] sm:$0xf] }
  0x4e   : > { %18488 = vst [vmem:[#allocation21_spill] sm:$0xff] %v15450_v14  ;;  %18489 = vst [vmem:[#allocation22_spill] sm:$0xff] %v15452_v15  ;;  %v15454_v16 = vld [vmem:[#allocation2 + $0x3c] sm:$0xf]  ;;  %v15456_v17 = vld [vmem:[#allocation2 + $0x40] sm:$0xf] }
  0x4f   : > { %18490 = vst [vmem:[#allocation23_spill] sm:$0xff] %v15454_v16  ;;  %18491 = vst [vmem:[#allocation24_spill] sm:$0xff] %v15456_v17  ;;  %v15458_v18 = vld [vmem:[#allocation2 + $0x44] sm:$0xf]  ;;  %v15460_v19 = vld [vmem:[#allocation2 + $0x48] sm:$0xf] }
  0x50   : > { %18492 = vst [vmem:[#allocation25_spill] sm:$0xff] %v15458_v18  ;;  %18493 = vst [vmem:[#allocation26_spill] sm:$0xff] %v15460_v19  ;;  %v15462_v20 = vld [vmem:[#allocation2 + $0x4c] sm:$0xf]  ;;  %v15464_v21 = vld [vmem:[#allocation2 + $0x50] sm:$0xf] }
  0x51   : > { %18494 = vst [vmem:[#allocation27_spill] sm:$0xff] %v15462_v20  ;;  %18495 = vst [vmem:[#allocation28_spill] sm:$0xff] %v15464_v21  ;;  %v15466_v22 = vld [vmem:[#allocation2 + $0x54] sm:$0xf]  ;;  %v15468_v23 = vld [vmem:[#allocation2 + $0x58] sm:$0xf] }
  0x52   : > { %18496 = vst [vmem:[#allocation29_spill] sm:$0xff] %v15466_v22  ;;  %18497 = vst [vmem:[#allocation30_spill] sm:$0xff] %v15468_v23  ;;  %v15470_v24 = vld [vmem:[#allocation2 + $0x5c] sm:$0xf]  ;;  %v15472_v25 = vld [vmem:[#allocation2 + $0x60] sm:$0xf] }
  0x53   : > { %18498 = vst [vmem:[#allocation31_spill] sm:$0xff] %v15470_v24  ;;  %18499 = vst [vmem:[#allocation32_spill] sm:$0xff] %v15472_v25  ;;  %v15474_v26 = vld [vmem:[#allocation2 + $0x64] sm:$0xf]  ;;  %v15476_v27 = vld [vmem:[#allocation2 + $0x68] sm:$0xf] }
  0x54   : > { %18500 = vst [vmem:[#allocation33_spill] sm:$0xff] %v15474_v26  ;;  %18501 = vst [vmem:[#allocation34_spill] sm:$0xff] %v15476_v27  ;;  %v15478_v28 = vld [vmem:[#allocation2 + $0x6c] sm:$0xf]  ;;  %v15480_v29 = vld [vmem:[#allocation2 + $0x70] sm:$0xf] }
  0x55   : > { %18502 = vst [vmem:[#allocation35_spill] sm:$0xff] %v15478_v28  ;;  %18503 = vst [vmem:[#allocation36_spill] sm:$0xff] %v15480_v29  ;;  %v15482_v30 = vld [vmem:[#allocation2 + $0x74] sm:$0xf]  ;;  %v15484_v31 = vld [vmem:[#allocation2 + $0x78] sm:$0xf] }
  0x56   : > { %18504 = vst [vmem:[#allocation37_spill] sm:$0xff] %v15482_v30  ;;  %18505 = vst [vmem:[#allocation38_spill] sm:$0xff] %v15484_v31  ;;  %v15486_v32 = vld [vmem:[#allocation2 + $0x7c] sm:$0xf]  ;;  %v15488_v33 = vld [vmem:[#allocation2 + $0x80] sm:$0xf] }
  0x57   : > { %18506 = vst [vmem:[#allocation39_spill] sm:$0xff] %v15486_v32  ;;  %18507 = vst [vmem:[#allocation40_spill] sm:$0xff] %v15488_v33  ;;  %v15490_v34 = vld [vmem:[#allocation2 + $0x84] sm:$0xf]  ;;  %v15492_v35 = vld [vmem:[#allocation2 + $0x88] sm:$0xf] }
  0x58   : > { %18508 = vst [vmem:[#allocation41_spill] sm:$0xff] %v15490_v34  ;;  %18509 = vst [vmem:[#allocation42_spill] sm:$0xff] %v15492_v35  ;;  %v15494_v36 = vld [vmem:[#allocation2 + $0x8c] sm:$0xf]  ;;  %v15496_v37 = vld [vmem:[#allocation2 + $0x90] sm:$0xf] }
  0x59   : > { %18510 = vst [vmem:[#allocation43_spill] sm:$0xff] %v15494_v36  ;;  %18511 = vst [vmem:[#allocation44_spill] sm:$0xff] %v15496_v37  ;;  %v15498_v38 = vld [vmem:[#allocation2 + $0x94] sm:$0xf]  ;;  %v15500_v39 = vld [vmem:[#allocation2 + $0x98] sm:$0xf] }
  0x5a   : > { %18512 = vst [vmem:[#allocation45_spill] sm:$0xff] %v15498_v38  ;;  %18513 = vst [vmem:[#allocation46_spill] sm:$0xff] %v15500_v39  ;;  %v15502_v40 = vld [vmem:[#allocation2 + $0x9c] sm:$0xf]  ;;  %v15504_v41 = vld [vmem:[#allocation2 + $0xa0] sm:$0xf] }
  0x5b   : > { %18514 = vst [vmem:[#allocation47_spill] sm:$0xff] %v15502_v40  ;;  %18515 = vst [vmem:[#allocation48_spill] sm:$0xff] %v15504_v41  ;;  %v15506_v42 = vld [vmem:[#allocation2 + $0xa4] sm:$0xf]  ;;  %v15508_v43 = vld [vmem:[#allocation2 + $0xa8] sm:$0xf] }
  0x5c   : > { %18516 = vst [vmem:[#allocation49_spill] sm:$0xff] %v15506_v42  ;;  %18517 = vst [vmem:[#allocation50_spill] sm:$0xff] %v15508_v43  ;;  %v15510_v44 = vld [vmem:[#allocation2 + $0xac] sm:$0xf]  ;;  %v15512_v45 = vld [vmem:[#allocation2 + $0xb0] sm:$0xf] }
  0x5d   : > { %18518 = vst [vmem:[#allocation51_spill] sm:$0xff] %v15510_v44  ;;  %18519 = vst [vmem:[#allocation52_spill] sm:$0xff] %v15512_v45  ;;  %v15514_v46 = vld [vmem:[#allocation2 + $0xb4] sm:$0xf]  ;;  %v15516_v47 = vld [vmem:[#allocation2 + $0xb8] sm:$0xf] }
  0x5e   : > { %18520 = vst [vmem:[#allocation53_spill] sm:$0xff] %v15514_v46  ;;  %18521 = vst [vmem:[#allocation54_spill] sm:$0xff] %v15516_v47  ;;  %v15518_v48 = vld [vmem:[#allocation2 + $0xbc] sm:$0xf]  ;;  %v15520_v49 = vld [vmem:[#allocation2 + $0xc0] sm:$0xf] }
  0x5f   : > { %18522 = vst [vmem:[#allocation55_spill] sm:$0xff] %v15518_v48  ;;  %18523 = vst [vmem:[#allocation56_spill] sm:$0xff] %v15520_v49  ;;  %v15522_v50 = vld [vmem:[#allocation2 + $0xc4] sm:$0xf]  ;;  %v15524_v51 = vld [vmem:[#allocation2 + $0xc8] sm:$0xf] }
  0x60   : > { %18524 = vst [vmem:[#allocation57_spill] sm:$0xff] %v15522_v50  ;;  %18525 = vst [vmem:[#allocation58_spill] sm:$0xff] %v15524_v51  ;;  %v15526_v52 = vld [vmem:[#allocation2 + $0xcc] sm:$0xf]  ;;  %v15528_v53 = vld [vmem:[#allocation2 + $0xd0] sm:$0xf] }
  0x61   : > { %18526 = vst [vmem:[#allocation59_spill] sm:$0xff] %v15526_v52  ;;  %18527 = vst [vmem:[#allocation60_spill] sm:$0xff] %v15528_v53  ;;  %v15530_v54 = vld [vmem:[#allocation2 + $0xd4] sm:$0xf]  ;;  %v15532_v55 = vld [vmem:[#allocation2 + $0xd8] sm:$0xf] }
  0x62   : > { %18528 = vst [vmem:[#allocation61_spill] sm:$0xff] %v15530_v54  ;;  %18529 = vst [vmem:[#allocation62_spill] sm:$0xff] %v15532_v55  ;;  %v15534_v56 = vld [vmem:[#allocation2 + $0xdc] sm:$0xf]  ;;  %v15536_v57 = vld [vmem:[#allocation2 + $0xe0] sm:$0xf] }
  0x63   : > { %18530 = vst [vmem:[#allocation63_spill] sm:$0xff] %v15534_v56  ;;  %18531 = vst [vmem:[#allocation64_spill] sm:$0xff] %v15536_v57  ;;  %v15538_v58 = vld [vmem:[#allocation2 + $0xe4] sm:$0xf]  ;;  %v15540_v59 = vld [vmem:[#allocation2 + $0xe8] sm:$0xf] }
  0x64   : > { %18532 = vst [vmem:[#allocation65_spill] sm:$0xff] %v15538_v58  ;;  %18533 = vst [vmem:[#allocation66_spill] sm:$0xff] %v15540_v59  ;;  %v15542_v60 = vld [vmem:[#allocation2 + $0xec] sm:$0xf]  ;;  %v15544_v61 = vld [vmem:[#allocation2 + $0xf0] sm:$0xf] }
  0x65   : > { %18534 = vst [vmem:[#allocation67_spill] sm:$0xff] %v15542_v60  ;;  %18535 = vst [vmem:[#allocation68_spill] sm:$0xff] %v15544_v61  ;;  %v15546_v62 = vld [vmem:[#allocation2 + $0xf4] sm:$0xf]  ;;  %v15548_v63 = vld [vmem:[#allocation2 + $0xf8] sm:$0xf] }
  0x66   : > { %18536 = vst [vmem:[#allocation69_spill] sm:$0xff] %v15546_v62  ;;  %18537 = vst [vmem:[#allocation70_spill] sm:$0xff] %v15548_v63  ;;  %v15550_v0 = vld [vmem:[#allocation2 + $0xfc] sm:$0xf]  ;;  %v15552_v53 = vld [vmem:[#allocation2 + $0x100] sm:$0xf] }
  0x67   : > { %18538 = vst [vmem:[#allocation71_spill] sm:$0xff] %v15550_v0  ;;  %18539 = vst [vmem:[#allocation72_spill] sm:$0xff] %v15552_v53  ;;  %v15554_v55 = vld [vmem:[#allocation2 + $0x104] sm:$0xf]  ;;  %v15556_v56 = vld [vmem:[#allocation2 + $0x108] sm:$0xf] }
  0x68   : > { %18540 = vst [vmem:[#allocation73_spill] sm:$0xff] %v15554_v55  ;;  %18541 = vst [vmem:[#allocation74_spill] sm:$0xff] %v15556_v56  ;;  %v15558_v57 = vld [vmem:[#allocation2 + $0x10c] sm:$0xf]  ;;  %v15560_v58 = vld [vmem:[#allocation2 + $0x110] sm:$0xf] }
  0x69   : > { %18542 = vst [vmem:[#allocation75_spill] sm:$0xff] %v15558_v57  ;;  %18543 = vst [vmem:[#allocation76_spill] sm:$0xff] %v15560_v58  ;;  %v15562_v59 = vld [vmem:[#allocation2 + $0x114] sm:$0xf]  ;;  %v15564_v60 = vld [vmem:[#allocation2 + $0x118] sm:$0xf] }
  0x6a   : > { %18544 = vst [vmem:[#allocation77_spill] sm:$0xff] %v15562_v59  ;;  %18545 = vst [vmem:[#allocation78_spill] sm:$0xff] %v15564_v60  ;;  %v15566_v61 = vld [vmem:[#allocation2 + $0x11c] sm:$0xf]  ;;  %v15568_v62 = vld [vmem:[#allocation2 + $0x120] sm:$0xf] }
  0x6b   : > { %18546 = vst [vmem:[#allocation79_spill] sm:$0xff] %v15566_v61  ;;  %18547 = vst [vmem:[#allocation80_spill] sm:$0xff] %v15568_v62  ;;  %v15570_v63 = vld [vmem:[#allocation2 + $0x124] sm:$0xf]  ;;  %v15572_v0 = vld [vmem:[#allocation2 + $0x128] sm:$0xf] }
  0x6c   : > { %18548 = vst [vmem:[#allocation81_spill] sm:$0xff] %v15570_v63  ;;  %18549 = vst [vmem:[#allocation82_spill] sm:$0xff] %v15572_v0  ;;  %v15574_v53 = vld [vmem:[#allocation2 + $0x12c] sm:$0xf]  ;;  %v15576_v55 = vld [vmem:[#allocation2 + $0x130] sm:$0xf] }
  0x6d   : > { %18550 = vst [vmem:[#allocation83_spill] sm:$0xff] %v15574_v53  ;;  %18551 = vst [vmem:[#allocation84_spill] sm:$0xff] %v15576_v55  ;;  %v15578_v56 = vld [vmem:[#allocation2 + $0x134] sm:$0xf]  ;;  %v15580_v57 = vld [vmem:[#allocation2 + $0x138] sm:$0xf] }
  0x6e   : > { %18552 = vst [vmem:[#allocation85_spill] sm:$0xff] %v15578_v56  ;;  %18553 = vst [vmem:[#allocation86_spill] sm:$0xff] %v15580_v57  ;;  %v15582_v58 = vld [vmem:[#allocation2 + $0x13c] sm:$0xf]  ;;  %v15584_v59 = vld [vmem:[#allocation2 + $0x1c0] sm:$0xf] }
  0x6f   : > { %18554 = vst [vmem:[#allocation87_spill] sm:$0xff] %v15582_v58  ;;  %18555 = vst [vmem:[#allocation88_spill] sm:$0xff] %v15584_v59  ;;  %v15586_v60 = vld [vmem:[#allocation2 + $0x1c4] sm:$0xf]  ;;  %v15588_v61 = vld [vmem:[#allocation2 + $0x1c8] sm:$0xf] }
  0x70   : > { %18556 = vst [vmem:[#allocation89_spill] sm:$0xff] %v15586_v60  ;;  %18557 = vst [vmem:[#allocation90_spill] sm:$0xff] %v15588_v61  ;;  %v15590_v62 = vld [vmem:[#allocation2 + $0x1cc] sm:$0xf]  ;;  %v15592_v63 = vld [vmem:[#allocation2 + $0x1d0] sm:$0xf] }
  0x71   : > { %18558 = vst [vmem:[#allocation91_spill] sm:$0xff] %v15590_v62  ;;  %18559 = vst [vmem:[#allocation92_spill] sm:$0xff] %v15592_v63  ;;  %v15594_v0 = vld [vmem:[#allocation2 + $0x1d4] sm:$0xf]  ;;  %v15596_v53 = vld [vmem:[#allocation2 + $0x1d8] sm:$0xf] }
  0x72   : > { %18560 = vst [vmem:[#allocation93_spill] sm:$0xff] %v15594_v0  ;;  %18561 = vst [vmem:[#allocation94_spill] sm:$0xff] %v15596_v53  ;;  %v15598_v55 = vld [vmem:[#allocation2 + $0x1dc] sm:$0xf]  ;;  %v15600_v56 = vld [vmem:[#allocation2 + $0x1e0] sm:$0xf] }
  0x73   : > { %18562 = vst [vmem:[#allocation95_spill] sm:$0xff] %v15598_v55  ;;  %18563 = vst [vmem:[#allocation96_spill] sm:$0xff] %v15600_v56  ;;  %v15602_v57 = vld [vmem:[#allocation2 + $0x1e4] sm:$0xf]  ;;  %v15604_v58 = vld [vmem:[#allocation2 + $0x1e8] sm:$0xf] }
  0x74   : > { %18564 = vst [vmem:[#allocation97_spill] sm:$0xff] %v15602_v57  ;;  %18565 = vst [vmem:[#allocation98_spill] sm:$0xff] %v15604_v58  ;;  %v15606_v59 = vld [vmem:[#allocation2 + $0x1ec] sm:$0xf]  ;;  %v15608_v60 = vld [vmem:[#allocation2 + $0x1f0] sm:$0xf] }
  0x75   : > { %18566 = vst [vmem:[#allocation99_spill] sm:$0xff] %v15606_v59  ;;  %18567 = vst [vmem:[#allocation100_spill] sm:$0xff] %v15608_v60  ;;  %v15610_v61 = vld [vmem:[#allocation2 + $0x1f4] sm:$0xf]  ;;  %v15612_v62 = vld [vmem:[#allocation2 + $0x1f8] sm:$0xf] }
  0x76   : > { %18568 = vst [vmem:[#allocation101_spill] sm:$0xff] %v15610_v61  ;;  %18569 = vst [vmem:[#allocation102_spill] sm:$0xff] %v15612_v62  ;;  %v15614_v63 = vld [vmem:[#allocation2 + $0x1fc] sm:$0xf]  ;;  %v15616_v0 = vld [vmem:[#allocation2 + $0x200] sm:$0xf] }
  0x77   : > { %18570 = vst [vmem:[#allocation103_spill] sm:$0xff] %v15614_v63  ;;  %18571 = vst [vmem:[#allocation104_spill] sm:$0xff] %v15616_v0  ;;  %v15618_v53 = vld [vmem:[#allocation2 + $0x204] sm:$0xf]  ;;  %v15620_v55 = vld [vmem:[#allocation2 + $0x208] sm:$0xf] }
  0x78   : > { %18572 = vst [vmem:[#allocation105_spill] sm:$0xff] %v15618_v53  ;;  %18573 = vst [vmem:[#allocation106_spill] sm:$0xff] %v15620_v55  ;;  %v15622_v56 = vld [vmem:[#allocation2 + $0x20c] sm:$0xf]  ;;  %v15624_v57 = vld [vmem:[#allocation2 + $0x210] sm:$0xf] }
  0x79   : > { %18574 = vst [vmem:[#allocation107_spill] sm:$0xff] %v15622_v56  ;;  %18575 = vst [vmem:[#allocation108_spill] sm:$0xff] %v15624_v57  ;;  %v15626_v58 = vld [vmem:[#allocation2 + $0x214] sm:$0xf]  ;;  %v15628_v59 = vld [vmem:[#allocation2 + $0x218] sm:$0xf] }
  0x7a   : > { %18576 = vst [vmem:[#allocation109_spill] sm:$0xff] %v15626_v58  ;;  %18577 = vst [vmem:[#allocation110_spill] sm:$0xff] %v15628_v59  ;;  %v15630_v60 = vld [vmem:[#allocation2 + $0x21c] sm:$0xf]  ;;  %v15632_v61 = vld [vmem:[#allocation2 + $0x220] sm:$0xf] }
  0x7b   : > { %18578 = vst [vmem:[#allocation111_spill] sm:$0xff] %v15630_v60  ;;  %18579 = vst [vmem:[#allocation112_spill] sm:$0xff] %v15632_v61  ;;  %v15634_v62 = vld [vmem:[#allocation2 + $0x224] sm:$0xf]  ;;  %v15636_v63 = vld [vmem:[#allocation2 + $0x228] sm:$0xf] }
  0x7c   : > { %18580 = vst [vmem:[#allocation113_spill] sm:$0xff] %v15634_v62  ;;  %18581 = vst [vmem:[#allocation114_spill] sm:$0xff] %v15636_v63  ;;  %v15638_v0 = vld [vmem:[#allocation2 + $0x22c] sm:$0xf]  ;;  %v15640_v53 = vld [vmem:[#allocation2 + $0x230] sm:$0xf] }
  0x7d   : > { %18582 = vst [vmem:[#allocation115_spill] sm:$0xff] %v15638_v0  ;;  %18583 = vst [vmem:[#allocation116_spill] sm:$0xff] %v15640_v53  ;;  %v15642_v55 = vld [vmem:[#allocation2 + $0x234] sm:$0xf]  ;;  %v15644_v56 = vld [vmem:[#allocation2 + $0x238] sm:$0xf] }
  0x7e   : > { %18584 = vst [vmem:[#allocation117_spill] sm:$0xff] %v15642_v55  ;;  %18585 = vst [vmem:[#allocation118_spill] sm:$0xff] %v15644_v56  ;;  %v15646_v57 = vld [vmem:[#allocation2 + $0x23c] sm:$0xf]  ;;  %v15648_v58 = vld [vmem:[#allocation2 + $0x2c0] sm:$0xf] }
  0x7f   : > { %18586 = vst [vmem:[#allocation119_spill] sm:$0xff] %v15646_v57  ;;  %18587 = vst [vmem:[#allocation120_spill] sm:$0xff] %v15648_v58  ;;  %v15650_v59 = vld [vmem:[#allocation2 + $0x2c4] sm:$0xf]  ;;  %v15652_v60 = vld [vmem:[#allocation2 + $0x2c8] sm:$0xf] }
  0x80   : > { %18588 = vst [vmem:[#allocation121_spill] sm:$0xff] %v15650_v59  ;;  %18589 = vst [vmem:[#allocation122_spill] sm:$0xff] %v15652_v60  ;;  %v15654_v61 = vld [vmem:[#allocation2 + $0x2cc] sm:$0xf]  ;;  %v15656_v62 = vld [vmem:[#allocation2 + $0x2d0] sm:$0xf] }
  0x81   : > { %18590 = vst [vmem:[#allocation123_spill] sm:$0xff] %v15654_v61  ;;  %18591 = vst [vmem:[#allocation124_spill] sm:$0xff] %v15656_v62  ;;  %v15658_v63 = vld [vmem:[#allocation2 + $0x2d4] sm:$0xf]  ;;  %v15660_v0 = vld [vmem:[#allocation2 + $0x2d8] sm:$0xf] }
  0x82   : > { %18592 = vst [vmem:[#allocation125_spill] sm:$0xff] %v15658_v63  ;;  %18593 = vst [vmem:[#allocation126_spill] sm:$0xff] %v15660_v0  ;;  %v15662_v53 = vld [vmem:[#allocation2 + $0x2dc] sm:$0xf]  ;;  %v15664_v55 = vld [vmem:[#allocation2 + $0x2e0] sm:$0xf] }
  0x83   : > { %18594 = vst [vmem:[#allocation127_spill] sm:$0xff] %v15662_v53  ;;  %18595 = vst [vmem:[#allocation128_spill] sm:$0xff] %v15664_v55  ;;  %v15666_v56 = vld [vmem:[#allocation2 + $0x2e4] sm:$0xf]  ;;  %v15668_v57 = vld [vmem:[#allocation2 + $0x2e8] sm:$0xf] }
  0x84   : > { %18596 = vst [vmem:[#allocation129_spill] sm:$0xff] %v15666_v56  ;;  %18597 = vst [vmem:[#allocation130_spill] sm:$0xff] %v15668_v57  ;;  %v15670_v58 = vld [vmem:[#allocation2 + $0x2ec] sm:$0xf]  ;;  %v15672_v59 = vld [vmem:[#allocation2 + $0x2f0] sm:$0xf] }
  0x85   : > { %18598 = vst [vmem:[#allocation131_spill] sm:$0xff] %v15670_v58  ;;  %18599 = vst [vmem:[#allocation132_spill] sm:$0xff] %v15672_v59  ;;  %v15674_v60 = vld [vmem:[#allocation2 + $0x2f4] sm:$0xf]  ;;  %v15676_v61 = vld [vmem:[#allocation2 + $0x2f8] sm:$0xf] }
  0x86   : > { %18600 = vst [vmem:[#allocation133_spill] sm:$0xff] %v15674_v60  ;;  %18601 = vst [vmem:[#allocation134_spill] sm:$0xff] %v15676_v61  ;;  %v15678_v62 = vld [vmem:[#allocation2 + $0x2fc] sm:$0xf]  ;;  %v15683_v0 = vld [vmem:[%s18314_s4] ss:$0 sm:$0xff] }
  0x87   : > { %18602 = vst [vmem:[#allocation135_spill] sm:$0xff] %v15678_v62  ;;  %18603 = vst [vmem:[#allocation136_spill] sm:$0xff] %v15683_v0  ;;  %v15688_v55 = vld [vmem:[%s18314_s4 + $0x1] ss:$0 sm:$0xff]  ;;  %v15693_v59 = vld [vmem:[%s18314_s4 + $0x2] ss:$0 sm:$0xff] }
  0x88   : > { %18604 = vst [vmem:[#allocation137_spill] sm:$0xff] %v15688_v55  ;;  %18605 = vst [vmem:[#allocation138_spill] sm:$0xff] %v15693_v59  ;;  %v15698_v61 = vld [vmem:[%s18314_s4 + $0x3] ss:$0 sm:$0xff]  ;;  %v15703_v62 = vld [vmem:[%s18314_s4 + $0x4] ss:$0 sm:$0xff] }
  0x89   : > { %18606 = vst [vmem:[#allocation139_spill] sm:$0xff] %v15698_v61  ;;  %18607 = vst [vmem:[#allocation140_spill] sm:$0xff] %v15703_v62  ;;  %v15708_v60 = vld [vmem:[%s18314_s4 + $0x7] ss:$0 sm:$0xff]  ;;  %v15713_v57 = vld [vmem:[%s18314_s4 + $0x8] ss:$0 sm:$0xff] }
  0x8a   : > { %18608 = vst [vmem:[#allocation141_spill] sm:$0xff] %v15708_v60  ;;  %18609 = vst [vmem:[#allocation142_spill] sm:$0xff] %v15713_v57  ;;  %v15718_v58 = vld [vmem:[%s18314_s4 + $0xb] ss:$0 sm:$0xff]  ;;  %v15723_v56 = vld [vmem:[%s18315_s5] sm:$0xff]  ;;  %s15256_s29 = smov 32  }
  0x8b   : > { %18610 = vst [vmem:[#allocation143_spill] sm:$0xff] %v15718_v58  ;;  %18611 = vst [vmem:[#allocation144_spill] sm:$0xff] %v15723_v56  ;;  %v15728_v53 = vld [vmem:[%s18315_s5 + $0x8] sm:$0xff]  ;;  %v15733_v63 = vld [vmem:[%s18315_s5 + $0x10] sm:$0xff]  ;;  %s16327_s23 = smov 0  }
  0x8c   : > { %18612 = vst [vmem:[#allocation145_spill] sm:$0xff] %v15728_v53  ;;  %18613 = vst [vmem:[#allocation146_spill] sm:$0xff] %v15733_v63  ;;  %v15738_v57 = vld [vmem:[%s18315_s5 + $0x18] sm:$0xff]  ;;  %v15743_v58 = vld [vmem:[%s18315_s5 + $0x20] sm:$0xff] }
  0x8d   : > { %18614 = vst [vmem:[#allocation147_spill] sm:$0xff] %v15738_v57  ;;  %18615 = vst [vmem:[#allocation148_spill] sm:$0xff] %v15743_v58  ;;  %v15748_v56 = vld [vmem:[%s18315_s5 + $0x28] sm:$0xff]  ;;  %v15753_v53 = vld [vmem:[%s18315_s5 + $0x30] sm:$0xff] }
  0x8e   : > { %18616 = vst [vmem:[#allocation149_spill] sm:$0xff] %v15748_v56  ;;  %18617 = vst [vmem:[#allocation150_spill] sm:$0xff] %v15753_v53  ;;  %v15758_v63 = vld [vmem:[%s18315_s5 + $0x38] sm:$0xff]  ;;  %v15763_v57 = vld [vmem:[%s18315_s5 + $0x40] sm:$0xff] }
  0x8f   : > { %18618 = vst [vmem:[#allocation151_spill] sm:$0xff] %v15758_v63  ;;  %18619 = vst [vmem:[#allocation152_spill] sm:$0xff] %v15763_v57  ;;  %v15768_v58 = vld [vmem:[%s18315_s5 + $0x48] sm:$0xff]  ;;  %v15773_v56 = vld [vmem:[%s18315_s5 + $0x50] sm:$0xff] }
  0x90   : > { %18620 = vst [vmem:[#allocation153_spill] sm:$0xff] %v15768_v58  ;;  %18621 = vst [vmem:[#allocation154_spill] sm:$0xff] %v15773_v56  ;;  %v15778_v53 = vld [vmem:[%s18315_s5 + $0x58] sm:$0xff]  ;;  %v15783_v63 = vld [vmem:[%s18315_s5 + $0x60] sm:$0xff] }
  0x91   : > { %18622 = vst [vmem:[#allocation155_spill] sm:$0xff] %v15778_v53  ;;  %18623 = vst [vmem:[#allocation156_spill] sm:$0xff] %v15783_v63  ;;  %v15788_v57 = vld [vmem:[%s18315_s5 + $0x68] sm:$0xff]  ;;  %v15793_v58 = vld [vmem:[%s18315_s5 + $0x70] sm:$0xff] }
  0x92   : > { %18624 = vst [vmem:[#allocation157_spill] sm:$0xff] %v15788_v57  ;;  %18625 = vst [vmem:[#allocation158_spill] sm:$0xff] %v15793_v58  ;;  %v15798_v56 = vld [vmem:[%s18315_s5 + $0x78] sm:$0xff]  ;;  %v15803_v53 = vld [vmem:[%s18316_s6] sm:$0x3] }
  0x93   : > { %18626 = vst [vmem:[#allocation159_spill] sm:$0xff] %v15798_v56  ;;  %18627 = vst [vmem:[#allocation160_spill] sm:$0xff] %v15803_v53  ;;  %v15805_v63 = vld [vmem:[#allocation4] sm:$0xf]  ;;  %v15807_v60 = vld [vmem:[#allocation4 + $0x4] sm:$0xf] }
  0x94   : > { %18628 = vst [vmem:[#allocation161_spill] sm:$0xff] %v15805_v63  ;;  %18629 = vst [vmem:[#allocation162_spill] sm:$0xff] %v15807_v60  ;;  %v15809_v57 = vld [vmem:[#allocation4 + $0x8] sm:$0xf]  ;;  %v15811_v62 = vld [vmem:[#allocation4 + $0xc] sm:$0xf] }
  0x95   : > { %18630 = vst [vmem:[#allocation163_spill] sm:$0xff] %v15809_v57  ;;  %18631 = vst [vmem:[#allocation164_spill] sm:$0xff] %v15811_v62  ;;  %v15813_v61 = vld [vmem:[#allocation4 + $0x10] sm:$0xf]  ;;  %v15815_v58 = vld [vmem:[#allocation4 + $0x14] sm:$0xf] }
  0x96   : > { %18632 = vst [vmem:[#allocation165_spill] sm:$0xff] %v15813_v61  ;;  %18633 = vst [vmem:[#allocation166_spill] sm:$0xff] %v15815_v58  ;;  %v15817_v54 = vld [vmem:[#allocation4 + $0x18] sm:$0xf]  ;;  %v15819_v56 = vld [vmem:[#allocation4 + $0x1c] sm:$0xf] }
  0x97   : > { %18634 = vst [vmem:[#allocation167_spill] sm:$0xff] %v15817_v54  ;;  %18635 = vst [vmem:[#allocation168_spill] sm:$0xff] %v15819_v56  ;;  %v15821_v51 = vld [vmem:[#allocation4 + $0x20] sm:$0xf]  ;;  %v15823_v52 = vld [vmem:[#allocation4 + $0x24] sm:$0xf] }
  0x98   : > { %18636 = vst [vmem:[#allocation169_spill] sm:$0xff] %v15821_v51  ;;  %18637 = vst [vmem:[#allocation170_spill] sm:$0xff] %v15823_v52  ;;  %v15825_v53 = vld [vmem:[#allocation4 + $0x28] sm:$0xf]  ;;  %v15827_v63 = vld [vmem:[#allocation4 + $0x2c] sm:$0xf] }
  0x99   : > { %18638 = vst [vmem:[#allocation171_spill] sm:$0xff] %v15825_v53  ;;  %18639 = vst [vmem:[#allocation172_spill] sm:$0xff] %v15827_v63  ;;  %v15829_v60 = vld [vmem:[#allocation4 + $0x30] sm:$0xf]  ;;  %v15831_v57 = vld [vmem:[#allocation4 + $0x34] sm:$0xf] }
  0x9a   : > { %18640 = vst [vmem:[#allocation173_spill] sm:$0xff] %v15829_v60  ;;  %18641 = vst [vmem:[#allocation174_spill] sm:$0xff] %v15831_v57  ;;  %v15833_v62 = vld [vmem:[#allocation4 + $0x38] sm:$0xf]  ;;  %v15835_v61 = vld [vmem:[#allocation4 + $0x3c] sm:$0xf] }
  0x9b   : > { %18642 = vst [vmem:[#allocation175_spill] sm:$0xff] %v15833_v62  ;;  %18643 = vst [vmem:[#allocation176_spill] sm:$0xff] %v15835_v61  ;;  %v15837_v58 = vld [vmem:[#allocation4 + $0x40] sm:$0xf]  ;;  %v15839_v54 = vld [vmem:[#allocation4 + $0x44] sm:$0xf] }
  0x9c   : > { %18644 = vst [vmem:[#allocation177_spill] sm:$0xff] %v15837_v58  ;;  %18645 = vst [vmem:[#allocation178_spill] sm:$0xff] %v15839_v54  ;;  %v15841_v56 = vld [vmem:[#allocation4 + $0x48] sm:$0xf]  ;;  %v15843_v51 = vld [vmem:[#allocation4 + $0x4c] sm:$0xf] }
  0x9d   : > { %18646 = vst [vmem:[#allocation179_spill] sm:$0xff] %v15841_v56  ;;  %18647 = vst [vmem:[#allocation180_spill] sm:$0xff] %v15843_v51  ;;  %v15845_v52 = vld [vmem:[#allocation4 + $0x50] sm:$0xf]  ;;  %v15847_v53 = vld [vmem:[#allocation4 + $0x54] sm:$0xf] }
  0x9e   : > { %18648 = vst [vmem:[#allocation181_spill] sm:$0xff] %v15845_v52  ;;  %18649 = vst [vmem:[#allocation182_spill] sm:$0xff] %v15847_v53  ;;  %v15849_v63 = vld [vmem:[#allocation4 + $0x58] sm:$0xf]  ;;  %v15851_v60 = vld [vmem:[#allocation4 + $0x5c] sm:$0xf] }
  0x9f   : > { %18650 = vst [vmem:[#allocation183_spill] sm:$0xff] %v15849_v63  ;;  %18651 = vst [vmem:[#allocation184_spill] sm:$0xff] %v15851_v60  ;;  %v15853_v57 = vld [vmem:[#allocation4 + $0x60] sm:$0xf]  ;;  %v15855_v62 = vld [vmem:[#allocation4 + $0x64] sm:$0xf] }
  0xa0   : > { %18652 = vst [vmem:[#allocation185_spill] sm:$0xff] %v15853_v57  ;;  %18653 = vst [vmem:[#allocation186_spill] sm:$0xff] %v15855_v62  ;;  %v15857_v61 = vld [vmem:[#allocation4 + $0x68] sm:$0xf]  ;;  %v15859_v58 = vld [vmem:[#allocation4 + $0x6c] sm:$0xf] }
  0xa1   : > { %18654 = vst [vmem:[#allocation187_spill] sm:$0xff] %v15857_v61  ;;  %18655 = vst [vmem:[#allocation188_spill] sm:$0xff] %v15859_v58  ;;  %v15861_v54 = vld [vmem:[#allocation4 + $0x70] sm:$0xf]  ;;  %v15863_v56 = vld [vmem:[#allocation4 + $0x74] sm:$0xf] }
  0xa2   : > { %18656 = vst [vmem:[#allocation189_spill] sm:$0xff] %v15861_v54  ;;  %18657 = vst [vmem:[#allocation190_spill] sm:$0xff] %v15863_v56  ;;  %v15865_v51 = vld [vmem:[#allocation4 + $0x78] sm:$0xf]  ;;  %v15867_v52 = vld [vmem:[#allocation4 + $0x7c] sm:$0xf] }
  0xa3   : > { %18658 = vst [vmem:[#allocation191_spill] sm:$0xff] %v15865_v51  ;;  %18659 = vst [vmem:[#allocation192_spill] sm:$0xff] %v15867_v52  ;;  %v15872_v63 = vld [vmem:[%s18318_s8] ss:$0 sm:$0xff]  ;;  %v15882_v54 = vld [vmem:[%s18319_s9 + $0x1] ss:$0 sm:$0xff] }
  0xa4   : > { %18660 = vst [vmem:[#allocation193_spill] sm:$0xff] %v15872_v63  ;;  %v15877_v57 = vld [vmem:[%s18319_s9] ss:$0 sm:$0xff]  ;;  %18662 = vst [vmem:[#allocation195_spill] sm:$0xff] %v15882_v54  ;;  %v15887_v51 = vld [vmem:[%s18319_s9 + $0x2] ss:$0 sm:$0xff] }
  0xa5   : > { %18661 = vst [vmem:[#allocation194_spill] sm:$0xff] %v15877_v57  ;;  %18663 = vst [vmem:[#allocation196_spill] sm:$0xff] %v15887_v51  ;;  %v15892_v52 = vld [vmem:[%s18319_s9 + $0x3] ss:$0 sm:$0xff]  ;;  %v15897_v63 = vld [vmem:[%s18320_s10] ss:$0 sm:$0xff] }
  0xa6   : > { %18664 = vst [vmem:[#allocation197_spill] sm:$0xff] %v15892_v52  ;;  %18665 = vst [vmem:[#allocation198_spill] sm:$0xff] %v15897_v63  ;;  %v15902_v56 = vld [vmem:[%s18320_s10 + $0x1] ss:$0 sm:$0xff]  ;;  %v15907_v61 = vld [vmem:[%s18320_s10 + $0x2] ss:$0 sm:$0xff] }
  0xa7   : > { %18666 = vst [vmem:[#allocation199_spill] sm:$0xff] %v15902_v56  ;;  %18667 = vst [vmem:[#allocation200_spill] sm:$0xff] %v15907_v61  ;;  %v15912_v51 = vld [vmem:[%s18320_s10 + $0x3] ss:$0 sm:$0xff]  ;;  %v15072_v62 = vld [vmem:[#allocation2 + $0x148] sm:$0xff]   ;;  %v18669_v60 = vmov 0.0  }
  0xa8   : > { %18668 = vst [vmem:[#allocation201_spill] sm:$0xff] %v15912_v51  ;;  %v15070_v52 = vld [vmem:[#allocation2 + $0x140] sm:$0xff]   ;;  %v15073_v53 = vld [vmem:[#allocation2 + $0x188] sm:$0xff]   ;;  %v15074_v56 = vld [vmem:[#allocation2 + $0x150] sm:$0xff]  }
  0xa9   : > { %v15071_v58 = vld [vmem:[#allocation2 + $0x180] sm:$0xff]   ;;  %14591 = vmatpush3.bf16.msra.mxu0 %v15070_v52  ;;  %v15075_v61 = vld [vmem:[#allocation2 + $0x190] sm:$0xff]   ;;  %v15076_v51 = vld [vmem:[#allocation2 + $0x158] sm:$0xff]  }
  0xaa   : > { %14611 = vmatpush3.bf16.msra.mxu1 %v15071_v58  ;;  %14592 = vmatprep.subr.bf16.mxu0 %v18669_v60  ;;  %v15077_v52 = vld [vmem:[#allocation2 + $0x198] sm:$0xff]   ;;  %v15079_v58 = vld [vmem:[#allocation2 + $0x1a0] sm:$0xff]   ;;  %v452_v54 = vld [vmem:[%s440_s24 + $0x8] sm:$0xff] }
  0xab   : > { %14612 = vmatprep.subr.bf16.mxu1 %v18669_v60  ;;  %v15085_v63 = vld [vmem:[#allocation2 + $0x1b8] sm:$0xff]   ;;  %v15086_v57 = vld [vmem:[#allocation2 + $0x240] sm:$0xff]  }
  0xad   : > { %14593 = vmatpush3.bf16.msra.mxu0 %v15072_v62  ;;  %v15925_v62 = vld [vmem:[%s435_s20] sm:$0xff]  }
  0xae   : > { %14613 = vmatpush3.bf16.msra.mxu1 %v15073_v53  ;;  %14594 = vmatprep.subr.bf16.mxu0 %v18669_v60  ;;  %v15078_v53 = vld [vmem:[#allocation2 + $0x160] sm:$0xff]  }
  0xaf   : > { %14614 = vmatprep.subr.bf16.mxu1 %v18669_v60 }
  0xb1   : > { %14595 = vmatpush3.bf16.msra.mxu0 %v15074_v56  ;;  %v15080_v56 = vld [vmem:[#allocation2 + $0x168] sm:$0xff]  }
  0xb2   : > { %14615 = vmatpush3.bf16.msra.mxu1 %v15075_v61  ;;  %14596 = vmatprep.subr.bf16.mxu0 %v18669_v60  ;;  %v15081_v61 = vld [vmem:[#allocation2 + $0x1a8] sm:$0xff]  }
  0xb3   : > { %14616 = vmatprep.subr.bf16.mxu1 %v18669_v60 }
  0xb5   : > { %14597 = vmatpush3.bf16.msra.mxu0 %v15076_v51  ;;  %v15082_v51 = vld [vmem:[#allocation2 + $0x170] sm:$0xff]  }
  0xb6   : > { %14617 = vmatpush3.bf16.msra.mxu1 %v15077_v52  ;;  %14598 = vmatprep.subr.bf16.mxu0 %v18669_v60  ;;  %v15083_v52 = vld [vmem:[#allocation2 + $0x1b0] sm:$0xff]  }
  0xb7   : > { %14618 = vmatprep.subr.bf16.mxu1 %v18669_v60 }
  0xb9   : > { %14599 = vmatpush3.bf16.msra.mxu0 %v15078_v53  ;;  %v15084_v53 = vld [vmem:[#allocation2 + $0x178] sm:$0xff]  }
  0xba   : > { %14619 = vmatpush3.bf16.msra.mxu1 %v15079_v58  ;;  %14600 = vmatprep.subr.bf16.mxu0 %v18669_v60  ;;  %v451_v58 = vld [vmem:[%s440_s24] sm:$0xff] }
  0xbb   : > { %14620 = vmatprep.subr.bf16.mxu1 %v18669_v60 }
  0xbd   : > { %14601 = vmatpush3.bf16.msra.mxu0 %v15080_v56  ;;  %v716_v56 = vpack.c.bf16 %v452_v54, %v451_v58  ;;  %v15090_v54 = vld [vmem:[#allocation2 + $0x250] sm:$0xff]   ;;  %v15094_v58 = vld [vmem:[#allocation2 + $0x260] sm:$0xff]  }
  0xbe   : > { %14621 = vmatpush3.bf16.msra.mxu1 %v15081_v61  ;;  %14602 = vmatprep.subr.bf16.mxu0 %v18669_v60  ;;  %v15087_v61 = vld [vmem:[#allocation2 + $0x280] sm:$0xff]  }
  0xbf   : > { %14622 = vmatprep.subr.bf16.mxu1 %v18669_v60 }
  0xc1   : > { %14603 = vmatpush3.bf16.msra.mxu0 %v15082_v51  ;;  %v15088_v51 = vld [vmem:[#allocation2 + $0x248] sm:$0xff]  }
  0xc2   : > { %14623 = vmatpush3.bf16.msra.mxu1 %v15083_v52  ;;  %14604 = vmatprep.subr.bf16.mxu0 %v18669_v60  ;;  %v15089_v52 = vld [vmem:[#allocation2 + $0x288] sm:$0xff]  }
  0xc3   : > { %14624 = vmatprep.subr.bf16.mxu1 %v18669_v60 }
  0xc5   : > { %14605 = vmatpush3.bf16.msra.mxu0 %v15084_v53  ;;  %v15093_v53 = vld [vmem:[#allocation2 + $0x298] sm:$0xff]  }
  0xc6   : > { %14625 = vmatpush3.bf16.msra.mxu1 %v15085_v63  ;;  %14630 = vmatprep.subr.bf16.mxu0 %v18669_v60  ;;  %v15092_v63 = vld [vmem:[#allocation2 + $0x258] sm:$0xff]  }
  0xc7   : > { %14650 = vmatprep.subr.bf16.mxu1 %v18669_v60 }
  0xc8   : > { %14607 = vmatmul.mubr.bf16.vlgmr.msra.gmra.mrb[0].mxu0 %v716_v56 }
  0xc9   : > { %14631 = vmatpush3.bf16.msra.mxu0 %v15086_v57  ;;  %14627 = vmatmul.mubr.bf16.vlgmr.msra.gmra.mrb[0].mxu1 %v716_v56  ;;  %v15091_v57 = vld [vmem:[#allocation2 + $0x290] sm:$0xff]   ;;  %v15095_v56 = vld [vmem:[#allocation2 + $0x2a0] sm:$0xff]  }
  0xca   : > { %14651 = vmatpush3.bf16.msra.mxu1 %v15087_v61  ;;  %14632 = vmatprep.subr.bf16.mxu0 %v18669_v60  ;;  %v15096_v61 = vld [vmem:[#allocation2 + $0x268] sm:$0xff]  }
  0xcb   : > { %14652 = vmatprep.subr.bf16.mxu1 %v18669_v60  ;;  %14646 = vmatprep.mubr.msk.bf16.mxu0 %vm15253_vm0, %v18669_v60 }
  0xcc   : > { %14666 = vmatprep.mubr.msk.bf16.mxu1 %vm15253_vm0, %v18669_v60 }
  0xcd   : > { %14633 = vmatpush3.bf16.msra.mxu0 %v15088_v51  ;;  %v15097_v51 = vld [vmem:[#allocation2 + $0x2a8] sm:$0xff]  }
  0xce   : > { %14653 = vmatpush3.bf16.msra.mxu1 %v15089_v52  ;;  %14634 = vmatprep.subr.bf16.mxu0 %v18669_v60  ;;  %v15098_v52 = vld [vmem:[#allocation2 + $0x270] sm:$0xff]  }
  0xcf   : > { %14654 = vmatprep.subr.bf16.mxu1 %v18669_v60 }
  0xd1   : > { %14635 = vmatpush3.bf16.msra.mxu0 %v15090_v54  ;;  %v15099_v54 = vld [vmem:[#allocation2 + $0x2b0] sm:$0xff]  }
  0xd2   : > { %14655 = vmatpush3.bf16.msra.mxu1 %v15091_v57  ;;  %14636 = vmatprep.subr.bf16.mxu0 %v18669_v60  ;;  %v15100_v57 = vld [vmem:[#allocation2 + $0x278] sm:$0xff]  }
  0xd3   : > { %14656 = vmatprep.subr.bf16.mxu1 %v18669_v60 }
  0xd5   : > { %14637 = vmatpush3.bf16.msra.mxu0 %v15092_v63  ;;  %v453_v63 = vld [vmem:[%s444_s16] sm:$0xff] }
  0xd6   : > { %14657 = vmatpush3.bf16.msra.mxu1 %v15093_v53  ;;  %14638 = vmatprep.subr.bf16.mxu0 %v18669_v60  ;;  %v15101_v53 = vld [vmem:[#allocation2 + $0x2b8] sm:$0xff]  }
  0xd7   : > { %14658 = vmatprep.subr.bf16.mxu1 %v18669_v60 }
  0xd9   : > { %14639 = vmatpush3.bf16.msra.mxu0 %v15094_v58  ;;  %v1251_v58 = vpack.c.bf16 %v453_v63, %v453_v63 }
  0xda   : > { %14659 = vmatpush3.bf16.msra.mxu1 %v15095_v56  ;;  %14640 = vmatprep.subr.bf16.mxu0 %v18669_v60  ;;  %v14188_v56 = vld [vmem:[%s18314_s4 + $0x5] ss:$0 sm:$0xff] }
  0xdb   : > { %14660 = vmatprep.subr.bf16.mxu1 %v18669_v60 }
  0xdd   : > { %14641 = vmatpush3.bf16.msra.mxu0 %v15096_v61 }
  0xde   : > { %14661 = vmatpush3.bf16.msra.mxu1 %v15097_v51  ;;  %14642 = vmatprep.subr.bf16.mxu0 %v18669_v60 }
  0xdf   : > { %14662 = vmatprep.subr.bf16.mxu1 %v18669_v60 }
  0xe1   : > { %14643 = vmatpush3.bf16.msra.mxu0 %v15098_v52 }
  0xe2   : > { %14663 = vmatpush3.bf16.msra.mxu1 %v15099_v54  ;;  %14644 = vmatprep.subr.bf16.mxu0 %v18669_v60 }
  0xe3   : > { %14664 = vmatprep.subr.bf16.mxu1 %v18669_v60 }
  0xe5   : > { %14645 = vmatpush3.bf16.msra.mxu0 %v15100_v57 }
  0xe6   : > { %14665 = vmatpush3.bf16.msra.mxu1 %v15101_v53 }
  0xe8   : > { %14647 = vmatmul.mubr.bf16.vlgmr.msra.gmra.mrb[4].mxu0 %v1251_v58 }
  0xe9   : > { %14667 = vmatmul.mubr.bf16.vlgmr.msra.gmra.mrb[4].mxu1 %v1251_v58 }
 0x19b   : > { %v805_v61 = vpop.f32.mrb[0].mxu0 }
 0x19c   : > { %v15965_v51 = vadd.f32 %v14188_v56, %v805_v61  ;;  %v14608_v52 = vpop.f32.mrb[1].mxu0  ;;  %v900_v49 = vpop.f32.mrb[0].mxu1  ;;  %v14197_v61 = vld [vmem:[%s18314_s4 + $0x6] ss:$0 sm:$0xff] }
 0x19d   : > { %v808_v54 = vpop.f32.mrb[2].mxu0  ;;  %v14628_v50 = vpop.f32.mrb[1].mxu1 }
 0x19e   : > { %915 = vrot.lane.b32.xlu1 %v15965_v51, %s15254_s25  ;;  %909 = vrot.lane.b32.xlu0 %v15965_v51, %s15255_s26  ;;  %v14609_v57 = vpop.f32.mrb[3].mxu0  ;;  %v903_v63 = vpop.f32.mrb[2].mxu1  ;;  %v15971_v58 = vadd.f32 %v14188_v56, %v808_v54  ;;  %v15979_v50 = vadd.f32 %v14197_v61, %v900_v49  ;;  %v14206_v49 = vld [vmem:[%s18314_s4 + $0x9] ss:$0 sm:$0xff]  ;;  %v14215_v54 = vld [vmem:[%s18314_s4 + $0xa] ss:$0 sm:$0xff] }
 0x19f   : > { %v14629_v53 = vpop.f32.mrb[3].mxu1  ;;  %v15984_v52 = vadd.f32 %v14197_v61, %v903_v63 }
 0x1a2   : > { %921 = vrot.lane.b32.xlu0 %v15965_v51, %s15256_s29  ;;  %917 = vrot.lane.b32.xlu1 %v15971_v58, %s15254_s25 }
 0x1a6   : > { %1081 = vrot.lane.b32.xlu0 %v15979_v50, %s15255_s26  ;;  %923 = vrot.lane.b32.xlu1 %v15971_v58, %s15256_s29 }
 0x1aa   : > { %1087 = vrot.lane.b32.xlu0 %v15979_v50, %s15254_s25  ;;  %1083 = vrot.lane.b32.xlu1 %v15984_v52, %s15255_s26 }
 0x1ae   : > { %1093 = vrot.lane.b32.xlu0 %v15979_v50, %s15256_s29  ;;  %1089 = vrot.lane.b32.xlu1 %v15984_v52, %s15254_s25 }
 0x1b2   : > { %1095 = vrot.lane.b32.xlu1 %v15984_v52, %s15256_s29  ;;  %911 = vrot.lane.b32.xlu0 %v15971_v58, %s15255_s26 }
 0x1bb   : > { %v1340_v56 = vpop.f32.mrb[4].mxu0 }
 0x1bc   : > { %v16002_v57 = vadd.f32 %v14206_v49, %v1340_v56  ;;  %v14648_v63 = vpop.f32.mrb[5].mxu0  ;;  %v1434_v53 = vpop.f32.mrb[4].mxu1  ;;  %v932_v49 = vlaneseq  ;;  %v15258_v56 = vmov 1934713408  }
 0x1bd   : > { %v1343_v61 = vpop.f32.mrb[6].mxu0  ;;  %v14668_v59 = vpop.f32.mrb[5].mxu1  ;;  %v16004_v0 = vadd.f32 %v14215_v54, %v1434_v53  ;;  %v962_v54 = vunpack.c.l.s4 %v15258_v56 }
 0x1be   : > { %v1437_v55 = vpop.f32.mrb[6].mxu1  ;;  %1444 = vrot.lane.b32.xlu1 %v16002_v57, %s15254_s25  ;;  %1441 = vrot.lane.b32.xlu0 %v16002_v57, %s15255_s26  ;;  %v14649_v47 = vpop.f32.mrb[7].mxu0  ;;  %v15257_v59 = vmov 1983009808   ;;  %v16016_v53 = vshrl.u32 %v932_v49, 7 }
 0x1bf   : > { %v14669_v48 = vpop.f32.mrb[7].mxu1  ;;  %v930_v55 = vunpack.c.l.s4 %v15257_v59  ;;  %v963_v61 = vunpack.c.0.s8 %v962_v54 }
 0x1c0   : > { %18670 = vst [vmem:[#allocation202_spill] sm:$0xff] %v16016_v53 }
 0x1c1   : > { %v931_v63 = vunpack.c.0.s8 %v930_v55  ;;  %v16024_v39 = vsub.s32 %v963_v61, %v16016_v53 }
 0x1c2   : > { %1527 = vrot.lane.b32.xlu1 %v16004_v0, %s15255_s26  ;;  %1447 = vrot.lane.b32.xlu0 %v16002_v57, %s15256_s29 }
 0x1c3   : > { %v16019_v45 = vsub.s32 %v931_v63, %v16016_v53 }
 0x1c6   : > { %1533 = vrot.lane.b32.xlu1 %v16004_v0, %s15256_s29  ;;  %1530 = vrot.lane.b32.xlu0 %v16004_v0, %s15254_s25 }
 0x210   : > { %v916_v47 = vpop.permute.xlu1 %915  ;;  %v910_v48 = vpop.permute.xlu0 %909 }
 0x211   : > { %v927_v46 = vcombine.low %v15965_v51, %v916_v47  ;;  %v928_v43 = vcombine.high %v15965_v51, %v916_v47 }
 0x213   : > { %v935_v55 = vrot.slane %v927_v46, %v16019_v45  ;;  %v942_v49 = vrot.slane %v928_v43, %v16019_v45 }
 0x214   : > { %v922_v44 = vpop.permute.xlu0 %921  ;;  %v918_v41 = vpop.permute.xlu1 %917 }
 0x215   : > { %v943_v42 = vcombine.low %v910_v48, %v922_v44  ;;  %v944_v59 = vcombine.high %v910_v48, %v922_v44 }
 0x217   : > { %v951_v56 = vrot.slane %v943_v42, %v16019_v45  ;;  %v958_v54 = vrot.slane %v944_v59, %v16019_v45 }
 0x218   : > { %v1082_v63 = vpop.permute.xlu0 %1081  ;;  %v924_v40 = vpop.permute.xlu1 %923 }
 0x219   : > { %v959_v37 = vcombine.low %v935_v55, %v951_v56  ;;  %v960_v38 = vcombine.high %v935_v55, %v951_v56  ;;  %v975_v51 = vcombine.low %v942_v49, %v958_v54  ;;  %v976_v47 = vcombine.high %v942_v49, %v958_v54 }
 0x21a   : > { %v995_v49 = vcombine.low %v15971_v58, %v918_v41 }
 0x21b   : > { %v16031_v35 = vrot.slane %v959_v37, %v16024_v39  ;;  %v16034_v44 = vrot.slane %v960_v38, %v16024_v39  ;;  %v16037_v46 = vrot.slane %v975_v51, %v16024_v39  ;;  %v16040_v43 = vrot.slane %v976_v47, %v16024_v39 }
 0x21c   : > { %v1088_v42 = vpop.permute.xlu0 %1087  ;;  %v1084_v48 = vpop.permute.xlu1 %1083 }
 0x21d   : > { %18671 = vst [vmem:[#allocation203_spill] sm:$0xff] %v16031_v35  ;;  %18672 = vst [vmem:[#allocation204_spill] sm:$0xff] %v16034_v44  ;;  %v16044_v61 = vcombine.high %v16031_v35, %v18669_v60  ;;  %v16048_v59 = vcombine.high %v16034_v44, %v18669_v60  ;;  %v16052_v37 = vcombine.high %v16037_v46, %v18669_v60 }
 0x21e   : > { %18673 = vst [vmem:[#allocation205_spill] sm:$0xff] %v16037_v46  ;;  %18674 = vst [vmem:[#allocation206_spill] sm:$0xff] %v16040_v43  ;;  %v16056_v38 = vcombine.high %v16040_v43, %v18669_v60  ;;  %v996_v44 = vcombine.high %v15971_v58, %v918_v41  ;;  %v1099_v56 = vcombine.low %v15979_v50, %v1088_v42 }
 0x21f   : > { %18675 = vst [vmem:[#allocation207_spill] sm:$0xff] %v16044_v61  ;;  %18676 = vst [vmem:[#allocation208_spill] sm:$0xff] %v16048_v59  ;;  %v1100_v54 = vcombine.high %v15979_v50, %v1088_v42  ;;  %v1003_v58 = vrot.slane %v995_v49, %v16019_v45 }
 0x220   : > { %18677 = vst [vmem:[#allocation209_spill] sm:$0xff] %v16052_v37  ;;  %18678 = vst [vmem:[#allocation210_spill] sm:$0xff] %v16056_v38  ;;  %v1094_v43 = vpop.permute.xlu0 %1093  ;;  %v1090_v46 = vpop.permute.xlu1 %1089  ;;  %v1107_v53 = vrot.slane %v1099_v56, %v16019_v45  ;;  %v1010_v50 = vrot.slane %v996_v44, %v16019_v45 }
 0x221   : > { %v1115_v51 = vcombine.low %v1082_v63, %v1094_v43  ;;  %v1116_v61 = vcombine.high %v1082_v63, %v1094_v43  ;;  %v1167_v47 = vcombine.low %v15984_v52, %v1090_v46  ;;  %v1168_v59 = vcombine.high %v15984_v52, %v1090_v46 }
 0x222   : > { %v1114_v55 = vrot.slane %v1100_v54, %v16019_v45 }
 0x223   : > { %v1123_v38 = vrot.slane %v1115_v51, %v16019_v45  ;;  %v1130_v41 = vrot.slane %v1116_v61, %v16019_v45  ;;  %v1175_v42 = vrot.slane %v1167_v47, %v16019_v45  ;;  %v1182_v63 = vrot.slane %v1168_v59, %v16019_v45 }
 0x224   : > { %v1096_v43 = vpop.permute.xlu1 %1095  ;;  %v912_v37 = vpop.permute.xlu0 %911 }
 0x225   : > { %v1131_v35 = vcombine.low %v1107_v53, %v1123_v38  ;;  %v1132_v52 = vcombine.high %v1107_v53, %v1123_v38  ;;  %v1147_v46 = vcombine.low %v1114_v55, %v1130_v41  ;;  %v1148_v56 = vcombine.high %v1114_v55, %v1130_v41 }
 0x226   : > { %v1183_v36 = vcombine.low %v1084_v48, %v1096_v43  ;;  %v1184_v54 = vcombine.high %v1084_v48, %v1096_v43  ;;  %v1011_v33 = vcombine.low %v912_v37, %v924_v40  ;;  %v1012_v51 = vcombine.high %v912_v37, %v924_v40 }
 0x227   : > { %v16089_v61 = vrot.slane %v1131_v35, %v16024_v39  ;;  %v16092_v49 = vrot.slane %v1132_v52, %v16024_v39  ;;  %v16095_v44 = vrot.slane %v1147_v46, %v16024_v39  ;;  %v16098_v59 = vrot.slane %v1148_v56, %v16024_v39 }
 0x228   : > { %v1191_v53 = vrot.slane %v1183_v36, %v16019_v45  ;;  %v1198_v38 = vrot.slane %v1184_v54, %v16019_v45  ;;  %v1019_v48 = vrot.slane %v1011_v33, %v16019_v45  ;;  %v1026_v40 = vrot.slane %v1012_v51, %v16019_v45 }
 0x229   : > { %18679 = vst [vmem:[#allocation211_spill] sm:$0xff] %v16089_v61  ;;  %18680 = vst [vmem:[#allocation212_spill] sm:$0xff] %v16092_v49  ;;  %v16106_v35 = vcombine.high %v16089_v61, %v18669_v60  ;;  %v16110_v37 = vcombine.high %v16092_v49, %v18669_v60  ;;  %v16114_v55 = vcombine.high %v16095_v44, %v18669_v60 }
 0x22a   : > { %18681 = vst [vmem:[#allocation213_spill] sm:$0xff] %v16095_v44  ;;  %18682 = vst [vmem:[#allocation214_spill] sm:$0xff] %v16098_v59  ;;  %v16118_v36 = vcombine.high %v16098_v59, %v18669_v60  ;;  %v1199_v51 = vcombine.low %v1175_v42, %v1191_v53  ;;  %v1200_v47 = vcombine.high %v1175_v42, %v1191_v53 }
 0x22b   : > { %18683 = vst [vmem:[#allocation215_spill] sm:$0xff] %v16106_v35  ;;  %18684 = vst [vmem:[#allocation216_spill] sm:$0xff] %v16110_v37  ;;  %v1215_v33 = vcombine.low %v1182_v63, %v1198_v38  ;;  %v1216_v49 = vcombine.high %v1182_v63, %v1198_v38  ;;  %v1027_v41 = vcombine.low %v1003_v58, %v1019_v48 }
 0x22c   : > { %18685 = vst [vmem:[#allocation217_spill] sm:$0xff] %v16114_v55  ;;  %18686 = vst [vmem:[#allocation218_spill] sm:$0xff] %v16118_v36  ;;  %v1028_v44 = vcombine.high %v1003_v58, %v1019_v48  ;;  %v1043_v61 = vcombine.low %v1010_v50, %v1026_v40  ;;  %v1044_v43 = vcombine.high %v1010_v50, %v1026_v40 }
 0x22d   : > { %v16137_v59 = vrot.slane %v1199_v51, %v16024_v39  ;;  %v16140_v52 = vrot.slane %v1200_v47, %v16024_v39  ;;  %v16143_v46 = vrot.slane %v1215_v33, %v16024_v39  ;;  %v16146_v56 = vrot.slane %v1216_v49, %v16024_v39 }
 0x22e   : > { %v16149_v42 = vrot.slane %v1027_v41, %v16024_v39  ;;  %v16152_v63 = vrot.slane %v1028_v44, %v16024_v39  ;;  %v16155_v58 = vrot.slane %v1043_v61, %v16024_v39  ;;  %v16158_v50 = vrot.slane %v1044_v43, %v16024_v39 }
 0x22f   : > { %18687 = vst [vmem:[#allocation219_spill] sm:$0xff] %v16137_v59  ;;  %18688 = vst [vmem:[#allocation220_spill] sm:$0xff] %v16140_v52  ;;  %v16162_v53 = vcombine.high %v16137_v59, %v18669_v60  ;;  %v16166_v49 = vcombine.high %v16140_v52, %v18669_v60  ;;  %v16170_v38 = vcombine.high %v16143_v46, %v18669_v60 }
 0x230   : > { %18689 = vst [vmem:[#allocation221_spill] sm:$0xff] %v16143_v46  ;;  %18690 = vst [vmem:[#allocation222_spill] sm:$0xff] %v16146_v56  ;;  %v16174_v44 = vcombine.high %v16146_v56, %v18669_v60  ;;  %v1445_v61 = vpop.permute.xlu1 %1444  ;;  %v1442_v48 = vpop.permute.xlu0 %1441  ;;  %v16194_v33 = vcombine.high %v16149_v42, %v18669_v60  ;;  %v16198_v47 = vcombine.high %v16152_v63, %v18669_v60 }
 0x231   : > { %18691 = vst [vmem:[#allocation223_spill] sm:$0xff] %v16149_v42  ;;  %18692 = vst [vmem:[#allocation224_spill] sm:$0xff] %v16152_v63  ;;  %v16202_v41 = vcombine.high %v16155_v58, %v18669_v60  ;;  %v16206_v51 = vcombine.high %v16158_v50, %v18669_v60  ;;  %v1451_v43 = vcombine.high %v16002_v57, %v1445_v61 }
 0x232   : > { %18693 = vst [vmem:[#allocation225_spill] sm:$0xff] %v16155_v58  ;;  %18694 = vst [vmem:[#allocation226_spill] sm:$0xff] %v16158_v50 }
 0x233   : > { %18695 = vst [vmem:[#allocation227_spill] sm:$0xff] %v16162_v53  ;;  %18696 = vst [vmem:[#allocation228_spill] sm:$0xff] %v16166_v49  ;;  %v1450_v53 = vcombine.low %v16002_v57, %v1445_v61  ;;  %v1465_v59 = vrot.slane %v1451_v43, %v16019_v45 }
 0x234   : > { %18697 = vst [vmem:[#allocation229_spill] sm:$0xff] %v16170_v38  ;;  %18698 = vst [vmem:[#allocation230_spill] sm:$0xff] %v16174_v44  ;;  %v1528_v38 = vpop.permute.xlu1 %1527  ;;  %v1448_v56 = vpop.permute.xlu0 %1447 }
 0x235   : > { %18699 = vst [vmem:[#allocation231_spill] sm:$0xff] %v16194_v33  ;;  %18700 = vst [vmem:[#allocation232_spill] sm:$0xff] %v16198_v47  ;;  %v1466_v52 = vcombine.low %v1442_v48, %v1448_v56  ;;  %v1467_v44 = vcombine.high %v1442_v48, %v1448_v56  ;;  %v1458_v36 = vrot.slane %v1450_v53, %v16019_v45 }
 0x236   : > { %18701 = vst [vmem:[#allocation233_spill] sm:$0xff] %v16202_v41  ;;  %18702 = vst [vmem:[#allocation234_spill] sm:$0xff] %v16206_v51 }
 0x237   : > { %v1474_v49 = vrot.slane %v1466_v52, %v16019_v45  ;;  %v1481_v46 = vrot.slane %v1467_v44, %v16019_v45 }
 0x238   : > { %v1534_v55 = vpop.permute.xlu1 %1533  ;;  %v1531_v37 = vpop.permute.xlu0 %1530 }
 0x239   : > { %v1552_v54 = vcombine.low %v1528_v38, %v1534_v55  ;;  %v1553_v35 = vcombine.high %v1528_v38, %v1534_v55  ;;  %v1536_v40 = vcombine.low %v16004_v0, %v1531_v37  ;;  %v1537_v50 = vcombine.high %v16004_v0, %v1531_v37 }
 0x23a   : > { %v1482_v58 = vcombine.low %v1458_v36, %v1474_v49  ;;  %v1483_v57 = vcombine.high %v1458_v36, %v1474_v49  ;;  %v1498_v61 = vcombine.low %v1465_v59, %v1481_v46  ;;  %v1499_v56 = vcombine.high %v1465_v59, %v1481_v46 }
 0x23b   : > { %v1560_v53 = vrot.slane %v1552_v54, %v16019_v45  ;;  %v1567_v48 = vrot.slane %v1553_v35, %v16019_v45  ;;  %v1544_v52 = vrot.slane %v1536_v40, %v16019_v45  ;;  %v1551_v44 = vrot.slane %v1537_v50, %v16019_v45 }
 0x23c   : > { %v16237_v43 = vrot.slane %v1482_v58, %v16024_v39  ;;  %v16240_v55 = vrot.slane %v1483_v57, %v16024_v39  ;;  %v16243_v0 = vrot.slane %v1498_v61, %v16024_v39  ;;  %v16246_v37 = vrot.slane %v1499_v56, %v16024_v39 }
 0x23d   : > { %v1568_v59 = vcombine.low %v1544_v52, %v1560_v53  ;;  %v1569_v36 = vcombine.high %v1544_v52, %v1560_v53  ;;  %v1584_v46 = vcombine.low %v1551_v44, %v1567_v48  ;;  %v1585_v35 = vcombine.high %v1551_v44, %v1567_v48 }
 0x23e   : > { %18703 = vst [vmem:[#allocation235_spill] sm:$0xff] %v16240_v55  ;;  %18704 = vst [vmem:[#allocation236_spill] sm:$0xff] %v16243_v0  ;;  %v16250_v54 = vcombine.high %v16237_v43, %v18669_v60  ;;  %v16254_v58 = vcombine.high %v16240_v55, %v18669_v60  ;;  %v16258_v50 = vcombine.high %v16243_v0, %v18669_v60 }
 0x23f   : > { %18705 = vst [vmem:[#allocation237_spill] sm:$0xff] %v16246_v37  ;;  %v16262_v49 = vcombine.high %v16246_v37, %v18669_v60  ;;  %v16281_v44 = vrot.slane %v1568_v59, %v16024_v39  ;;  %v16284_v57 = vrot.slane %v1569_v36, %v16024_v39  ;;  %v16287_v61 = vrot.slane %v1584_v46, %v16024_v39 }
 0x240   : > { %18706 = vst [vmem:[#allocation238_spill] sm:$0xff] %v16250_v54  ;;  %18707 = vst [vmem:[#allocation239_spill] sm:$0xff] %v16254_v58  ;;  %v16290_v56 = vrot.slane %v1585_v35, %v16024_v39 }
 0x241   : > { %18708 = vst [vmem:[#allocation240_spill] sm:$0xff] %v16258_v50  ;;  %18709 = vst [vmem:[#allocation241_spill] sm:$0xff] %v16262_v49  ;;  %v16294_v53 = vcombine.high %v16281_v44, %v18669_v60  ;;  %v16298_v48 = vcombine.high %v16284_v57, %v18669_v60  ;;  %v16302_v59 = vcombine.high %v16287_v61, %v18669_v60 }
 0x242   : > { %18710 = vst [vmem:[#allocation242_spill] sm:$0xff] %v16281_v44  ;;  %18711 = vst [vmem:[#allocation243_spill] sm:$0xff] %v16284_v57  ;;  %v16306_v36 = vcombine.high %v16290_v56, %v18669_v60 }
 0x243   : > { %18712 = vst [vmem:[#allocation244_spill] sm:$0xff] %v16287_v61  ;;  %18713 = vst [vmem:[#allocation245_spill] sm:$0xff] %v16290_v56 }
 0x244   : > { %18714 = vst [vmem:[#allocation246_spill] sm:$0xff] %v16294_v53  ;;  %18715 = vst [vmem:[#allocation247_spill] sm:$0xff] %v16298_v48 }
 0x245   : > { %18716 = vst [vmem:[#allocation248_spill] sm:$0xff] %v16302_v59  ;;  %18717 = vst [vmem:[#allocation249_spill] sm:$0xff] %v16306_v36 }
 0x246 LB: >> { %v18718_v63 = vld [vmem:[#allocation224_spill] sm:$0xff]  ;;  %v18719_v51 = vld [vmem:[#allocation234_spill] sm:$0xff]  ;;  %v18721_v42 = vld [vmem:[#allocation223_spill] sm:$0xff]  ;;  %v18399_v52 = vmov 0.0   ;;  %vm15260_vm1 = vmmov 0   ;;  %s15261_s24 = smov 32   ;;  %s15246_s23 = sphi %s16327_s23, %s1617_s23   ;;  %v15242_v62 = vphi %v15925_v62, %v19015_v62  }
 0x247   : >> { %v18720_v47 = vld [vmem:[#allocation232_spill] sm:$0xff]  ;;  %v18722_v41 = vld [vmem:[#allocation233_spill] sm:$0xff]  ;;  %v18723_v33 = vld [vmem:[#allocation231_spill] sm:$0xff]  ;;  %14670 = vmatprep.subr.bf16.mxu0 %v18399_v52  ;;  %14690 = vmatprep.subr.bf16.mxu1 %v18399_v52  ;;  %s15262_s18 = smov 96   ;;  %s15263_s15 = smov 64   ;;  %vm3431_vm2 = vcmask 261120  }
 0x248   : >> { %v18724_v18 = vld [vmem:[#allocation25_spill] sm:$0xff]  ;;  %v18725_v17 = vld [vmem:[#allocation24_spill] sm:$0xff]  ;;  %v18726_v20 = vld [vmem:[#allocation27_spill] sm:$0xff]  ;;  %14686 = vmatprep.mubr.msk.bf16.mxu0 %vm15260_vm1, %v18399_v52  ;;  %14706 = vmatprep.mubr.msk.bf16.mxu1 %vm15260_vm1, %v18399_v52  ;;  %vm3604_vm3 = vcmask 64512   ;;  %vm5474_vm4 = vcmask 523264   ;;  %vm5476_vm5 = vcmask 785408  }
 0x249   : >> { %v14225_v40 = vcombine.low %v18725_v17, %v18724_v18  ;;  %v18727_v19 = vld [vmem:[#allocation26_spill] sm:$0xff]  ;;  %v18728_v22 = vld [vmem:[#allocation29_spill] sm:$0xff]  ;;  %v18729_v21 = vld [vmem:[#allocation28_spill] sm:$0xff]  ;;  %vm7688_vm6 = vcmask 130048   ;;  %s1617_s23 = sadd.s32 1, %s15246_s23  }
 0x24a   : >> { %v14226_v46 = vcombine.low %v18727_v19, %v18726_v20  ;;  %v14227_v35 = vcombine.low %v18729_v21, %v18728_v22  ;;  %v18730_v24 = vld [vmem:[#allocation31_spill] sm:$0xff]  ;;  %v18731_v23 = vld [vmem:[#allocation30_spill] sm:$0xff]  ;;  %v18732_v26 = vld [vmem:[#allocation33_spill] sm:$0xff]  ;;  %p1614_p5 = scmp.ge.s32.totalorder %s1617_s23, 2  }
 0x24b   : >> { %14671 = vmatpush3.bf16.msra.mxu0 %v14225_v40  ;;  %v14228_v40 = vcombine.low %v18731_v23, %v18730_v24  ;;  %v18733_v25 = vld [vmem:[#allocation32_spill] sm:$0xff]  ;;  %v18734_v28 = vld [vmem:[#allocation35_spill] sm:$0xff]  ;;  %v18735_v27 = vld [vmem:[#allocation34_spill] sm:$0xff] }
 0x24c   : >> { %14672 = vmatprep.subr.bf16.mxu0 %v18399_v52  ;;  %v14229_v60 = vcombine.low %v18733_v25, %v18732_v26  ;;  %v18736_v30 = vld [vmem:[#allocation37_spill] sm:$0xff]  ;;  %v18737_v29 = vld [vmem:[#allocation36_spill] sm:$0xff]  ;;  %v18738_v32 = vld [vmem:[#allocation39_spill] sm:$0xff] }
 0x24d   : >> { %v18739_v31 = vld [vmem:[#allocation38_spill] sm:$0xff]  ;;  %v18740_v2 = vld [vmem:[#allocation9_spill] sm:$0xff]  ;;  %v18741_v1 = vld [vmem:[#allocation8_spill] sm:$0xff] }
 0x24e   : >> { %v14243_v37 = vcombine.low %v18741_v1, %v18740_v2  ;;  %v18742_v4 = vld [vmem:[#allocation11_spill] sm:$0xff]  ;;  %v18743_v3 = vld [vmem:[#allocation10_spill] sm:$0xff]  ;;  %v18744_v6 = vld [vmem:[#allocation13_spill] sm:$0xff] }
 0x24f   : >> { %14673 = vmatpush3.bf16.msra.mxu0 %v14226_v46  ;;  %v14230_v46 = vcombine.low %v18735_v27, %v18734_v28  ;;  %v18745_v5 = vld [vmem:[#allocation12_spill] sm:$0xff]  ;;  %v18746_v8 = vld [vmem:[#allocation15_spill] sm:$0xff]  ;;  %v18747_v7 = vld [vmem:[#allocation14_spill] sm:$0xff] }
 0x250   : >> { %14674 = vmatprep.subr.bf16.mxu0 %v18399_v52  ;;  %v18748_v10 = vld [vmem:[#allocation17_spill] sm:$0xff]  ;;  %v18749_v9 = vld [vmem:[#allocation16_spill] sm:$0xff]  ;;  %v18750_v12 = vld [vmem:[#allocation19_spill] sm:$0xff] }
 0x251   : >> { %v18751_v11 = vld [vmem:[#allocation18_spill] sm:$0xff]  ;;  %v18752_v14 = vld [vmem:[#allocation21_spill] sm:$0xff]  ;;  %v18753_v13 = vld [vmem:[#allocation20_spill] sm:$0xff] }
 0x252   : >> { %v18754_v16 = vld [vmem:[#allocation23_spill] sm:$0xff]  ;;  %v18755_v15 = vld [vmem:[#allocation22_spill] sm:$0xff]  ;;  %v18756_v34 = vld [vmem:[#allocation41_spill] sm:$0xff] }
 0x253   : >> { %14675 = vmatpush3.bf16.msra.mxu0 %v14227_v35  ;;  %v14231_v35 = vcombine.low %v18737_v29, %v18736_v30  ;;  %v18758_v38 = vld [vmem:[#allocation43_spill] sm:$0xff]  ;;  %v18759_v1 = vld [vmem:[#allocation42_spill] sm:$0xff] }
 0x254   : >> { %14676 = vmatprep.subr.bf16.mxu0 %v18399_v52  ;;  %v14235_v2 = vcombine.low %v18759_v1, %v18758_v38  ;;  %v18766_v1 = vld [vmem:[#allocation51_spill] sm:$0xff] }
 0x257   : >> { %14677 = vmatpush3.bf16.msra.mxu0 %v14228_v40  ;;  %v14232_v40 = vcombine.low %v18739_v31, %v18738_v32 }
 0x258   : >> { %14678 = vmatprep.subr.bf16.mxu0 %v18399_v52 }
 0x25b   : >> { %14679 = vmatpush3.bf16.msra.mxu0 %v14229_v60  ;;  %v1619_v60 = vpack.c.bf16 %v15242_v62, %v15242_v62 }
 0x25c   : >> { %14680 = vmatprep.subr.bf16.mxu0 %v18399_v52 }
 0x25f   : >> { %14681 = vmatpush3.bf16.msra.mxu0 %v14230_v46  ;;  %v14244_v46 = vcombine.low %v18743_v3, %v18742_v4  ;;  %v18761_v3 = vld [vmem:[#allocation44_spill] sm:$0xff] }
 0x260   : >> { %14682 = vmatprep.subr.bf16.mxu0 %v18399_v52 }
 0x263   : >> { %14683 = vmatpush3.bf16.msra.mxu0 %v14231_v35  ;;  %v14245_v35 = vcombine.low %v18745_v5, %v18744_v6  ;;  %v18763_v5 = vld [vmem:[#allocation46_spill] sm:$0xff] }
 0x264   : >> { %14684 = vmatprep.subr.bf16.mxu0 %v18399_v52 }
 0x267   : >> { %14685 = vmatpush3.bf16.msra.mxu0 %v14232_v40  ;;  %v14246_v40 = vcombine.low %v18747_v7, %v18746_v8 }
 0x268   : >> { %14710 = vmatprep.subr.bf16.mxu0 %v18399_v52 }
 0x26a   : >> { %14687 = vmatmul.mubr.bf16.vlgmr.msra.gmra.mrb[0].mxu0 %v1619_v60 }
 0x26b   : >> { %14711 = vmatpush3.bf16.msra.mxu0 %v14243_v37  ;;  %14726 = vmatprep.mubr.msk.bf16.mxu0 %vm15260_vm1, %v18399_v52  ;;  %v14247_v37 = vcombine.low %v18749_v9, %v18748_v10 }
 0x26c   : >> { %14712 = vmatprep.subr.bf16.mxu0 %v18399_v52 }
 0x26f   : >> { %14713 = vmatpush3.bf16.msra.mxu0 %v14244_v46  ;;  %v14248_v46 = vcombine.low %v18751_v11, %v18750_v12 }
 0x270   : >> { %14714 = vmatprep.subr.bf16.mxu0 %v18399_v52 }
 0x273   : >> { %14715 = vmatpush3.bf16.msra.mxu0 %v14245_v35  ;;  %v14249_v35 = vcombine.low %v18753_v13, %v18752_v14 }
 0x274   : >> { %14716 = vmatprep.subr.bf16.mxu0 %v18399_v52 }
 0x277   : >> { %14717 = vmatpush3.bf16.msra.mxu0 %v14246_v40  ;;  %v14250_v40 = vcombine.low %v18755_v15, %v18754_v16 }
 0x278   : >> { %14718 = vmatprep.subr.bf16.mxu0 %v18399_v52 }
 0x27b   : >> { %14719 = vmatpush3.bf16.msra.mxu0 %v14247_v37  ;;  %v18757_v37 = vld [vmem:[#allocation40_spill] sm:$0xff] }
 0x27c   : >> { %14720 = vmatprep.subr.bf16.mxu0 %v18399_v52 }
 0x27f   : >> { %14721 = vmatpush3.bf16.msra.mxu0 %v14248_v46  ;;  %v14234_v46 = vcombine.low %v18757_v37, %v18756_v34  ;;  %v18764_v37 = vld [vmem:[#allocation49_spill] sm:$0xff] }
 0x280   : >> { %14722 = vmatprep.subr.bf16.mxu0 %v18399_v52 }
 0x281   : >> { %14691 = vmatpush3.bf16.msra.mxu1 %v14234_v46  ;;  %v18765_v46 = vld [vmem:[#allocation48_spill] sm:$0xff] }
 0x282   : >> { %14692 = vmatprep.subr.bf16.mxu1 %v18399_v52  ;;  %v14238_v7 = vcombine.low %v18765_v46, %v18764_v37  ;;  %v18772_v37 = vld [vmem:[#allocation137_spill] sm:$0xff] }
 0x283   : >> { %14723 = vmatpush3.bf16.msra.mxu0 %v14249_v35  ;;  %v18760_v35 = vld [vmem:[#allocation45_spill] sm:$0xff] }
 0x284   : >> { %14724 = vmatprep.subr.bf16.mxu0 %v18399_v52  ;;  %v14236_v4 = vcombine.low %v18761_v3, %v18760_v35  ;;  %v18768_v3 = vld [vmem:[#allocation53_spill] sm:$0xff] }
 0x285   : >> { %14693 = vmatpush3.bf16.msra.mxu1 %v14235_v2  ;;  %v18767_v2 = vld [vmem:[#allocation50_spill] sm:$0xff] }
 0x286   : >> { %14694 = vmatprep.subr.bf16.mxu1 %v18399_v52  ;;  %v14239_v38 = vcombine.low %v18767_v2, %v18766_v1 }
 0x287   : >> { %14725 = vmatpush3.bf16.msra.mxu0 %v14250_v40  ;;  %v18762_v40 = vld [vmem:[#allocation47_spill] sm:$0xff] }
 0x288   : >> { %14786 = vmatprep.subr.bf16.mxu0 %v18399_v52  ;;  %v14237_v6 = vcombine.low %v18763_v5, %v18762_v40  ;;  %v18770_v5 = vld [vmem:[#allocation55_spill] sm:$0xff] }
 0x289   : >> { %14695 = vmatpush3.bf16.msra.mxu1 %v14236_v4  ;;  %v18769_v4 = vld [vmem:[#allocation52_spill] sm:$0xff] }
 0x28a   : >> { %14727 = vmatmul.mubr.bf16.vlgmr.msra.gmra.mrb[4].mxu0 %v1619_v60  ;;  %14696 = vmatprep.subr.bf16.mxu1 %v18399_v52  ;;  %v14240_v35 = vcombine.low %v18769_v4, %v18768_v3 }
 0x28b   : >> { %14802 = vmatprep.mubr.msk.bf16.mxu0 %vm15260_vm1, %v18399_v52 }
 0x28d   : >> { %14697 = vmatpush3.bf16.msra.mxu1 %v14237_v6  ;;  %v18771_v6 = vld [vmem:[#allocation54_spill] sm:$0xff] }
 0x28e   : >> { %14698 = vmatprep.subr.bf16.mxu1 %v18399_v52  ;;  %v14241_v40 = vcombine.low %v18771_v6, %v18770_v5 }
 0x291   : >> { %14699 = vmatpush3.bf16.msra.mxu1 %v14238_v7 }
 0x292   : >> { %14700 = vmatprep.subr.bf16.mxu1 %v18399_v52 }
 0x295   : >> { %14701 = vmatpush3.bf16.msra.mxu1 %v14239_v38 }
 0x296   : >> { %14702 = vmatprep.subr.bf16.mxu1 %v18399_v52 }
 0x299   : >> { %14703 = vmatpush3.bf16.msra.mxu1 %v14240_v35 }
 0x29a   : >> { %14704 = vmatprep.subr.bf16.mxu1 %v18399_v52 }
 0x29d   : >> { %14705 = vmatpush3.bf16.msra.mxu1 %v14241_v40 }
 0x29e   : >> { %14730 = vmatprep.subr.bf16.mxu1 %v18399_v52 }
 0x2a0   : >> { %14707 = vmatmul.mubr.bf16.vlgmr.msra.gmra.mrb[0].mxu1 %v1619_v60  ;;  %v18773_v60 = vld [vmem:[#allocation136_spill] sm:$0xff] }
 0x2a1   : >> { %14734 = vmatprep.mubr.msk.bf16.mxu1 %vm15260_vm1, %v18399_v52 }
 0x33d   : >> { %v1708_v7 = vpop.f32.mrb[0].mxu0 }
 0x33e   : >> { %v1709_v46 = vadd.f32 %v18772_v37, %v1708_v7  ;;  %v14688_v1 = vpop.f32.mrb[1].mxu0 }
 0x33f   : >> { %v1711_v2 = vpop.f32.mrb[2].mxu0 }
 0x340   : >> { %1815 = vrot.lane.b32.xlu1 %v1709_v46, %s15261_s24  ;;  %1809 = vrot.lane.b32.xlu0 %v1709_v46, %s15262_s18  ;;  %v14689_v38 = vpop.f32.mrb[3].mxu0 }
 0x344   : >> { %1812 = vrot.lane.b32.xlu0 %v1709_v46, %s15263_s15 }
 0x35d   : >> { %v2068_v3 = vpop.f32.mrb[4].mxu0 }
 0x35e   : >> { %v2069_v4 = vadd.f32 %v18773_v60, %v2068_v3  ;;  %v14728_v35 = vpop.f32.mrb[5].mxu0 }
 0x35f   : >> { %v2071_v5 = vpop.f32.mrb[6].mxu0 }
 0x360   : >> { %v16426_v6 = vmul.f32 0.17677669, %v2069_v4  ;;  %v14729_v40 = vpop.f32.mrb[7].mxu0 }
 0x362   : >> { %2079 = vrot.lane.b32.xlu1 %v16426_v6, %s15263_s15  ;;  %2076 = vrot.lane.b32.xlu0 %v16426_v6, %s15262_s18 }
 0x366   : >> { %2082 = vrot.lane.b32.xlu1 %v16426_v6, %s15261_s24 }
 0x3b2   : >> { %v1816_v7 = vpop.permute.xlu1 %1815  ;;  %v1810_v37 = vpop.permute.xlu0 %1809 }
 0x3b3   : >> { %v1834_v1 = vcombine.low %v1810_v37, %v1816_v7  ;;  %v1835_v2 = vcombine.high %v1810_v37, %v1816_v7  ;;  %v18774_v37 = vmov 0.0  }
 0x3b5   : >> { %v1842_v4 = vrot.slane %v1834_v1, %v16019_v45  ;;  %v1849_v40 = vrot.slane %v1835_v2, %v16019_v45 }
 0x3b6   : >> { %v1813_v38 = vpop.permute.xlu0 %1812 }
 0x3b7   : >> { %v1818_v3 = vcombine.low %v1709_v46, %v1813_v38  ;;  %v1819_v60 = vcombine.high %v1709_v46, %v1813_v38 }
 0x3b9   : >> { %v1826_v35 = vrot.slane %v1818_v3, %v16019_v45  ;;  %v1833_v5 = vrot.slane %v1819_v60, %v16019_v45 }
 0x3bb   : >> { %v1850_v52 = vcombine.low %v1826_v35, %v1842_v4  ;;  %v1851_v8 = vcombine.high %v1826_v35, %v1842_v4  ;;  %v1866_v9 = vcombine.low %v1833_v5, %v1849_v40  ;;  %v1867_v1 = vcombine.high %v1833_v5, %v1849_v40 }
 0x3bd   : >> { %v1858_v10 = vrot.slane %v1850_v52, %v16024_v39  ;;  %v1865_v11 = vrot.slane %v1851_v8, %v16024_v39  ;;  %v1874_v46 = vrot.slane %v1866_v9, %v16024_v39  ;;  %v1881_v60 = vrot.slane %v1867_v1, %v16024_v39 }
 0x3bf   : >> { %v1886_v12 = vpack.c.bf16 %v1858_v10, %v1858_v10  ;;  %v1888_v7 = vpack.c.bf16 %v1865_v11, %v1865_v11  ;;  %v1883_v13 = vcombine.high %v1865_v11, %v18774_v37  ;;  %v1890_v3 = vpack.c.bf16 %v1874_v46, %v1874_v46 }
 0x3c0   : >> { %v1884_v2 = vcombine.high %v1874_v46, %v18774_v37  ;;  %v1892_v4 = vpack.c.bf16 %v1881_v60, %v1881_v60  ;;  %v1885_v8 = vcombine.high %v1881_v60, %v18774_v37  ;;  %v1882_v35 = vcombine.high %v1858_v10, %v18774_v37 }
 0x3c1   : >> { %2223 = vxpose.xlu1.c.b16.start.end [1/1] (short) (narrow) %v1886_v12, 32  ;;  %2255 = vxpose.xlu0.c.b16.start.end [1/1] (short) (narrow) %v1888_v7, 32  ;;  %v1889_v38 = vpack.c.bf16 %v1883_v13, %v1883_v13  ;;  %v16446_v12 = vpop.f32.mrb[0].mxu1 }
 0x3c2   : >> { %v1891_v52 = vpack.c.bf16 %v1884_v2, %v1884_v2  ;;  %v1893_v9 = vpack.c.bf16 %v1885_v8, %v1885_v8  ;;  %v1887_v11 = vpack.c.bf16 %v1882_v35, %v1882_v35  ;;  %v14708_v13 = vpop.f32.mrb[1].mxu1 }
 0x3c3   : >> { %v1805_v5 = vpop.f32.mrb[2].mxu1 }
 0x3c4   : >> { %v14709_v40 = vpop.f32.mrb[3].mxu1 }
 0x3c6   : >> { %2271 = vxpose.xlu1.c.b16.start.end [1/1] (short) (narrow) %v1889_v38, 32  ;;  %2287 = vxpose.xlu0.c.b16.start.end [1/1] (short) (narrow) %v1890_v3, 32 }
 0x3cb   : >> { %2303 = vxpose.xlu1.c.b16.start.end [1/1] (short) (narrow) %v1891_v52, 32  ;;  %2319 = vxpose.xlu0.c.b16.start.end [1/1] (short) (narrow) %v1892_v4, 32 }
 0x3d0   : >> { %2335 = vxpose.xlu1.c.b16.start.end [1/1] (short) (narrow) %v1893_v9, 32  ;;  %2239 = vxpose.xlu0.c.b16.start.end [1/1] (short) (narrow) %v1887_v11, 32 }
 0x3d4   : >> { %v16448_v7 = vpop.permute.xlu1 %2079  ;;  %v16452_v1 = vpop.permute.xlu0 %2076 }
 0x3d8   : >> { %v16450_v46 = vpop.permute.xlu1 %2082 }
 0x427   : >> { %v2231_v38 = vpop.trf.xlu1  ;;  %v2263_v3 = vpop.trf.xlu0 }
 0x428   : >> { %v2355_v5 = vshrl.u32 %v2231_v38, 16  ;;  %v2363_v24 = vshrl.u32 %v2263_v3, 16 }
 0x42b   : >> { %v16454_v10 = vpop.trf.xlu1  ;;  %v16456_v2 = vpop.trf.xlu0 }
 0x42f   : >> { %v2279_v60 = vpop.trf.xlu1  ;;  %v2295_v52 = vpop.trf.xlu0 }
 0x430   : >> { %v2361_v40 = vpack.i.b16 %v2279_v60, %v2263_v3  ;;  %v2364_v14 = vshrl.u32 %v2279_v60, 16  ;;  %v2371_v25 = vshrl.u32 %v2295_v52, 16 }
 0x432   : >> { %v2365_v32 = vpack.i.b16 %v2364_v14, %v2363_v24 }
 0x433   : >> { %v16458_v4 = vpop.trf.xlu1  ;;  %v16460_v8 = vpop.trf.xlu0 }
 0x437   : >> { %v2311_v35 = vpop.trf.xlu1  ;;  %v2327_v9 = vpop.trf.xlu0 }
 0x438   : >> { %v2369_v15 = vpack.i.b16 %v2311_v35, %v2295_v52  ;;  %v2372_v16 = vshrl.u32 %v2311_v35, 16  ;;  %v2379_v17 = vshrl.u32 %v2327_v9, 16 }
 0x43a   : >> { %v2373_v34 = vpack.i.b16 %v2372_v16, %v2371_v25  ;;  %v18403_v25 = vmov 0  }
 0x43b   : >> { %v16462_v11 = vpop.trf.xlu1  ;;  %v16464_v13 = vpop.trf.xlu0 }
 0x43f   : >> { %v2343_v18 = vpop.trf.xlu1  ;;  %v2247_v19 = vpop.trf.xlu0 }
 0x440   : >> { %v2377_v20 = vpack.i.b16 %v2343_v18, %v2327_v9  ;;  %v2380_v21 = vshrl.u32 %v2343_v18, 16  ;;  %v2353_v22 = vpack.i.b16 %v2247_v19, %v2231_v38  ;;  %v2356_v23 = vshrl.u32 %v2247_v19, 16 }
 0x442   : >> { %v2381_v26 = vpack.i.b16 %v2380_v21, %v2379_v17  ;;  %v2357_v27 = vpack.i.b16 %v2356_v23, %v2355_v5  ;;  %v2415_v28 = vcombine.low %v2353_v22, %v2369_v15  ;;  %v2431_v29 = vcombine.low %v2361_v40, %v2377_v20 }
 0x443   : >> { %v2416_v30 = vcombine.high %v2353_v22, %v2369_v15  ;;  %v2432_v31 = vcombine.high %v2361_v40, %v2377_v20  ;;  %v2344_v9 = vpop.trf.xlu1 }
 0x444   : >> { %v2423_v60 = vrot.slane %v2415_v28, %v16019_v45  ;;  %v2439_v35 = vrot.slane %v2431_v29, %v16019_v45  ;;  %v2483_v38 = vcombine.low %v2357_v27, %v2373_v34  ;;  %v2499_v19 = vcombine.low %v2365_v32, %v2381_v26 }
 0x445   : >> { %v2430_v56 = vrot.slane %v2416_v30, %v16019_v45  ;;  %v2446_v18 = vrot.slane %v2432_v31, %v16019_v45  ;;  %v2484_v20 = vcombine.high %v2357_v27, %v2373_v34  ;;  %v2500_v22 = vcombine.high %v2365_v32, %v2381_v26  ;;  %v2248_v34 = vpop.trf.xlu0 }
 0x446   : >> { %v2448_v3 = vcombine.high %v2423_v60, %v2439_v35  ;;  %v2447_v52 = vcombine.low %v2423_v60, %v2439_v35  ;;  %v2491_v21 = vrot.slane %v2483_v38, %v16019_v45  ;;  %v2507_v15 = vrot.slane %v2499_v19, %v16019_v45 }
 0x447   : >> { %v2463_v17 = vcombine.low %v2430_v56, %v2446_v18  ;;  %v2464_v24 = vcombine.high %v2430_v56, %v2446_v18  ;;  %v2498_v30 = vrot.slane %v2484_v20, %v16019_v45  ;;  %v2514_v31 = vrot.slane %v2500_v22, %v16019_v45 }
 0x448   : >> { %v2462_v14 = vrot.slane %v2448_v3, %v16024_v39  ;;  %v2455_v16 = vrot.slane %v2447_v52, %v16024_v39  ;;  %v2516_v29 = vcombine.high %v2491_v21, %v2507_v15  ;;  %v2515_v27 = vcombine.low %v2491_v21, %v2507_v15 }
 0x449   : >> { %v2471_v23 = vrot.slane %v2463_v17, %v16024_v39  ;;  %v2478_v5 = vrot.slane %v2464_v24, %v16024_v39  ;;  %v2531_v32 = vcombine.low %v2498_v30, %v2514_v31  ;;  %v2409_v56 = vpack.i.b16 %v2344_v9, %v16464_v13 }
 0x44a   : >> { %2751 = vxpose.xlu1.c.b16.start.end [1/1] (short) (narrow) %v2462_v14, 16  ;;  %2687 = vxpose.xlu0.c.b16.start.end [1/1] (short) (narrow) %v2455_v16, 16  ;;  %v2479_v28 = vcombine.high %v2455_v16, %v18403_v25  ;;  %v2530_v26 = vrot.slane %v2516_v29, %v16024_v39  ;;  %v2385_v40 = vpack.i.b16 %v2248_v34, %v16454_v10  ;;  %v2412_v3 = vshrl.u32 %v2344_v9, 16 }
 0x44b   : >> { %v2523_v60 = vrot.slane %v2515_v27, %v16024_v39  ;;  %v2539_v35 = vrot.slane %v2531_v32, %v16024_v39  ;;  %v2532_v18 = vcombine.high %v2498_v30, %v2514_v31  ;;  %v2393_v38 = vpack.i.b16 %v16458_v4, %v16456_v2 }
 0x44c   : >> { %v2401_v19 = vpack.i.b16 %v16462_v11, %v16460_v8  ;;  %v2388_v52 = vshrl.u32 %v2248_v34, 16  ;;  %v2480_v17 = vcombine.high %v2462_v14, %v18403_v25  ;;  %v2387_v20 = vshrl.u32 %v16454_v10, 16 }
 0x44d   : >> { %v2546_v21 = vrot.slane %v2532_v18, %v16024_v39  ;;  %v2567_v16 = vcombine.low %v2393_v38, %v2409_v56  ;;  %v2404_v22 = vshrl.u32 %v16462_v11, 16  ;;  %v2411_v24 = vshrl.u32 %v16464_v13, 16 }
 0x44e   : >> { %2815 = vxpose.xlu1.c.b16.start.end [1/1] (short) (narrow) %v2471_v23, 16  ;;  %2719 = vxpose.xlu0.c.b16.start.end [1/1] (short) (narrow) %v2479_v28, 16  ;;  %v2551_v15 = vcombine.low %v2385_v40, %v2401_v19  ;;  %v2396_v28 = vshrl.u32 %v16458_v4, 16  ;;  %v2395_v29 = vshrl.u32 %v16456_v2, 16  ;;  %v2403_v30 = vshrl.u32 %v16460_v8, 16 }
 0x44f   : >> { %v2413_v31 = vpack.i.b16 %v2412_v3, %v2411_v24  ;;  %v2389_v14 = vpack.i.b16 %v2388_v52, %v2387_v20  ;;  %v2481_v9 = vcombine.high %v2471_v23, %v18403_v25  ;;  %v2547_v27 = vcombine.high %v2523_v60, %v18403_v25 }
 0x450   : >> { %v2559_v10 = vrot.slane %v2551_v15, %v16019_v45  ;;  %v2575_v11 = vrot.slane %v2567_v16, %v16019_v45  ;;  %v2405_v32 = vpack.i.b16 %v2404_v22, %v2403_v30  ;;  %v2397_v13 = vpack.i.b16 %v2396_v28, %v2395_v29 }
 0x451   : >> { %v2482_v4 = vcombine.high %v2478_v5, %v18403_v25  ;;  %v2548_v2 = vcombine.high %v2530_v26, %v18403_v25  ;;  %v2552_v3 = vcombine.high %v2385_v40, %v2401_v19  ;;  %v2568_v52 = vcombine.high %v2393_v38, %v2409_v56 }
 0x452   : >> { %2879 = vxpose.xlu1.c.b16.start.end [1/1] (short) (narrow) %v2478_v5, 16  ;;  %2767 = vxpose.xlu0.c.b16.start.end [1/1] (short) (narrow) %v2530_v26, 16  ;;  %v2619_v34 = vcombine.low %v2389_v14, %v2405_v32  ;;  %v2583_v8 = vcombine.low %v2559_v10, %v2575_v11  ;;  %v2635_v18 = vcombine.low %v2397_v13, %v2413_v31 }
 0x453   : >> { %v2549_v23 = vcombine.high %v2539_v35, %v18403_v25  ;;  %v2566_v5 = vrot.slane %v2552_v3, %v16019_v45  ;;  %v2582_v26 = vrot.slane %v2568_v52, %v16019_v45  ;;  %v2550_v40 = vcombine.high %v2546_v21, %v18403_v25 }
 0x454   : >> { %v2591_v15 = vrot.slane %v2583_v8, %v16024_v39  ;;  %v2643_v16 = vrot.slane %v2635_v18, %v16019_v45  ;;  %v2620_v56 = vcombine.high %v2389_v14, %v2405_v32  ;;  %v2636_v20 = vcombine.high %v2397_v13, %v2413_v31  ;;  %v18775_v18 = vld [vmem:[#allocation138_spill] sm:$0xff] }
 0x455   : >> { %v2600_v30 = vcombine.high %v2566_v5, %v2582_v26  ;;  %v16526_v3 = vadd.f32 %v18775_v18, %v16446_v12 }
 0x456   : >> { %2703 = vxpose.xlu1.c.b16.start.end [1/1] (short) (narrow) %v2523_v60, 16  ;;  %2831 = vxpose.xlu0.c.b16.start.end [1/1] (short) (narrow) %v2539_v35, 16  ;;  %v2584_v60 = vcombine.high %v2559_v10, %v2575_v11  ;;  %v2599_v35 = vcombine.low %v2566_v5, %v2582_v26  ;;  %v2634_v24 = vrot.slane %v2620_v56, %v16019_v45 }
 0x457   : >> { %v2614_v14 = vrot.slane %v2600_v30, %v16024_v39  ;;  %v2615_v10 = vcombine.high %v2591_v15, %v18403_v25 }
 0x458   : >> { %v2598_v38 = vrot.slane %v2584_v60, %v16024_v39  ;;  %v2607_v29 = vrot.slane %v2599_v35, %v16024_v39 }
 0x459   : >> { %v2618_v8 = vcombine.high %v2614_v14, %v18403_v25 }
 0x45a   : >> { %2783 = vxpose.xlu1.c.b16.start.end [1/1] (short) (narrow) %v2480_v17, 16  ;;  %2895 = vxpose.xlu0.c.b16.start.end [1/1] (short) (narrow) %v2546_v21, 16  ;;  %v2627_v17 = vrot.slane %v2619_v34, %v16019_v45  ;;  %v2616_v13 = vcombine.high %v2598_v38, %v18403_v25 }
 0x45c   : >> { %v2651_v19 = vcombine.low %v2627_v17, %v2643_v16  ;;  %v2652_v22 = vcombine.high %v2627_v17, %v2643_v16 }
 0x45e   : >> { %2847 = vxpose.xlu1.c.b16.start.end [1/1] (short) (narrow) %v2481_v9, 16  ;;  %2735 = vxpose.xlu0.c.b16.start.end [1/1] (short) (narrow) %v2547_v27, 16  ;;  %v2659_v28 = vrot.slane %v2651_v19, %v16024_v39  ;;  %v2650_v9 = vrot.slane %v2636_v20, %v16019_v45  ;;  %v2666_v21 = vrot.slane %v2652_v22, %v16024_v39 }
 0x460   : >> { %v2667_v27 = vcombine.low %v2634_v24, %v2650_v9  ;;  %v2668_v11 = vcombine.high %v2634_v24, %v2650_v9  ;;  %v2684_v34 = vcombine.high %v2666_v21, %v18403_v25 }
 0x462   : >> { %2911 = vxpose.xlu1.c.b16.start.end [1/1] (short) (narrow) %v2482_v4, 16  ;;  %2799 = vxpose.xlu0.c.b16.start.end [1/1] (short) (narrow) %v2548_v2, 16  ;;  %v2675_v31 = vrot.slane %v2667_v27, %v16024_v39  ;;  %v2682_v32 = vrot.slane %v2668_v11, %v16024_v39  ;;  %v2683_v4 = vcombine.high %v2659_v28, %v18403_v25 }
 0x463   : >> { %v2617_v2 = vcombine.high %v2607_v29, %v18403_v25 }
 0x464   : >> { %v2685_v52 = vcombine.high %v2675_v31, %v18403_v25 }
 0x466   : >> { %2863 = vxpose.xlu0.c.b16.start.end [1/1] (short) (narrow) %v2549_v23, 16  ;;  %2943 = vxpose.xlu1.c.b16.start.end [1/1] (short) (narrow) %v2591_v15, 16  ;;  %v2686_v23 = vcombine.high %v2682_v32, %v18403_v25 }
 0x46a   : >> { %2927 = vxpose.xlu0.c.b16.start.end [1/1] (short) (narrow) %v2550_v40, 16  ;;  %3007 = vxpose.xlu1.c.b16.start.end [1/1] (short) (narrow) %v2598_v38, 16 }
 0x46e   : >> { %2959 = vxpose.xlu0.c.b16.start.end [1/1] (short) (narrow) %v2659_v28, 16  ;;  %3071 = vxpose.xlu1.c.b16.start.end [1/1] (short) (narrow) %v2607_v29, 16 }
 0x472   : >> { %3023 = vxpose.xlu0.c.b16.start.end [1/1] (short) (narrow) %v2666_v21, 16  ;;  %3135 = vxpose.xlu1.c.b16.start.end [1/1] (short) (narrow) %v2614_v14, 16 }
 0x476   : >> { %3087 = vxpose.xlu0.c.b16.start.end [1/1] (short) (narrow) %v2675_v31, 16  ;;  %2975 = vxpose.xlu1.c.b16.start.end [1/1] (short) (narrow) %v2615_v10, 16 }
 0x47a   : >> { %3151 = vxpose.xlu0.c.b16.start.end [1/1] (short) (narrow) %v2682_v32, 16  ;;  %3039 = vxpose.xlu1.c.b16.start.end [1/1] (short) (narrow) %v2616_v13, 16 }
 0x47e   : >> { %2991 = vxpose.xlu0.c.b16.start.end [1/1] (short) (narrow) %v2683_v4, 16  ;;  %3103 = vxpose.xlu1.c.b16.start.end [1/1] (short) (narrow) %v2617_v2, 16 }
 0x482   : >> { %3055 = vxpose.xlu0.c.b16.start.end [1/1] (short) (narrow) %v2684_v34, 16  ;;  %3167 = vxpose.xlu1.c.b16.start.end [1/1] (short) (narrow) %v2618_v8, 16 }
 0x486   : >> { %3119 = vxpose.xlu0.c.b16.start.end [1/1] (short) (narrow) %v2685_v52, 16  ;;  %1895 = vrot.lane.b32.xlu1 %v16526_v3, %s15262_s18 }
 0x48a   : >> { %3183 = vxpose.xlu0.c.b16.start.end [1/1] (short) (narrow) %v2686_v23, 16  ;;  %1901 = vrot.lane.b32.xlu1 %v16526_v3, %s15261_s24 }
 0x493   : >> { %1898 = vrot.lane.b32.xlu0 %v16526_v3, %s15263_s15 }
 0x4b0   : >> { %v2759_v60 = vpop.trf.xlu1  ;;  %v2695_v17 = vpop.trf.xlu0 }
 0x4b1   : >> { %v3199_v27 = vcombine.low %v2695_v17, %v2759_v60 }
 0x4b3   : >> { %v3206_v18 = vrot.slane %v3199_v27, %v16019_v45 }
 0x4b4   : >> { %v2823_v15 = vpop.trf.xlu1  ;;  %v2727_v12 = vpop.trf.xlu0 }
 0x4b8   : >> { %v2887_v16 = vpop.trf.xlu1  ;;  %v2775_v5 = vpop.trf.xlu0 }
 0x4b9   : >> { %v3215_v29 = vcombine.low %v2823_v15, %v2887_v16 }
 0x4bb   : >> { %v3222_v32 = vrot.slane %v3215_v29, %v16019_v45  ;;  %v2085_v29 = vcombine.low %v16426_v6, %v16448_v7 }
 0x4bc   : >> { %v2711_v26 = vpop.trf.xlu1  ;;  %v2839_v40 = vpop.trf.xlu0 }
 0x4bd   : >> { %v3249_v14 = vcombine.low %v2711_v26, %v2775_v5 }
 0x4bf   : >> { %v3256_v34 = vrot.slane %v3249_v14, %v16019_v45 }
 0x4c0   : >> { %v2791_v56 = vpop.trf.xlu1  ;;  %v2903_v38 = vpop.trf.xlu0 }
 0x4c1   : >> { %v3207_v30 = vcombine.low %v2727_v12, %v2791_v56  ;;  %v3265_v10 = vcombine.low %v2839_v40, %v2903_v38 }
 0x4c3   : >> { %v3214_v13 = vrot.slane %v3207_v30, %v16019_v45  ;;  %v3272_v23 = vrot.slane %v3265_v10, %v16019_v45  ;;  %v2086_v30 = vcombine.high %v16426_v6, %v16448_v7 }
 0x4c4   : >> { %v2855_v19 = vpop.trf.xlu1  ;;  %v2743_v35 = vpop.trf.xlu0 }
 0x4c5   : >> { %v3231_v15 = vcombine.low %v3206_v18, %v3214_v13 }
 0x4c7   : >> { %v16558_v38 = vrot.slane %v3231_v15, %v16024_v39 }
 0x4c8   : >> { %v2919_v20 = vpop.trf.xlu1  ;;  %v2807_v22 = vpop.trf.xlu0 }
 0x4c9   : >> { %v3223_v24 = vcombine.low %v2855_v19, %v2919_v20  ;;  %v3257_v28 = vcombine.low %v2743_v35, %v2807_v22  ;;  %v2101_v22 = vcombine.low %v16452_v1, %v16450_v46 }
 0x4cb   : >> { %v3230_v31 = vrot.slane %v3223_v24, %v16019_v45  ;;  %v3264_v11 = vrot.slane %v3257_v28, %v16019_v45  ;;  %v2102_v24 = vcombine.high %v16452_v1, %v16450_v46  ;;  %v2093_v46 = vrot.slane %v2085_v29, %v16019_v45 }
 0x4cc   : >> { %v16536_v9 = vpop.trf.xlu1  ;;  %v2871_v21 = vpop.trf.xlu0  ;;  %v2100_v1 = vrot.slane %v2086_v30, %v16019_v45 }
 0x4cd   : >> { %v3239_v52 = vcombine.low %v3222_v32, %v3230_v31  ;;  %v3281_v60 = vcombine.low %v3256_v34, %v3264_v11  ;;  %v2109_v31 = vrot.slane %v2101_v22, %v16019_v45  ;;  %v2116_v10 = vrot.slane %v2102_v24, %v16019_v45 }
 0x4cf   : >> { %v16549_v26 = vrot.slane %v3239_v52, %v16024_v39  ;;  %v16552_v40 = vrot.slane %v3281_v60, %v16024_v39  ;;  %v2117_v13 = vcombine.low %v2093_v46, %v2109_v31  ;;  %v2118_v6 = vcombine.high %v2093_v46, %v2109_v31 }
 0x4d0   : >> { %v16542_v4 = vpop.trf.xlu1  ;;  %v2935_v2 = vpop.trf.xlu0  ;;  %v2133_v7 = vcombine.low %v2100_v1, %v2116_v10 }
 0x4d1   : >> { %v3273_v8 = vcombine.low %v2871_v21, %v2935_v2  ;;  %v16570_v28 = vcombine.low %v16558_v38, %v16549_v26  ;;  %v2134_v2 = vcombine.high %v2100_v1, %v2116_v10  ;;  %v2125_v18 = vrot.slane %v2117_v13, %v16024_v39 }
 0x4d2   : >> { %v2132_v52 = vrot.slane %v2118_v6, %v16024_v39  ;;  %v3299_v1 = vcombine.low %v16536_v9, %v16542_v4 }
 0x4d3   : >> { %v3280_v17 = vrot.slane %v3273_v8, %v16019_v45  ;;  %v2148_v60 = vrot.slane %v2134_v2, %v16024_v39  ;;  %v2149_v22 = vcombine.high %v2125_v18, %v18774_v37 }
 0x4d4   : >> { %v3079_v12 = vpop.trf.xlu1  ;;  %v2967_v16 = vpop.trf.xlu0  ;;  %v2150_v24 = vcombine.high %v2132_v52, %v18774_v37 }
 0x4d5   : >> { %v3289_v5 = vcombine.low %v3272_v23, %v3280_v17  ;;  %v2141_v23 = vrot.slane %v2133_v7, %v16024_v39  ;;  %v2152_v30 = vcombine.high %v2148_v60, %v18774_v37 }
 0x4d7   : >> { %v16555_v56 = vrot.slane %v3289_v5, %v16024_v39  ;;  %v2151_v29 = vcombine.high %v2141_v23, %v18774_v37  ;;  %v14254_v2 = vpack.c.bf16 %v2152_v30, %v2150_v24  ;;  %v14251_v36 = vpack.c.bf16 %v2141_v23, %v2125_v18 }
 0x4d8   : >> { %v3143_v19 = vpop.trf.xlu1  ;;  %v3031_v35 = vpop.trf.xlu0 }
 0x4d9   : >> { %v16562_v20 = vcombine.low %v16552_v40, %v16555_v56  ;;  %v3349_v13 = vcombine.low %v2967_v16, %v3031_v35  ;;  %v14253_v7 = vpack.c.bf16 %v2151_v29, %v2149_v22  ;;  %v2201_v35 = vrot.slane %v14254_v2, %v16019_v45 }
 0x4db   : >> { %v3401_v27 = vpack.i.b16 %v16562_v20, %v16570_v28  ;;  %v2193_v16 = vrot.slane %v14253_v7, %v16019_v45 }
 0x4dc   : >> { %v2983_v21 = vpop.trf.xlu1  ;;  %v3095_v14 = vpop.trf.xlu0 }
 0x4dd   : >> { %14731 = vmatpush3.bf16.msra.mxu1 %v3401_v27  ;;  %v3315_v27 = vcombine.low %v3079_v12, %v3143_v19  ;;  %v14252_v12 = vpack.c.bf16 %v2148_v60, %v2132_v52  ;;  %v2202_v60 = vcombine.low %v2193_v16, %v2201_v35 }
 0x4de   : >> { %14732 = vmatprep.subr.bf16.mxu1 %v18774_v37 }
 0x4df   : >> { %v2176_v18 = vrot.slane %v14252_v12, %v16019_v45 }
 0x4e0   : >> { %v3047_v11 = vpop.trf.xlu1  ;;  %v3159_v32 = vpop.trf.xlu0 }
 0x4e1   : >> { %v3307_v31 = vcombine.low %v2983_v21, %v3047_v11  ;;  %v3365_v25 = vcombine.low %v3095_v14, %v3159_v32  ;;  %v3306_v21 = vrot.slane %v3299_v1, %v16019_v45  ;;  %v3356_v11 = vrot.slane %v3349_v13, %v16019_v45 }
 0x4e2   : >> { %v2168_v32 = vrot.slane %v14251_v36, %v16019_v45  ;;  %v3404_v36 = vshrl.u32 %v16562_v20, 16  ;;  %v3403_v1 = vshrl.u32 %v16570_v28, 16  ;;  %v3298_v28 = vcombine.high %v16552_v40, %v16555_v56 }
 0x4e4   : >> { %v3111_v34 = vpop.trf.xlu1  ;;  %v2999_v8 = vpop.trf.xlu0  ;;  %v2177_v30 = vcombine.low %v2168_v32, %v2176_v18  ;;  %v3405_v7 = vpack.i.b16 %v3404_v36, %v3403_v1 }
 0x4e8   : >> { %v3175_v17 = vpop.trf.xlu1  ;;  %v3063_v15 = vpop.trf.xlu0 }
 0x4e9   : >> { %v3323_v5 = vcombine.low %v3111_v34, %v3175_v17  ;;  %v3357_v10 = vcombine.low %v2999_v8, %v3063_v15  ;;  %v3322_v34 = vrot.slane %v3315_v27, %v16019_v45  ;;  %v3314_v17 = vrot.slane %v3307_v31, %v16019_v45 }
 0x4ea   : >> { %v3372_v15 = vrot.slane %v3365_v25, %v16019_v45  ;;  %v2209_v31 = vrot.slane %v2202_v60, %v16024_v39 }
 0x4eb   : >> { %v3330_v6 = vrot.slane %v3323_v5, %v16019_v45  ;;  %v3364_v61 = vrot.slane %v3357_v10, %v16019_v45  ;;  %v3331_v8 = vcombine.low %v3306_v21, %v3314_v17 }
 0x4ec   : >> { %v3127_v46 = vpop.trf.xlu0  ;;  %v2215_v17 = vshrl.u32 %v2209_v31, 16 }
 0x4ed   : >> { %v3339_v9 = vcombine.low %v3322_v34, %v3330_v6  ;;  %v3381_v5 = vcombine.low %v3356_v11, %v3364_v61  ;;  %v3338_v22 = vrot.slane %v3331_v8, %v16024_v39  ;;  %v3248_v11 = vcombine.high %v16558_v38, %v16549_v26 }
 0x4ef   : >> { %v3346_v52 = vrot.slane %v3339_v9, %v16024_v39  ;;  %v3388_v24 = vrot.slane %v3381_v5, %v16024_v39  ;;  %v3409_v5 = vpack.i.b16 %v3298_v28, %v3248_v11 }
 0x4f0   : >> { %v3191_v19 = vpop.trf.xlu0 }
 0x4f1   : >> { %v3373_v4 = vcombine.low %v3127_v46, %v3191_v19  ;;  %v3347_v27 = vcombine.low %v3338_v22, %v3346_v52  ;;  %v2184_v46 = vrot.slane %v2177_v30, %v16024_v39  ;;  %v3348_v26 = vcombine.high %v3338_v22, %v3346_v52 }
 0x4f2   : >> { %v3411_v52 = vshrl.u32 %v3248_v11, 16 }
 0x4f3   : >> { %v3380_v14 = vrot.slane %v3373_v4, %v16019_v45  ;;  %v2213_v13 = vpack.i.b16 %v2209_v31, %v2184_v46  ;;  %v3419_v34 = vshrl.u32 %v3347_v27, 16  ;;  %v2214_v21 = vshrl.u32 %v2184_v46, 16 }
 0x4f5   : >> { %v3389_v23 = vcombine.low %v3372_v15, %v3380_v14  ;;  %v2216_v8 = vpack.i.b16 %v2215_v17, %v2214_v21 }
 0x4f7   : >> { %v3396_v29 = vrot.slane %v3389_v23, %v16024_v39  ;;  %v3412_v23 = vshrl.u32 %v3298_v28, 16 }
 0x4f8   : >> { %v1896_v61 = vpop.permute.xlu1 %1895 }
 0x4f9   : >> { %v3397_v25 = vcombine.low %v3388_v24, %v3396_v29  ;;  %v3398_v15 = vcombine.high %v3388_v24, %v3396_v29 }
 0x4fb   : >> { %v3417_v10 = vpack.i.b16 %v3397_v25, %v3347_v27  ;;  %v3420_v6 = vshrl.u32 %v3397_v25, 16  ;;  %v3425_v60 = vpack.i.b16 %v3398_v15, %v3348_v26  ;;  %v3428_v36 = vshrl.u32 %v3398_v15, 16 }
 0x4fc   : >> { %v1902_v2 = vpop.permute.xlu1 %1901 }
 0x4fd   : >> { %14733 = vmatpush3.bf16.msra.mxu1 %v3417_v10  ;;  %v1920_v20 = vcombine.low %v1896_v61, %v1902_v2  ;;  %v3421_v12 = vpack.i.b16 %v3420_v6, %v3419_v34  ;;  %v1921_v19 = vcombine.high %v1896_v61, %v1902_v2 }
 0x4fe   : >> { %14738 = vmatprep.subr.bf16.mxu1 %v18774_v37 }
 0x4ff   : >> { %v1928_v4 = vrot.slane %v1920_v20, %v16019_v45  ;;  %v1935_v40 = vrot.slane %v1921_v19, %v16019_v45 }
 0x500   : >> { %14735 = vmatmul.mubr.msk.bf16.vlgmr.msra.gmra.mrb[4].mxu1 %vm3431_vm2, %v2213_v13  ;;  %v3427_v13 = vshrl.u32 %v3348_v26, 16 }
 0x501   : >> { %14739 = vmatpush3.bf16.msra.mxu1 %v3405_v7  ;;  %14742 = vmatprep.mubr.msk.bf16.mxu1 %vm15260_vm1, %v18774_v37 }
 0x502   : >> { %14740 = vmatprep.subr.bf16.mxu1 %v18774_v37  ;;  %v3429_v2 = vpack.i.b16 %v3428_v36, %v3427_v13 }
 0x505   : >> { %14741 = vmatpush3.bf16.msra.mxu1 %v3421_v12  ;;  %v1899_v9 = vpop.permute.xlu0 %1898 }
 0x506   : >> { %v1904_v16 = vcombine.low %v16526_v3, %v1899_v9  ;;  %v1905_v35 = vcombine.high %v16526_v3, %v1899_v9  ;;  %14746 = vmatprep.subr.bf16.mxu1 %v18774_v37  ;;  %v18776_v3 = vmov 0  }
 0x507   : >> { %v2210_v32 = vcombine.high %v2209_v31, %v18776_v3  ;;  %v2185_v24 = vcombine.high %v2184_v46, %v18776_v3  ;;  %v3413_v31 = vpack.i.b16 %v3412_v23, %v3411_v52 }
 0x508   : >> { %v1912_v56 = vrot.slane %v1904_v16, %v16019_v45  ;;  %v1919_v14 = vrot.slane %v1905_v35, %v16019_v45  ;;  %14743 = vmatmul.mubr.msk.bf16.vlgmr.msra.gmra.mrb[8].mxu1 %vm3431_vm2, %v2216_v8 }
 0x509   : >> { %14747 = vmatpush3.bf16.msra.mxu1 %v3409_v5  ;;  %14750 = vmatprep.mubr.msk.bf16.mxu1 %vm15260_vm1, %v18774_v37  ;;  %v2219_v22 = vpack.i.b16 %v2210_v32, %v2185_v24  ;;  %v2221_v7 = vshrl.u32 %v2210_v32, 16  ;;  %v2220_v20 = vshrl.u32 %v2185_v24, 16 }
 0x50a   : >> { %v1936_v38 = vcombine.low %v1912_v56, %v1928_v4  ;;  %14748 = vmatprep.subr.bf16.mxu1 %v18774_v37  ;;  %v1937_v18 = vcombine.high %v1912_v56, %v1928_v4  ;;  %v1952_v27 = vcombine.low %v1919_v14, %v1935_v40  ;;  %v1953_v6 = vcombine.high %v1919_v14, %v1935_v40 }
 0x50b   : >> { %v2222_v19 = vpack.i.b16 %v2221_v7, %v2220_v20 }
 0x50c   : >> { %v1944_v29 = vrot.slane %v1936_v38, %v16024_v39  ;;  %v1951_v30 = vrot.slane %v1937_v18, %v16024_v39  ;;  %v1960_v1 = vrot.slane %v1952_v27, %v16024_v39  ;;  %v1967_v12 = vrot.slane %v1953_v6, %v16024_v39 }
 0x50d   : >> { %14749 = vmatpush3.bf16.msra.mxu1 %v3425_v60 }
 0x50e   : >> { %14754 = vmatprep.subr.bf16.mxu1 %v18774_v37  ;;  %v1972_v25 = vpack.c.bf16 %v1944_v29, %v1944_v29  ;;  %v1968_v61 = vcombine.high %v1944_v29, %v18774_v37  ;;  %v1969_v10 = vcombine.high %v1951_v30, %v18774_v37  ;;  %v1970_v17 = vcombine.high %v1960_v1, %v18774_v37 }
 0x50f   : >> { %v1974_v28 = vpack.c.bf16 %v1951_v30, %v1951_v30  ;;  %v1971_v11 = vcombine.high %v1967_v12, %v18774_v37  ;;  %v1976_v9 = vpack.c.bf16 %v1960_v1, %v1960_v1  ;;  %v1978_v16 = vpack.c.bf16 %v1967_v12, %v1967_v12 }
 0x510   : >> { %14751 = vmatmul.mubr.msk.bf16.vlgmr.msra.gmra.mrb[12].mxu1 %vm3431_vm2, %v2219_v22  ;;  %3649 = vxpose.xlu1.c.b16.start.end [1/1] (short) (narrow) %v1972_v25, 32  ;;  %v1973_v46 = vpack.c.bf16 %v1968_v61, %v1968_v61  ;;  %v1975_v34 = vpack.c.bf16 %v1969_v10, %v1969_v10  ;;  %v1977_v21 = vpack.c.bf16 %v1970_v17, %v1970_v17 }
 0x511   : >> { %14755 = vmatpush3.bf16.msra.mxu1 %v3413_v31  ;;  %14758 = vmatprep.mubr.msk.bf16.mxu1 %vm15260_vm1, %v18774_v37  ;;  %v1979_v4 = vpack.c.bf16 %v1971_v11, %v1971_v11 }
 0x512   : >> { %3665 = vxpose.xlu0.c.b16.start.end [1/1] (short) (narrow) %v1973_v46, 32  ;;  %14756 = vmatprep.subr.bf16.mxu1 %v18774_v37 }
 0x515   : >> { %14757 = vmatpush3.bf16.msra.mxu1 %v3429_v2  ;;  %3697 = vxpose.xlu1.c.b16.start.end [1/1] (short) (narrow) %v1975_v34, 32 }
 0x517   : >> { %3681 = vxpose.xlu0.c.b16.start.end [1/1] (short) (narrow) %v1974_v28, 32 }
 0x518   : >> { %14759 = vmatmul.mubr.msk.bf16.vlgmr.msra.gmra.mrb[16].mxu1 %vm3431_vm2, %v2222_v19 }
 0x51a   : >> { %3729 = vxpose.xlu1.c.b16.start.end [1/1] (short) (narrow) %v1977_v21, 32 }
 0x51c   : >> { %3713 = vxpose.xlu0.c.b16.start.end [1/1] (short) (narrow) %v1976_v9, 32 }
 0x51f   : >> { %3761 = vxpose.xlu1.c.b16.start.end [1/1] (short) (narrow) %v1979_v4, 32 }
 0x521   : >> { %3745 = vxpose.xlu0.c.b16.start.end [1/1] (short) (narrow) %v1978_v16, 32 }
 0x576   : >> { %v3657_v35 = vpop.trf.xlu1 }
 0x577   : >> { %v3781_v24 = vshrl.u32 %v3657_v35, 16 }
 0x578   : >> { %v3673_v8 = vpop.trf.xlu0 }
 0x579   : >> { %v3782_v29 = vshrl.u32 %v3673_v8, 16  ;;  %v3779_v52 = vpack.i.b16 %v3673_v8, %v3657_v35 }
 0x57a   : >> { %v16649_v15 = vpop.trf.xlu1 }
 0x57b   : >> { %v3783_v10 = vpack.i.b16 %v3782_v29, %v3781_v24 }
 0x57c   : >> { %v16651_v5 = vpop.trf.xlu0 }
 0x57e   : >> { %v3705_v40 = vpop.trf.xlu1 }
 0x57f   : >> { %v3790_v25 = vshrl.u32 %v3705_v40, 16 }
 0x580   : >> { %v3689_v56 = vpop.trf.xlu0 }
 0x581   : >> { %v3789_v61 = vshrl.u32 %v3689_v56, 16  ;;  %v3787_v1 = vpack.i.b16 %v3705_v40, %v3689_v56 }
 0x582   : >> { %v16653_v14 = vpop.trf.xlu1 }
 0x583   : >> { %v3791_v2 = vpack.i.b16 %v3790_v25, %v3789_v61 }
 0x584   : >> { %v16655_v26 = vpop.trf.xlu0 }
 0x586   : >> { %v3737_v38 = vpop.trf.xlu1 }
 0x587   : >> { %v3798_v23 = vshrl.u32 %v3737_v38, 16 }
 0x588   : >> { %v3721_v32 = vpop.trf.xlu0 }
 0x589   : >> { %v3797_v60 = vshrl.u32 %v3721_v32, 16  ;;  %v3795_v27 = vpack.i.b16 %v3737_v38, %v3721_v32 }
 0x58a   : >> { %v16657_v18 = vpop.trf.xlu1 }
 0x58b   : >> { %v3799_v36 = vpack.i.b16 %v3798_v23, %v3797_v60  ;;  %v3841_v7 = vcombine.low %v3779_v52, %v3795_v27  ;;  %v3842_v23 = vcombine.high %v3779_v52, %v3795_v27 }
 0x58c   : >> { %v16659_v30 = vpop.trf.xlu0 }
 0x58d   : >> { %v3909_v17 = vcombine.low %v3783_v10, %v3799_v36  ;;  %v3849_v28 = vrot.slane %v3841_v7, %v16019_v45  ;;  %v3856_v61 = vrot.slane %v3842_v23, %v16019_v45 }
 0x58e   : >> { %v3769_v22 = vpop.trf.xlu1 }
 0x58f   : >> { %v3806_v31 = vshrl.u32 %v3769_v22, 16  ;;  %v3917_v11 = vrot.slane %v3909_v17, %v16019_v45  ;;  %v3829_v17 = vshrl.u32 %v16659_v30, 16 }
 0x590   : >> { %v3753_v46 = vpop.trf.xlu0 }
 0x591   : >> { %v3803_v13 = vpack.i.b16 %v3769_v22, %v3753_v46  ;;  %v3805_v6 = vshrl.u32 %v3753_v46, 16  ;;  %v3910_v22 = vcombine.high %v3783_v10, %v3799_v36 }
 0x592   : >> { %v3770_v46 = vpop.trf.xlu1 }
 0x593   : >> { %v3807_v34 = vpack.i.b16 %v3806_v31, %v3805_v6  ;;  %v3857_v20 = vcombine.low %v3787_v1, %v3803_v13  ;;  %v3858_v56 = vcombine.high %v3787_v1, %v3803_v13  ;;  %v3924_v52 = vrot.slane %v3910_v22, %v16019_v45 }
 0x594   : >> { %v3754_v1 = vpop.trf.xlu0  ;;  %v3838_v6 = vshrl.u32 %v3770_v46, 16 }
 0x595   : >> { %v3865_v12 = vrot.slane %v3857_v20, %v16019_v45  ;;  %v3925_v19 = vcombine.low %v3791_v2, %v3807_v34  ;;  %v3926_v60 = vcombine.high %v3791_v2, %v3807_v34  ;;  %v3872_v29 = vrot.slane %v3858_v56, %v16019_v45 }
 0x596   : >> { %v3837_v7 = vshrl.u32 %v3754_v1, 16  ;;  %v3822_v2 = vshrl.u32 %v16653_v14, 16  ;;  %v3821_v34 = vshrl.u32 %v16655_v26, 16  ;;  %v3830_v20 = vshrl.u32 %v16657_v18, 16 }
 0x597   : >> { %v3873_v21 = vcombine.low %v3849_v28, %v3865_v12  ;;  %v3933_v9 = vrot.slane %v3925_v19, %v16019_v45  ;;  %v3874_v40 = vcombine.high %v3849_v28, %v3865_v12  ;;  %v3940_v31 = vrot.slane %v3926_v60, %v16019_v45 }
 0x598   : >> { %v3889_v27 = vcombine.low %v3856_v61, %v3872_v29  ;;  %v3835_v28 = vpack.i.b16 %v3770_v46, %v3754_v1  ;;  %v3813_v19 = vshrl.u32 %v16649_v15, 16 }
 0x599   : >> { %v3881_v4 = vrot.slane %v3873_v21, %v16024_v39  ;;  %v3941_v16 = vcombine.low %v3917_v11, %v3933_v9  ;;  %v3942_v32 = vcombine.high %v3917_v11, %v3933_v9  ;;  %v3888_v24 = vrot.slane %v3874_v40, %v16024_v39 }
 0x59a   : >> { %v3957_v10 = vcombine.low %v3924_v52, %v3940_v31  ;;  %v3897_v12 = vrot.slane %v3889_v27, %v16024_v39  ;;  %v3814_v21 = vshrl.u32 %v16651_v5, 16  ;;  %v3819_v11 = vpack.i.b16 %v16653_v14, %v16655_v26 }
 0x59b   : >> { %4113 = vxpose.xlu0.c.b16.start.end [1/1] (short) (narrow) %v3881_v4, 16  ;;  %v3949_v35 = vrot.slane %v3941_v16, %v16024_v39  ;;  %v3905_v8 = vcombine.high %v3881_v4, %v18776_v3  ;;  %v3956_v25 = vrot.slane %v3942_v32, %v16024_v39  ;;  %v3906_v13 = vcombine.high %v3888_v24, %v18776_v3 }
 0x59c   : >> { %v3827_v9 = vpack.i.b16 %v16657_v18, %v16659_v30  ;;  %v3839_v4 = vpack.i.b16 %v3838_v6, %v3837_v7  ;;  %v3965_v16 = vrot.slane %v3957_v10, %v16024_v39  ;;  %v3831_v40 = vpack.i.b16 %v3830_v20, %v3829_v17 }
 0x59d   : >> { %4129 = vxpose.xlu1.c.b16.start.end [1/1] (short) (narrow) %v3949_v35, 16  ;;  %v3973_v38 = vcombine.high %v3949_v35, %v18776_v3  ;;  %v3974_v36 = vcombine.high %v3956_v25, %v18776_v3  ;;  %v3811_v35 = vpack.i.b16 %v16651_v5, %v16649_v15  ;;  %v3907_v56 = vcombine.high %v3897_v12, %v18776_v3 }
 0x59e   : >> { %v3993_v32 = vcombine.low %v3819_v11, %v3835_v28  ;;  %v3815_v23 = vpack.i.b16 %v3814_v21, %v3813_v19  ;;  %v3975_v14 = vcombine.high %v3965_v16, %v18776_v3  ;;  %v3958_v26 = vcombine.high %v3924_v52, %v3940_v31 }
 0x59f   : >> { %4145 = vxpose.xlu0.c.b16.start.end [1/1] (short) (narrow) %v3905_v8, 16  ;;  %v3823_v8 = vpack.i.b16 %v3822_v2, %v3821_v34  ;;  %v3977_v18 = vcombine.low %v3811_v35, %v3827_v9  ;;  %v3994_v10 = vcombine.high %v3819_v11, %v3835_v28  ;;  %v3978_v17 = vcombine.high %v3811_v35, %v3827_v9 }
 0x5a0   : >> { %v4045_v15 = vcombine.low %v3815_v23, %v3831_v40  ;;  %v3972_v5 = vrot.slane %v3958_v26, %v16024_v39  ;;  %v4046_v52 = vcombine.high %v3815_v23, %v3831_v40 }
 0x5a1   : >> { %4161 = vxpose.xlu1.c.b16.start.end [1/1] (short) (narrow) %v3973_v38, 16  ;;  %v3890_v38 = vcombine.high %v3856_v61, %v3872_v29  ;;  %v4061_v30 = vcombine.low %v3823_v8, %v3839_v4  ;;  %v3985_v22 = vrot.slane %v3977_v18, %v16019_v45  ;;  %v4008_v21 = vrot.slane %v3994_v10, %v16019_v45 }
 0x5a2   : >> { %v4053_v31 = vrot.slane %v4045_v15, %v16019_v45  ;;  %v3976_v46 = vcombine.high %v3972_v5, %v18776_v3  ;;  %v4060_v20 = vrot.slane %v4046_v52, %v16019_v45 }
 0x5a3   : >> { %4177 = vxpose.xlu0.c.b16.start.end [1/1] (short) (narrow) %v3888_v24, 16  ;;  %v3904_v60 = vrot.slane %v3890_v38, %v16024_v39  ;;  %v4001_v24 = vrot.slane %v3993_v32, %v16019_v45  ;;  %v4069_v29 = vrot.slane %v4061_v30, %v16019_v45 }
 0x5a5   : >> { %4193 = vxpose.xlu1.c.b16.start.end [1/1] (short) (narrow) %v3956_v25, 16  ;;  %v3908_v25 = vcombine.high %v3904_v60, %v18776_v3  ;;  %v4009_v61 = vcombine.low %v3985_v22, %v4001_v24  ;;  %v4077_v1 = vcombine.low %v4053_v31, %v4069_v29  ;;  %v4078_v7 = vcombine.high %v4053_v31, %v4069_v29 }
 0x5a6   : >> { %v4010_v34 = vcombine.high %v3985_v22, %v4001_v24 }
 0x5a7   : >> { %4209 = vxpose.xlu0.c.b16.start.end [1/1] (short) (narrow) %v3906_v13, 16  ;;  %v4062_v13 = vcombine.high %v3823_v8, %v3839_v4  ;;  %v4017_v27 = vrot.slane %v4009_v61, %v16024_v39  ;;  %v4085_v6 = vrot.slane %v4077_v1, %v16024_v39 }
 0x5a8   : >> { %v4024_v4 = vrot.slane %v4010_v34, %v16024_v39 }
 0x5a9   : >> { %4225 = vxpose.xlu1.c.b16.start.end [1/1] (short) (narrow) %v3974_v36, 16  ;;  %v4076_v36 = vrot.slane %v4062_v13, %v16019_v45  ;;  %v4041_v2 = vcombine.high %v4017_v27, %v18776_v3 }
 0x5aa   : >> { %v4042_v8 = vcombine.high %v4024_v4, %v18776_v3 }
 0x5ab   : >> { %4241 = vxpose.xlu0.c.b16.start.end [1/1] (short) (narrow) %v3897_v12, 16  ;;  %v4092_v12 = vrot.slane %v4078_v7, %v16024_v39  ;;  %v4093_v19 = vcombine.low %v4060_v20, %v4076_v36  ;;  %v4094_v11 = vcombine.high %v4060_v20, %v4076_v36 }
 0x5ad   : >> { %4257 = vxpose.xlu1.c.b16.start.end [1/1] (short) (narrow) %v3965_v16, 16  ;;  %v3992_v16 = vrot.slane %v3978_v17, %v16019_v45  ;;  %v4101_v28 = vrot.slane %v4093_v19, %v16024_v39  ;;  %v4108_v9 = vrot.slane %v4094_v11, %v16024_v39  ;;  %v4110_v23 = vcombine.high %v4092_v12, %v18776_v3 }
 0x5af   : >> { %4273 = vxpose.xlu0.c.b16.start.end [1/1] (short) (narrow) %v3907_v56, 16  ;;  %v4025_v40 = vcombine.low %v3992_v16, %v4008_v21  ;;  %v4109_v56 = vcombine.high %v4085_v6, %v18776_v3  ;;  %v4026_v32 = vcombine.high %v3992_v16, %v4008_v21  ;;  %v4111_v26 = vcombine.high %v4101_v28, %v18776_v3 }
 0x5b1   : >> { %4289 = vxpose.xlu1.c.b16.start.end [1/1] (short) (narrow) %v3975_v14, 16  ;;  %v4033_v35 = vrot.slane %v4025_v40, %v16024_v39  ;;  %v4040_v14 = vrot.slane %v4026_v32, %v16024_v39 }
 0x5b3   : >> { %4305 = vxpose.xlu0.c.b16.start.end [1/1] (short) (narrow) %v3904_v60, 16  ;;  %v4043_v38 = vcombine.high %v4033_v35, %v18776_v3  ;;  %v4044_v16 = vcombine.high %v4040_v14, %v18776_v3 }
 0x5b5   : >> { %4321 = vxpose.xlu1.c.b16.start.end [1/1] (short) (narrow) %v3972_v5, 16 }
 0x5b7   : >> { %4337 = vxpose.xlu0.c.b16.start.end [1/1] (short) (narrow) %v3908_v25, 16 }
 0x5b9   : >> { %4353 = vxpose.xlu1.c.b16.start.end [1/1] (short) (narrow) %v3976_v46, 16 }
 0x5bb   : >> { %4369 = vxpose.xlu0.c.b16.start.end [1/1] (short) (narrow) %v4017_v27, 16 }
 0x5bd   : >> { %4385 = vxpose.xlu1.c.b16.start.end [1/1] (short) (narrow) %v4085_v6, 16 }
 0x5bf   : >> { %4401 = vxpose.xlu0.c.b16.start.end [1/1] (short) (narrow) %v4041_v2, 16 }
 0x5c1   : >> { %4449 = vxpose.xlu1.c.b16.start.end [1/1] (short) (narrow) %v4092_v12, 16 }
 0x5c3   : >> { %4433 = vxpose.xlu0.c.b16.start.end [1/1] (short) (narrow) %v4024_v4, 16 }
 0x5c5   : >> { %4513 = vxpose.xlu1.c.b16.start.end [1/1] (short) (narrow) %v4101_v28, 16 }
 0x5c7   : >> { %4465 = vxpose.xlu0.c.b16.start.end [1/1] (short) (narrow) %v4042_v8, 16 }
 0x5c9   : >> { %4577 = vxpose.xlu1.c.b16.start.end [1/1] (short) (narrow) %v4108_v9, 16 }
 0x5cb   : >> { %4497 = vxpose.xlu0.c.b16.start.end [1/1] (short) (narrow) %v4033_v35, 16 }
 0x5cd   : >> { %4417 = vxpose.xlu1.c.b16.start.end [1/1] (short) (narrow) %v4109_v56, 16 }
 0x5cf   : >> { %4529 = vxpose.xlu0.c.b16.start.end [1/1] (short) (narrow) %v4043_v38, 16  ;;  %v4112_v38 = vcombine.high %v4108_v9, %v18776_v3 }
 0x5d1   : >> { %4481 = vxpose.xlu1.c.b16.start.end [1/1] (short) (narrow) %v4110_v23, 16 }
 0x5d3   : >> { %v16719_v18 = vpop.f32.mrb[4].mxu1  ;;  %4561 = vxpose.xlu0.c.b16.start.end [1/1] (short) (narrow) %v4040_v14, 16 }
 0x5d4   : >> { %v14736_v30 = vpop.f32.mrb[5].mxu1  ;;  %v3605_v25 = vsel %vm3604_vm3, %v16719_v18, -inf }
 0x5d5   : >> { %v3472_v60 = vpop.f32.mrb[6].mxu1  ;;  %4545 = vxpose.xlu1.c.b16.start.end [1/1] (short) (narrow) %v4111_v26, 16 }
 0x5d6   : >> { %v14737_v24 = vpop.f32.mrb[7].mxu1 }
 0x5db   : >> { %v16721_v15 = vpop.f32.mrb[8].mxu1 }
 0x5dc   : >> { %v14744_v5 = vpop.f32.mrb[9].mxu1  ;;  %v3608_v61 = vsel %vm3604_vm3, %v16721_v15, -inf }
 0x5dd   : >> { %v3515_v22 = vpop.f32.mrb[10].mxu1 }
 0x5de   : >> { %v14745_v29 = vpop.f32.mrb[11].mxu1 }
 0x5e0   : >> { %3606 = vmax.xlane.f32.xlu0 %v3605_v25 }
 0x5e2   : >> { %3609 = vmax.xlane.f32.xlu1 %v3608_v61 }
 0x5e3   : >> { %v16727_v31 = vpop.f32.mrb[12].mxu1 }
 0x5e4   : >> { %v14752_v46 = vpop.f32.mrb[13].mxu1  ;;  %v3611_v1 = vsel %vm3604_vm3, %v16727_v31, -inf }
 0x5e5   : >> { %v3558_v13 = vpop.f32.mrb[14].mxu1  ;;  %3612 = vmax.xlane.f32.xlu0 %v3611_v1 }
 0x5e6   : >> { %v14753_v27 = vpop.f32.mrb[15].mxu1 }
 0x5eb   : >> { %v16731_v52 = vpop.f32.mrb[16].mxu1 }
 0x5ec   : >> { %v14760_v6 = vpop.f32.mrb[17].mxu1  ;;  %v3614_v7 = vsel %vm3604_vm3, %v16731_v52, -inf }
 0x5ed   : >> { %v3601_v36 = vpop.f32.mrb[18].mxu1  ;;  %3615 = vmax.xlane.f32.xlu1 %v3614_v7 }
 0x5ee   : >> { %v14761_v10 = vpop.f32.mrb[19].mxu1 }
 0x601   : >> { %v4121_v2 = vpop.trf.xlu0 }
 0x603   : >> { %v4137_v34 = vpop.trf.xlu1 }
 0x605   : >> { %v4153_v20 = vpop.trf.xlu0 }
 0x607   : >> { %v4169_v17 = vpop.trf.xlu1 }
 0x609   : >> { %v4185_v12 = vpop.trf.xlu0 }
 0x60a   : >> { %v4625_v40 = vcombine.low %v4121_v2, %v4185_v12 }
 0x60b   : >> { %v4201_v19 = vpop.trf.xlu1 }
 0x60c   : >> { %v4675_v32 = vcombine.low %v4137_v34, %v4201_v19  ;;  %v4632_v30 = vrot.slane %v4625_v40, %v16019_v45 }
 0x60d   : >> { %v4217_v21 = vpop.trf.xlu0 }
 0x60e   : >> { %v4633_v35 = vcombine.low %v4153_v20, %v4217_v21  ;;  %v4682_v14 = vrot.slane %v4675_v32, %v16019_v45 }
 0x60f   : >> { %v4233_v4 = vpop.trf.xlu1 }
 0x610   : >> { %v4683_v23 = vcombine.low %v4169_v17, %v4233_v4  ;;  %v4640_v60 = vrot.slane %v4633_v35, %v16019_v45 }
 0x611   : >> { %v4249_v28 = vpop.trf.xlu0 }
 0x612   : >> { %4593 = vxpose.xlu0.c.b16.start.end [1/1] (short) (narrow) %v4044_v16, 16  ;;  %v4690_v22 = vrot.slane %v4683_v23, %v16019_v45  ;;  %v4657_v61 = vcombine.low %v4632_v30, %v4640_v60 }
 0x613   : >> { %v4265_v11 = vpop.trf.xlu1 }
 0x614   : >> { %v4707_v13 = vcombine.low %v4682_v14, %v4690_v22  ;;  %v4664_v36 = vrot.slane %v4657_v61, %v16024_v39 }
 0x615   : >> { %v4281_v8 = vpop.trf.xlu0 }
 0x616   : >> { %v4714_v34 = vrot.slane %v4707_v13, %v16024_v39 }
 0x617   : >> { %v4297_v56 = vpop.trf.xlu1 }
 0x619   : >> { %v4313_v26 = vpop.trf.xlu0 }
 0x61a   : >> { %4609 = vxpose.xlu1.c.b16.start.end [1/1] (short) (narrow) %v4112_v38, 16  ;;  %v4641_v24 = vcombine.low %v4249_v28, %v4313_v26 }
 0x61b   : >> { %v4329_v5 = vpop.trf.xlu1  ;;  %15102 = vset.pattern.permute.xlu0 %v18776_v3 }
 0x61c   : >> { %v4691_v29 = vcombine.low %v4265_v11, %v4329_v5  ;;  %v4648_v9 = vrot.slane %v4641_v24, %v16019_v45 }
 0x61d   : >> { %v4345_v25 = vpop.trf.xlu0 }
 0x61e   : >> { %v4649_v46 = vcombine.low %v4281_v8, %v4345_v25  ;;  %15103 = vset.pattern.permute.xlu1 %v18776_v3  ;;  %v4698_v27 = vrot.slane %v4691_v29, %v16019_v45 }
 0x61f   : >> { %v4361_v1 = vpop.trf.xlu1 }
 0x620   : >> { %v4699_v6 = vcombine.low %v4297_v56, %v4361_v1  ;;  %v4656_v7 = vrot.slane %v4649_v46, %v16019_v45 }
 0x621   : >> { %v4377_v23 = vpop.trf.xlu0 }
 0x622   : >> { %v4706_v10 = vrot.slane %v4699_v6, %v16019_v45  ;;  %v4665_v2 = vcombine.low %v4648_v9, %v4656_v7 }
 0x623   : >> { %v4393_v26 = vpop.trf.xlu1 }
 0x624   : >> { %v4715_v20 = vcombine.low %v4698_v27, %v4706_v10  ;;  %v4672_v17 = vrot.slane %v4665_v2, %v16024_v39 }
 0x625   : >> { %v4409_v30 = vpop.trf.xlu0 }
 0x626   : >> { %v4722_v12 = vrot.slane %v4715_v20, %v16024_v39  ;;  %v4673_v19 = vcombine.low %v4664_v36, %v4672_v17  ;;  %v16751_v21 = vcombine.high %v4664_v36, %v4672_v17 }
 0x627   : >> { %v4457_v60 = vpop.trf.xlu1 }
 0x628   : >> { %v4723_v4 = vcombine.low %v4714_v34, %v4722_v12  ;;  %v16753_v16 = vcombine.high %v4714_v34, %v4722_v12  ;;  %v4828_v28 = vshrl.u32 %v4673_v19, 16  ;;  %v4834_v11 = vshrl.u32 %v16751_v21, 16 }
 0x629   : >> { %v4441_v24 = vpop.trf.xlu0  ;;  %v4775_v17 = vcombine.low %v4393_v26, %v4457_v60 }
 0x62a   : >> { %v4829_v8 = vshrl.u32 %v4723_v4, 16  ;;  %v4835_v40 = vshrl.u32 %v16753_v16, 16  ;;  %v4827_v35 = vpack.i.b16 %v4723_v4, %v4673_v19  ;;  %v4833_v56 = vpack.i.b16 %v16753_v16, %v16751_v21 }
 0x62b   : >> { %v4521_v5 = vpop.trf.xlu1  ;;  %v4725_v4 = vcombine.low %v4377_v23, %v4441_v24 }
 0x62c   : >> { %14764 = vmatprep.mubr.msk.bf16.mxu1 %vm3604_vm3, %v4827_v35  ;;  %v16760_v38 = vpack.i.b16 %v4829_v8, %v4828_v28  ;;  %v16762_v32 = vpack.i.b16 %v4835_v40, %v4834_v11 }
 0x62d   : >> { %v4473_v14 = vpop.trf.xlu0  ;;  %v4732_v60 = vrot.slane %v4725_v4, %v16019_v45 }
 0x62e   : >> { %v4733_v11 = vcombine.low %v4409_v30, %v4473_v14 }
 0x62f   : >> { %v4585_v22 = vpop.trf.xlu1 }
 0x630   : >> { %v4791_v26 = vcombine.low %v4521_v5, %v4585_v22  ;;  %v4740_v30 = vrot.slane %v4733_v11, %v16019_v45 }
 0x631   : >> { %v4505_v29 = vpop.trf.xlu0 }
 0x633   : >> { %v4425_v25 = vpop.trf.xlu1 }
 0x635   : >> { %v4537_v61 = vpop.trf.xlu0 }
 0x637   : >> { %v4489_v9 = vpop.trf.xlu1 }
 0x638   : >> { %v4783_v28 = vcombine.low %v4425_v25, %v4489_v9 }
 0x639   : >> { %v4569_v46 = vpop.trf.xlu0 }
 0x63a   : >> { %v4790_v23 = vrot.slane %v4783_v28, %v16019_v45 }
 0x63b   : >> { %v4553_v1 = vpop.trf.xlu1 }
 0x66d   : >> { %v3607_v13 = vpop.xlane.xlu0 %3606 }
 0x66e   : >> { %v3617_v27 = vsub.f32 %v16719_v18, %v3607_v13  ;;  %v4741_v18 = vcombine.low %v4505_v29, %v4569_v46  ;;  %v4798_v46 = vrot.slane %v4791_v26, %v16019_v45 }
 0x66f   : >> { %v3610_v6 = vpop.xlane.xlu1 %3609 }
 0x670   : >> { %v3621_v7 = vmul.f32 1.442695, %v3617_v27  ;;  %v3618_v36 = vsub.f32 %v16721_v15, %v3610_v6  ;;  %v4782_v15 = vrot.slane %v4775_v17, %v16019_v45 }
 0x672   : >> { %15104 = vpow2.f32 %v3621_v7  ;;  %v3623_v10 = vmul.f32 1.442695, %v3618_v36  ;;  %v3613_v2 = vpop.xlane.xlu0 %3612  ;;  %v4807_v36 = vcombine.low %v4782_v15, %v4790_v23 }
 0x673   : >> { %v3619_v34 = vsub.f32 %v16727_v31, %v3613_v2 }
 0x674   : >> { %15106 = vpow2.f32 %v3623_v10  ;;  %v4757_v10 = vcombine.low %v4732_v60, %v4740_v30  ;;  %v4814_v17 = vrot.slane %v4807_v36, %v16024_v39 }
 0x675   : >> { %v3625_v20 = vmul.f32 1.442695, %v3619_v34 }
 0x677   : >> { %15108 = vpow2.f32 %v3625_v20 }
 0x678   : >> { %v4601_v12 = vpop.trf.xlu0 }
 0x679   : >> { %v4749_v19 = vcombine.low %v4537_v61, %v4601_v12  ;;  %v4764_v12 = vrot.slane %v4757_v10, %v16024_v39 }
 0x67a   : >> { %v3616_v8 = vpop.xlane.xlu1 %3615 }
 0x67b   : >> { %v3620_v40 = vsub.f32 %v16731_v52, %v3616_v8  ;;  %v4756_v13 = vrot.slane %v4749_v19, %v16019_v45  ;;  %v4748_v52 = vrot.slane %v4741_v18, %v16019_v45 }
 0x67c   : >> { %v15105_v35 = vpop.eup %15104 }
 0x67d   : >> { %v3627_v27 = vmul.f32 1.442695, %v3620_v40  ;;  %v3629_v31 = vsel %vm3604_vm3, %v15105_v35, 0.0  ;;  %v3645_v6 = vpack.c.bf16 %v15105_v35, %v15105_v35  ;;  %v4765_v25 = vcombine.low %v4748_v52, %v4756_v13 }
 0x67e   : >> { %v15107_v7 = vpop.eup %15106  ;;  %3630 = vadd.xlane.f32.xlu0 %v3629_v31 }
 0x67f   : >> { %15110 = vpow2.f32 %v3627_v27  ;;  %14998 = vmatprep.subr.msk.bf16.mxu1 %vm3604_vm3, %v3645_v6  ;;  %v3632_v24 = vsel %vm3604_vm3, %v15107_v7, 0.0  ;;  %v4856_v14 = vsel %vm3604_vm3, %v3645_v6, 0  ;;  %v3646_v5 = vpack.c.bf16 %v15107_v7, %v15107_v7 }
 0x680   : >> { %3633 = vadd.xlane.f32.xlu1 %v3632_v24  ;;  %v4617_v29 = vpop.trf.xlu1  ;;  %14763 = vmatpush3.bf16.xpose.msra.mxu1 %v4856_v14  ;;  %v4772_v34 = vrot.slane %v4765_v25, %v16024_v39 }
 0x681   : >> { %v15109_v22 = vpop.eup %15108  ;;  %v4799_v61 = vcombine.low %v4553_v1, %v4617_v29  ;;  %14999 = vmatprep.subr.msk.bf16.mxu1 %vm3604_vm3, %v3646_v5  ;;  %v4914_v18 = vsel %vm3604_vm3, %v3646_v5, 0 }
 0x682   : >> { %v3635_v9 = vsel %vm3604_vm3, %v15109_v22, 0.0  ;;  %v4773_v4 = vcombine.low %v4764_v12, %v4772_v34  ;;  %v3647_v40 = vpack.c.bf16 %v15109_v22, %v15109_v22 }
 0x683   : >> { %v4806_v2 = vrot.slane %v4799_v61, %v16019_v45  ;;  %3636 = vadd.xlane.f32.xlu0 %v3635_v9 }
 0x684   : >> { %v4840_v15 = vshrl.u32 %v4773_v4, 16  ;;  %v4972_v27 = vsel %vm3604_vm3, %v3647_v40, 0 }
 0x685   : >> { %v4815_v20 = vcombine.low %v4798_v46, %v4806_v2 }
 0x687   : >> { %v4822_v1 = vrot.slane %v4815_v20, %v16024_v39 }
 0x689   : >> { %v15111_v19 = vpop.eup %15110  ;;  %v4823_v28 = vcombine.low %v4814_v17, %v4822_v1  ;;  %v4824_v6 = vcombine.high %v4814_v17, %v4822_v1 }
 0x68a   : >> { %v3638_v11 = vsel %vm3604_vm3, %v15111_v19, 0.0  ;;  %v3648_v31 = vpack.c.bf16 %v15111_v19, %v15111_v19 }
 0x68b   : >> { %v4839_v8 = vpack.i.b16 %v4823_v28, %v4773_v4  ;;  %3639 = vadd.xlane.f32.xlu1 %v3638_v11  ;;  %v4841_v35 = vshrl.u32 %v4823_v28, 16  ;;  %v4847_v60 = vshrl.u32 %v4824_v6, 16 }
 0x68c   : >> { %v5030_v26 = vsel %vm3604_vm3, %v3648_v31, 0 }
 0x68d   : >> { %14765 = vmatmul.mubr.msk.bf16.vlgmr.msra.gmra.mrb[20].mxu1 %vm3604_vm3, %v4839_v8  ;;  %v4842_v13 = vpack.i.b16 %v4841_v35, %v4840_v15 }
 0x68e   : >> { %14769 = vmatpush3.bf16.xpose.msra.mxu1 %v4914_v18  ;;  %14770 = vmatprep.mubr.msk.bf16.mxu1 %vm3604_vm3, %v16760_v38  ;;  %v4774_v38 = vcombine.high %v4764_v12, %v4772_v34 }
 0x68f   : >> { %15000 = vmatprep.subr.msk.bf16.mxu1 %vm3604_vm3, %v3647_v40 }
 0x690   : >> { %v4845_v7 = vpack.i.b16 %v4824_v6, %v4774_v38  ;;  %v4846_v23 = vshrl.u32 %v4774_v38, 16 }
 0x692   : >> { %v4848_v21 = vpack.i.b16 %v4847_v60, %v4846_v23 }
 0x695   : >> { %14771 = vmatmul.mubr.msk.bf16.vlgmr.msra.gmra.mrb[24].mxu1 %vm3604_vm3, %v4842_v13 }
 0x696   : >> { %14775 = vmatpush3.bf16.xpose.msra.mxu1 %v4972_v27  ;;  %14776 = vmatprep.mubr.msk.bf16.mxu1 %vm3604_vm3, %v4833_v56 }
 0x697   : >> { %15001 = vmatprep.subr.msk.bf16.mxu1 %vm3604_vm3, %v3648_v31 }
 0x69d   : >> { %14777 = vmatmul.mubr.msk.bf16.vlgmr.msra.gmra.mrb[28].mxu1 %vm3604_vm3, %v4845_v7 }
 0x69e   : >> { %14781 = vmatpush3.bf16.xpose.msra.mxu1 %v5030_v26  ;;  %14782 = vmatprep.mubr.msk.bf16.mxu1 %vm3604_vm3, %v16762_v32 }
 0x69f   : >> { %14806 = vmatprep.subr.bf16.mxu1 %v18774_v37 }
 0x6a5   : >> { %14783 = vmatmul.mubr.msk.bf16.vlgmr.msra.gmra.mrb[32].mxu1 %vm3604_vm3, %v4848_v21 }
 0x6a6   : >> { %14822 = vmatprep.mubr.msk.bf16.mxu1 %vm15260_vm1, %v18774_v37 }
 0x70b   : >> { %v3631_v16 = vpop.xlane.xlu0 %3630 }
 0x70d   : >> { %v3634_v30 = vpop.xlane.xlu1 %3633 }
 0x710   : >> { %v3637_v56 = vpop.xlane.xlu0 %3636 }
 0x711   : >> { %15112 = vrcp.f32 %v3637_v56 }
 0x712   : >> { %15114 = vrcp.f32 %v3631_v16 }
 0x713   : >> { %15116 = vrcp.f32 %v3634_v30 }
 0x718   : >> { %v3640_v52 = vpop.xlane.xlu1 %3639 }
 0x719   : >> { %15118 = vrcp.f32 %v3640_v52  ;;  %v18777_v52 = vld [vmem:[#allocation57_spill] sm:$0xff] }
 0x71b   : >> { %v15113_v24 = vpop.eup %15112 }
 0x71c   : >> { %v15115_v32 = vpop.eup %15114 }
 0x71d   : >> { %v15117_v14 = vpop.eup %15116  ;;  %v5277_v29 = vcombine.low %v15115_v32, %v15113_v24  ;;  %v5278_v25 = vcombine.high %v15115_v32, %v15113_v24  ;;  %v18778_v24 = vld [vmem:[#allocation56_spill] sm:$0xff] }
 0x71e   : >> { %v14268_v32 = vcombine.low %v18778_v24, %v18777_v52 }
 0x71f   : >> { %v5285_v9 = vrot.slane %v5277_v29, %v16019_v45  ;;  %v5292_v34 = vrot.slane %v5278_v25, %v16019_v45  ;;  %v18780_v29 = vld [vmem:[#allocation58_spill] sm:$0xff]  ;;  %v18782_v25 = vld [vmem:[#allocation60_spill] sm:$0xff] }
 0x720   : >> { %14787 = vmatpush3.bf16.msra.mxu0 %v14268_v32 }
 0x721   : >> { %14788 = vmatprep.subr.bf16.mxu0 %v18774_v37 }
 0x723   : >> { %v15119_v5 = vpop.eup %15118 }
 0x724   : >> { %v5293_v22 = vcombine.low %v15117_v14, %v15119_v5  ;;  %v5294_v61 = vcombine.high %v15117_v14, %v15119_v5  ;;  %v18779_v14 = vld [vmem:[#allocation59_spill] sm:$0xff] }
 0x725   : >> { %v14269_v5 = vcombine.low %v18780_v29, %v18779_v14 }
 0x726   : >> { %v5301_v46 = vrot.slane %v5293_v22, %v16019_v45  ;;  %v5308_v36 = vrot.slane %v5294_v61, %v16019_v45  ;;  %v18781_v22 = vld [vmem:[#allocation61_spill] sm:$0xff] }
 0x727   : >> { %14789 = vmatpush3.bf16.msra.mxu0 %v14269_v5  ;;  %v14270_v61 = vcombine.low %v18782_v25, %v18781_v22 }
 0x728   : >> { %v5310_v10 = vcombine.high %v5285_v9, %v5301_v46  ;;  %v5309_v2 = vcombine.low %v5285_v9, %v5301_v46  ;;  %v5325_v12 = vcombine.low %v5292_v34, %v5308_v36  ;;  %v5326_v19 = vcombine.high %v5292_v34, %v5308_v36  ;;  %14790 = vmatprep.subr.bf16.mxu0 %v18774_v37  ;;  %v18783_v9 = vld [vmem:[#allocation63_spill] sm:$0xff]  ;;  %v18784_v46 = vld [vmem:[#allocation62_spill] sm:$0xff] }
 0x729   : >> { %v14271_v36 = vcombine.low %v18784_v46, %v18783_v9 }
 0x72a   : >> { %v5324_v20 = vrot.slane %v5310_v10, %v16024_v39  ;;  %v5317_v17 = vrot.slane %v5309_v2, %v16024_v39  ;;  %v5333_v1 = vrot.slane %v5325_v12, %v16024_v39  ;;  %v5340_v4 = vrot.slane %v5326_v19, %v16024_v39  ;;  %v18785_v10 = vld [vmem:[#allocation65_spill] sm:$0xff]  ;;  %v18786_v2 = vld [vmem:[#allocation64_spill] sm:$0xff] }
 0x72b   : >> { %14791 = vmatpush3.bf16.msra.mxu0 %v14270_v61  ;;  %v14272_v34 = vcombine.low %v18786_v2, %v18785_v10 }
 0x72c   : >> { %5357 = vperm.xlu1 %15103, %v5324_v20   ;;  %5347 = vperm.xlu0 %15102, %v5317_v17   ;;  %v5341_v28 = vcombine.high %v5317_v17, %v18774_v37  ;;  %v5342_v11 = vcombine.high %v5324_v20, %v18774_v37  ;;  %v5343_v8 = vcombine.high %v5333_v1, %v18774_v37  ;;  %v18787_v20 = vld [vmem:[#allocation67_spill] sm:$0xff]  ;;  %v18788_v17 = vld [vmem:[#allocation66_spill] sm:$0xff] }
 0x72d   : >> { %v5344_v18 = vcombine.high %v5340_v4, %v18774_v37  ;;  %14792 = vmatprep.subr.bf16.mxu0 %v18774_v37  ;;  %v14273_v12 = vcombine.low %v18788_v17, %v18787_v20 }
 0x72f   : >> { %14793 = vmatpush3.bf16.msra.mxu0 %v14271_v36 }
 0x730   : >> { %5367 = vperm.xlu1 %15103, %v5333_v1   ;;  %14794 = vmatprep.subr.bf16.mxu0 %v18774_v37 }
 0x733   : >> { %14795 = vmatpush3.bf16.msra.mxu0 %v14272_v34 }
 0x734   : >> { %5377 = vperm.xlu1 %15103, %v5340_v4   ;;  %14796 = vmatprep.subr.bf16.mxu0 %v18774_v37 }
 0x737   : >> { %14797 = vmatpush3.bf16.msra.mxu0 %v14273_v12 }
 0x738   : >> { %5352 = vperm.xlu1 %15103, %v5341_v28   ;;  %14798 = vmatprep.subr.bf16.mxu0 %v18774_v37 }
 0x73c   : >> { %5362 = vperm.xlu1 %15103, %v5342_v11  }
 0x740   : >> { %5372 = vperm.xlu1 %15103, %v5343_v8  }
 0x744   : >> { %5382 = vperm.xlu1 %15103, %v5344_v18  }
 0x760   : >> { %v14766_v40 = vpop.f32.mrb[20].mxu1 }
 0x761   : >> { %v4892_v35 = vpop.f32.mrb[21].mxu1 }
 0x762   : >> { %v14767_v15 = vpop.f32.mrb[22].mxu1 }
 0x763   : >> { %v4895_v13 = vpop.f32.mrb[23].mxu1 }
 0x768   : >> { %v14772_v27 = vpop.f32.mrb[24].mxu1 }
 0x769   : >> { %v4950_v31 = vpop.f32.mrb[25].mxu1 }
 0x76a   : >> { %v14773_v6 = vpop.f32.mrb[26].mxu1  ;;  %5113 = vxpose.xlu0.b32.start [1/4] (short) (narrow) %v4950_v31, 8 }
 0x76b   : >> { %v4953_v38 = vpop.f32.mrb[27].mxu1 }
 0x76d   : >> { %5081 = vxpose.xlu1.b32.start [1/4] (short) (narrow) %v4892_v35, 8 }
 0x76e   : >> { %5114 = vxpose.xlu0.b32.cont [2/4] (short) (narrow) %v4953_v38, 8 }
 0x770   : >> { %v14778_v7 = vpop.f32.mrb[28].mxu1 }
 0x771   : >> { %v5008_v26 = vpop.f32.mrb[29].mxu1  ;;  %5082 = vxpose.xlu1.b32.cont [2/4] (short) (narrow) %v4895_v13, 8 }
 0x772   : >> { %v14779_v60 = vpop.f32.mrb[30].mxu1  ;;  %5115 = vxpose.xlu0.b32.cont [3/4] (short) (narrow) %v14772_v27, 8 }
 0x773   : >> { %v5011_v23 = vpop.f32.mrb[31].mxu1 }
 0x775   : >> { %5083 = vxpose.xlu1.b32.cont [3/4] (short) (narrow) %v14766_v40, 8 }
 0x776   : >> { %5116 = vxpose.xlu0.b32.end [4/4] (short) (narrow) %v14773_v6, 8 }
 0x778   : >> { %v14784_v21 = vpop.f32.mrb[32].mxu1 }
 0x779   : >> { %v5066_v16 = vpop.f32.mrb[33].mxu1  ;;  %5084 = vxpose.xlu1.b32.end [4/4] (short) (narrow) %v14767_v15, 8 }
 0x77a   : >> { %v14785_v56 = vpop.f32.mrb[34].mxu1  ;;  %5145 = vxpose.xlu0.b32.start [1/4] (short) (narrow) %v5008_v26, 8 }
 0x77b   : >> { %v5069_v30 = vpop.f32.mrb[35].mxu1 }
 0x77d   : >> { %5177 = vxpose.xlu1.b32.start [1/4] (short) (narrow) %v5066_v16, 8 }
 0x77e   : >> { %5146 = vxpose.xlu0.b32.cont [2/4] (short) (narrow) %v5011_v23, 8 }
 0x781   : >> { %5178 = vxpose.xlu1.b32.cont [2/4] (short) (narrow) %v5069_v30, 8 }
 0x782   : >> { %5147 = vxpose.xlu0.b32.cont [3/4] (short) (narrow) %v14778_v7, 8 }
 0x785   : >> { %5179 = vxpose.xlu1.b32.cont [3/4] (short) (narrow) %v14784_v21, 8 }
 0x786   : >> { %5148 = vxpose.xlu0.b32.end [4/4] (short) (narrow) %v14779_v60, 8 }
 0x789   : >> { %5180 = vxpose.xlu1.b32.end [4/4] (short) (narrow) %v14785_v56, 8 }
 0x7ab   : >> { %v5358_v1 = vpop.permute.xlu1 %5357  ;;  %v5348_v18 = vpop.permute.xlu0 %5347 }
 0x7af   : >> { %v5368_v19 = vpop.permute.xlu1 %5367 }
 0x7b3   : >> { %v5378_v4 = vpop.permute.xlu1 %5377 }
 0x7b7   : >> { %v5353_v28 = vpop.permute.xlu1 %5352 }
 0x7bb   : >> { %v5363_v11 = vpop.permute.xlu1 %5362 }
 0x7bf   : >> { %v5373_v8 = vpop.permute.xlu1 %5372 }
 0x7c3   : >> { %v5383_v40 = vpop.permute.xlu1 %5382 }
 0x7ea   : >> { %v5129_v35 = vpop.trf.xlu0 }
 0x7ed   : >> { %v5097_v15 = vpop.trf.xlu1 }
 0x7fa   : >> { %v5161_v13 = vpop.trf.xlu0 }
 0x7fb   : >> { %v5209_v27 = vcombine.low %v5097_v15, %v5161_v13  ;;  %v5210_v31 = vcombine.high %v5097_v15, %v5161_v13  ;;  %v18789_v15 = vld [vmem:[#allocation69_spill] sm:$0xff]  ;;  %v18790_v13 = vld [vmem:[#allocation68_spill] sm:$0xff] }
 0x7fd   : >> { %v5193_v6 = vpop.trf.xlu1  ;;  %v5217_v26 = vrot.slane %v5209_v27, %v16019_v45  ;;  %v5224_v60 = vrot.slane %v5210_v31, %v16019_v45  ;;  %v14274_v27 = vcombine.low %v18790_v13, %v18789_v15  ;;  %v18798_v13 = vld [vmem:[#allocation208_spill] sm:$0xff] }
 0x7fe   : >> { %v5225_v38 = vcombine.low %v5129_v35, %v5193_v6  ;;  %v5226_v7 = vcombine.high %v5129_v35, %v5193_v6 }
 0x7ff   : >> { %14799 = vmatpush3.bf16.msra.mxu0 %v14274_v27  ;;  %v18799_v27 = vpack.c.bf16 %v18798_v13, %v18798_v13 }
 0x800   : >> { %v5233_v23 = vrot.slane %v5225_v38, %v16019_v45  ;;  %v5240_v21 = vrot.slane %v5226_v7, %v16019_v45  ;;  %14800 = vmatprep.subr.bf16.mxu0 %v18774_v37 }
 0x802   : >> { %v5241_v16 = vcombine.low %v5217_v26, %v5233_v23  ;;  %v5242_v56 = vcombine.high %v5217_v26, %v5233_v23  ;;  %v5257_v30 = vcombine.low %v5224_v60, %v5240_v21  ;;  %v5258_v52 = vcombine.high %v5224_v60, %v5240_v21 }
 0x804   : >> { %v5249_v24 = vrot.slane %v5241_v16, %v16024_v39  ;;  %v5256_v32 = vrot.slane %v5242_v56, %v16024_v39  ;;  %v5265_v14 = vrot.slane %v5257_v30, %v16024_v39  ;;  %v5272_v29 = vrot.slane %v5258_v52, %v16024_v39 }
 0x806   : >> { %v5273_v5 = vcombine.high %v5249_v24, %v18774_v37  ;;  %v5274_v22 = vcombine.high %v5256_v32, %v18774_v37  ;;  %v5275_v25 = vcombine.high %v5265_v14, %v18774_v37  ;;  %v5276_v61 = vcombine.high %v5272_v29, %v18774_v37 }
 0x807   : >> { %v5385_v9 = vmul.f32 %v5348_v18, %v5249_v24  ;;  %v5387_v46 = vmul.f32 %v5358_v1, %v5256_v32  ;;  %v5389_v36 = vmul.f32 %v5368_v19, %v5265_v14  ;;  %v5391_v10 = vmul.f32 %v5378_v4, %v5272_v29  ;;  %v18791_v4 = vld [vmem:[#allocation71_spill] sm:$0xff] }
 0x808   : >> { %v5386_v2 = vmul.f32 %v5353_v28, %v5273_v5  ;;  %v5388_v34 = vmul.f32 %v5363_v11, %v5274_v22  ;;  %v5390_v20 = vmul.f32 %v5373_v8, %v5275_v25  ;;  %v5392_v17 = vmul.f32 %v5383_v40, %v5276_v61  ;;  %v18792_v28 = vld [vmem:[#allocation70_spill] sm:$0xff] }
 0x809   : >> { %v5393_v12 = vcombine.low %v5385_v9, %v5387_v46  ;;  %v5409_v35 = vcombine.low %v5389_v36, %v5391_v10  ;;  %v14275_v11 = vcombine.low %v18792_v28, %v18791_v4  ;;  %v18793_v46 = vld [vmem:[#allocation139_spill] sm:$0xff]  ;;  %v18807_v4 = vpack.c.bf16 %v18719_v51, %v18719_v51  ;;  %v18808_v28 = vld [vmem:[#allocation73_spill] sm:$0xff] }
 0x80a   : >> { %v5401_v31 = vcombine.low %v5386_v2, %v5388_v34  ;;  %v5417_v6 = vcombine.low %v5390_v20, %v5392_v17  ;;  %v18794_v17 = vld [vmem:[#allocation203_spill] sm:$0xff] }
 0x80b   : >> { %v5400_v38 = vrot.slane %v5393_v12, %v16019_v45  ;;  %v5416_v7 = vrot.slane %v5409_v35, %v16019_v45  ;;  %14801 = vmatpush3.bf16.msra.mxu0 %v14275_v11  ;;  %v18795_v12 = vpack.c.bf16 %v18794_v17, %v18794_v17  ;;  %v18796_v35 = vld [vmem:[#allocation204_spill] sm:$0xff]  ;;  %v18837_v17 = vld [vmem:[#allocation198_spill] sm:$0xff] }
 0x80c   : >> { %v5408_v1 = vrot.slane %v5401_v31, %v16019_v45  ;;  %v5424_v19 = vrot.slane %v5417_v6, %v16019_v45  ;;  %14826 = vmatprep.subr.bf16.mxu0 %v18774_v37  ;;  %v18797_v15 = vpack.c.bf16 %v18796_v35, %v18796_v35  ;;  %v18800_v31 = vld [vmem:[#allocation209_spill] sm:$0xff]  ;;  %v18809_v11 = vld [vmem:[#allocation72_spill] sm:$0xff] }
 0x80d   : >> { %v18801_v6 = vpack.c.bf16 %v18800_v31, %v18800_v31 }
 0x80e   : >> { %v5426_v8 = vcombine.high %v5400_v38, %v5408_v1  ;;  %v5442_v18 = vcombine.high %v5416_v7, %v5424_v19  ;;  %v5425_v40 = vcombine.low %v5400_v38, %v5408_v1  ;;  %v5441_v26 = vcombine.low %v5416_v7, %v5424_v19  ;;  %v18802_v38 = vld [vmem:[#allocation210_spill] sm:$0xff] }
 0x80f   : >> { %v18804_v7 = vpack.c.bf16 %v18723_v33, %v18723_v33  ;;  %v18805_v1 = vpack.c.bf16 %v18720_v47, %v18720_v47  ;;  %v18806_v19 = vpack.c.bf16 %v18722_v41, %v18722_v41 }
 0x810   : >> { %v5440_v60 = vrot.slane %v5426_v8, %v16024_v39  ;;  %v5456_v23 = vrot.slane %v5442_v18, %v16024_v39  ;;  %v5433_v21 = vrot.slane %v5425_v40, %v16024_v39  ;;  %v5449_v16 = vrot.slane %v5441_v26, %v16024_v39  ;;  %v18810_v18 = vld [vmem:[#allocation75_spill] sm:$0xff]  ;;  %v18811_v40 = vld [vmem:[#allocation74_spill] sm:$0xff] }
 0x811   : >> { %v14279_v8 = vcombine.low %v18809_v11, %v18808_v28  ;;  %v14280_v26 = vcombine.low %v18811_v40, %v18810_v18  ;;  %v18831_v11 = vpack.c.bf16 %v18718_v63, %v18718_v63 }
 0x812   : >> { %v5459_v56 = vcombine.low %v5440_v60, %v5456_v23  ;;  %v5458_v30 = vcombine.high %v5433_v21, %v5449_v16  ;;  %v5457_v52 = vcombine.low %v5433_v21, %v5449_v16  ;;  %v5460_v24 = vcombine.high %v5440_v60, %v5456_v23 }
 0x813   : >> { %14807 = vmatpush3.bf16.msra.mxu1 %v14279_v8  ;;  %v18832_v8 = vld [vmem:[#allocation225_spill] sm:$0xff] }
 0x814   : >> { %5466 = vrot.lane.b32.xlu1 %v5459_v56, %s15263_s15  ;;  %5462 = vrot.lane.b32.xlu0 %v5458_v30, %s15261_s24  ;;  %v18812_v56 = vld [vmem:[#allocation77_spill] sm:$0xff]  ;;  %v18813_v30 = vld [vmem:[#allocation76_spill] sm:$0xff]  ;;  %v18833_v18 = vpack.c.bf16 %v18832_v8, %v18832_v8  ;;  %v18836_v8 = vld [vmem:[#allocation194_spill] sm:$0xff] }
 0x815   : >> { %14808 = vmatprep.subr.bf16.mxu1 %v18774_v37 }
 0x817   : >> { %14809 = vmatpush3.bf16.msra.mxu1 %v14280_v26  ;;  %v18834_v26 = vld [vmem:[#allocation226_spill] sm:$0xff] }
 0x818   : >> { %5470 = vrot.lane.b32.xlu1 %v5460_v24, %s15262_s18  ;;  %14810 = vmatprep.subr.bf16.mxu1 %v18774_v37  ;;  %v18814_v24 = vld [vmem:[#allocation79_spill] sm:$0xff] }
 0x886   : >> { %v5467_v32 = vpop.permute.xlu1 %5466  ;;  %v5463_v14 = vpop.permute.xlu0 %5462 }
 0x887   : >> { %v5473_v29 = vsel %vm3431_vm2, %v5457_v52, %v5463_v14  ;;  %v14281_v52 = vcombine.low %v18813_v30, %v18812_v56 }
 0x888   : >> { %v5475_v22 = vsel %vm5474_vm4, %v5473_v29, %v5467_v32  ;;  %v18815_v32 = vld [vmem:[#allocation78_spill] sm:$0xff]  ;;  %v18816_v29 = vld [vmem:[#allocation81_spill] sm:$0xff] }
 0x889   : >> { %14811 = vmatpush3.bf16.msra.mxu1 %v14281_v52  ;;  %v14282_v14 = vcombine.low %v18815_v32, %v18814_v24 }
 0x88a   : >> { %v5471_v5 = vpop.permute.xlu1 %5470  ;;  %14812 = vmatprep.subr.bf16.mxu1 %v18774_v37 }
 0x88b   : >> { %v5477_v25 = vsel %vm5476_vm5, %v5475_v22, %v5471_v5  ;;  %v18817_v5 = vld [vmem:[#allocation80_spill] sm:$0xff] }
 0x88c   : >> { %v5478_v61 = vpack.c.bf16 %v5477_v25, %v5477_v25  ;;  %v14283_v22 = vcombine.low %v18817_v5, %v18816_v29  ;;  %v18818_v25 = vld [vmem:[#allocation83_spill] sm:$0xff] }
 0x88d   : >> { %14813 = vmatpush3.bf16.msra.mxu1 %v14282_v14 }
 0x88e   : >> { %14803 = vmatmul.mubr.bf16.vlgmr.msra.gmra.mrb[8].mxu0 %v5478_v61  ;;  %14814 = vmatprep.subr.bf16.mxu1 %v18774_v37  ;;  %v18819_v61 = vld [vmem:[#allocation82_spill] sm:$0xff] }
 0x88f   : >> { %14830 = vmatprep.mubr.msk.bf16.mxu0 %vm15260_vm1, %v18774_v37 }
 0x891   : >> { %14815 = vmatpush3.bf16.msra.mxu1 %v14283_v22 }
 0x892   : >> { %14816 = vmatprep.subr.bf16.mxu1 %v18774_v37 }
 0x961   : >> { %v5567_v9 = vpop.f32.mrb[8].mxu0 }
 0x962   : >> { %v5568_v36 = vadd.f32 %v18793_v46, %v5567_v9  ;;  %v14804_v10 = vpop.f32.mrb[9].mxu0  ;;  %v14284_v9 = vcombine.low %v18819_v61, %v18818_v25  ;;  %v18820_v46 = vld [vmem:[#allocation85_spill] sm:$0xff] }
 0x963   : >> { %v5570_v2 = vpop.f32.mrb[10].mxu0 }
 0x964   : >> { %v5573_v34 = vadd.f32 %v15242_v62, %v5568_v36  ;;  %v14805_v20 = vpop.f32.mrb[11].mxu0  ;;  %v18803_v62 = vpack.c.bf16 %v18802_v38, %v18802_v38  ;;  %14817 = vmatpush3.bf16.msra.mxu1 %v14284_v9  ;;  %v18821_v36 = vld [vmem:[#allocation84_spill] sm:$0xff]  ;;  %v18822_v2 = vld [vmem:[#allocation87_spill] sm:$0xff] }
 0x965   : >> { %v14285_v10 = vcombine.low %v18821_v36, %v18820_v46  ;;  %14818 = vmatprep.subr.bf16.mxu1 %v18774_v37 }
 0x966   : >> { %5574 = vadd.xlane.f32.xlu0 %v5573_v34 }
 0x968   : >> { %14819 = vmatpush3.bf16.msra.mxu1 %v14285_v10 }
 0x969   : >> { %14820 = vmatprep.subr.bf16.mxu1 %v18774_v37 }
 0x993   : >> { %5844 = vxpose.xlu0.c.b16.start.end [1/1] (short) (narrow) %v18795_v12, 32  ;;  %v18824_v12 = vld [vmem:[#allocation207_spill] sm:$0xff] }
 0x998   : >> { %5876 = vxpose.xlu0.c.b16.start.end [1/1] (short) (narrow) %v18797_v15, 32  ;;  %v18825_v15 = vpack.c.bf16 %v18824_v12, %v18824_v12 }
 0x99d   : >> { %5892 = vxpose.xlu0.c.b16.start.end [1/1] (short) (narrow) %v18799_v27, 32  ;;  %v18826_v27 = vld [vmem:[#allocation205_spill] sm:$0xff] }
 0x9a2   : >> { %5924 = vxpose.xlu0.c.b16.start.end [1/1] (short) (narrow) %v18801_v6, 32  ;;  %v18827_v6 = vpack.c.bf16 %v18826_v27, %v18826_v27 }
 0x9a7   : >> { %5956 = vxpose.xlu0.c.b16.start.end [1/1] (short) (narrow) %v18803_v62, 32 }
 0x9ac   : >> { %5988 = vxpose.xlu0.c.b16.start.end [1/1] (short) (narrow) %v18804_v7, 32  ;;  %v18828_v7 = vld [vmem:[#allocation206_spill] sm:$0xff] }
 0x9b1   : >> { %6020 = vxpose.xlu0.c.b16.start.end [1/1] (short) (narrow) %v18805_v1, 32  ;;  %v18829_v1 = vpack.c.bf16 %v18828_v7, %v18828_v7 }
 0x9b6   : >> { %6052 = vxpose.xlu0.c.b16.start.end [1/1] (short) (narrow) %v18806_v19, 32 }
 0x9bb   : >> { %6084 = vxpose.xlu0.c.b16.start.end [1/1] (short) (narrow) %v18807_v4, 32  ;;  %v18830_v4 = vpack.c.bf16 %v18721_v42, %v18721_v42 }
 0x9f3   : >> { %v5575_v60 = vpop.xlane.xlu0 %5574 }
 0x9f4   : >> { %v5577_v23 = vmul.f32 0.0078125, %v5575_v60  ;;  %v18835_v60 = vpack.c.bf16 %v18834_v26, %v18834_v26 }
 0x9f6   : >> { %v5578_v21 = vsub.f32 %v5573_v34, %v5577_v23  ;;  %v18823_v34 = vld [vmem:[#allocation86_spill] sm:$0xff] }
 0x9f7   : >> { %v14286_v20 = vcombine.low %v18823_v34, %v18822_v2 }
 0x9f8   : >> { %v5579_v16 = vmul.f32 %v5578_v21, %v5578_v21 }
 0x9f9   : >> { %14821 = vmatpush3.bf16.msra.mxu1 %v14286_v20  ;;  %v16930_v62 = vpop.trf.xlu0 }
 0x9fa   : >> { %5580 = vadd.xlane.f32.xlu1 %v5579_v16  ;;  %14834 = vmatprep.subr.bf16.mxu1 %v18774_v37 }
 0x9fd   : >> { %v16935_v19 = vpop.trf.xlu0 }
 0xa01   : >> { %v16940_v28 = vpop.trf.xlu0 }
 0xa05   : >> { %v16948_v40 = vpop.trf.xlu0 }
 0xa09   : >> { %v16953_v23 = vpop.trf.xlu0 }
 0xa0d   : >> { %v16955_v16 = vpop.trf.xlu0 }
 0xa11   : >> { %v16957_v56 = vpop.trf.xlu0 }
 0xa15   : >> { %v16959_v30 = vpop.trf.xlu0 }
 0xa19   : >> { %v16961_v52 = vpop.trf.xlu0 }
 0xa1d   : >> { %v16963_v24 = vpop.trf.xlu0 }
 0xa1e   : >> { %v6525_v34 = vcombine.high %v16955_v16, %v16963_v24 }
 0xa21   : >> { %v5996_v32 = vpop.trf.xlu0 }
 0xa25   : >> { %v16965_v14 = vpop.trf.xlu0 }
 0xa27   : >> { %5860 = vxpose.xlu1.c.b16.start.end [1/1] (short) (narrow) %v18825_v15, 32 }
 0xa29   : >> { %v6028_v29 = vpop.trf.xlu0 }
 0xa2c   : >> { %5908 = vxpose.xlu1.c.b16.start.end [1/1] (short) (narrow) %v18827_v6, 32 }
 0xa2d   : >> { %v16967_v5 = vpop.trf.xlu0 }
 0xa31   : >> { %5940 = vxpose.xlu1.c.b16.start.end [1/1] (short) (narrow) %v18829_v1, 32  ;;  %v6060_v22 = vpop.trf.xlu0 }
 0xa32   : >> { %v6268_v27 = vcombine.low %v5996_v32, %v6060_v22  ;;  %v6269_v31 = vcombine.high %v5996_v32, %v6060_v22  ;;  %v6524_v22 = vcombine.low %v16955_v16, %v16963_v24 }
 0xa34   : >> { %v6276_v38 = vrot.slane %v6268_v27, %v16019_v45  ;;  %v6283_v51 = vrot.slane %v6269_v31, %v16019_v45  ;;  %v6253_v27 = vcombine.high %v16953_v23, %v16961_v52 }
 0xa35   : >> { %v16969_v9 = vpop.trf.xlu0 }
 0xa36   : >> { %5972 = vxpose.xlu1.c.b16.start.end [1/1] (short) (narrow) %v18830_v4, 32  ;;  %v6541_v6 = vcombine.high %v16965_v14, %v16969_v9  ;;  %v17056_v53 = vrot.slane %v6253_v27, %v16019_v45 }
 0xa39   : >> { %v6092_v10 = vpop.trf.xlu0 }
 0xa3a   : >> { %v6285_v33 = vcombine.high %v6028_v29, %v6092_v10 }
 0xa3b   : >> { %6004 = vxpose.xlu1.c.b16.start.end [1/1] (short) (narrow) %v18831_v11, 32 }
 0xa3c   : >> { %v6299_v63 = vrot.slane %v6285_v33, %v16019_v45 }
 0xa3d   : >> { %v16977_v20 = vpop.trf.xlu0 }
 0xa3e   : >> { %v6557_v1 = vcombine.high %v16967_v5, %v16977_v20  ;;  %v6348_v33 = vcombine.low %v6283_v51, %v6299_v63  ;;  %v6349_v48 = vcombine.high %v6283_v51, %v6299_v63 }
 0xa40   : >> { %6036 = vxpose.xlu1.c.b16.start.end [1/1] (short) (narrow) %v18833_v18, 32  ;;  %v16988_v18 = vrot.slane %v6525_v34, %v16019_v45 }
 0xa45   : >> { %6068 = vxpose.xlu1.c.b16.start.end [1/1] (short) (narrow) %v18835_v60, 32 }
 0xa87   : >> { %v5581_v25 = vpop.xlane.xlu1 %5580 }
 0xa88   : >> { %v5582_v61 = vmul.f32 0.0078125, %v5581_v25 }
 0xa8a   : >> { %v5583_v46 = vadd.f32 1e-05, %v5582_v61  ;;  %v16994_v61 = vrot.slane %v6541_v6, %v16019_v45 }
 0xa8c   : >> { %15120 = vrsqrt.f32 %v5583_v46  ;;  %v16997_v46 = vrot.slane %v6557_v1, %v16019_v45 }
 0xa8d   : >> { %v16971_v36 = vpop.trf.xlu1 }
 0xa8e   : >> { %v6621_v34 = vcombine.high %v16994_v61, %v16997_v46 }
 0xa91   : >> { %v16973_v2 = vpop.trf.xlu1 }
 0xa92   : >> { %v6509_v15 = vcombine.high %v16973_v2, %v16959_v30 }
 0xa94   : >> { %v16991_v60 = vrot.slane %v6509_v15, %v16019_v45 }
 0xa95   : >> { %v16985_v4 = vpop.trf.xlu1 }
 0xa96   : >> { %v15121_v11 = vpop.eup %15120  ;;  %v6589_v13 = vcombine.high %v16991_v60, %v16988_v18  ;;  %v6100_v57 = vcombine.low %v16930_v62, %v16985_v4 }
 0xa97   : >> { %v5585_v25 = vmul.f32 %v15121_v11, %v5578_v21  ;;  %v17017_v11 = vrot.slane %v6621_v34, %v16024_v39  ;;  %v6236_v34 = vcombine.low %v16971_v36, %v16957_v56 }
 0xa98   : >> { %v17014_v1 = vrot.slane %v6589_v13, %v16024_v39  ;;  %v6284_v13 = vcombine.low %v6028_v29, %v6092_v10  ;;  %v6540_v10 = vcombine.low %v16965_v14, %v16969_v9  ;;  %v17072_v14 = vrot.slane %v6348_v33, %v16024_v39 }
 0xa99   : >> { %v16999_v7 = vpop.trf.xlu1  ;;  %v5592_v12 = vmul.f32 %v18836_v8, %v5585_v25  ;;  %v6244_v42 = vrot.slane %v6236_v34, %v16019_v45 }
 0xa9a   : >> { %v6292_v41 = vrot.slane %v6284_v13, %v16019_v45 }
 0xa9b   : >> { %v17007_v15 = vadd.f32 %v18837_v17, %v5592_v12  ;;  %v17025_v17 = vcombine.high %v17014_v1, %v17017_v11 }
 0xa9c   : >> { %v6332_v13 = vcombine.low %v6276_v38, %v6292_v41  ;;  %v6333_v34 = vcombine.high %v6276_v38, %v6292_v41  ;;  %v17064_v41 = vrot.slane %v6540_v10, %v16019_v45  ;;  %v6101_v38 = vcombine.high %v16930_v62, %v16985_v4 }
 0xa9d   : >> { %v17009_v21 = vpop.trf.xlu1  ;;  %v5600_v6 = vpack.c.bf16 %v17007_v15, %v17007_v15  ;;  %v6373_v10 = vcombine.high %v16935_v19, %v16999_v7 }
 0xa9e   : >> { %v6116_v32 = vcombine.low %v16940_v28, %v17009_v21  ;;  %v6347_v51 = vrot.slane %v6333_v34, %v16024_v39  ;;  %v6117_v9 = vcombine.high %v16940_v28, %v17009_v21  ;;  %v6556_v28 = vcombine.low %v16967_v5, %v16977_v20 }
 0xa9f   : >> { %14823 = vmatmul.mubr.bf16.vlgmr.msra.gmra.mrb[36].mxu1 %v5600_v6  ;;  %v6252_v6 = vcombine.low %v16953_v23, %v16961_v52  ;;  %v17059_v23 = vrot.slane %v6524_v22, %v16019_v45  ;;  %v6237_v52 = vcombine.high %v16971_v36, %v16957_v56  ;;  %v17077_v36 = vrot.slane %v6349_v48, %v16024_v39 }
 0xaa0   : >> { %14838 = vmatprep.mubr.msk.bf16.mxu1 %vm15260_vm1, %v18774_v37  ;;  %v6124_v59 = vrot.slane %v6116_v32, %v16019_v45  ;;  %v17089_v21 = vrot.slane %v6101_v38, %v16019_v45 }
 0xaa1   : >> { %v17021_v8 = vpop.trf.xlu1  ;;  %v6260_v47 = vrot.slane %v6252_v6, %v16019_v45  ;;  %v6108_v6 = vrot.slane %v6100_v57, %v16019_v45  ;;  %v6340_v57 = vrot.slane %v6332_v13, %v16024_v39  ;;  %v17081_v22 = vrot.slane %v6237_v52, %v16019_v45 }
 0xaa3   : >> { %v6300_v31 = vcombine.low %v6244_v42, %v6260_v47  ;;  %v6301_v24 = vcombine.high %v6244_v42, %v6260_v47  ;;  %v6164_v56 = vcombine.low %v6108_v6, %v6124_v59  ;;  %v6165_v32 = vcombine.high %v6108_v6, %v6124_v59 }
 0xaa4   : >> { %v6316_v52 = vcombine.low %v17081_v22, %v17056_v53 }
 0xaa5   : >> { %v5980_v12 = vpop.trf.xlu1  ;;  %v6308_v63 = vrot.slane %v6300_v31, %v16024_v39  ;;  %v6315_v13 = vrot.slane %v6301_v24, %v16024_v39  ;;  %v6172_v5 = vrot.slane %v6164_v56, %v16024_v39  ;;  %v6179_v20 = vrot.slane %v6165_v32, %v16024_v39 }
 0xaa7   : >> { %v6364_v59 = vcombine.low %v6308_v63, %v6340_v57  ;;  %v17112_v24 = vcombine.low %v6315_v13, %v6347_v51  ;;  %v17133_v0 = vcombine.high %v6315_v13, %v6347_v51 }
 0xaa9   : >> { %v17027_v25 = vpop.trf.xlu1  ;;  %v6665_v54 = vshrl.u32 %v17112_v24, 16 }
 0xaad   : >> { %v6012_v26 = vpop.trf.xlu1 }
 0xab1   : >> { %v17033_v35 = vpop.trf.xlu1 }
 0xab5   : >> { %v6044_v29 = vpop.trf.xlu1 }
 0xab6   : >> { %v6132_v16 = vcombine.low %v5980_v12, %v6044_v29  ;;  %v6133_v42 = vcombine.high %v5980_v12, %v6044_v29  ;;  %v17092_v12 = vcombine.high %v6308_v63, %v6340_v57  ;;  %v6389_v29 = vcombine.high %v16948_v40, %v17021_v8 }
 0xab7   : >> { %v17115_v57 = vrot.slane %v6556_v28, %v16019_v45 }
 0xab8   : >> { %v6140_v27 = vrot.slane %v6132_v16, %v16019_v45  ;;  %v17100_v31 = vrot.slane %v6133_v42, %v16019_v45  ;;  %v17108_v16 = vrot.slane %v6373_v10, %v16019_v45  ;;  %v6657_v56 = vshrl.u32 %v17092_v12, 16 }
 0xab9   : >> { %v17053_v44 = vpop.trf.xlu1 }
 0xaba   : >> { %v6405_v32 = vcombine.high %v17027_v25, %v17053_v44 }
 0xabd   : >> { %v6076_v47 = vpop.trf.xlu1 }
 0xabe   : >> { %v6148_v62 = vcombine.low %v6012_v26, %v6076_v47  ;;  %v6149_v4 = vcombine.high %v6012_v26, %v6076_v47  ;;  %v17095_v26 = vrot.slane %v6117_v9, %v16019_v45  ;;  %v6649_v9 = vshrl.u32 %v6364_v59, 16 }
 0xac0   : >> { %v6156_v48 = vrot.slane %v6148_v62, %v16019_v45  ;;  %v17103_v34 = vrot.slane %v6149_v4, %v16019_v45  ;;  %v6180_v47 = vcombine.low %v17089_v21, %v17095_v26  ;;  %v17128_v4 = vrot.slane %v6389_v29, %v16019_v45 }
 0xac1   : >> { %v6077_v42 = vpop.trf.xlu1 }
 0xac2   : >> { %v6196_v33 = vcombine.low %v6140_v27, %v6156_v48  ;;  %v6197_v6 = vcombine.high %v6140_v27, %v6156_v48  ;;  %v6212_v27 = vcombine.low %v17100_v31, %v17103_v34  ;;  %v6421_v62 = vcombine.high %v17033_v35, %v6077_v42 }
 0xac3   : >> { %v6453_v49 = vcombine.high %v17108_v16, %v17128_v4  ;;  %v6188_v29 = vrot.slane %v6180_v47, %v16024_v39 }
 0xac4   : >> { %v6204_v38 = vrot.slane %v6196_v33, %v16024_v39  ;;  %v6211_v63 = vrot.slane %v6197_v6, %v16024_v39  ;;  %v6508_v33 = vcombine.low %v16973_v2, %v16959_v30  ;;  %v6324_v6 = vrot.slane %v6316_v52, %v16024_v39 }
 0xac5   : >> { %v17144_v30 = vrot.slane %v6421_v62, %v16019_v45  ;;  %v17155_v62 = vrot.slane %v6453_v49, %v16024_v39 }
 0xac6   : >> { %v6228_v10 = vcombine.low %v6172_v5, %v6204_v38  ;;  %v6229_v28 = vcombine.high %v6172_v5, %v6204_v38  ;;  %v6230_v48 = vcombine.low %v6179_v20, %v6211_v63  ;;  %v17140_v5 = vrot.slane %v6405_v32, %v16019_v45 }
 0xac7   : >> { %v6220_v38 = vrot.slane %v6212_v27, %v16024_v39  ;;  %v6231_v2 = vcombine.high %v6179_v20, %v6211_v63  ;;  %v6368_v47 = vcombine.low %v6324_v6, %v17072_v14  ;;  %v6673_v32 = vshrl.u32 %v17133_v0, 16 }
 0xac8   : >> { %v6646_v50 = vpack.i.b16 %v6364_v59, %v6228_v10  ;;  %v6648_v58 = vshrl.u32 %v6228_v10, 16  ;;  %v6656_v55 = vshrl.u32 %v6229_v28, 16  ;;  %v6664_v52 = vshrl.u32 %v6230_v48, 16 }
 0xac9   : >> { %v6372_v59 = vcombine.low %v16935_v19, %v16999_v7  ;;  %v6317_v10 = vcombine.high %v17081_v22, %v17056_v53  ;;  %v6181_v27 = vcombine.high %v17089_v21, %v17095_v26  ;;  %v6404_v53 = vcombine.low %v17027_v25, %v17053_v44 }
 0xaca   : >> { %6772 = vxpose.xlu1.c.b16.start.end [1/1] (short) (narrow) %v6646_v50, 16  ;;  %v6650_v51 = vpack.i.b16 %v6649_v9, %v6648_v58  ;;  %v6658_v13 = vpack.i.b16 %v6657_v56, %v6656_v55  ;;  %v6654_v55 = vpack.i.b16 %v17092_v12, %v6229_v28  ;;  %v6485_v58 = vcombine.high %v17140_v5, %v17144_v30 }
 0xacb   : >> { %v6388_v50 = vcombine.low %v16948_v40, %v17021_v8  ;;  %v6213_v7 = vcombine.high %v17100_v31, %v17103_v34  ;;  %v6420_v19 = vcombine.low %v17033_v35, %v6077_v42  ;;  %v6232_v22 = vcombine.low %v6188_v29, %v6220_v38 }
 0xacc   : >> { %6788 = vxpose.xlu0.c.b16.start.end [1/1] (short) (narrow) %v6650_v51, 16  ;;  %v6666_v49 = vpack.i.b16 %v6665_v54, %v6664_v52  ;;  %v6672_v21 = vshrl.u32 %v6231_v2, 16  ;;  %v17168_v12 = vrot.slane %v6485_v58, %v16024_v39  ;;  %v6380_v26 = vrot.slane %v6372_v59, %v16019_v45 }
 0xacd   : >> { %v6516_v20 = vrot.slane %v6508_v33, %v16019_v45  ;;  %v6331_v40 = vrot.slane %v6317_v10, %v16024_v39  ;;  %v6369_v44 = vcombine.high %v6324_v6, %v17072_v14  ;;  %v6195_v8 = vrot.slane %v6181_v27, %v16024_v39 }
 0xace   : >> { %6820 = vxpose.xlu1.c.b16.start.end [1/1] (short) (narrow) %v6658_v13, 16  ;;  %v6662_v35 = vpack.i.b16 %v17112_v24, %v6230_v48  ;;  %v6681_v25 = vshrl.u32 %v6368_v47, 16  ;;  %v17178_v54 = vcombine.high %v17155_v62, %v17168_v12  ;;  %v6396_v31 = vrot.slane %v6388_v50, %v16019_v45 }
 0xacf   : >> { %v6412_v34 = vrot.slane %v6404_v53, %v16019_v45  ;;  %v6227_v63 = vrot.slane %v6213_v7, %v16024_v39  ;;  %v6428_v9 = vrot.slane %v6420_v19, %v16019_v45  ;;  %v6233_v56 = vcombine.high %v6188_v29, %v6220_v38 }
 0xad0   : >> { %6804 = vxpose.xlu0.c.b16.start.end [1/1] (short) (narrow) %v6654_v55, 16  ;;  %v6674_v14 = vpack.i.b16 %v6673_v32, %v6672_v21  ;;  %v6680_v42 = vshrl.u32 %v6232_v22, 16  ;;  %v6766_v24 = vpack.i.b16 %v17025_v17, %v17178_v54  ;;  %v6768_v28 = vshrl.u32 %v17178_v54, 16 }
 0xad1   : >> { %v6769_v48 = vshrl.u32 %v17025_v17, 16  ;;  %v6670_v33 = vpack.i.b16 %v17133_v0, %v6231_v2  ;;  %v6604_v6 = vcombine.low %v17064_v41, %v17115_v57  ;;  %v6436_v51 = vcombine.low %v6380_v26, %v6396_v31  ;;  %v18847_v17 = vld [vmem:[#allocation216_spill] sm:$0xff] }
 0xad2   : >> { %6852 = vxpose.xlu1.c.b16.start.end [1/1] (short) (narrow) %v6666_v49, 16  ;;  %v6572_v13 = vcombine.low %v6516_v20, %v17059_v23  ;;  %v6370_v29 = vcombine.low %v6331_v40, %v17077_v36  ;;  %v6689_v38 = vshrl.u32 %v6369_v44, 16  ;;  %v6234_v52 = vcombine.low %v6195_v8, %v6227_v63 }
 0xad3   : >> { %v6682_v59 = vpack.i.b16 %v6681_v25, %v6680_v42  ;;  %v6468_v10 = vcombine.low %v6412_v34, %v6428_v9  ;;  %v6688_v32 = vshrl.u32 %v6233_v56, 16  ;;  %v17193_v27 = vpack.i.b16 %v6769_v48, %v6768_v28 }
 0xad4   : >> { %6836 = vxpose.xlu0.c.b16.start.end [1/1] (short) (narrow) %v6662_v35, 16  ;;  %v6612_v55 = vrot.slane %v6604_v6, %v16024_v39  ;;  %v6678_v0 = vpack.i.b16 %v6368_v47, %v6232_v22  ;;  %v6444_v2 = vrot.slane %v6436_v51, %v16024_v39  ;;  %v6580_v58 = vrot.slane %v6572_v13, %v16024_v39 }
 0xad5   : >> { %v6371_v50 = vcombine.high %v6331_v40, %v17077_v36  ;;  %v6697_v53 = vshrl.u32 %v6370_v29, 16  ;;  %v6235_v7 = vcombine.high %v6195_v8, %v6227_v63  ;;  %v6476_v19 = vrot.slane %v6468_v10, %v16024_v39 }
 0xad6   : >> { %6884 = vxpose.xlu1.c.b16.start.end [1/1] (short) (narrow) %v6674_v14, 16  ;;  %v6690_v49 = vpack.i.b16 %v6689_v38, %v6688_v32  ;;  %v6696_v21 = vshrl.u32 %v6234_v52, 16  ;;  %v6605_v35 = vcombine.high %v17064_v41, %v17115_v57  ;;  %v6686_v25 = vpack.i.b16 %v6369_v44, %v6233_v56 }
 0xad7   : >> { %v6437_v14 = vcombine.high %v6380_v26, %v6396_v31  ;;  %v6573_v47 = vcombine.high %v6516_v20, %v17059_v23  ;;  %v6636_v22 = vcombine.low %v6580_v58, %v6612_v55  ;;  %v6705_v42 = vshrl.u32 %v6371_v50, 16 }
 0xad8   : >> { %6868 = vxpose.xlu0.c.b16.start.end [1/1] (short) (narrow) %v6670_v33, 16  ;;  %v6469_v28 = vcombine.high %v6412_v34, %v6428_v9  ;;  %v6500_v48 = vcombine.low %v6444_v2, %v6476_v19  ;;  %v6698_v36 = vpack.i.b16 %v6697_v53, %v6696_v21  ;;  %v6704_v40 = vshrl.u32 %v6235_v7, 16 }
 0xad9   : >> { %v6619_v8 = vrot.slane %v6605_v35, %v16024_v39  ;;  %v6694_v63 = vpack.i.b16 %v6370_v29, %v6234_v52  ;;  %v6451_v33 = vrot.slane %v6437_v14, %v16024_v39  ;;  %v6587_v41 = vrot.slane %v6573_v47, %v16024_v39 }
 0xada   : >> { %6916 = vxpose.xlu1.c.b16.start.end [1/1] (short) (narrow) %v6682_v59, 16  ;;  %v6637_v57 = vcombine.high %v6580_v58, %v6612_v55  ;;  %v6713_v44 = vshrl.u32 %v6636_v22, 16  ;;  %v6483_v26 = vrot.slane %v6469_v28, %v16024_v39  ;;  %v6501_v23 = vcombine.high %v6444_v2, %v6476_v19 }
 0xadb   : >> { %v6706_v20 = vpack.i.b16 %v6705_v42, %v6704_v40  ;;  %v6712_v31 = vshrl.u32 %v6500_v48, 16  ;;  %v6620_v34 = vcombine.low %v16994_v61, %v16997_v46  ;;  %v6702_v9 = vpack.i.b16 %v6371_v50, %v6235_v7 }
 0xadc   : >> { %6900 = vxpose.xlu0.c.b16.start.end [1/1] (short) (narrow) %v6678_v0, 16  ;;  %v6452_v56 = vcombine.low %v17108_v16, %v17128_v4  ;;  %v6588_v6 = vcombine.low %v16991_v60, %v16988_v18  ;;  %v6638_v51 = vcombine.low %v6587_v41, %v6619_v8  ;;  %v6721_v13 = vshrl.u32 %v6637_v57, 16 }
 0xadd   : >> { %v6484_v29 = vcombine.low %v17140_v5, %v17144_v30  ;;  %v6502_v38 = vcombine.low %v6451_v33, %v6483_v26  ;;  %v6714_v52 = vpack.i.b16 %v6713_v44, %v6712_v31  ;;  %v6720_v59 = vshrl.u32 %v6501_v23, 16 }
 0xade   : >> { %6948 = vxpose.xlu1.c.b16.start.end [1/1] (short) (narrow) %v6690_v49, 16  ;;  %v6628_v10 = vrot.slane %v6620_v34, %v16024_v39  ;;  %v6710_v61 = vpack.i.b16 %v6636_v22, %v6500_v48  ;;  %v6460_v46 = vrot.slane %v6452_v56, %v16024_v39  ;;  %v6596_v16 = vrot.slane %v6588_v6, %v16024_v39 }
 0xadf   : >> { %v6639_v4 = vcombine.high %v6587_v41, %v6619_v8  ;;  %v6729_v32 = vshrl.u32 %v6638_v51, 16  ;;  %v6492_v18 = vrot.slane %v6484_v29, %v16024_v39  ;;  %v6503_v60 = vcombine.high %v6451_v33, %v6483_v26 }
 0xae0   : >> { %6932 = vxpose.xlu0.c.b16.start.end [1/1] (short) (narrow) %v6686_v25, 16  ;;  %v6722_v55 = vpack.i.b16 %v6721_v13, %v6720_v59  ;;  %v6728_v5 = vshrl.u32 %v6502_v38, 16  ;;  %v6718_v30 = vpack.i.b16 %v6637_v57, %v6501_v23  ;;  %v6640_v0 = vcombine.low %v6596_v16, %v6628_v10 }
 0xae1   : >> { %v6504_v2 = vcombine.low %v6460_v46, %v6492_v18  ;;  %v6736_v50 = vshrl.u32 %v6503_v60, 16  ;;  %v6737_v53 = vshrl.u32 %v6639_v4, 16  ;;  %v6726_v7 = vpack.i.b16 %v6638_v51, %v6502_v38 }
 0xae2   : >> { %6980 = vxpose.xlu1.c.b16.start.end [1/1] (short) (narrow) %v6698_v36, 16  ;;  %v6730_v58 = vpack.i.b16 %v6729_v32, %v6728_v5  ;;  %v6641_v19 = vcombine.high %v6596_v16, %v6628_v10  ;;  %v6505_v49 = vcombine.high %v6460_v46, %v6492_v18  ;;  %v6745_v25 = vshrl.u32 %v6640_v0, 16 }
 0xae3   : >> { %v6738_v21 = vpack.i.b16 %v6737_v53, %v6736_v50  ;;  %v6744_v35 = vshrl.u32 %v6504_v2, 16  ;;  %v6734_v14 = vpack.i.b16 %v6639_v4, %v6503_v60  ;;  %v6642_v47 = vcombine.low %v17014_v1, %v17017_v11 }
 0xae4   : >> { %6964 = vxpose.xlu0.c.b16.start.end [1/1] (short) (narrow) %v6694_v63, 16  ;;  %v6506_v22 = vcombine.low %v17155_v62, %v17168_v12  ;;  %v6752_v28 = vshrl.u32 %v6505_v49, 16  ;;  %v6753_v48 = vshrl.u32 %v6641_v19, 16  ;;  %v6742_v36 = vpack.i.b16 %v6640_v0, %v6504_v2 }
 0xae5   : >> { %v6746_v42 = vpack.i.b16 %v6745_v25, %v6744_v35  ;;  %v6761_v63 = vshrl.u32 %v6642_v47, 16  ;;  %v6750_v33 = vpack.i.b16 %v6641_v19, %v6505_v49  ;;  %v18848_v54 = vpack.c.bf16 %v18847_v17, %v18847_v17 }
 0xae6   : >> { %7012 = vxpose.xlu1.c.b16.start.end [1/1] (short) (narrow) %v6706_v20, 16  ;;  %v6754_v40 = vpack.i.b16 %v6753_v48, %v6752_v28  ;;  %v6760_v8 = vshrl.u32 %v6506_v22, 16  ;;  %v6758_v1 = vpack.i.b16 %v6642_v47, %v6506_v22 }
 0xae8   : >> { %6996 = vxpose.xlu0.c.b16.start.end [1/1] (short) (narrow) %v6702_v9, 16  ;;  %v6762_v41 = vpack.i.b16 %v6761_v63, %v6760_v8 }
 0xaea   : >> { %7044 = vxpose.xlu1.c.b16.start.end [1/1] (short) (narrow) %v6714_v52, 16 }
 0xaec   : >> { %7028 = vxpose.xlu0.c.b16.start.end [1/1] (short) (narrow) %v6710_v61, 16 }
 0xaee   : >> { %7076 = vxpose.xlu1.c.b16.start.end [1/1] (short) (narrow) %v6722_v55, 16 }
 0xaf0   : >> { %7060 = vxpose.xlu0.c.b16.start.end [1/1] (short) (narrow) %v6718_v30, 16 }
 0xaf2   : >> { %7108 = vxpose.xlu1.c.b16.start.end [1/1] (short) (narrow) %v6730_v58, 16 }
 0xaf4   : >> { %7092 = vxpose.xlu0.c.b16.start.end [1/1] (short) (narrow) %v6726_v7, 16 }
 0xaf6   : >> { %7140 = vxpose.xlu1.c.b16.start.end [1/1] (short) (narrow) %v6738_v21, 16 }
 0xaf8   : >> { %7124 = vxpose.xlu0.c.b16.start.end [1/1] (short) (narrow) %v6734_v14, 16 }
 0xafa   : >> { %7172 = vxpose.xlu1.c.b16.start.end [1/1] (short) (narrow) %v6746_v42, 16 }
 0xafc   : >> { %7156 = vxpose.xlu0.c.b16.start.end [1/1] (short) (narrow) %v6742_v36, 16 }
 0xafe   : >> { %7204 = vxpose.xlu1.c.b16.start.end [1/1] (short) (narrow) %v6754_v40, 16 }
 0xb00   : >> { %7188 = vxpose.xlu0.c.b16.start.end [1/1] (short) (narrow) %v6750_v33, 16 }
 0xb02   : >> { %7236 = vxpose.xlu1.c.b16.start.end [1/1] (short) (narrow) %v6762_v41, 16 }
 0xb04   : >> { %7220 = vxpose.xlu0.c.b16.start.end [1/1] (short) (narrow) %v6758_v1, 16  ;;  %v18838_v1 = vld [vmem:[#allocation140_spill] sm:$0xff] }
 0xb30   : >> { %v6780_v11 = vpop.trf.xlu1 }
 0xb32   : >> { %v6796_v62 = vpop.trf.xlu0 }
 0xb34   : >> { %v6828_v12 = vpop.trf.xlu1 }
 0xb36   : >> { %v6812_v57 = vpop.trf.xlu0 }
 0xb38   : >> { %v6860_v44 = vpop.trf.xlu1 }
 0xb39   : >> { %v7334_v56 = vcombine.low %v6796_v62, %v6860_v44 }
 0xb3a   : >> { %v6844_v26 = vpop.trf.xlu0 }
 0xb3b   : >> { %v7284_v13 = vcombine.low %v6780_v11, %v6844_v26  ;;  %v7341_v52 = vrot.slane %v7334_v56, %v16019_v45  ;;  %v18839_v26 = vld [vmem:[#allocation211_spill] sm:$0xff]  ;;  %v18845_v56 = vld [vmem:[#allocation213_spill] sm:$0xff] }
 0xb3c   : >> { %v6892_v23 = vpop.trf.xlu1 }
 0xb3d   : >> { %v7342_v6 = vcombine.low %v6828_v12, %v6892_v23  ;;  %v7291_v46 = vrot.slane %v7284_v13, %v16019_v45  ;;  %v18840_v23 = vpack.c.bf16 %v18839_v26, %v18839_v26 }
 0xb3e   : >> { %v6876_v20 = vpop.trf.xlu0 }
 0xb3f   : >> { %v7292_v29 = vcombine.low %v6812_v57, %v6876_v20  ;;  %v7349_v59 = vrot.slane %v7342_v6, %v16019_v45  ;;  %v18841_v20 = vld [vmem:[#allocation212_spill] sm:$0xff]  ;;  %v18846_v6 = vpack.c.bf16 %v18845_v56, %v18845_v56 }
 0xb40   : >> { %v6924_v31 = vpop.trf.xlu1 }
 0xb41   : >> { %v7299_v16 = vrot.slane %v7292_v29, %v16019_v45  ;;  %v7366_v18 = vcombine.low %v7341_v52, %v7349_v59  ;;  %v18853_v29 = vld [vmem:[#allocation219_spill] sm:$0xff]  ;;  %v18855_v52 = vld [vmem:[#allocation218_spill] sm:$0xff] }
 0xb42   : >> { %v6908_v34 = vpop.trf.xlu0  ;;  %v18856_v59 = vpack.c.bf16 %v18855_v52, %v18855_v52 }
 0xb43   : >> { %v7316_v30 = vcombine.low %v7291_v46, %v7299_v16  ;;  %v7373_v50 = vrot.slane %v7366_v18, %v16024_v39  ;;  %v18859_v46 = vld [vmem:[#allocation227_spill] sm:$0xff]  ;;  %v18863_v18 = vld [vmem:[#allocation228_spill] sm:$0xff] }
 0xb44   : >> { %v6956_v9 = vpop.trf.xlu1  ;;  %v18860_v16 = vpack.c.bf16 %v18859_v46, %v18859_v46 }
 0xb45   : >> { %v7323_v19 = vrot.slane %v7316_v30, %v16024_v39 }
 0xb46   : >> { %v6940_v51 = vpop.trf.xlu0 }
 0xb48   : >> { %v6988_v38 = vpop.trf.xlu1 }
 0xb49   : >> { %v7350_v10 = vcombine.low %v6924_v31, %v6988_v38  ;;  %v18842_v31 = vpack.c.bf16 %v18841_v20, %v18841_v20  ;;  %v18854_v38 = vpack.c.bf16 %v18853_v29, %v18853_v29 }
 0xb4a   : >> { %v6972_v61 = vpop.trf.xlu0 }
 0xb4b   : >> { %v7300_v4 = vcombine.low %v6908_v34, %v6972_v61  ;;  %v7357_v60 = vrot.slane %v7350_v10, %v16019_v45  ;;  %v18843_v34 = vld [vmem:[#allocation215_spill] sm:$0xff]  ;;  %v18857_v10 = vld [vmem:[#allocation220_spill] sm:$0xff] }
 0xb4c   : >> { %v7020_v32 = vpop.trf.xlu1  ;;  %v18858_v61 = vpack.c.bf16 %v18857_v10, %v18857_v10 }
 0xb4d   : >> { %v7358_v55 = vcombine.low %v6956_v9, %v7020_v32  ;;  %v7307_v0 = vrot.slane %v7300_v4, %v16019_v45  ;;  %v18844_v9 = vpack.c.bf16 %v18843_v34, %v18843_v34  ;;  %v18861_v4 = vld [vmem:[#allocation221_spill] sm:$0xff] }
 0xb4e   : >> { %v7004_v5 = vpop.trf.xlu0  ;;  %v18862_v32 = vpack.c.bf16 %v18861_v4, %v18861_v4 }
 0xb4f   : >> { %v7365_v2 = vrot.slane %v7358_v55, %v16019_v45  ;;  %v7308_v58 = vcombine.low %v6940_v51, %v7004_v5  ;;  %v18865_v55 = vld [vmem:[#allocation222_spill] sm:$0xff] }
 0xb50   : >> { %v18866_v5 = vpack.c.bf16 %v18865_v55, %v18865_v55  ;;  %v7052_v30 = vpop.trf.xlu1 }
 0xb51   : >> { %v7374_v53 = vcombine.low %v7357_v60, %v7365_v2  ;;  %v7315_v7 = vrot.slane %v7308_v58, %v16019_v45  ;;  %v18864_v60 = vpack.c.bf16 %v18863_v18, %v18863_v18  ;;  %v18867_v2 = vld [vmem:[#allocation229_spill] sm:$0xff] }
 0xb52   : >> { %v18868_v58 = vpack.c.bf16 %v18867_v2, %v18867_v2 }
 0xb53   : >> { %v7381_v49 = vrot.slane %v7374_v53, %v16024_v39  ;;  %v7324_v21 = vcombine.low %v7307_v0, %v7315_v7  ;;  %v7036_v0 = vpop.trf.xlu0  ;;  %v18869_v53 = vld [vmem:[#allocation230_spill] sm:$0xff] }
 0xb54   : >> { %v18870_v7 = vpack.c.bf16 %v18869_v53, %v18869_v53 }
 0xb55   : >> { %v7382_v35 = vcombine.low %v7373_v50, %v7381_v49  ;;  %v17234_v25 = vcombine.high %v7373_v50, %v7381_v49  ;;  %v7331_v14 = vrot.slane %v7324_v21, %v16024_v39  ;;  %v7084_v50 = vpop.trf.xlu1 }
 0xb57   : >> { %v7489_v47 = vshrl.u32 %v7382_v35, 16  ;;  %v7497_v22 = vshrl.u32 %v17234_v25, 16  ;;  %v7332_v42 = vcombine.low %v7323_v19, %v7331_v14  ;;  %v17238_v28 = vcombine.high %v7323_v19, %v7331_v14  ;;  %v7068_v19 = vpop.trf.xlu0 }
 0xb59   : >> { %v7488_v48 = vshrl.u32 %v7332_v42, 16  ;;  %v7496_v36 = vshrl.u32 %v17238_v28, 16  ;;  %v7486_v40 = vpack.i.b16 %v7382_v35, %v7332_v42  ;;  %v7494_v8 = vpack.i.b16 %v17234_v25, %v17238_v28  ;;  %v7116_v49 = vpop.trf.xlu1 }
 0xb5b   : >> { %14827 = vmatpush3.bf16.msra.mxu0 %v7486_v40  ;;  %v7490_v63 = vpack.i.b16 %v7489_v47, %v7488_v48  ;;  %v17243_v33 = vpack.i.b16 %v7497_v22, %v7496_v36  ;;  %v7100_v21 = vpop.trf.xlu0 }
 0xb5c   : >> { %14828 = vmatprep.subr.bf16.mxu0 %v18774_v37 }
 0xb5d   : >> { %14835 = vmatpush3.bf16.msra.mxu1 %v7490_v63  ;;  %v7148_v35 = vpop.trf.xlu1 }
 0xb5e   : >> { %14836 = vmatprep.subr.bf16.mxu1 %v18774_v37 }
 0xb5f   : >> { %v7132_v14 = vpop.trf.xlu0 }
 0xb61   : >> { %v7180_v47 = vpop.trf.xlu1 }
 0xb63   : >> { %v7164_v22 = vpop.trf.xlu0 }
 0xb65   : >> { %v7212_v42 = vpop.trf.xlu1 }
 0xb67   : >> { %v7196_v48 = vpop.trf.xlu0 }
 0xb69   : >> { %v7244_v36 = vpop.trf.xlu1 }
 0xb6b   : >> { %v7228_v40 = vpop.trf.xlu0 }
 0xb72   : >> { %v5689_v41 = vpop.f32.mrb[36].mxu1 }
 0xb73   : >> { %v5690_v11 = vadd.f32 %v18838_v1, %v5689_v41  ;;  %v14824_v62 = vpop.f32.mrb[37].mxu1 }
 0xb74   : >> { %v5692_v12 = vpop.f32.mrb[38].mxu1 }
 0xb75   : >> { %v5695_v57 = vmul.f32 0.17677669, %v5690_v11  ;;  %v14825_v44 = vpop.f32.mrb[39].mxu1 }
 0xb77   : >> { %5697 = vrot.lane.b32.xlu1 %v5695_v57, %s15262_s18  ;;  %5700 = vrot.lane.b32.xlu0 %v5695_v57, %s15263_s15 }
 0xb7b   : >> { %5703 = vrot.lane.b32.xlu1 %v5695_v57, %s15261_s24 }
 0xb95   : >> { %7252 = vxpose.xlu0.c.b16.start.end [1/1] (short) (narrow) %v6766_v24, 16  ;;  %v18849_v24 = vld [vmem:[#allocation214_spill] sm:$0xff] }
 0xb96   : >> { %v18850_v51 = vpack.c.bf16 %v18849_v24, %v18849_v24 }
 0xb99   : >> { %7733 = vxpose.xlu0.c.b16.start.end [1/1] (short) (narrow) %v18840_v23, 32 }
 0xb9e   : >> { %7268 = vxpose.xlu1.c.b16.start.end [1/1] (short) (narrow) %v17193_v27, 16  ;;  %7765 = vxpose.xlu0.c.b16.start.end [1/1] (short) (narrow) %v18842_v31, 32  ;;  %v18851_v27 = vld [vmem:[#allocation217_spill] sm:$0xff] }
 0xb9f   : >> { %v18852_v13 = vpack.c.bf16 %v18851_v27, %v18851_v27 }
 0xba2   : >> { %7749 = vxpose.xlu1.c.b16.start.end [1/1] (short) (narrow) %v18844_v9, 32 }
 0xba3   : >> { %7797 = vxpose.xlu0.c.b16.start.end [1/1] (short) (narrow) %v18846_v6, 32 }
 0xba7   : >> { %7781 = vxpose.xlu1.c.b16.start.end [1/1] (short) (narrow) %v18848_v54, 32 }
 0xba8   : >> { %7829 = vxpose.xlu0.c.b16.start.end [1/1] (short) (narrow) %v18850_v51, 32 }
 0xbac   : >> { %7813 = vxpose.xlu1.c.b16.start.end [1/1] (short) (narrow) %v18852_v13, 32 }
 0xbad   : >> { %7861 = vxpose.xlu0.c.b16.start.end [1/1] (short) (narrow) %v18854_v38, 32 }
 0xbb1   : >> { %7845 = vxpose.xlu1.c.b16.start.end [1/1] (short) (narrow) %v18856_v59, 32 }
 0xbb2   : >> { %7893 = vxpose.xlu0.c.b16.start.end [1/1] (short) (narrow) %v18858_v61, 32 }
 0xbb6   : >> { %7877 = vxpose.xlu1.c.b16.start.end [1/1] (short) (narrow) %v18860_v16, 32 }
 0xbb7   : >> { %7925 = vxpose.xlu0.c.b16.start.end [1/1] (short) (narrow) %v18862_v32, 32 }
 0xbbb   : >> { %7909 = vxpose.xlu1.c.b16.start.end [1/1] (short) (narrow) %v18864_v60, 32 }
 0xbbc   : >> { %7957 = vxpose.xlu0.c.b16.start.end [1/1] (short) (narrow) %v18866_v5, 32 }
 0xbc0   : >> { %7941 = vxpose.xlu1.c.b16.start.end [1/1] (short) (narrow) %v18868_v58, 32 }
 0xbc5   : >> { %7973 = vxpose.xlu1.c.b16.start.end [1/1] (short) (narrow) %v18870_v7, 32 }
 0xbe9   : >> { %v5698_v63 = vpop.permute.xlu1 %5697  ;;  %v5701_v41 = vpop.permute.xlu0 %5700 }
 0xbea   : >> { %v5706_v1 = vcombine.low %v5695_v57, %v5701_v41  ;;  %v5707_v62 = vcombine.high %v5695_v57, %v5701_v41  ;;  %v7384_v41 = vcombine.low %v7036_v0, %v7100_v21 }
 0xbec   : >> { %v5714_v9 = vrot.slane %v5706_v1, %v16019_v45  ;;  %v5721_v6 = vrot.slane %v5707_v62, %v16019_v45  ;;  %v7392_v1 = vcombine.low %v7068_v19, %v7132_v14  ;;  %v7434_v62 = vcombine.low %v7052_v30, %v7116_v49 }
 0xbed   : >> { %v5704_v11 = vpop.permute.xlu1 %5703  ;;  %v7450_v30 = vcombine.low %v7180_v47, %v7244_v36 }
 0xbee   : >> { %v5722_v12 = vcombine.low %v5698_v63, %v5704_v11  ;;  %v5723_v44 = vcombine.high %v5698_v63, %v5704_v11  ;;  %v7400_v11 = vcombine.low %v7164_v22, %v7228_v40  ;;  %v7441_v0 = vrot.slane %v7434_v62, %v16019_v45 }
 0xbf0   : >> { %v5730_v23 = vrot.slane %v5722_v12, %v16019_v45  ;;  %v5737_v31 = vrot.slane %v5723_v44, %v16019_v45  ;;  %v7442_v12 = vcombine.low %v7084_v50, %v7148_v35 }
 0xbf2   : >> { %v5738_v54 = vcombine.low %v5714_v9, %v5730_v23  ;;  %v5739_v51 = vcombine.high %v5714_v9, %v5730_v23  ;;  %v5754_v13 = vcombine.low %v5721_v6, %v5737_v31  ;;  %v5755_v38 = vcombine.high %v5721_v6, %v5737_v31 }
 0xbf3   : >> { %v7391_v6 = vrot.slane %v7384_v41, %v16019_v45  ;;  %v7449_v19 = vrot.slane %v7442_v12, %v16019_v45 }
 0xbf4   : >> { %v5746_v59 = vrot.slane %v5738_v54, %v16024_v39  ;;  %v5753_v61 = vrot.slane %v5739_v51, %v16024_v39  ;;  %v5762_v57 = vrot.slane %v5754_v13, %v16024_v39  ;;  %v5769_v16 = vrot.slane %v5755_v38, %v16024_v39 }
 0xbf5   : >> { %v7399_v54 = vrot.slane %v7392_v1, %v16019_v45  ;;  %v7407_v51 = vrot.slane %v7400_v11, %v16019_v45 }
 0xbf6   : >> { %v5770_v32 = vcombine.high %v5746_v59, %v18774_v37  ;;  %v5771_v5 = vcombine.high %v5753_v61, %v18774_v37  ;;  %v5772_v58 = vcombine.high %v5762_v57, %v18774_v37  ;;  %v5773_v7 = vcombine.high %v5769_v16, %v18774_v37 }
 0xbf7   : >> { %v14287_v13 = vpack.c.bf16 %v5762_v57, %v5746_v59  ;;  %v14288_v38 = vpack.c.bf16 %v5769_v16, %v5753_v61  ;;  %v7416_v22 = vcombine.low %v7391_v6, %v7399_v54  ;;  %v7466_v61 = vcombine.low %v7441_v0, %v7449_v19 }
 0xbf8   : >> { %v14289_v31 = vpack.c.bf16 %v5772_v58, %v5770_v32  ;;  %v14290_v9 = vpack.c.bf16 %v5773_v7, %v5771_v5  ;;  %v7457_v57 = vrot.slane %v7450_v30, %v16019_v45 }
 0xbf9   : >> { %v5789_v40 = vrot.slane %v14287_v13, %v16019_v45  ;;  %v5797_v59 = vrot.slane %v14288_v38, %v16019_v45  ;;  %v7423_v5 = vrot.slane %v7416_v22, %v16024_v39  ;;  %v7473_v7 = vrot.slane %v7466_v61, %v16024_v39 }
 0xbfa   : >> { %v5814_v21 = vrot.slane %v14289_v31, %v16019_v45  ;;  %v5822_v35 = vrot.slane %v14290_v9, %v16019_v45 }
 0xbfb   : >> { %v7260_v60 = vpop.trf.xlu0 }
 0xbfc   : >> { %v7408_v63 = vcombine.low %v7196_v48, %v7260_v60  ;;  %v5823_v32 = vcombine.low %v5814_v21, %v5822_v35 }
 0xbfe   : >> { %v7415_v44 = vrot.slane %v7408_v63, %v16019_v45  ;;  %v5830_v11 = vrot.slane %v5823_v32, %v16024_v39 }
 0xbff   : >> { %v17316_v23 = vpop.trf.xlu0 }
 0xc00   : >> { %v7424_v50 = vcombine.low %v7407_v51, %v7415_v44  ;;  %v5836_v13 = vshrl.u32 %v5830_v11, 16  ;;  %v5831_v22 = vcombine.high %v5830_v11, %v18776_v3 }
 0xc02   : >> { %v7431_v16 = vrot.slane %v7424_v50, %v16024_v39  ;;  %v5842_v25 = vshrl.u32 %v5831_v22, 16 }
 0xc03   : >> { %v17323_v49 = vpop.trf.xlu0 }
 0xc04   : >> { %v7276_v14 = vpop.trf.xlu1  ;;  %v7432_v63 = vcombine.low %v7423_v5, %v7431_v16  ;;  %v7433_v50 = vcombine.high %v7423_v5, %v7431_v16 }
 0xc05   : >> { %v7458_v48 = vcombine.low %v7212_v42, %v7276_v14  ;;  %v5798_v42 = vcombine.low %v5789_v40, %v5797_v59 }
 0xc06   : >> { %v7504_v31 = vshrl.u32 %v7432_v63, 16  ;;  %v7512_v59 = vshrl.u32 %v7433_v50, 16 }
 0xc07   : >> { %v7465_v47 = vrot.slane %v7458_v48, %v16019_v45  ;;  %v17332_v36 = vpop.trf.xlu0  ;;  %v5805_v44 = vrot.slane %v5798_v42, %v16024_v39 }
 0xc08   : >> { %v17334_v60 = vpop.trf.xlu1 }
 0xc09   : >> { %v7474_v58 = vcombine.low %v7457_v57, %v7465_v47  ;;  %v5834_v19 = vpack.i.b16 %v5830_v11, %v5805_v44  ;;  %v5835_v30 = vshrl.u32 %v5805_v44, 16  ;;  %v5806_v40 = vcombine.high %v5805_v44, %v18776_v3 }
 0xc0b   : >> { %v7481_v41 = vrot.slane %v7474_v58, %v16024_v39  ;;  %v7774_v1 = vpop.trf.xlu0  ;;  %v5837_v14 = vpack.i.b16 %v5836_v13, %v5835_v30  ;;  %v5840_v47 = vpack.i.b16 %v5831_v22, %v5806_v40  ;;  %v5841_v5 = vshrl.u32 %v5806_v40, 16 }
 0xc0c   : >> { %v17340_v62 = vpop.trf.xlu1 }
 0xc0d   : >> { %v7482_v12 = vcombine.low %v7473_v7, %v7481_v41  ;;  %v7483_v38 = vcombine.high %v7473_v7, %v7481_v41  ;;  %v5843_v42 = vpack.i.b16 %v5842_v25, %v5841_v5 }
 0xc0f   : >> { %v7505_v9 = vshrl.u32 %v7482_v12, 16  ;;  %v7502_v6 = vpack.i.b16 %v7482_v12, %v7432_v63  ;;  %v17343_v54 = vpop.trf.xlu0  ;;  %v7513_v48 = vshrl.u32 %v7483_v38, 16  ;;  %v7510_v61 = vpack.i.b16 %v7483_v38, %v7433_v50 }
 0xc10   : >> { %v17345_v51 = vpop.trf.xlu1 }
 0xc11   : >> { %14829 = vmatpush3.bf16.msra.mxu0 %v7502_v6  ;;  %v7506_v0 = vpack.i.b16 %v7505_v9, %v7504_v31  ;;  %v7514_v28 = vpack.i.b16 %v7513_v48, %v7512_v59  ;;  %v7989_v48 = vcombine.low %v17316_v23, %v17343_v54  ;;  %v7990_v59 = vcombine.high %v17316_v23, %v17343_v54 }
 0xc12   : >> { %14842 = vmatprep.subr.bf16.mxu0 %v18774_v37 }
 0xc13   : >> { %14837 = vmatpush3.bf16.msra.mxu1 %v7506_v0  ;;  %v7806_v21 = vpop.trf.xlu0 }
 0xc14   : >> { %v17348_v35 = vpop.trf.xlu1  ;;  %14831 = vmatmul.mubr.msk.bf16.vlgmr.msra.gmra.mrb[12].mxu0 %vm3431_vm2, %v5834_v19  ;;  %14850 = vmatprep.subr.bf16.mxu1 %v18774_v37  ;;  %v8262_v32 = vcombine.high %v17323_v49, %v7806_v21 }
 0xc15   : >> { %14843 = vmatpush3.bf16.msra.mxu0 %v7494_v8  ;;  %14846 = vmatprep.mubr.msk.bf16.mxu0 %vm15260_vm1, %v18774_v37  ;;  %v8261_v8 = vcombine.low %v17323_v49, %v7806_v21 }
 0xc16   : >> { %14839 = vmatmul.mubr.msk.bf16.vlgmr.msra.gmra.mrb[40].mxu1 %vm3431_vm2, %v5837_v14  ;;  %14844 = vmatprep.subr.bf16.mxu0 %v18774_v37  ;;  %v17376_v11 = vrot.slane %v8262_v32, %v16019_v45 }
 0xc17   : >> { %14851 = vmatpush3.bf16.msra.mxu1 %v17243_v33  ;;  %14854 = vmatprep.mubr.msk.bf16.mxu1 %vm15260_vm1, %v18774_v37  ;;  %v7837_v57 = vpop.trf.xlu0  ;;  %v17373_v7 = vrot.slane %v8261_v8, %v16019_v45 }
 0xc18   : >> { %v17364_v16 = vpop.trf.xlu1  ;;  %14852 = vmatprep.subr.bf16.mxu1 %v18774_v37  ;;  %v8005_v40 = vcombine.low %v17332_v36, %v7837_v57 }
 0xc19   : >> { %14845 = vmatpush3.bf16.msra.mxu0 %v7510_v61  ;;  %v8006_v61 = vcombine.high %v17332_v36, %v7837_v57  ;;  %v8125_v5 = vcombine.low %v17334_v60, %v17364_v16 }
 0xc1a   : >> { %v8013_v32 = vrot.slane %v8005_v40, %v16019_v45 }
 0xc1b   : >> { %14853 = vmatpush3.bf16.msra.mxu1 %v7514_v28  ;;  %v7838_v33 = vpop.trf.xlu0  ;;  %v8020_v23 = vrot.slane %v8006_v61, %v16019_v45 }
 0xc1c   : >> { %v17369_v58 = vpop.trf.xlu1  ;;  %14847 = vmatmul.mubr.msk.bf16.vlgmr.msra.gmra.mrb[16].mxu0 %vm3431_vm2, %v5840_v47  ;;  %v8277_v63 = vcombine.low %v7774_v1, %v7838_v33  ;;  %v8278_v41 = vcombine.high %v7774_v1, %v7838_v33  ;;  %v7997_v47 = vrot.slane %v7989_v48, %v16019_v45  ;;  %v8004_v33 = vrot.slane %v7990_v59, %v16019_v45 }
 0xc1d   : >> { %v8133_v1 = vrot.slane %v8125_v5, %v16019_v45  ;;  %v8397_v61 = vcombine.low %v17340_v62, %v17369_v58 }
 0xc1e   : >> { %14855 = vmatmul.mubr.msk.bf16.vlgmr.msra.gmra.mrb[44].mxu1 %vm3431_vm2, %v5843_v42  ;;  %v17380_v49 = vrot.slane %v8277_v63, %v16019_v45  ;;  %v17383_v12 = vrot.slane %v8278_v41, %v16019_v45  ;;  %v8126_v41 = vcombine.high %v17334_v60, %v17364_v16  ;;  %v8053_v48 = vcombine.low %v7997_v47, %v8013_v32 }
 0xc1f   : >> { %v17385_v44 = vpop.trf.xlu0  ;;  %v8054_v40 = vcombine.high %v7997_v47, %v8013_v32  ;;  %v8069_v9 = vcombine.low %v8004_v33, %v8020_v23  ;;  %v8070_v13 = vcombine.high %v8004_v33, %v8020_v23 }
 0xc20   : >> { %v7853_v31 = vpop.trf.xlu1  ;;  %v17439_v16 = vrot.slane %v8126_v41, %v16019_v45  ;;  %v8061_v32 = vrot.slane %v8053_v48, %v16024_v39 }
 0xc21   : >> { %v8141_v42 = vcombine.low %v17345_v51, %v7853_v31  ;;  %v8142_v47 = vcombine.high %v17345_v51, %v7853_v31  ;;  %v17444_v5 = vrot.slane %v8054_v40, %v16024_v39  ;;  %v17447_v33 = vrot.slane %v8069_v9, %v16024_v39 }
 0xc23   : >> { %v17395_v38 = vpop.trf.xlu0  ;;  %v8149_v59 = vrot.slane %v8141_v42, %v16019_v45 }
 0xc24   : >> { %v17397_v0 = vpop.trf.xlu1 }
 0xc25   : >> { %v8189_v42 = vcombine.low %v8133_v1, %v8149_v59  ;;  %v8414_v23 = vcombine.high %v17348_v35, %v17397_v0 }
 0xc27   : >> { %v17399_v19 = vpop.trf.xlu0 }
 0xc28   : >> { %v7885_v30 = vpop.trf.xlu1 }
 0xc2b   : >> { %v17401_v50 = vpop.trf.xlu0 }
 0xc2c   : >> { %v17403_v21 = vpop.trf.xlu1 }
 0xc2f   : >> { %v7933_v14 = vpop.trf.xlu0 }
 0xc30   : >> { %v17405_v22 = vpop.trf.xlu1  ;;  %v8021_v8 = vcombine.low %v17385_v44, %v7933_v14 }
 0xc32   : >> { %v8029_v63 = vrot.slane %v8021_v8, %v16019_v45  ;;  %v8398_v8 = vcombine.high %v17340_v62, %v17369_v58  ;;  %v8022_v62 = vcombine.high %v17385_v44, %v7933_v14  ;;  %v17453_v58 = vrot.slane %v8397_v61, %v16019_v45 }
 0xc33   : >> { %v17413_v25 = vpop.trf.xlu0  ;;  %v17466_v44 = vrot.slane %v8142_v47, %v16019_v45  ;;  %v8190_v14 = vcombine.high %v8133_v1, %v8149_v59 }
 0xc34   : >> { %v17415_v28 = vpop.trf.xlu1  ;;  %v17460_v48 = vrot.slane %v8398_v8, %v16019_v45  ;;  %v8294_v1 = vcombine.high %v17395_v38, %v17413_v25 }
 0xc37   : >> { %v7965_v36 = vpop.trf.xlu0 }
 0xc38   : >> { %v7949_v54 = vpop.trf.xlu1  ;;  %v8037_v57 = vcombine.low %v17399_v19, %v7965_v36  ;;  %v8038_v41 = vcombine.high %v17399_v19, %v7965_v36  ;;  %v17471_v19 = vrot.slane %v8414_v23, %v16019_v45  ;;  %v17474_v36 = vrot.slane %v8022_v62, %v16019_v45 }
 0xc39   : >> { %v8157_v4 = vcombine.low %v7885_v30, %v7949_v54  ;;  %v8158_v51 = vcombine.high %v7885_v30, %v7949_v54  ;;  %v8197_v30 = vrot.slane %v8189_v42, %v16024_v39 }
 0xc3a   : >> { %v8045_v6 = vrot.slane %v8037_v57, %v16019_v45  ;;  %v17456_v57 = vrot.slane %v8070_v13, %v16024_v39 }
 0xc3b   : >> { %v8165_v9 = vrot.slane %v8157_v4, %v16019_v45  ;;  %v17477_v54 = vpop.trf.xlu0  ;;  %v17480_v8 = vrot.slane %v8158_v51, %v16019_v45 }
 0xc3c   : >> { %v17434_v2 = vpop.trf.xlu1  ;;  %v8085_v60 = vcombine.low %v8029_v63, %v8045_v6  ;;  %v8086_v61 = vcombine.high %v8029_v63, %v8045_v6  ;;  %v17485_v6 = vrot.slane %v8038_v41, %v16019_v45  ;;  %v8204_v41 = vrot.slane %v8190_v14, %v16024_v39 }
 0xc3d   : >> { %v8430_v63 = vcombine.high %v17403_v21, %v17434_v2 }
 0xc3e   : >> { %v8093_v10 = vrot.slane %v8085_v60, %v16024_v39  ;;  %v8100_v62 = vrot.slane %v8086_v61, %v16024_v39 }
 0xc3f   : >> { %v17515_v14 = vrot.slane %v8430_v63, %v16019_v45  ;;  %v8206_v63 = vcombine.high %v17439_v16, %v17466_v44 }
 0xc40   : >> { %v7981_v31 = vpop.trf.xlu1  ;;  %v8117_v47 = vcombine.low %v8061_v32, %v8093_v10  ;;  %v8118_v51 = vcombine.high %v8061_v32, %v8093_v10  ;;  %v8101_v10 = vcombine.low %v17474_v36, %v17485_v6  ;;  %v8119_v20 = vcombine.low %v17444_v5, %v8100_v62 }
 0xc41   : >> { %v8173_v40 = vcombine.low %v17405_v22, %v7981_v31  ;;  %v8174_v13 = vcombine.high %v17405_v22, %v7981_v31  ;;  %v8310_v22 = vcombine.high %v17401_v50, %v17477_v54 }
 0xc42   : >> { %v8545_v24 = vshrl.u32 %v8118_v51, 16 }
 0xc43   : >> { %v8181_v4 = vrot.slane %v8173_v40, %v16019_v45  ;;  %v17494_v23 = vrot.slane %v8174_v13, %v16019_v45  ;;  %v8205_v40 = vcombine.low %v17439_v16, %v17466_v44  ;;  %v17507_v13 = vrot.slane %v8294_v1, %v16019_v45 }
 0xc44   : >> { %v17491_v42 = vpop.trf.xlu1  ;;  %v17512_v32 = vrot.slane %v8310_v22, %v16019_v45  ;;  %v8553_v44 = vshrl.u32 %v8119_v20, 16 }
 0xc45   : >> { %v8221_v59 = vcombine.low %v8165_v9, %v8181_v4  ;;  %v8222_v60 = vcombine.high %v8165_v9, %v8181_v4  ;;  %v8446_v31 = vcombine.high %v17415_v28, %v17491_v42  ;;  %v8478_v4 = vcombine.high %v17460_v48, %v17471_v19 }
 0xc46   : >> { %v8213_v46 = vrot.slane %v8205_v40, %v16024_v39 }
 0xc47   : >> { %v8229_v17 = vrot.slane %v8221_v59, %v16024_v39  ;;  %v8236_v9 = vrot.slane %v8222_v60, %v16024_v39  ;;  %v8537_v59 = vshrl.u32 %v8117_v47, 16  ;;  %v8237_v60 = vcombine.low %v17480_v8, %v17494_v23 }
 0xc48   : >> { %v17521_v1 = vrot.slane %v8446_v31, %v16019_v45  ;;  %v8374_v31 = vcombine.high %v17507_v13, %v17512_v32  ;;  %v17538_v16 = vrot.slane %v8478_v4, %v16024_v39 }
 0xc49   : >> { %v8253_v61 = vcombine.low %v8197_v30, %v8229_v17  ;;  %v8254_v18 = vcombine.high %v8197_v30, %v8229_v17  ;;  %v8255_v26 = vcombine.low %v8204_v41, %v8236_v9  ;;  %v8413_v17 = vcombine.low %v17348_v35, %v17397_v0 }
 0xc4a   : >> { %v18871_v30 = vcombine.high %v17376_v11, %v17383_v12  ;;  %v8245_v35 = vrot.slane %v8237_v60, %v16024_v39  ;;  %v8120_v0 = vcombine.high %v17444_v5, %v8100_v62  ;;  %v8510_v40 = vcombine.high %v17515_v14, %v17521_v1 }
 0xc4b   : >> { %v8535_v27 = vpack.i.b16 %v8253_v61, %v8117_v47  ;;  %v8538_v29 = vshrl.u32 %v8253_v61, 16  ;;  %v8546_v22 = vshrl.u32 %v8254_v18, 16  ;;  %v8109_v47 = vrot.slane %v8101_v10, %v16024_v39 }
 0xc4c   : >> { %v17531_v34 = vrot.slane %v18871_v30, %v16024_v39  ;;  %v8543_v52 = vpack.i.b16 %v8254_v18, %v8118_v51  ;;  %v8256_v30 = vcombine.high %v8204_v41, %v8236_v9  ;;  %v8554_v55 = vshrl.u32 %v8255_v26, 16 }
 0xc4d   : >> { %8661 = vxpose.xlu0.c.b16.start.end [1/1] (short) (narrow) %v8535_v27, 16  ;;  %v8539_v61 = vpack.i.b16 %v8538_v29, %v8537_v59  ;;  %v8547_v53 = vpack.i.b16 %v8546_v22, %v8545_v24  ;;  %v8429_v27 = vcombine.low %v17403_v21, %v17434_v2  ;;  %v8293_v29 = vcombine.low %v17395_v38, %v17413_v25 }
 0xc4e   : >> { %v8102_v18 = vcombine.high %v17474_v36, %v17485_v6  ;;  %v17551_v51 = vrot.slane %v8374_v31, %v16024_v39  ;;  %v8121_v5 = vcombine.low %v17447_v33, %v8109_v47  ;;  %v8551_v24 = vpack.i.b16 %v8255_v26, %v8119_v20 }
 0xc4f   : >> { %8677 = vxpose.xlu1.c.b16.start.end [1/1] (short) (narrow) %v8539_v61, 16  ;;  %v17555_v62 = vrot.slane %v8510_v40, %v16024_v39  ;;  %v8309_v41 = vcombine.low %v17401_v50, %v17477_v54  ;;  %v8220_v2 = vrot.slane %v8206_v63, %v16024_v39  ;;  %v8238_v38 = vcombine.high %v17480_v8, %v17494_v23 }
 0xc50   : >> { %v8257_v21 = vcombine.low %v8213_v46, %v8245_v35  ;;  %v8445_v25 = vcombine.low %v17415_v28, %v17491_v42  ;;  %v8555_v36 = vpack.i.b16 %v8554_v55, %v8553_v44  ;;  %v8561_v6 = vshrl.u32 %v8120_v0, 16 }
 0xc51   : >> { %8693 = vxpose.xlu0.c.b16.start.end [1/1] (short) (narrow) %v8543_v52, 16  ;;  %v8562_v52 = vshrl.u32 %v8256_v30, 16  ;;  %v17566_v26 = vcombine.high %v17538_v16, %v17555_v62  ;;  %v17569_v20 = vrot.slane %v8413_v17, %v16019_v45  ;;  %v17572_v50 = vrot.slane %v8293_v29, %v16019_v45 }
 0xc52   : >> { %v8116_v54 = vrot.slane %v8102_v18, %v16024_v39  ;;  %v17577_v8 = vcombine.high %v17531_v34, %v17551_v51  ;;  %v8437_v55 = vrot.slane %v8429_v27, %v16019_v45  ;;  %v8569_v28 = vshrl.u32 %v8121_v5, 16 }
 0xc53   : >> { %8709 = vxpose.xlu1.c.b16.start.end [1/1] (short) (narrow) %v8547_v53, 16  ;;  %v8559_v53 = vpack.i.b16 %v8256_v30, %v8120_v0  ;;  %v8317_v42 = vrot.slane %v8309_v41, %v16019_v45  ;;  %v8252_v23 = vrot.slane %v8238_v38, %v16024_v39  ;;  %v8570_v9 = vshrl.u32 %v8257_v21, 16 }
 0xc54   : >> { %v8453_v4 = vrot.slane %v8445_v25, %v16019_v45  ;;  %v8655_v10 = vpack.i.b16 %v17566_v26, %v17577_v8  ;;  %v8258_v59 = vcombine.high %v8213_v46, %v8245_v35  ;;  %v8122_v60 = vcombine.high %v17447_v33, %v8109_v47 }
 0xc55   : >> { %8725 = vxpose.xlu0.c.b16.start.end [1/1] (short) (narrow) %v8551_v24, 16  ;;  %v8563_v22 = vpack.i.b16 %v8562_v52, %v8561_v6  ;;  %v8461_v63 = vcombine.low %v17453_v58, %v17569_v20  ;;  %v8123_v17 = vcombine.low %v17456_v57, %v8116_v54  ;;  %v8567_v31 = vpack.i.b16 %v8257_v21, %v8121_v5 }
 0xc56   : >> { %v8259_v61 = vcombine.low %v8220_v2, %v8252_v23  ;;  %v8571_v0 = vpack.i.b16 %v8570_v9, %v8569_v28  ;;  %v8493_v44 = vcombine.low %v8437_v55, %v8453_v4  ;;  %v8357_v30 = vcombine.low %v17572_v50, %v8317_v42 }
 0xc57   : >> { %8741 = vxpose.xlu1.c.b16.start.end [1/1] (short) (narrow) %v8555_v36, 16  ;;  %v8658_v40 = vshrl.u32 %v17566_v26, 16  ;;  %v8657_v46 = vshrl.u32 %v17577_v8, 16  ;;  %v8577_v33 = vshrl.u32 %v8122_v60, 16  ;;  %v8578_v47 = vshrl.u32 %v8258_v59, 16 }
 0xc58   : >> { %v8469_v35 = vrot.slane %v8461_v63, %v16024_v39  ;;  %v18872_v27 = vcombine.low %v17373_v7, %v17380_v49  ;;  %v8575_v18 = vpack.i.b16 %v8258_v59, %v8122_v60  ;;  %v8260_v5 = vcombine.high %v8220_v2, %v8252_v23 }
 0xc59   : >> { %8757 = vxpose.xlu0.c.b16.start.end [1/1] (short) (narrow) %v8559_v53, 16  ;;  %v8124_v24 = vcombine.high %v17456_v57, %v8116_v54  ;;  %v8501_v41 = vrot.slane %v8493_v44, %v16024_v39  ;;  %v8365_v38 = vrot.slane %v8357_v30, %v16024_v39  ;;  %v8579_v21 = vpack.i.b16 %v8578_v47, %v8577_v33 }
 0xc5a   : >> { %v8333_v29 = vrot.slane %v18872_v27, %v16024_v39  ;;  %v8585_v25 = vshrl.u32 %v8123_v17, 16  ;;  %v8586_v36 = vshrl.u32 %v8259_v61, 16  ;;  %v17600_v6 = vpack.i.b16 %v8658_v40, %v8657_v46 }
 0xc5b   : >> { %8773 = vxpose.xlu1.c.b16.start.end [1/1] (short) (narrow) %v8563_v22, 16  ;;  %v8583_v52 = vpack.i.b16 %v8259_v61, %v8123_v17  ;;  %v8525_v28 = vcombine.low %v8469_v35, %v8501_v41  ;;  %v8593_v59 = vshrl.u32 %v8124_v24, 16  ;;  %v8594_v2 = vshrl.u32 %v8260_v5, 16 }
 0xc5c   : >> { %v8389_v53 = vcombine.low %v8333_v29, %v8365_v38  ;;  %v8587_v9 = vpack.i.b16 %v8586_v36, %v8585_v25  ;;  %v8462_v57 = vcombine.high %v17453_v58, %v17569_v20  ;;  %v8494_v54 = vcombine.high %v8437_v55, %v8453_v4 }
 0xc5d   : >> { %8789 = vxpose.xlu0.c.b16.start.end [1/1] (short) (narrow) %v8567_v31, 16  ;;  %v8358_v23 = vcombine.high %v17572_v50, %v8317_v42  ;;  %v8591_v60 = vpack.i.b16 %v8260_v5, %v8124_v24  ;;  %v8390_v22 = vcombine.high %v8333_v29, %v8365_v38  ;;  %v8526_v63 = vcombine.high %v8469_v35, %v8501_v41 }
 0xc5e   : >> { %v8595_v31 = vpack.i.b16 %v8594_v2, %v8593_v59  ;;  %v8602_v17 = vshrl.u32 %v8525_v28, 16  ;;  %v18873_v61 = vcombine.high %v17373_v7, %v17380_v49  ;;  %v8476_v30 = vrot.slane %v8462_v57, %v16024_v39 }
 0xc5f   : >> { %8805 = vxpose.xlu1.c.b16.start.end [1/1] (short) (narrow) %v8571_v0, 16  ;;  %v8601_v0 = vshrl.u32 %v8389_v53, 16  ;;  %v8508_v58 = vrot.slane %v8494_v54, %v16024_v39  ;;  %v8372_v20 = vrot.slane %v8358_v23, %v16024_v39  ;;  %v8599_v50 = vpack.i.b16 %v8525_v28, %v8389_v53 }
 0xc60   : >> { %v8340_v44 = vrot.slane %v18873_v61, %v16024_v39  ;;  %v8609_v42 = vshrl.u32 %v8390_v22, 16  ;;  %v8610_v4 = vshrl.u32 %v8526_v63, 16  ;;  %v8477_v40 = vcombine.low %v17460_v48, %v17471_v19 }
 0xc61   : >> { %8821 = vxpose.xlu0.c.b16.start.end [1/1] (short) (narrow) %v8575_v18, 16  ;;  %v8603_v55 = vpack.i.b16 %v8602_v17, %v8601_v0  ;;  %v8509_v46 = vcombine.low %v17515_v14, %v17521_v1  ;;  %v8373_v7 = vcombine.low %v17507_v13, %v17512_v32  ;;  %v8527_v49 = vcombine.low %v8476_v30, %v8508_v58 }
 0xc62   : >> { %v8391_v33 = vcombine.low %v8340_v44, %v8372_v20  ;;  %v8607_v47 = vpack.i.b16 %v8526_v63, %v8390_v22  ;;  %v8611_v35 = vpack.i.b16 %v8610_v4, %v8609_v42  ;;  %v8485_v27 = vrot.slane %v8477_v40, %v16024_v39 }
 0xc63   : >> { %8837 = vxpose.xlu1.c.b16.start.end [1/1] (short) (narrow) %v8579_v21, 16  ;;  %v18874_v29 = vcombine.low %v17376_v11, %v17383_v12  ;;  %v8517_v48 = vrot.slane %v8509_v46, %v16024_v39  ;;  %v8381_v19 = vrot.slane %v8373_v7, %v16024_v39  ;;  %v8528_v14 = vcombine.high %v8476_v30, %v8508_v58 }
 0xc64   : >> { %v8392_v1 = vcombine.high %v8340_v44, %v8372_v20  ;;  %v8617_v13 = vshrl.u32 %v8391_v33, 16  ;;  %v8618_v32 = vshrl.u32 %v8527_v49, 16  ;;  %v8615_v5 = vpack.i.b16 %v8527_v49, %v8391_v33 }
 0xc65   : >> { %8853 = vxpose.xlu0.c.b16.start.end [1/1] (short) (narrow) %v8583_v52, 16  ;;  %v8349_v18 = vrot.slane %v18874_v29, %v16024_v39  ;;  %v8529_v24 = vcombine.low %v8485_v27, %v8517_v48  ;;  %v8626_v25 = vshrl.u32 %v8528_v14, 16  ;;  %v8530_v12 = vcombine.high %v8485_v27, %v8517_v48 }
 0xc66   : >> { %v8619_v38 = vpack.i.b16 %v8618_v32, %v8617_v13  ;;  %v8625_v21 = vshrl.u32 %v8392_v1, 16  ;;  %v8623_v11 = vpack.i.b16 %v8528_v14, %v8392_v1  ;;  %v8531_v59 = vcombine.low %v17538_v16, %v17555_v62 }
 0xc67   : >> { %8869 = vxpose.xlu1.c.b16.start.end [1/1] (short) (narrow) %v8587_v9, 16  ;;  %v8393_v41 = vcombine.low %v8349_v18, %v8381_v19  ;;  %v8394_v36 = vcombine.high %v8349_v18, %v8381_v19  ;;  %v8634_v28 = vshrl.u32 %v8529_v24, 16  ;;  %v8395_v2 = vcombine.low %v17531_v34, %v17551_v51 }
 0xc68   : >> { %v8627_v52 = vpack.i.b16 %v8626_v25, %v8625_v21  ;;  %v8642_v23 = vshrl.u32 %v8530_v12, 16 }
 0xc69   : >> { %8885 = vxpose.xlu0.c.b16.start.end [1/1] (short) (narrow) %v8591_v60, 16  ;;  %v8633_v53 = vshrl.u32 %v8393_v41, 16  ;;  %v8631_v9 = vpack.i.b16 %v8529_v24, %v8393_v41  ;;  %v8641_v54 = vshrl.u32 %v8394_v36, 16  ;;  %v8639_v60 = vpack.i.b16 %v8530_v12, %v8394_v36 }
 0xc6a   : >> { %v8649_v63 = vshrl.u32 %v8395_v2, 16  ;;  %v8647_v0 = vpack.i.b16 %v8531_v59, %v8395_v2 }
 0xc6b   : >> { %8901 = vxpose.xlu1.c.b16.start.end [1/1] (short) (narrow) %v8595_v31, 16  ;;  %v8635_v57 = vpack.i.b16 %v8634_v28, %v8633_v53  ;;  %v8643_v22 = vpack.i.b16 %v8642_v23, %v8641_v54  ;;  %v8650_v31 = vshrl.u32 %v8531_v59, 16 }
 0xc6d   : >> { %8917 = vxpose.xlu0.c.b16.start.end [1/1] (short) (narrow) %v8599_v50, 16  ;;  %v8651_v17 = vpack.i.b16 %v8650_v31, %v8649_v63 }
 0xc6f   : >> { %8933 = vxpose.xlu1.c.b16.start.end [1/1] (short) (narrow) %v8603_v55, 16 }
 0xc71   : >> { %8949 = vxpose.xlu0.c.b16.start.end [1/1] (short) (narrow) %v8607_v47, 16 }
 0xc73   : >> { %8965 = vxpose.xlu1.c.b16.start.end [1/1] (short) (narrow) %v8611_v35, 16 }
 0xc75   : >> { %8981 = vxpose.xlu0.c.b16.start.end [1/1] (short) (narrow) %v8615_v5, 16 }
 0xc77   : >> { %8997 = vxpose.xlu1.c.b16.start.end [1/1] (short) (narrow) %v8619_v38, 16 }
 0xc79   : >> { %9013 = vxpose.xlu0.c.b16.start.end [1/1] (short) (narrow) %v8623_v11, 16 }
 0xc7b   : >> { %9029 = vxpose.xlu1.c.b16.start.end [1/1] (short) (narrow) %v8627_v52, 16 }
 0xc7d   : >> { %9045 = vxpose.xlu0.c.b16.start.end [1/1] (short) (narrow) %v8631_v9, 16 }
 0xc7f   : >> { %9061 = vxpose.xlu1.c.b16.start.end [1/1] (short) (narrow) %v8635_v57, 16 }
 0xc81   : >> { %9077 = vxpose.xlu0.c.b16.start.end [1/1] (short) (narrow) %v8639_v60, 16 }
 0xc83   : >> { %9093 = vxpose.xlu1.c.b16.start.end [1/1] (short) (narrow) %v8643_v22, 16 }
 0xc85   : >> { %9109 = vxpose.xlu0.c.b16.start.end [1/1] (short) (narrow) %v8647_v0, 16 }
 0xc87   : >> { %9125 = vxpose.xlu1.c.b16.start.end [1/1] (short) (narrow) %v8651_v17, 16 }
 0xcb3   : >> { %v8669_v61 = vpop.trf.xlu0 }
 0xcb5   : >> { %v8685_v16 = vpop.trf.xlu1 }
 0xcb7   : >> { %v8701_v62 = vpop.trf.xlu0 }
 0xcb9   : >> { %v8717_v44 = vpop.trf.xlu1 }
 0xcbb   : >> { %v8733_v34 = vpop.trf.xlu0 }
 0xcbc   : >> { %v9173_v42 = vcombine.low %v8669_v61, %v8733_v34 }
 0xcbd   : >> { %v8749_v51 = vpop.trf.xlu1 }
 0xcbe   : >> { %v9223_v46 = vcombine.low %v8685_v16, %v8749_v51  ;;  %v9180_v33 = vrot.slane %v9173_v42, %v16019_v45 }
 0xcbf   : >> { %v8765_v30 = vpop.trf.xlu0 }
 0xcc0   : >> { %v9181_v4 = vcombine.low %v8701_v62, %v8765_v30  ;;  %v9230_v29 = vrot.slane %v9223_v46, %v16019_v45 }
 0xcc1   : >> { %v8781_v58 = vpop.trf.xlu1 }
 0xcc2   : >> { %v9231_v7 = vcombine.low %v8717_v44, %v8781_v58  ;;  %v9188_v47 = vrot.slane %v9181_v4, %v16019_v45 }
 0xcc3   : >> { %v8797_v20 = vpop.trf.xlu0 }
 0xcc4   : >> { %v9238_v18 = vrot.slane %v9231_v7, %v16019_v45  ;;  %v9205_v14 = vcombine.low %v9180_v33, %v9188_v47 }
 0xcc5   : >> { %v8813_v50 = vpop.trf.xlu1 }
 0xcc6   : >> { %v9255_v5 = vcombine.low %v9230_v29, %v9238_v18  ;;  %v9212_v21 = vrot.slane %v9205_v14, %v16024_v39 }
 0xcc7   : >> { %v8829_v55 = vpop.trf.xlu0 }
 0xcc8   : >> { %v9262_v12 = vrot.slane %v9255_v5, %v16024_v39 }
 0xcc9   : >> { %v8845_v40 = vpop.trf.xlu1 }
 0xccb   : >> { %v8861_v49 = vpop.trf.xlu0 }
 0xccc   : >> { %v9189_v35 = vcombine.low %v8797_v20, %v8861_v49 }
 0xccd   : >> { %v8877_v27 = vpop.trf.xlu1 }
 0xcce   : >> { %v9239_v48 = vcombine.low %v8813_v50, %v8877_v27  ;;  %v9196_v1 = vrot.slane %v9189_v35, %v16019_v45 }
 0xccf   : >> { %v8893_v19 = vpop.trf.xlu0 }
 0xcd0   : >> { %v9197_v13 = vcombine.low %v8829_v55, %v8893_v19  ;;  %v9246_v24 = vrot.slane %v9239_v48, %v16019_v45 }
 0xcd1   : >> { %v8909_v32 = vpop.trf.xlu1 }
 0xcd2   : >> { %v9247_v41 = vcombine.low %v8845_v40, %v8909_v32  ;;  %v9204_v38 = vrot.slane %v9197_v13, %v16019_v45 }
 0xcd3   : >> { %v8925_v35 = vpop.trf.xlu0 }
 0xcd4   : >> { %v9254_v25 = vrot.slane %v9247_v41, %v16019_v45  ;;  %v9213_v11 = vcombine.low %v9196_v1, %v9204_v38 }
 0xcd5   : >> { %v8941_v27 = vpop.trf.xlu1 }
 0xcd6   : >> { %v9263_v36 = vcombine.low %v9246_v24, %v9254_v25  ;;  %v9220_v52 = vrot.slane %v9213_v11, %v16024_v39 }
 0xcd7   : >> { %v8957_v29 = vpop.trf.xlu0 }
 0xcd8   : >> { %v9270_v53 = vrot.slane %v9263_v36, %v16024_v39  ;;  %v9221_v28 = vcombine.low %v9212_v21, %v9220_v52  ;;  %v17641_v9 = vcombine.high %v9212_v21, %v9220_v52 }
 0xcd9   : >> { %v8973_v18 = vpop.trf.xlu1 }
 0xcda   : >> { %v9271_v59 = vcombine.low %v9262_v12, %v9270_v53  ;;  %v17643_v2 = vcombine.high %v9262_v12, %v9270_v53  ;;  %v9376_v57 = vshrl.u32 %v9221_v28, 16  ;;  %v9382_v54 = vshrl.u32 %v17641_v9, 16 }
 0xcdb   : >> { %v8989_v48 = vpop.trf.xlu0 }
 0xcdc   : >> { %v9377_v23 = vshrl.u32 %v9271_v59, 16  ;;  %v9383_v60 = vshrl.u32 %v17643_v2, 16  ;;  %v9375_v22 = vpack.i.b16 %v9271_v59, %v9221_v28  ;;  %v9381_v63 = vpack.i.b16 %v17643_v2, %v17641_v9 }
 0xcdd   : >> { %v9005_v19 = vpop.trf.xlu1  ;;  %v9273_v11 = vcombine.low %v8925_v35, %v8989_v48 }
 0xcde   : >> { %14860 = vmatprep.mubr.msk.bf16.mxu0 %vm7688_vm6, %v9375_v22  ;;  %v9378_v31 = vpack.i.b16 %v9377_v23, %v9376_v57  ;;  %v17650_v0 = vpack.i.b16 %v9383_v60, %v9382_v54  ;;  %v9323_v53 = vcombine.low %v8941_v27, %v9005_v19 }
 0xcdf   : >> { %v9021_v14 = vpop.trf.xlu0  ;;  %v9280_v23 = vrot.slane %v9273_v11, %v16019_v45 }
 0xce0   : >> { %14866 = vmatprep.mubr.msk.bf16.mxu1 %vm7688_vm6, %v9378_v31  ;;  %v9281_v36 = vcombine.low %v8957_v29, %v9021_v14 }
 0xce1   : >> { %v9037_v1 = vpop.trf.xlu1 }
 0xce2   : >> { %v9331_v28 = vcombine.low %v8973_v18, %v9037_v1  ;;  %v9288_v60 = vrot.slane %v9281_v36, %v16019_v45 }
 0xce3   : >> { %v9053_v13 = vpop.trf.xlu0 }
 0xce5   : >> { %v9069_v32 = vpop.trf.xlu1 }
 0xce7   : >> { %v7553_v17 = vpop.f32.mrb[12].mxu0  ;;  %v9085_v5 = vpop.trf.xlu0 }
 0xce8   : >> { %v14832_v61 = vpop.f32.mrb[13].mxu0  ;;  %v7689_v16 = vsel %vm7688_vm6, %v7553_v17, -inf }
 0xce9   : >> { %v7596_v62 = vpop.f32.mrb[40].mxu1  ;;  %7690 = vmax.xlane.f32.xlu0 %v7689_v16  ;;  %v7556_v44 = vpop.f32.mrb[14].mxu0  ;;  %v9338_v61 = vrot.slane %v9331_v28, %v16019_v45 }
 0xcea   : >> { %v14833_v34 = vpop.f32.mrb[15].mxu0  ;;  %v14840_v51 = vpop.f32.mrb[41].mxu1  ;;  %v7692_v30 = vsel %vm7688_vm6, %v7596_v62, -inf }
 0xceb   : >> { %v7599_v58 = vpop.f32.mrb[42].mxu1  ;;  %7693 = vmax.xlane.f32.xlu1 %v7692_v30  ;;  %v9101_v24 = vpop.trf.xlu1 }
 0xcec   : >> { %v14841_v20 = vpop.f32.mrb[43].mxu1  ;;  %v9117_v41 = vpop.trf.xlu0 }
 0xced   : >> { %v9289_v22 = vcombine.low %v9053_v13, %v9117_v41 }
 0xcef   : >> { %v7639_v50 = vpop.f32.mrb[16].mxu0  ;;  %v9133_v38 = vpop.trf.xlu1 }
 0xcf0   : >> { %v14848_v55 = vpop.f32.mrb[17].mxu0  ;;  %v7695_v42 = vsel %vm7688_vm6, %v7639_v50, -inf  ;;  %v9339_v44 = vcombine.low %v9069_v32, %v9133_v38 }
 0xcf1   : >> { %v7682_v4 = vpop.f32.mrb[44].mxu1  ;;  %7696 = vmax.xlane.f32.xlu0 %v7695_v42  ;;  %v7642_v40 = vpop.f32.mrb[18].mxu0  ;;  %v9296_v55 = vrot.slane %v9289_v22, %v16019_v45 }
 0xcf2   : >> { %v14849_v46 = vpop.f32.mrb[19].mxu0  ;;  %v14856_v7 = vpop.f32.mrb[45].mxu1  ;;  %v7698_v49 = vsel %vm7688_vm6, %v7682_v4, -inf }
 0xcf3   : >> { %v7685_v33 = vpop.f32.mrb[46].mxu1  ;;  %7699 = vmax.xlane.f32.xlu1 %v7698_v49 }
 0xcf4   : >> { %v14857_v47 = vpop.f32.mrb[47].mxu1  ;;  %v9346_v33 = vrot.slane %v9339_v44, %v16019_v45 }
 0xd1e   : >> { %9141 = vxpose.xlu0.c.b16.start.end [1/1] (short) (narrow) %v8655_v10, 16 }
 0xd20   : >> { %9157 = vxpose.xlu1.c.b16.start.end [1/1] (short) (narrow) %v17600_v6, 16 }
 0xd76   : >> { %v7691_v21 = vpop.xlane.xlu0 %7690 }
 0xd77   : >> { %v7701_v25 = vsub.f32 %v7553_v17, %v7691_v21  ;;  %v9330_v17 = vrot.slane %v9323_v53, %v16019_v45 }
 0xd78   : >> { %v7694_v26 = vpop.xlane.xlu1 %7693 }
 0xd79   : >> { %v7705_v8 = vmul.f32 1.442695, %v7701_v25  ;;  %v7702_v10 = vsub.f32 %v7596_v62, %v7694_v26  ;;  %v9355_v40 = vcombine.low %v9330_v17, %v9338_v61 }
 0xd7b   : >> { %15122 = vpow2.f32 %v7705_v8  ;;  %v7707_v6 = vmul.f32 1.442695, %v7702_v10  ;;  %v9362_v14 = vrot.slane %v9355_v40, %v16024_v39 }
 0xd7d   : >> { %15124 = vpow2.f32 %v7707_v6 }
 0xd7e   : >> { %v7697_v12 = vpop.xlane.xlu0 %7696 }
 0xd7f   : >> { %v7703_v52 = vsub.f32 %v7639_v50, %v7697_v12  ;;  %v9305_v50 = vcombine.low %v9280_v23, %v9288_v60 }
 0xd80   : >> { %v7700_v59 = vpop.xlane.xlu1 %7699 }
 0xd81   : >> { %v7709_v57 = vmul.f32 1.442695, %v7703_v52  ;;  %v7704_v54 = vsub.f32 %v7682_v4, %v7700_v59  ;;  %v9312_v29 = vrot.slane %v9305_v50, %v16024_v39 }
 0xd83   : >> { %15126 = vpow2.f32 %v7709_v57  ;;  %v7711_v31 = vmul.f32 1.442695, %v7704_v54 }
 0xd84   : >> { %v9149_v16 = vpop.trf.xlu0 }
 0xd85   : >> { %v15123_v62 = vpop.eup %15122  ;;  %15128 = vpow2.f32 %v7711_v31  ;;  %v9297_v34 = vcombine.low %v9085_v5, %v9149_v16 }
 0xd86   : >> { %v9165_v51 = vpop.trf.xlu1  ;;  %v7713_v30 = vsel %vm7688_vm6, %v15123_v62, 0.0  ;;  %v7729_v58 = vpack.c.bf16 %v15123_v62, %v15123_v62 }
 0xd87   : >> { %v15125_v20 = vpop.eup %15124  ;;  %v9304_v42 = vrot.slane %v9297_v34, %v16019_v45  ;;  %v9347_v4 = vcombine.low %v9101_v24, %v9165_v51  ;;  %7714 = vadd.xlane.f32.xlu0 %v7713_v30 }
 0xd88   : >> { %15002 = vmatprep.subr.msk.bf16.mxu0 %vm7688_vm6, %v7729_v58  ;;  %v7716_v46 = vsel %vm7688_vm6, %v15125_v20, 0.0  ;;  %v9404_v7 = vsel %vm7688_vm6, %v7729_v58, 0  ;;  %v7730_v49 = vpack.c.bf16 %v15125_v20, %v15125_v20 }
 0xd89   : >> { %v9313_v47 = vcombine.low %v9296_v55, %v9304_v42  ;;  %v9354_v35 = vrot.slane %v9347_v4, %v16019_v45  ;;  %7717 = vadd.xlane.f32.xlu1 %v7716_v46  ;;  %14859 = vmatpush3.bf16.xpose.msra.mxu0 %v9404_v7 }
 0xd8a   : >> { %15003 = vmatprep.subr.msk.bf16.mxu1 %vm7688_vm6, %v7730_v49  ;;  %v9462_v27 = vsel %vm7688_vm6, %v7730_v49, 0 }
 0xd8b   : >> { %v9320_v18 = vrot.slane %v9313_v47, %v16024_v39  ;;  %v9363_v48 = vcombine.low %v9346_v33, %v9354_v35  ;;  %14865 = vmatpush3.bf16.xpose.msra.mxu1 %v9462_v27 }
 0xd8d   : >> { %v15127_v19 = vpop.eup %15126  ;;  %v9321_v1 = vcombine.low %v9312_v29, %v9320_v18  ;;  %v9370_v13 = vrot.slane %v9363_v48, %v16024_v39  ;;  %v9322_v12 = vcombine.high %v9312_v29, %v9320_v18 }
 0xd8e   : >> { %v7719_v32 = vsel %vm7688_vm6, %v15127_v19, 0.0  ;;  %v7731_v5 = vpack.c.bf16 %v15127_v19, %v15127_v19 }
 0xd8f   : >> { %v15129_v24 = vpop.eup %15128  ;;  %v9371_v41 = vcombine.low %v9362_v14, %v9370_v13  ;;  %7720 = vadd.xlane.f32.xlu0 %v7719_v32  ;;  %v9388_v25 = vshrl.u32 %v9321_v1, 16  ;;  %v9372_v10 = vcombine.high %v9362_v14, %v9370_v13  ;;  %v9394_v53 = vshrl.u32 %v9322_v12, 16 }
 0xd90   : >> { %15004 = vmatprep.subr.msk.bf16.mxu0 %vm7688_vm6, %v7731_v5  ;;  %v7722_v38 = vsel %vm7688_vm6, %v15129_v24, 0.0  ;;  %v7732_v21 = vpack.c.bf16 %v15129_v24, %v15129_v24  ;;  %v9520_v11 = vsel %vm7688_vm6, %v7731_v5, 0 }
 0xd91   : >> { %v9387_v26 = vpack.i.b16 %v9371_v41, %v9321_v1  ;;  %v9389_v8 = vshrl.u32 %v9371_v41, 16  ;;  %7723 = vadd.xlane.f32.xlu1 %v7722_v38  ;;  %v9395_v52 = vshrl.u32 %v9372_v10, 16  ;;  %v9393_v28 = vpack.i.b16 %v9372_v10, %v9322_v12  ;;  %v18878_v10 = vld [vmem:[#allocation90_spill] sm:$0xff]  ;;  %v18880_v12 = vld [vmem:[#allocation92_spill] sm:$0xff] }
 0xd92   : >> { %15005 = vmatprep.subr.msk.bf16.mxu1 %vm7688_vm6, %v7732_v21  ;;  %v9578_v36 = vsel %vm7688_vm6, %v7732_v21, 0  ;;  %v18875_v21 = vld [vmem:[#allocation89_spill] sm:$0xff] }
 0xd93   : >> { %v9390_v6 = vpack.i.b16 %v9389_v8, %v9388_v25  ;;  %14861 = vmatmul.mubr.msk.bf16.vlgmr.msra.gmra.mrb[20].mxu0 %vm7688_vm6, %v9387_v26  ;;  %v9396_v59 = vpack.i.b16 %v9395_v52, %v9394_v53  ;;  %v18876_v25 = vld [vmem:[#allocation88_spill] sm:$0xff]  ;;  %v18877_v8 = vld [vmem:[#allocation91_spill] sm:$0xff]  ;;  %v18882_v53 = vld [vmem:[#allocation94_spill] sm:$0xff] }
 0xd94   : >> { %14871 = vmatpush3.bf16.xpose.msra.mxu0 %v9520_v11  ;;  %14872 = vmatprep.mubr.msk.bf16.mxu0 %vm7688_vm6, %v9381_v63  ;;  %v14304_v26 = vcombine.low %v18876_v25, %v18875_v21  ;;  %v18879_v11 = vld [vmem:[#allocation93_spill] sm:$0xff]  ;;  %v18881_v52 = vld [vmem:[#allocation95_spill] sm:$0xff] }
 0xd95   : >> { %14867 = vmatmul.mubr.msk.bf16.vlgmr.msra.gmra.mrb[48].mxu1 %vm7688_vm6, %v9390_v6  ;;  %14882 = vmatprep.subr.bf16.mxu0 %v18774_v37  ;;  %v14305_v6 = vcombine.low %v18878_v10, %v18877_v8  ;;  %v18887_v8 = vld [vmem:[#allocation101_spill] sm:$0xff]  ;;  %v18888_v10 = vld [vmem:[#allocation100_spill] sm:$0xff] }
 0xd96   : >> { %14877 = vmatpush3.bf16.xpose.msra.mxu1 %v9578_v36  ;;  %14878 = vmatprep.mubr.msk.bf16.mxu1 %vm7688_vm6, %v17650_v0  ;;  %v14306_v36 = vcombine.low %v18880_v12, %v18879_v11 }
 0xd97   : >> { %14902 = vmatprep.subr.bf16.mxu1 %v18774_v37 }
 0xd9b   : >> { %14873 = vmatmul.mubr.msk.bf16.vlgmr.msra.gmra.mrb[24].mxu0 %vm7688_vm6, %v9393_v28  ;;  %v14307_v28 = vcombine.low %v18882_v53, %v18881_v52 }
 0xd9c   : >> { %14898 = vmatprep.mubr.msk.bf16.mxu0 %vm15260_vm1, %v18774_v37  ;;  %14883 = vmatpush3.bf16.msra.mxu0 %v14304_v26 }
 0xd9d   : >> { %14879 = vmatmul.mubr.msk.bf16.vlgmr.msra.gmra.mrb[52].mxu1 %vm7688_vm6, %v9396_v59  ;;  %14884 = vmatprep.subr.bf16.mxu0 %v18774_v37  ;;  %v18883_v59 = vld [vmem:[#allocation97_spill] sm:$0xff] }
 0xd9e   : >> { %14918 = vmatprep.mubr.msk.bf16.mxu1 %vm15260_vm1, %v18774_v37 }
 0xda0   : >> { %14885 = vmatpush3.bf16.msra.mxu0 %v14305_v6  ;;  %v14310_v6 = vcombine.low %v18888_v10, %v18887_v8  ;;  %v18906_v8 = vld [vmem:[#allocation108_spill] sm:$0xff] }
 0xda1   : >> { %14886 = vmatprep.subr.bf16.mxu0 %v18774_v37 }
 0xda4   : >> { %14887 = vmatpush3.bf16.msra.mxu0 %v14306_v36 }
 0xda5   : >> { %14888 = vmatprep.subr.bf16.mxu0 %v18774_v37 }
 0xda8   : >> { %14889 = vmatpush3.bf16.msra.mxu0 %v14307_v28 }
 0xda9   : >> { %14890 = vmatprep.subr.bf16.mxu0 %v18774_v37 }
 0xe14   : >> { %v7715_v9 = vpop.xlane.xlu0 %7714 }
 0xe15   : >> { %15130 = vrcp.f32 %v7715_v9  ;;  %v18884_v9 = vld [vmem:[#allocation96_spill] sm:$0xff] }
 0xe16   : >> { %v7718_v2 = vpop.xlane.xlu1 %7717 }
 0xe1c   : >> { %v7721_v63 = vpop.xlane.xlu0 %7720 }
 0xe1d   : >> { %15132 = vrcp.f32 %v7721_v63  ;;  %v18885_v63 = vld [vmem:[#allocation99_spill] sm:$0xff] }
 0xe1e   : >> { %15134 = vrcp.f32 %v7718_v2  ;;  %v7724_v0 = vpop.xlane.xlu1 %7723  ;;  %v14308_v2 = vcombine.low %v18884_v9, %v18883_v59  ;;  %v18889_v59 = vld [vmem:[#allocation103_spill] sm:$0xff]  ;;  %v18890_v9 = vld [vmem:[#allocation102_spill] sm:$0xff] }
 0xe1f   : >> { %15136 = vrcp.f32 %v7724_v0  ;;  %v15131_v57 = vpop.eup %15130  ;;  %v18886_v0 = vld [vmem:[#allocation98_spill] sm:$0xff] }
 0xe20   : >> { %14891 = vmatpush3.bf16.msra.mxu0 %v14308_v2  ;;  %v14311_v2 = vcombine.low %v18890_v9, %v18889_v59  ;;  %v18912_v59 = vld [vmem:[#allocation114_spill] sm:$0xff] }
 0xe21   : >> { %14892 = vmatprep.subr.bf16.mxu0 %v18774_v37 }
 0xe27   : >> { %v15133_v54 = vpop.eup %15132 }
 0xe28   : >> { %v15135_v23 = vpop.eup %15134  ;;  %v9825_v60 = vcombine.low %v15131_v57, %v15133_v54  ;;  %v9826_v17 = vcombine.high %v15131_v57, %v15133_v54  ;;  %v14309_v57 = vcombine.low %v18886_v0, %v18885_v63 }
 0xe29   : >> { %v15137_v22 = vpop.eup %15136 }
 0xe2a   : >> { %v9841_v31 = vcombine.low %v15135_v23, %v15137_v22  ;;  %v9842_v61 = vcombine.high %v15135_v23, %v15137_v22  ;;  %v9833_v16 = vrot.slane %v9825_v60, %v16019_v45  ;;  %v9840_v30 = vrot.slane %v9826_v17, %v16019_v45  ;;  %14893 = vmatpush3.bf16.msra.mxu0 %v14309_v57 }
 0xe2b   : >> { %14894 = vmatprep.subr.bf16.mxu0 %v18774_v37 }
 0xe2c   : >> { %v9849_v62 = vrot.slane %v9841_v31, %v16019_v45  ;;  %v9856_v44 = vrot.slane %v9842_v61, %v16019_v45 }
 0xe2e   : >> { %v9858_v34 = vcombine.high %v9833_v16, %v9849_v62  ;;  %v9857_v51 = vcombine.low %v9833_v16, %v9849_v62  ;;  %v9873_v50 = vcombine.low %v9840_v30, %v9856_v44  ;;  %v9874_v4 = vcombine.high %v9840_v30, %v9856_v44  ;;  %14895 = vmatpush3.bf16.msra.mxu0 %v14310_v6  ;;  %v18907_v6 = vld [vmem:[#allocation111_spill] sm:$0xff] }
 0xe2f   : >> { %14896 = vmatprep.subr.bf16.mxu0 %v18774_v37 }
 0xe30   : >> { %v9872_v58 = vrot.slane %v9858_v34, %v16024_v39  ;;  %v9865_v20 = vrot.slane %v9857_v51, %v16024_v39  ;;  %v9881_v55 = vrot.slane %v9873_v50, %v16024_v39  ;;  %v9888_v40 = vrot.slane %v9874_v4, %v16024_v39 }
 0xe32   : >> { %9905 = vperm.xlu1 %15103, %v9872_v58   ;;  %9895 = vperm.xlu0 %15102, %v9865_v20   ;;  %v9890_v42 = vcombine.high %v9872_v58, %v18774_v37  ;;  %v9891_v46 = vcombine.high %v9881_v55, %v18774_v37  ;;  %v9892_v7 = vcombine.high %v9888_v40, %v18774_v37 }
 0xe33   : >> { %v9889_v49 = vcombine.high %v9865_v20, %v18774_v37  ;;  %14897 = vmatpush3.bf16.msra.mxu0 %v14311_v2  ;;  %v18913_v2 = vld [vmem:[#allocation117_spill] sm:$0xff] }
 0xe34   : >> { %14922 = vmatprep.subr.bf16.mxu0 %v18774_v37 }
 0xe36   : >> { %9915 = vperm.xlu1 %15103, %v9881_v55   ;;  %9910 = vperm.xlu0 %15102, %v9890_v42  }
 0xe3a   : >> { %9925 = vperm.xlu1 %15103, %v9888_v40   ;;  %9920 = vperm.xlu0 %15102, %v9891_v46  }
 0xe3e   : >> { %9930 = vperm.xlu0 %15102, %v9892_v7   ;;  %9900 = vperm.xlu1 %15103, %v9889_v49  }
 0xe66   : >> { %v14862_v33 = vpop.f32.mrb[20].mxu0 }
 0xe67   : >> { %v9440_v47 = vpop.f32.mrb[21].mxu0 }
 0xe68   : >> { %v14868_v35 = vpop.f32.mrb[48].mxu1  ;;  %9629 = vxpose.xlu1.b32.start [1/4] (short) (narrow) %v9440_v47, 8  ;;  %v14863_v27 = vpop.f32.mrb[22].mxu0 }
 0xe69   : >> { %v9443_v29 = vpop.f32.mrb[23].mxu0  ;;  %v9498_v18 = vpop.f32.mrb[49].mxu1 }
 0xe6a   : >> { %v14869_v48 = vpop.f32.mrb[50].mxu1  ;;  %9661 = vxpose.xlu0.b32.start [1/4] (short) (narrow) %v9498_v18, 8 }
 0xe6b   : >> { %v9501_v19 = vpop.f32.mrb[51].mxu1 }
 0xe6c   : >> { %9630 = vxpose.xlu1.b32.cont [2/4] (short) (narrow) %v9443_v29, 8 }
 0xe6e   : >> { %9662 = vxpose.xlu0.b32.cont [2/4] (short) (narrow) %v9501_v19, 8  ;;  %v14874_v14 = vpop.f32.mrb[24].mxu0 }
 0xe6f   : >> { %v9556_v1 = vpop.f32.mrb[25].mxu0 }
 0xe70   : >> { %v14880_v13 = vpop.f32.mrb[52].mxu1  ;;  %9631 = vxpose.xlu1.b32.cont [3/4] (short) (narrow) %v14862_v33, 8  ;;  %v14875_v32 = vpop.f32.mrb[26].mxu0 }
 0xe71   : >> { %v9559_v5 = vpop.f32.mrb[27].mxu0  ;;  %v9614_v24 = vpop.f32.mrb[53].mxu1 }
 0xe72   : >> { %v14881_v41 = vpop.f32.mrb[54].mxu1  ;;  %9663 = vxpose.xlu0.b32.cont [3/4] (short) (narrow) %v14868_v35, 8 }
 0xe73   : >> { %v9617_v38 = vpop.f32.mrb[55].mxu1 }
 0xe74   : >> { %9632 = vxpose.xlu1.b32.end [4/4] (short) (narrow) %v14863_v27, 8 }
 0xe76   : >> { %9664 = vxpose.xlu0.b32.end [4/4] (short) (narrow) %v14869_v48, 8 }
 0xe78   : >> { %9725 = vxpose.xlu1.b32.start [1/4] (short) (narrow) %v9614_v24, 8 }
 0xe7a   : >> { %9693 = vxpose.xlu0.b32.start [1/4] (short) (narrow) %v9556_v1, 8 }
 0xe7c   : >> { %9726 = vxpose.xlu1.b32.cont [2/4] (short) (narrow) %v9617_v38, 8 }
 0xe7e   : >> { %9694 = vxpose.xlu0.b32.cont [2/4] (short) (narrow) %v9559_v5, 8 }
 0xe80   : >> { %9727 = vxpose.xlu1.b32.cont [3/4] (short) (narrow) %v14880_v13, 8 }
 0xe82   : >> { %9695 = vxpose.xlu0.b32.cont [3/4] (short) (narrow) %v14874_v14, 8 }
 0xe84   : >> { %9728 = vxpose.xlu1.b32.end [4/4] (short) (narrow) %v14881_v41, 8 }
 0xe86   : >> { %9696 = vxpose.xlu0.b32.end [4/4] (short) (narrow) %v14875_v32, 8 }
 0xeb1   : >> { %v9906_v54 = vpop.permute.xlu1 %9905  ;;  %v9896_v23 = vpop.permute.xlu0 %9895 }
 0xeb5   : >> { %v9916_v60 = vpop.permute.xlu1 %9915  ;;  %v9911_v22 = vpop.permute.xlu0 %9910 }
 0xeb9   : >> { %v9926_v31 = vpop.permute.xlu1 %9925  ;;  %v9921_v17 = vpop.permute.xlu0 %9920 }
 0xebd   : >> { %v9901_v61 = vpop.permute.xlu1 %9900  ;;  %v9931_v16 = vpop.permute.xlu0 %9930 }
 0xee8   : >> { %v9645_v62 = vpop.trf.xlu1 }
 0xeea   : >> { %v9677_v44 = vpop.trf.xlu0 }
 0xef8   : >> { %v9741_v34 = vpop.trf.xlu1 }
 0xef9   : >> { %v9773_v51 = vcombine.low %v9677_v44, %v9741_v34  ;;  %v9774_v30 = vcombine.high %v9677_v44, %v9741_v34 }
 0xefa   : >> { %v9709_v58 = vpop.trf.xlu0 }
 0xefb   : >> { %v9757_v20 = vcombine.low %v9645_v62, %v9709_v58  ;;  %v9758_v50 = vcombine.high %v9645_v62, %v9709_v58  ;;  %v9781_v55 = vrot.slane %v9773_v51, %v16019_v45  ;;  %v9788_v42 = vrot.slane %v9774_v30, %v16019_v45 }
 0xefd   : >> { %v9765_v4 = vrot.slane %v9757_v20, %v16019_v45  ;;  %v9772_v40 = vrot.slane %v9758_v50, %v16019_v45 }
 0xeff   : >> { %v9789_v46 = vcombine.low %v9765_v4, %v9781_v55  ;;  %v9790_v7 = vcombine.high %v9765_v4, %v9781_v55  ;;  %v9805_v49 = vcombine.low %v9772_v40, %v9788_v42  ;;  %v9806_v33 = vcombine.high %v9772_v40, %v9788_v42  ;;  %v18891_v42 = vld [vmem:[#allocation141_spill] sm:$0xff] }
 0xf01   : >> { %v9797_v47 = vrot.slane %v9789_v46, %v16024_v39  ;;  %v9804_v35 = vrot.slane %v9790_v7, %v16024_v39  ;;  %v9813_v27 = vrot.slane %v9805_v49, %v16024_v39  ;;  %v9820_v29 = vrot.slane %v9806_v33, %v16024_v39 }
 0xf02   : >> { %v18892_v33 = vpack.c.bf16 %v16237_v43, %v16237_v43 }
 0xf03   : >> { %v9821_v18 = vcombine.high %v9797_v47, %v18774_v37  ;;  %v9822_v48 = vcombine.high %v9804_v35, %v18774_v37  ;;  %v9823_v19 = vcombine.high %v9813_v27, %v18774_v37  ;;  %v9824_v14 = vcombine.high %v9820_v29, %v18774_v37 }
 0xf04   : >> { %v9933_v1 = vmul.f32 %v9896_v23, %v9797_v47  ;;  %v9935_v13 = vmul.f32 %v9906_v54, %v9804_v35  ;;  %v9937_v32 = vmul.f32 %v9916_v60, %v9813_v27  ;;  %v9939_v5 = vmul.f32 %v9926_v31, %v9820_v29  ;;  %v18893_v47 = vld [vmem:[#allocation235_spill] sm:$0xff] }
 0xf05   : >> { %v9934_v24 = vmul.f32 %v9901_v61, %v9821_v18  ;;  %v9936_v41 = vmul.f32 %v9911_v22, %v9822_v48  ;;  %v9938_v38 = vmul.f32 %v9921_v17, %v9823_v19  ;;  %v9940_v21 = vmul.f32 %v9931_v16, %v9824_v14  ;;  %v18895_v27 = vld [vmem:[#allocation239_spill] sm:$0xff]  ;;  %v18897_v18 = vld [vmem:[#allocation240_spill] sm:$0xff]  ;;  %v18899_v19 = vld [vmem:[#allocation241_spill] sm:$0xff] }
 0xf06   : >> { %v9941_v25 = vcombine.low %v9933_v1, %v9935_v13  ;;  %v9957_v26 = vcombine.low %v9937_v32, %v9939_v5  ;;  %v18894_v35 = vpack.c.bf16 %v18893_v47, %v18893_v47  ;;  %v18896_v29 = vpack.c.bf16 %v18895_v27, %v18895_v27  ;;  %v18901_v14 = vld [vmem:[#allocation105_spill] sm:$0xff]  ;;  %v18902_v1 = vld [vmem:[#allocation104_spill] sm:$0xff]  ;;  %v18903_v32 = vld [vmem:[#allocation107_spill] sm:$0xff] }
 0xf07   : >> { %v9949_v11 = vcombine.low %v9934_v24, %v9936_v41  ;;  %v9965_v12 = vcombine.low %v9938_v38, %v9940_v21  ;;  %v18898_v48 = vpack.c.bf16 %v18897_v18, %v18897_v18  ;;  %v14315_v13 = vcombine.low %v18902_v1, %v18901_v14  ;;  %v18904_v5 = vld [vmem:[#allocation106_spill] sm:$0xff] }
 0xf08   : >> { %v9948_v36 = vrot.slane %v9941_v25, %v16019_v45  ;;  %v9964_v52 = vrot.slane %v9957_v26, %v16019_v45  ;;  %v14316_v24 = vcombine.low %v18904_v5, %v18903_v32  ;;  %v18905_v26 = vld [vmem:[#allocation109_spill] sm:$0xff] }
 0xf09   : >> { %v9956_v53 = vrot.slane %v9949_v11, %v16019_v45  ;;  %v9972_v28 = vrot.slane %v9965_v12, %v16019_v45  ;;  %14903 = vmatpush3.bf16.msra.mxu1 %v14315_v13  ;;  %v14317_v10 = vcombine.low %v18906_v8, %v18905_v26  ;;  %v18908_v11 = vld [vmem:[#allocation110_spill] sm:$0xff]  ;;  %v18923_v13 = vld [vmem:[#allocation195_spill] sm:$0xff] }
 0xf0a   : >> { %14904 = vmatprep.subr.bf16.mxu1 %v18774_v37  ;;  %v14318_v12 = vcombine.low %v18908_v11, %v18907_v6  ;;  %v18924_v8 = vld [vmem:[#allocation199_spill] sm:$0xff] }
 0xf0b   : >> { %v9974_v63 = vcombine.high %v9948_v36, %v9956_v53  ;;  %v9990_v0 = vcombine.high %v9964_v52, %v9972_v28  ;;  %v9973_v57 = vcombine.low %v9948_v36, %v9956_v53  ;;  %v9989_v54 = vcombine.low %v9964_v52, %v9972_v28  ;;  %v18909_v36 = vld [vmem:[#allocation113_spill] sm:$0xff]  ;;  %v18910_v52 = vld [vmem:[#allocation112_spill] sm:$0xff]  ;;  %v18911_v28 = vld [vmem:[#allocation115_spill] sm:$0xff] }
 0xf0c   : >> { %v14319_v53 = vcombine.low %v18910_v52, %v18909_v36  ;;  %v14320_v9 = vcombine.low %v18912_v59, %v18911_v28 }
 0xf0d   : >> { %v9988_v23 = vrot.slane %v9974_v63, %v16024_v39  ;;  %v10004_v60 = vrot.slane %v9990_v0, %v16024_v39  ;;  %v9981_v22 = vrot.slane %v9973_v57, %v16024_v39  ;;  %v9997_v31 = vrot.slane %v9989_v54, %v16024_v39  ;;  %14905 = vmatpush3.bf16.msra.mxu1 %v14316_v24  ;;  %v18914_v63 = vld [vmem:[#allocation116_spill] sm:$0xff]  ;;  %v18915_v57 = vld [vmem:[#allocation119_spill] sm:$0xff]  ;;  %v18916_v54 = vld [vmem:[#allocation118_spill] sm:$0xff] }
 0xf0e   : >> { %14906 = vmatprep.subr.bf16.mxu1 %v18774_v37  ;;  %v14321_v0 = vcombine.low %v18914_v63, %v18913_v2 }
 0xf0f   : >> { %v10007_v17 = vcombine.low %v9988_v23, %v10004_v60  ;;  %v10006_v61 = vcombine.high %v9981_v22, %v9997_v31  ;;  %v10005_v16 = vcombine.low %v9981_v22, %v9997_v31  ;;  %v10008_v62 = vcombine.high %v9988_v23, %v10004_v60  ;;  %v18917_v60 = vld [vmem:[#allocation238_spill] sm:$0xff]  ;;  %v18919_v31 = vld [vmem:[#allocation236_spill] sm:$0xff] }
 0xf10   : >> { %v14322_v23 = vcombine.low %v18916_v54, %v18915_v57  ;;  %v18918_v22 = vpack.c.bf16 %v18917_v60, %v18917_v60 }
 0xf11   : >> { %10014 = vrot.lane.b32.xlu1 %v10007_v17, %s15263_s15  ;;  %10010 = vrot.lane.b32.xlu0 %v10006_v61, %s15261_s24  ;;  %v18920_v17 = vpack.c.bf16 %v18919_v31, %v18919_v31  ;;  %v18921_v61 = vld [vmem:[#allocation237_spill] sm:$0xff] }
 0xf12   : >> { %14907 = vmatpush3.bf16.msra.mxu1 %v14317_v10 }
 0xf13   : >> { %14908 = vmatprep.subr.bf16.mxu1 %v18774_v37 }
 0xf15   : >> { %10018 = vrot.lane.b32.xlu1 %v10008_v62, %s15262_s18 }
 0xf16   : >> { %14909 = vmatpush3.bf16.msra.mxu1 %v14318_v12 }
 0xf17   : >> { %14910 = vmatprep.subr.bf16.mxu1 %v18774_v37 }
 0xf1a   : >> { %14911 = vmatpush3.bf16.msra.mxu1 %v14319_v53 }
 0xf1b   : >> { %14912 = vmatprep.subr.bf16.mxu1 %v18774_v37 }
 0xf1e   : >> { %14913 = vmatpush3.bf16.msra.mxu1 %v14320_v9 }
 0xf1f   : >> { %14914 = vmatprep.subr.bf16.mxu1 %v18774_v37 }
 0xf22   : >> { %14915 = vmatpush3.bf16.msra.mxu1 %v14321_v0 }
 0xf23   : >> { %14916 = vmatprep.subr.bf16.mxu1 %v18774_v37 }
 0xf26   : >> { %14917 = vmatpush3.bf16.msra.mxu1 %v14322_v23 }
 0xf27   : >> { %14930 = vmatprep.subr.bf16.mxu1 %v18774_v37 }
 0xf83   : >> { %v10015_v44 = vpop.permute.xlu1 %10014  ;;  %v10011_v34 = vpop.permute.xlu0 %10010 }
 0xf84   : >> { %v10021_v51 = vsel %vm3431_vm2, %v10005_v16, %v10011_v34  ;;  %v18922_v16 = vpack.c.bf16 %v18921_v61, %v18921_v61 }
 0xf85   : >> { %v10022_v58 = vsel %vm5474_vm4, %v10021_v51, %v10015_v44 }
 0xf87   : >> { %v10019_v30 = vpop.permute.xlu1 %10018 }
 0xf88   : >> { %v10023_v20 = vsel %vm5476_vm5, %v10022_v58, %v10019_v30 }
 0xf89   : >> { %v10024_v50 = vpack.c.bf16 %v10023_v20, %v10023_v20 }
 0xf8b   : >> { %14899 = vmatmul.mubr.bf16.vlgmr.msra.gmra.mrb[28].mxu0 %v10024_v50 }
 0xf8c   : >> { %14926 = vmatprep.mubr.msk.bf16.mxu0 %vm15260_vm1, %v18774_v37 }
0x105e   : >> { %v10113_v55 = vpop.f32.mrb[28].mxu0 }
0x105f   : >> { %v10114_v4 = vadd.f32 %v18891_v42, %v10113_v55  ;;  %v14900_v40 = vpop.f32.mrb[29].mxu0 }
0x1060   : >> { %v10116_v46 = vpop.f32.mrb[30].mxu0 }
0x1061   : >> { %v10119_v7 = vadd.f32 %v10114_v4, %v17007_v15  ;;  %v14901_v49 = vpop.f32.mrb[31].mxu0  ;;  %v18900_v15 = vpack.c.bf16 %v18899_v19, %v18899_v19 }
0x1063   : >> { %10120 = vadd.xlane.f32.xlu0 %v10119_v7 }
0x1090   : >> { %10389 = vxpose.xlu0.c.b16.start.end [1/1] (short) (narrow) %v18892_v33, 32 }
0x1095   : >> { %10421 = vxpose.xlu0.c.b16.start.end [1/1] (short) (narrow) %v18894_v35, 32 }
0x109a   : >> { %10437 = vxpose.xlu0.c.b16.start.end [1/1] (short) (narrow) %v18896_v29, 32 }
0x109f   : >> { %10469 = vxpose.xlu0.c.b16.start.end [1/1] (short) (narrow) %v18898_v48, 32 }
0x10a4   : >> { %10501 = vxpose.xlu0.c.b16.start.end [1/1] (short) (narrow) %v18900_v15, 32 }
0x10f0   : >> { %v10121_v41 = vpop.xlane.xlu0 %10120 }
0x10f1   : >> { %v10122_v38 = vmul.f32 0.0078125, %v10121_v41 }
0x10f3   : >> { %v10123_v21 = vsub.f32 %v10119_v7, %v10122_v38 }
0x10f5   : >> { %v10124_v25 = vmul.f32 %v10123_v21, %v10123_v21 }
0x10f6   : >> { %v10397_v62 = vpop.trf.xlu0 }
0x10f7   : >> { %10125 = vadd.xlane.f32.xlu1 %v10124_v25  ;;  %v10521_v33 = vshrl.u32 %v10397_v62, 16 }
0x10fa   : >> { %v17815_v44 = vpop.trf.xlu0 }
0x10fe   : >> { %v10429_v34 = vpop.trf.xlu0 }
0x10ff   : >> { %v10529_v41 = vshrl.u32 %v10429_v34, 16 }
0x1102   : >> { %v17817_v51 = vpop.trf.xlu0 }
0x1106   : >> { %v10445_v30 = vpop.trf.xlu0 }
0x1107   : >> { %v10530_v25 = vshrl.u32 %v10445_v30, 16  ;;  %v10527_v6 = vpack.i.b16 %v10445_v30, %v10429_v34 }
0x1109   : >> { %v10531_v52 = vpack.i.b16 %v10530_v25, %v10529_v41 }
0x110a   : >> { %v17819_v20 = vpop.trf.xlu0 }
0x110b   : >> { %v10562_v25 = vshrl.u32 %v17819_v20, 16 }
0x110e   : >> { %v10477_v4 = vpop.trf.xlu0 }
0x110f   : >> { %v10538_v48 = vshrl.u32 %v10477_v4, 16 }
0x1112   : >> { %v17823_v46 = vpop.trf.xlu0 }
0x1116   : >> { %v10509_v24 = vpop.trf.xlu0 }
0x1117   : >> { %v10546_v12 = vshrl.u32 %v10509_v24, 16 }
0x1124   : >> { %10405 = vxpose.xlu1.c.b16.start.end [1/1] (short) (narrow) %v18918_v22, 32 }
0x1129   : >> { %10453 = vxpose.xlu1.c.b16.start.end [1/1] (short) (narrow) %v18920_v17, 32 }
0x112e   : >> { %10485 = vxpose.xlu1.c.b16.start.end [1/1] (short) (narrow) %v18922_v16, 32 }
0x1184   : >> { %v10126_v58 = vpop.xlane.xlu1 %10125 }
0x1185   : >> { %v10127_v50 = vmul.f32 0.0078125, %v10126_v58 }
0x1187   : >> { %v10128_v55 = vadd.f32 1e-05, %v10127_v50 }
0x1189   : >> { %15138 = vrsqrt.f32 %v10128_v55 }
0x118a   : >> { %v10413_v42 = vpop.trf.xlu1 }
0x118b   : >> { %v10522_v35 = vshrl.u32 %v10413_v42, 16  ;;  %v10519_v14 = vpack.i.b16 %v10413_v42, %v10397_v62 }
0x118d   : >> { %v10523_v38 = vpack.i.b16 %v10522_v35, %v10521_v33 }
0x118e   : >> { %v17821_v40 = vpop.trf.xlu1 }
0x1192   : >> { %v10461_v7 = vpop.trf.xlu1 }
0x1193   : >> { %v15139_v49 = vpop.eup %15138  ;;  %v10537_v29 = vshrl.u32 %v10461_v7, 16  ;;  %v10535_v1 = vpack.i.b16 %v10477_v4, %v10461_v7 }
0x1194   : >> { %v10130_v15 = vmul.f32 %v15139_v49, %v10123_v21 }
0x1195   : >> { %v10539_v26 = vpack.i.b16 %v10538_v48, %v10537_v29  ;;  %v10581_v11 = vcombine.low %v10519_v14, %v10535_v1  ;;  %v10582_v62 = vcombine.high %v10519_v14, %v10535_v1  ;;  %v10510_v14 = vpop.trf.xlu0 }
0x1196   : >> { %v10137_v32 = vmul.f32 %v18923_v13, %v10130_v15  ;;  %v17826_v5 = vpop.trf.xlu1  ;;  %v10553_v13 = vshrl.u32 %v17815_v44, 16 }
0x1197   : >> { %v10649_v53 = vcombine.low %v10523_v38, %v10539_v26  ;;  %v10589_v9 = vrot.slane %v10581_v11, %v16019_v45  ;;  %v10650_v55 = vcombine.high %v10523_v38, %v10539_v26  ;;  %v10596_v49 = vrot.slane %v10582_v62, %v16019_v45 }
0x1198   : >> { %v17829_v10 = vadd.f32 %v18924_v8, %v10137_v32  ;;  %v10561_v32 = vshrl.u32 %v17817_v51, 16  ;;  %v10554_v38 = vshrl.u32 %v17821_v40, 16  ;;  %v10570_v26 = vshrl.u32 %v17823_v46, 16 }
0x1199   : >> { %v10657_v0 = vrot.slane %v10649_v53, %v16019_v45  ;;  %v10664_v29 = vrot.slane %v10650_v55, %v16019_v45  ;;  %v10578_v8 = vshrl.u32 %v10510_v14, 16  ;;  %v10567_v53 = vpack.i.b16 %v17823_v46, %v17826_v5 }
0x119a   : >> { %v10145_v21 = vpack.c.bf16 %v17829_v10, %v17829_v10  ;;  %v10493_v36 = vpop.trf.xlu1 }
0x119b   : >> { %v10545_v28 = vshrl.u32 %v10493_v36, 16  ;;  %v10543_v59 = vpack.i.b16 %v10509_v24, %v10493_v36  ;;  %v10559_v36 = vpack.i.b16 %v17819_v20, %v17817_v51 }
0x119c   : >> { %14919 = vmatmul.mubr.bf16.vlgmr.msra.gmra.mrb[56].mxu1 %v10145_v21 }
0x119d   : >> { %v10547_v2 = vpack.i.b16 %v10546_v12, %v10545_v28  ;;  %v10597_v63 = vcombine.low %v10527_v6, %v10543_v59  ;;  %14934 = vmatprep.mubr.msk.bf16.mxu1 %vm15260_vm1, %v18774_v37  ;;  %v10598_v34 = vcombine.high %v10527_v6, %v10543_v59  ;;  %v10569_v6 = vshrl.u32 %v17826_v5, 16 }
0x119e   : >> { %v10494_v1 = vpop.trf.xlu1 }
0x119f   : >> { %v10605_v57 = vrot.slane %v10597_v63, %v16019_v45  ;;  %v10665_v54 = vcombine.low %v10531_v52, %v10547_v2  ;;  %v10666_v42 = vcombine.high %v10531_v52, %v10547_v2  ;;  %v10612_v33 = vrot.slane %v10598_v34, %v16019_v45 }
0x11a0   : >> { %v10577_v21 = vshrl.u32 %v10494_v1, 16  ;;  %v10551_v52 = vpack.i.b16 %v17821_v40, %v17815_v44  ;;  %v10575_v59 = vpack.i.b16 %v10510_v14, %v10494_v1  ;;  %v10555_v2 = vpack.i.b16 %v10554_v38, %v10553_v13 }
0x11a1   : >> { %v10673_v23 = vrot.slane %v10665_v54, %v16019_v45  ;;  %v10613_v22 = vcombine.low %v10589_v9, %v10605_v57  ;;  %v10614_v50 = vcombine.high %v10589_v9, %v10605_v57  ;;  %v10680_v48 = vrot.slane %v10666_v42, %v16019_v45 }
0x11a2   : >> { %v10629_v41 = vcombine.low %v10596_v49, %v10612_v33  ;;  %v10563_v9 = vpack.i.b16 %v10562_v25, %v10561_v32  ;;  %v10571_v63 = vpack.i.b16 %v10570_v26, %v10569_v6  ;;  %v10579_v57 = vpack.i.b16 %v10578_v8, %v10577_v21 }
0x11a3   : >> { %v10621_v17 = vrot.slane %v10613_v22, %v16024_v39  ;;  %v10681_v16 = vcombine.low %v10657_v0, %v10673_v23  ;;  %v10682_v7 = vcombine.high %v10657_v0, %v10673_v23  ;;  %v10628_v35 = vrot.slane %v10614_v50, %v16024_v39 }
0x11a4   : >> { %v10697_v12 = vcombine.low %v10664_v29, %v10680_v48  ;;  %v10637_v28 = vrot.slane %v10629_v41, %v16024_v39  ;;  %v10717_v54 = vcombine.low %v10551_v52, %v10567_v53  ;;  %v10733_v20 = vcombine.low %v10559_v36, %v10575_v59 }
0x11a5   : >> { %10853 = vxpose.xlu1.c.b16.start.end [1/1] (short) (narrow) %v10621_v17, 16  ;;  %v10689_v30 = vrot.slane %v10681_v16, %v16024_v39  ;;  %v10645_v58 = vcombine.high %v10621_v17, %v18776_v3  ;;  %v10696_v15 = vrot.slane %v10682_v7, %v16024_v39  ;;  %v10646_v24 = vcombine.high %v10628_v35, %v18776_v3 }
0x11a6   : >> { %v10705_v0 = vrot.slane %v10697_v12, %v16024_v39  ;;  %v10647_v51 = vcombine.high %v10637_v28, %v18776_v3  ;;  %v10630_v44 = vcombine.high %v10596_v49, %v10612_v33  ;;  %v10785_v40 = vcombine.low %v10555_v2, %v10571_v63 }
0x11a7   : >> { %10869 = vxpose.xlu0.c.b16.start.end [1/1] (short) (narrow) %v10689_v30, 16  ;;  %v10713_v4 = vcombine.high %v10689_v30, %v18776_v3  ;;  %v10714_v11 = vcombine.high %v10696_v15, %v18776_v3  ;;  %v10801_v46 = vcombine.low %v10563_v9, %v10579_v57  ;;  %v10698_v23 = vcombine.high %v10664_v29, %v10680_v48 }
0x11a8   : >> { %v10715_v5 = vcombine.high %v10705_v0, %v18776_v3  ;;  %v10725_v22 = vrot.slane %v10717_v54, %v16019_v45  ;;  %v10741_v17 = vrot.slane %v10733_v20, %v16019_v45  ;;  %v10644_v16 = vrot.slane %v10630_v44, %v16024_v39 }
0x11a9   : >> { %10885 = vxpose.xlu1.c.b16.start.end [1/1] (short) (narrow) %v10645_v58, 16  ;;  %v10793_v62 = vrot.slane %v10785_v40, %v16019_v45  ;;  %v10809_v34 = vrot.slane %v10801_v46, %v16019_v45  ;;  %v10712_v30 = vrot.slane %v10698_v23, %v16024_v39  ;;  %v10718_v49 = vcombine.high %v10551_v52, %v10567_v53 }
0x11aa   : >> { %v10648_v58 = vcombine.high %v10644_v16, %v18776_v3  ;;  %v10749_v50 = vcombine.low %v10725_v22, %v10741_v17  ;;  %v10734_v33 = vcombine.high %v10559_v36, %v10575_v59  ;;  %v10750_v29 = vcombine.high %v10725_v22, %v10741_v17 }
0x11ab   : >> { %10901 = vxpose.xlu0.c.b16.start.end [1/1] (short) (narrow) %v10713_v4, 16  ;;  %v10716_v55 = vcombine.high %v10712_v30, %v18776_v3  ;;  %v10817_v42 = vcombine.low %v10793_v62, %v10809_v34  ;;  %v10786_v48 = vcombine.high %v10555_v2, %v10571_v63  ;;  %v10818_v1 = vcombine.high %v10793_v62, %v10809_v34 }
0x11ac   : >> { %v10757_v4 = vrot.slane %v10749_v50, %v16024_v39  ;;  %v10732_v13 = vrot.slane %v10718_v49, %v16019_v45  ;;  %v10748_v32 = vrot.slane %v10734_v33, %v16019_v45 }
0x11ad   : >> { %10917 = vxpose.xlu1.c.b16.start.end [1/1] (short) (narrow) %v10628_v35, 16  ;;  %v10825_v7 = vrot.slane %v10817_v42, %v16024_v39  ;;  %v10800_v41 = vrot.slane %v10786_v48, %v16019_v45  ;;  %v10832_v25 = vrot.slane %v10818_v1, %v16024_v39 }
0x11ae   : >> { %v10781_v35 = vcombine.high %v10757_v4, %v18776_v3  ;;  %v10765_v8 = vcombine.low %v10732_v13, %v10748_v32  ;;  %v10766_v52 = vcombine.high %v10732_v13, %v10748_v32 }
0x11af   : >> { %10933 = vxpose.xlu0.c.b16.start.end [1/1] (short) (narrow) %v10696_v15, 16  ;;  %v10802_v15 = vcombine.high %v10563_v9, %v10579_v57  ;;  %v10849_v14 = vcombine.high %v10825_v7, %v18776_v3  ;;  %v10850_v6 = vcombine.high %v10832_v25, %v18776_v3 }
0x11b0   : >> { %v10773_v12 = vrot.slane %v10765_v8, %v16024_v39  ;;  %v17892_v59 = vrot.slane %v10766_v52, %v16024_v39 }
0x11b1   : >> { %10949 = vxpose.xlu1.c.b16.start.end [1/1] (short) (narrow) %v10646_v24, 16  ;;  %v10764_v24 = vrot.slane %v10750_v29, %v16024_v39  ;;  %v10816_v38 = vrot.slane %v10802_v15, %v16019_v45 }
0x11b2   : >> { %v10783_v36 = vcombine.high %v10773_v12, %v18776_v3 }
0x11b3   : >> { %10965 = vxpose.xlu0.c.b16.start.end [1/1] (short) (narrow) %v10714_v11, 16  ;;  %v10782_v26 = vcombine.high %v10764_v24, %v18776_v3  ;;  %v10833_v11 = vcombine.low %v10800_v41, %v10816_v38 }
0x11b5   : >> { %10981 = vxpose.xlu1.c.b16.start.end [1/1] (short) (narrow) %v10637_v28, 16  ;;  %v10841_v21 = vrot.slane %v10833_v11, %v16024_v39  ;;  %v10834_v28 = vcombine.high %v10800_v41, %v10816_v38 }
0x11b7   : >> { %10997 = vxpose.xlu0.c.b16.start.end [1/1] (short) (narrow) %v10705_v0, 16  ;;  %v10851_v53 = vcombine.high %v10841_v21, %v18776_v3  ;;  %v17895_v9 = vrot.slane %v10834_v28, %v16024_v39 }
0x11b9   : >> { %11013 = vxpose.xlu1.c.b16.start.end [1/1] (short) (narrow) %v10647_v51, 16 }
0x11bb   : >> { %11029 = vxpose.xlu0.c.b16.start.end [1/1] (short) (narrow) %v10715_v5, 16 }
0x11bd   : >> { %11045 = vxpose.xlu1.c.b16.start.end [1/1] (short) (narrow) %v10644_v16, 16 }
0x11bf   : >> { %11061 = vxpose.xlu0.c.b16.start.end [1/1] (short) (narrow) %v10712_v30, 16 }
0x11c1   : >> { %11077 = vxpose.xlu1.c.b16.start.end [1/1] (short) (narrow) %v10648_v58, 16 }
0x11c3   : >> { %11093 = vxpose.xlu0.c.b16.start.end [1/1] (short) (narrow) %v10716_v55, 16 }
0x11c5   : >> { %11109 = vxpose.xlu1.c.b16.start.end [1/1] (short) (narrow) %v10757_v4, 16 }
0x11c7   : >> { %11125 = vxpose.xlu0.c.b16.start.end [1/1] (short) (narrow) %v10825_v7, 16 }
0x11c9   : >> { %11141 = vxpose.xlu1.c.b16.start.end [1/1] (short) (narrow) %v10781_v35, 16 }
0x11cb   : >> { %11157 = vxpose.xlu0.c.b16.start.end [1/1] (short) (narrow) %v10849_v14, 16 }
0x11cd   : >> { %11173 = vxpose.xlu1.c.b16.start.end [1/1] (short) (narrow) %v10764_v24, 16 }
0x11cf   : >> { %11189 = vxpose.xlu0.c.b16.start.end [1/1] (short) (narrow) %v10832_v25, 16 }
0x11d1   : >> { %11205 = vxpose.xlu1.c.b16.start.end [1/1] (short) (narrow) %v10782_v26, 16 }
0x11d3   : >> { %11221 = vxpose.xlu0.c.b16.start.end [1/1] (short) (narrow) %v10850_v6, 16 }
0x11d5   : >> { %11237 = vxpose.xlu1.c.b16.start.end [1/1] (short) (narrow) %v10773_v12, 16 }
0x11d7   : >> { %11253 = vxpose.xlu0.c.b16.start.end [1/1] (short) (narrow) %v10841_v21, 16 }
0x11d9   : >> { %11269 = vxpose.xlu1.c.b16.start.end [1/1] (short) (narrow) %v10783_v36, 16 }
0x11db   : >> { %11285 = vxpose.xlu0.c.b16.start.end [1/1] (short) (narrow) %v10851_v53, 16 }
0x11dd   : >> { %11301 = vxpose.xlu1.c.b16.start.end [1/1] (short) (narrow) %v17892_v59, 16 }
0x11df   : >> { %11317 = vxpose.xlu0.c.b16.start.end [1/1] (short) (narrow) %v17895_v9, 16 }
0x120b   : >> { %v10861_v2 = vpop.trf.xlu1 }
0x120d   : >> { %v10877_v63 = vpop.trf.xlu0 }
0x120f   : >> { %v10893_v0 = vpop.trf.xlu1 }
0x1211   : >> { %v10909_v57 = vpop.trf.xlu0 }
0x1213   : >> { %v10925_v54 = vpop.trf.xlu1 }
0x1214   : >> { %v11365_v5 = vcombine.low %v10861_v2, %v10925_v54 }
0x1215   : >> { %v10941_v51 = vpop.trf.xlu0 }
0x1216   : >> { %v11415_v23 = vcombine.low %v10877_v63, %v10941_v51  ;;  %v11372_v34 = vrot.slane %v11365_v5, %v16019_v45  ;;  %v18925_v51 = vld [vmem:[#allocation142_spill] sm:$0xff] }
0x1217   : >> { %v10957_v20 = vpop.trf.xlu1 }
0x1218   : >> { %v11373_v22 = vcombine.low %v10893_v0, %v10957_v20  ;;  %v11422_v30 = vrot.slane %v11415_v23, %v16019_v45  ;;  %v10852_v23 = vcombine.high %v17895_v9, %v18776_v3 }
0x1219   : >> { %v10973_v44 = vpop.trf.xlu0 }
0x121a   : >> { %v11423_v17 = vcombine.low %v10909_v57, %v10973_v44  ;;  %v11380_v58 = vrot.slane %v11373_v22, %v16019_v45  ;;  %v18926_v22 = vld [vmem:[#allocation246_spill] sm:$0xff] }
0x121b   : >> { %v10989_v40 = vpop.trf.xlu1 }
0x121c   : >> { %v11430_v50 = vrot.slane %v11423_v17, %v16019_v45  ;;  %v11397_v49 = vcombine.low %v11372_v34, %v11380_v58  ;;  %v18927_v17 = vpack.c.bf16 %v18926_v22, %v18926_v22  ;;  %v18931_v58 = vld [vmem:[#allocation242_spill] sm:$0xff] }
0x121d   : >> { %v11005_v46 = vpop.trf.xlu0 }
0x121e   : >> { %v11447_v33 = vcombine.low %v11422_v30, %v11430_v50  ;;  %v11404_v24 = vrot.slane %v11397_v49, %v16024_v39  ;;  %v18932_v50 = vpack.c.bf16 %v18931_v58, %v18931_v58  ;;  %v18939_v49 = vld [vmem:[#allocation244_spill] sm:$0xff] }
0x121f   : >> { %v11021_v16 = vpop.trf.xlu1 }
0x1220   : >> { %v11454_v41 = vrot.slane %v11447_v33, %v16024_v39  ;;  %v18940_v33 = vpack.c.bf16 %v18939_v49, %v18939_v49 }
0x1221   : >> { %v11037_v62 = vpop.trf.xlu0 }
0x1223   : >> { %v11053_v55 = vpop.trf.xlu1 }
0x1224   : >> { %v11381_v4 = vcombine.low %v10989_v40, %v11053_v55  ;;  %v18933_v55 = vld [vmem:[#allocation248_spill] sm:$0xff] }
0x1225   : >> { %v11069_v42 = vpop.trf.xlu0  ;;  %v18934_v9 = vpack.c.bf16 %v18933_v55, %v18933_v55 }
0x1226   : >> { %v11431_v7 = vcombine.low %v11005_v46, %v11069_v42  ;;  %v11388_v48 = vrot.slane %v11381_v4, %v16019_v45  ;;  %v18935_v42 = vld [vmem:[#allocation243_spill] sm:$0xff] }
0x1227   : >> { %v11085_v35 = vpop.trf.xlu1  ;;  %v18936_v4 = vpack.c.bf16 %v18935_v42, %v18935_v42 }
0x1228   : >> { %v11438_v15 = vrot.slane %v11431_v7, %v16019_v45  ;;  %v11389_v14 = vcombine.low %v11021_v16, %v11085_v35  ;;  %v10784_v16 = vcombine.high %v17892_v59, %v18776_v3  ;;  %v18937_v7 = vld [vmem:[#allocation249_spill] sm:$0xff] }
0x1229   : >> { %v11101_v29 = vpop.trf.xlu0  ;;  %v18938_v59 = vpack.c.bf16 %v18937_v7, %v18937_v7  ;;  %v18941_v35 = vld [vmem:[#allocation245_spill] sm:$0xff] }
0x122a   : >> { %v11439_v1 = vcombine.low %v11037_v62, %v11101_v29  ;;  %v11396_v13 = vrot.slane %v11389_v14, %v16019_v45  ;;  %v18928_v62 = vld [vmem:[#allocation247_spill] sm:$0xff]  ;;  %v18942_v29 = vpack.c.bf16 %v18941_v35, %v18941_v35 }
0x122b   : >> { %v18929_v34 = vmov %v18928_v62 }
0x122c   : >> { %v11446_v32 = vrot.slane %v11439_v1, %v16019_v45  ;;  %v11405_v38 = vcombine.low %v11388_v48, %v11396_v13  ;;  %v18930_v30 = vpack.c.bf16 %v18928_v62, %v18929_v34  ;;  %v11117_v48 = vpop.trf.xlu1 }
0x122e   : >> { %v11455_v25 = vcombine.low %v11438_v15, %v11446_v32  ;;  %v11412_v26 = vrot.slane %v11405_v38, %v16024_v39  ;;  %v11133_v15 = vpop.trf.xlu0 }
0x1230   : >> { %v11462_v8 = vrot.slane %v11455_v25, %v16024_v39  ;;  %v11413_v6 = vcombine.low %v11404_v24, %v11412_v26  ;;  %v17911_v11 = vcombine.high %v11404_v24, %v11412_v26  ;;  %v11149_v14 = vpop.trf.xlu1 }
0x1232   : >> { %v11463_v12 = vcombine.low %v11454_v41, %v11462_v8  ;;  %v17913_v21 = vcombine.high %v11454_v41, %v11462_v8  ;;  %v11569_v36 = vshrl.u32 %v11413_v6, 16  ;;  %v11577_v2 = vshrl.u32 %v17911_v11, 16  ;;  %v11165_v1 = vpop.trf.xlu0 }
0x1234   : >> { %v11570_v52 = vshrl.u32 %v11463_v12, 16  ;;  %v11567_v53 = vpack.i.b16 %v11463_v12, %v11413_v6  ;;  %v11578_v63 = vshrl.u32 %v17913_v21, 16  ;;  %v11575_v0 = vpack.i.b16 %v17913_v21, %v17911_v11  ;;  %v11181_v13 = vpop.trf.xlu1 }
0x1236   : >> { %v11571_v28 = vpack.i.b16 %v11570_v52, %v11569_v36  ;;  %14923 = vmatpush3.bf16.msra.mxu0 %v11567_v53  ;;  %v17921_v57 = vpack.i.b16 %v11578_v63, %v11577_v2  ;;  %v11197_v32 = vpop.trf.xlu0 }
0x1237   : >> { %14924 = vmatprep.subr.bf16.mxu0 %v18774_v37 }
0x1238   : >> { %14931 = vmatpush3.bf16.msra.mxu1 %v11571_v28  ;;  %v11213_v24 = vpop.trf.xlu1 }
0x1239   : >> { %14932 = vmatprep.subr.bf16.mxu1 %v18774_v37 }
0x123a   : >> { %v11229_v41 = vpop.trf.xlu0 }
0x123c   : >> { %v11245_v38 = vpop.trf.xlu1 }
0x123e   : >> { %v11261_v25 = vpop.trf.xlu0 }
0x1240   : >> { %v11277_v26 = vpop.trf.xlu1 }
0x1242   : >> { %v11293_v8 = vpop.trf.xlu0 }
0x1244   : >> { %v11309_v6 = vpop.trf.xlu1 }
0x1246   : >> { %v11325_v12 = vpop.trf.xlu0 }
0x126f   : >> { %v10234_v54 = vpop.f32.mrb[56].mxu1 }
0x1270   : >> { %v10235_v20 = vadd.f32 %v18925_v51, %v10234_v54  ;;  %v14920_v44 = vpop.f32.mrb[57].mxu1 }
0x1271   : >> { %v10237_v40 = vpop.f32.mrb[58].mxu1 }
0x1272   : >> { %v10240_v46 = vmul.f32 0.17677669, %v10235_v20  ;;  %v14921_v5 = vpop.f32.mrb[59].mxu1 }
0x1274   : >> { %10245 = vrot.lane.b32.xlu0 %v10240_v46, %s15263_s15  ;;  %10242 = vrot.lane.b32.xlu1 %v10240_v46, %s15262_s18 }
0x1278   : >> { %10248 = vrot.lane.b32.xlu1 %v10240_v46, %s15261_s24 }
0x1292   : >> { %11349 = vxpose.xlu0.c.b16.start.end [1/1] (short) (narrow) %v10852_v23, 16 }
0x1296   : >> { %11829 = vxpose.xlu0.c.b16.start.end [1/1] (short) (narrow) %v18927_v17, 32 }
0x129b   : >> { %11333 = vxpose.xlu1.c.b16.start.end [1/1] (short) (narrow) %v10784_v16, 16  ;;  %11861 = vxpose.xlu0.c.b16.start.end [1/1] (short) (narrow) %v18930_v30, 32 }
0x129f   : >> { %11813 = vxpose.xlu1.c.b16.start.end [1/1] (short) (narrow) %v18932_v50, 32 }
0x12a0   : >> { %11893 = vxpose.xlu0.c.b16.start.end [1/1] (short) (narrow) %v18934_v9, 32 }
0x12a4   : >> { %11845 = vxpose.xlu1.c.b16.start.end [1/1] (short) (narrow) %v18936_v4, 32 }
0x12a5   : >> { %11925 = vxpose.xlu0.c.b16.start.end [1/1] (short) (narrow) %v18938_v59, 32 }
0x12a9   : >> { %11877 = vxpose.xlu1.c.b16.start.end [1/1] (short) (narrow) %v18940_v33, 32 }
0x12ae   : >> { %11909 = vxpose.xlu1.c.b16.start.end [1/1] (short) (narrow) %v18942_v29, 32 }
0x12e6   : >> { %v10243_v36 = vpop.permute.xlu1 %10242  ;;  %v10246_v52 = vpop.permute.xlu0 %10245 }
0x12e7   : >> { %v10251_v53 = vcombine.low %v10240_v46, %v10246_v52  ;;  %v10252_v2 = vcombine.high %v10240_v46, %v10246_v52  ;;  %v11515_v52 = vcombine.low %v11133_v15, %v11197_v32 }
0x12e9   : >> { %v10259_v44 = vrot.slane %v10251_v53, %v16019_v45  ;;  %v10266_v40 = vrot.slane %v10252_v2, %v16019_v45  ;;  %v11523_v53 = vcombine.low %v11165_v1, %v11229_v41  ;;  %v11465_v2 = vcombine.low %v11117_v48, %v11181_v13 }
0x12ea   : >> { %v10249_v28 = vpop.permute.xlu1 %10248  ;;  %v11481_v48 = vcombine.low %v11245_v38, %v11309_v6 }
0x12eb   : >> { %v10267_v63 = vcombine.low %v10243_v36, %v10249_v28  ;;  %v10268_v54 = vcombine.high %v10243_v36, %v10249_v28  ;;  %v11531_v28 = vcombine.low %v11261_v25, %v11325_v12  ;;  %v11472_v15 = vrot.slane %v11465_v2, %v16019_v45 }
0x12ed   : >> { %v10275_v51 = vrot.slane %v10267_v63, %v16019_v45  ;;  %v10282_v20 = vrot.slane %v10268_v54, %v16019_v45  ;;  %v11473_v63 = vcombine.low %v11149_v14, %v11213_v24 }
0x12ef   : >> { %v10283_v5 = vcombine.low %v10259_v44, %v10275_v51  ;;  %v10284_v23 = vcombine.high %v10259_v44, %v10275_v51  ;;  %v10299_v17 = vcombine.low %v10266_v40, %v10282_v20  ;;  %v10300_v16 = vcombine.high %v10266_v40, %v10282_v20 }
0x12f0   : >> { %v11522_v40 = vrot.slane %v11515_v52, %v16019_v45  ;;  %v11480_v1 = vrot.slane %v11473_v63, %v16019_v45 }
0x12f1   : >> { %v10291_v62 = vrot.slane %v10283_v5, %v16024_v39  ;;  %v10298_v30 = vrot.slane %v10284_v23, %v16024_v39  ;;  %v10307_v46 = vrot.slane %v10299_v17, %v16024_v39  ;;  %v10314_v50 = vrot.slane %v10300_v16, %v16024_v39 }
0x12f2   : >> { %v11530_v5 = vrot.slane %v11523_v53, %v16019_v45  ;;  %v11538_v23 = vrot.slane %v11531_v28, %v16019_v45 }
0x12f3   : >> { %v10315_v9 = vcombine.high %v10291_v62, %v18774_v37  ;;  %v10316_v59 = vcombine.high %v10298_v30, %v18774_v37  ;;  %v10317_v33 = vcombine.high %v10307_v46, %v18774_v37  ;;  %v10318_v29 = vcombine.high %v10314_v50, %v18774_v37 }
0x12f4   : >> { %v14323_v17 = vpack.c.bf16 %v10307_v46, %v10291_v62  ;;  %v14324_v16 = vpack.c.bf16 %v10314_v50, %v10298_v30  ;;  %v11547_v25 = vcombine.low %v11522_v40, %v11530_v5  ;;  %v11497_v30 = vcombine.low %v11472_v15, %v11480_v1 }
0x12f5   : >> { %v14325_v20 = vpack.c.bf16 %v10317_v33, %v10315_v9  ;;  %v14326_v44 = vpack.c.bf16 %v10318_v29, %v10316_v59  ;;  %v11488_v46 = vrot.slane %v11481_v48, %v16019_v45 }
0x12f6   : >> { %v10334_v12 = vrot.slane %v14323_v17, %v16019_v45  ;;  %v10342_v62 = vrot.slane %v14324_v16, %v16019_v45  ;;  %v11554_v59 = vrot.slane %v11547_v25, %v16024_v39  ;;  %v11504_v29 = vrot.slane %v11497_v30, %v16024_v39 }
0x12f7   : >> { %v10359_v32 = vrot.slane %v14325_v20, %v16019_v45  ;;  %v10367_v24 = vrot.slane %v14326_v44, %v16019_v45 }
0x12f8   : >> { %v11357_v4 = vpop.trf.xlu0 }
0x12f9   : >> { %v11539_v36 = vcombine.low %v11293_v8, %v11357_v4  ;;  %v10368_v9 = vcombine.low %v10359_v32, %v10367_v24 }
0x12fb   : >> { %v11546_v54 = vrot.slane %v11539_v36, %v16019_v45  ;;  %v10375_v28 = vrot.slane %v10368_v9, %v16024_v39 }
0x12fc   : >> { %v17968_v51 = vpop.trf.xlu0 }
0x12fd   : >> { %v11555_v14 = vcombine.low %v11538_v23, %v11546_v54  ;;  %v10381_v5 = vshrl.u32 %v10375_v28, 16  ;;  %v10376_v24 = vcombine.high %v10375_v28, %v18776_v3 }
0x12ff   : >> { %v11562_v50 = vrot.slane %v11555_v14, %v16024_v39  ;;  %v10387_v11 = vshrl.u32 %v10376_v24, 16 }
0x1300   : >> { %v17975_v13 = vpop.trf.xlu0 }
0x1301   : >> { %v11341_v41 = vpop.trf.xlu1  ;;  %v11563_v36 = vcombine.low %v11554_v59, %v11562_v50  ;;  %v11564_v14 = vcombine.high %v11554_v59, %v11562_v50  ;;  %v11946_v50 = vshrl.u32 %v17968_v51, 16 }
0x1302   : >> { %v11489_v8 = vcombine.low %v11277_v26, %v11341_v41  ;;  %v10343_v26 = vcombine.low %v10334_v12, %v10342_v62 }
0x1303   : >> { %v11586_v20 = vshrl.u32 %v11563_v36, 16  ;;  %v11594_v62 = vshrl.u32 %v11564_v14, 16 }
0x1304   : >> { %v11496_v38 = vrot.slane %v11489_v8, %v16019_v45  ;;  %v17984_v6 = vpop.trf.xlu0  ;;  %v10350_v54 = vrot.slane %v10343_v26, %v16024_v39 }
0x1305   : >> { %v17986_v4 = vpop.trf.xlu1 }
0x1306   : >> { %v11505_v33 = vcombine.low %v11488_v46, %v11496_v38  ;;  %v10379_v1 = vpack.i.b16 %v10375_v28, %v10350_v54  ;;  %v10380_v48 = vshrl.u32 %v10350_v54, 16  ;;  %v10351_v8 = vcombine.high %v10350_v54, %v18776_v3 }
0x1307   : >> { %v11945_v9 = vshrl.u32 %v17986_v4, 16 }
0x1308   : >> { %v11512_v52 = vrot.slane %v11505_v33, %v16024_v39  ;;  %v17991_v53 = vpop.trf.xlu0  ;;  %v10382_v32 = vpack.i.b16 %v10381_v5, %v10380_v48  ;;  %v10386_v46 = vshrl.u32 %v10351_v8, 16  ;;  %v10385_v38 = vpack.i.b16 %v10376_v24, %v10351_v8 }
0x1309   : >> { %v17994_v2 = vpop.trf.xlu1  ;;  %v11947_v54 = vpack.i.b16 %v11946_v50, %v11945_v9 }
0x130a   : >> { %v11513_v63 = vcombine.low %v11504_v29, %v11512_v52  ;;  %v11514_v16 = vcombine.high %v11504_v29, %v11512_v52  ;;  %v10388_v29 = vpack.i.b16 %v10387_v11, %v10386_v46 }
0x130c   : >> { %v11585_v44 = vshrl.u32 %v11513_v63, 16  ;;  %v11583_v40 = vpack.i.b16 %v11563_v36, %v11513_v63  ;;  %v11901_v17 = vpop.trf.xlu0  ;;  %v11593_v25 = vshrl.u32 %v11514_v16, 16  ;;  %v11591_v30 = vpack.i.b16 %v11564_v14, %v11514_v16 }
0x130d   : >> { %v11853_v23 = vpop.trf.xlu1  ;;  %v11962_v33 = vshrl.u32 %v11901_v17, 16  ;;  %v11954_v63 = vshrl.u32 %v17984_v6, 16 }
0x130e   : >> { %14925 = vmatpush3.bf16.msra.mxu0 %v11583_v40  ;;  %v11587_v15 = vpack.i.b16 %v11586_v20, %v11585_v44  ;;  %v11953_v28 = vshrl.u32 %v11853_v23, 16  ;;  %v11951_v44 = vpack.i.b16 %v17984_v6, %v11853_v23 }
0x130f   : >> { %14938 = vmatprep.subr.bf16.mxu0 %v18774_v37 }
0x1310   : >> { %14933 = vmatpush3.bf16.msra.mxu1 %v11587_v15  ;;  %v18011_v12 = vpop.trf.xlu0 }
0x1311   : >> { %14927 = vmatmul.mubr.msk.bf16.vlgmr.msra.gmra.mrb[32].mxu0 %vm3431_vm2, %v10379_v1  ;;  %14946 = vmatprep.subr.bf16.mxu1 %v18774_v37  ;;  %v18001_v41 = vpop.trf.xlu1 }
0x1312   : >> { %14939 = vmatpush3.bf16.msra.mxu0 %v11575_v0  ;;  %14942 = vmatprep.mubr.msk.bf16.mxu0 %vm15260_vm1, %v18774_v37  ;;  %v11595_v0 = vpack.i.b16 %v11594_v62, %v11593_v25 }
0x1313   : >> { %14935 = vmatmul.mubr.msk.bf16.vlgmr.msra.gmra.mrb[60].mxu1 %vm3431_vm2, %v10382_v32  ;;  %14940 = vmatprep.subr.bf16.mxu0 %v18774_v37 }
0x1314   : >> { %14947 = vmatpush3.bf16.msra.mxu1 %v17921_v57  ;;  %14950 = vmatprep.mubr.msk.bf16.mxu1 %vm15260_vm1, %v18774_v37  ;;  %v11943_v57 = vpack.i.b16 %v17968_v51, %v17986_v4  ;;  %v11933_v52 = vpop.trf.xlu0  ;;  %v11955_v51 = vpack.i.b16 %v11954_v63, %v11953_v28 }
0x1315   : >> { %14948 = vmatprep.subr.bf16.mxu1 %v18774_v37  ;;  %v11885_v21 = vpop.trf.xlu1  ;;  %v11970_v5 = vshrl.u32 %v11933_v52, 16 }
0x1316   : >> { %14941 = vmatpush3.bf16.msra.mxu0 %v11591_v30  ;;  %v11961_v59 = vshrl.u32 %v11885_v21, 16  ;;  %v11959_v26 = vpack.i.b16 %v11901_v17, %v11885_v21 }
0x1318   : >> { %14949 = vmatpush3.bf16.msra.mxu1 %v11595_v0  ;;  %v11963_v20 = vpack.i.b16 %v11962_v33, %v11961_v59  ;;  %v12005_v40 = vcombine.low %v11943_v57, %v11959_v26  ;;  %v12006_v30 = vcombine.high %v11943_v57, %v11959_v26  ;;  %v11934_v63 = vpop.trf.xlu0 }
0x1319   : >> { %14943 = vmatmul.mubr.msk.bf16.vlgmr.msra.gmra.mrb[36].mxu0 %vm3431_vm2, %v10385_v38  ;;  %v18022_v36 = vpop.trf.xlu1 }
0x131a   : >> { %v12073_v15 = vcombine.low %v11947_v54, %v11963_v20  ;;  %v12013_v1 = vrot.slane %v12005_v40, %v16019_v45  ;;  %v12074_v50 = vcombine.high %v11947_v54, %v11963_v20  ;;  %v12020_v33 = vrot.slane %v12006_v30, %v16019_v45 }
0x131b   : >> { %14951 = vmatmul.mubr.msk.bf16.vlgmr.msra.gmra.mrb[64].mxu1 %vm3431_vm2, %v10388_v29  ;;  %v11977_v40 = vshrl.u32 %v17994_v2, 16 }
0x131c   : >> { %v12081_v25 = vrot.slane %v12073_v15, %v16019_v45  ;;  %v12088_v57 = vrot.slane %v12074_v50, %v16019_v45  ;;  %v12002_v15 = vshrl.u32 %v11934_v63, 16 }
0x131d   : >> { %v11917_v16 = vpop.trf.xlu1 }
0x131e   : >> { %v11969_v4 = vshrl.u32 %v11917_v16, 16  ;;  %v11967_v17 = vpack.i.b16 %v11933_v52, %v11917_v16  ;;  %v11986_v16 = vshrl.u32 %v17991_v53, 16 }
0x1320   : >> { %v11971_v48 = vpack.i.b16 %v11970_v5, %v11969_v4  ;;  %v12021_v14 = vcombine.low %v11951_v44, %v11967_v17  ;;  %v12022_v11 = vcombine.high %v11951_v44, %v11967_v17  ;;  %v11978_v5 = vshrl.u32 %v17975_v13, 16 }
0x1321   : >> { %v11918_v44 = vpop.trf.xlu1  ;;  %v11985_v4 = vshrl.u32 %v18001_v41, 16  ;;  %v11994_v17 = vshrl.u32 %v18011_v12, 16 }
0x1322   : >> { %v12029_v32 = vrot.slane %v12021_v14, %v16019_v45  ;;  %v12089_v24 = vcombine.low %v11955_v51, %v11971_v48  ;;  %v12090_v38 = vcombine.high %v11955_v51, %v11971_v48  ;;  %v12036_v29 = vrot.slane %v12022_v11, %v16019_v45 }
0x1323   : >> { %v11975_v51 = vpack.i.b16 %v17975_v13, %v17994_v2  ;;  %v11999_v2 = vpack.i.b16 %v11934_v63, %v11918_v44 }
0x1324   : >> { %v12037_v8 = vcombine.low %v12013_v1, %v12029_v32  ;;  %v12097_v62 = vrot.slane %v12089_v24, %v16019_v45  ;;  %v12038_v21 = vcombine.high %v12013_v1, %v12029_v32  ;;  %v12104_v26 = vrot.slane %v12090_v38, %v16019_v45 }
0x1325   : >> { %v12053_v54 = vcombine.low %v12020_v33, %v12036_v29  ;;  %v11993_v1 = vshrl.u32 %v18022_v36, 16  ;;  %v12001_v32 = vshrl.u32 %v11918_v44, 16  ;;  %v11983_v24 = vpack.i.b16 %v17991_v53, %v18001_v41 }
0x1326   : >> { %v12045_v6 = vrot.slane %v12037_v8, %v16024_v39  ;;  %v12105_v23 = vcombine.low %v12081_v25, %v12097_v62  ;;  %v12106_v59 = vcombine.high %v12081_v25, %v12097_v62  ;;  %v12052_v52 = vrot.slane %v12038_v21, %v16024_v39 }
0x1327   : >> { %v12121_v14 = vcombine.low %v12088_v57, %v12104_v26  ;;  %v11991_v25 = vpack.i.b16 %v18011_v12, %v18022_v36  ;;  %v12061_v13 = vrot.slane %v12053_v54, %v16024_v39  ;;  %v11979_v8 = vpack.i.b16 %v11978_v5, %v11977_v40 }
0x1328   : >> { %12277 = vxpose.xlu1.c.b16.start.end [1/1] (short) (narrow) %v12045_v6, 16  ;;  %v12069_v0 = vcombine.high %v12045_v6, %v18776_v3  ;;  %v12113_v46 = vrot.slane %v12105_v23, %v16024_v39  ;;  %v12120_v28 = vrot.slane %v12106_v59, %v16024_v39  ;;  %v12070_v20 = vcombine.high %v12052_v52, %v18776_v3 }
0x1329   : >> { %v11987_v62 = vpack.i.b16 %v11986_v16, %v11985_v4  ;;  %v11995_v6 = vpack.i.b16 %v11994_v17, %v11993_v1  ;;  %v12129_v23 = vrot.slane %v12121_v14, %v16024_v39  ;;  %v12003_v30 = vpack.i.b16 %v12002_v15, %v12001_v32 }
0x132a   : >> { %12293 = vxpose.xlu0.c.b16.start.end [1/1] (short) (narrow) %v12113_v46, 16  ;;  %v12137_v9 = vcombine.high %v12113_v46, %v18776_v3  ;;  %v12138_v48 = vcombine.high %v12120_v28, %v18776_v3  ;;  %v12141_v11 = vcombine.low %v11975_v51, %v11991_v25  ;;  %v12054_v21 = vcombine.high %v12020_v33, %v12036_v29 }
0x132b   : >> { %v12157_v53 = vcombine.low %v11983_v24, %v11999_v2  ;;  %v12209_v41 = vcombine.low %v11979_v8, %v11995_v6  ;;  %v12225_v12 = vcombine.low %v11987_v62, %v12003_v30  ;;  %v12139_v36 = vcombine.high %v12129_v23, %v18776_v3 }
0x132c   : >> { %12309 = vxpose.xlu1.c.b16.start.end [1/1] (short) (narrow) %v12069_v0, 16  ;;  %v12071_v0 = vcombine.high %v12061_v13, %v18776_v3  ;;  %v12122_v46 = vcombine.high %v12088_v57, %v12104_v26  ;;  %v12149_v50 = vrot.slane %v12141_v11, %v16019_v45  ;;  %v12068_v38 = vrot.slane %v12054_v21, %v16024_v39 }
0x132d   : >> { %v12217_v59 = vrot.slane %v12209_v41, %v16019_v45  ;;  %v12233_v33 = vrot.slane %v12225_v12, %v16019_v45  ;;  %v12158_v44 = vcombine.high %v11983_v24, %v11999_v2  ;;  %v12210_v16 = vcombine.high %v11979_v8, %v11995_v6 }
0x132e   : >> { %12325 = vxpose.xlu0.c.b16.start.end [1/1] (short) (narrow) %v12137_v9, 16  ;;  %v12165_v9 = vrot.slane %v12157_v53, %v16019_v45  ;;  %v12136_v29 = vrot.slane %v12122_v46, %v16024_v39  ;;  %v12226_v4 = vcombine.high %v11987_v62, %v12003_v30 }
0x132f   : >> { %v12241_v26 = vcombine.low %v12217_v59, %v12233_v33  ;;  %v12242_v15 = vcombine.high %v12217_v59, %v12233_v33 }
0x1330   : >> { %12341 = vxpose.xlu1.c.b16.start.end [1/1] (short) (narrow) %v12052_v52, 16  ;;  %v12173_v52 = vcombine.low %v12149_v50, %v12165_v9  ;;  %v12140_v57 = vcombine.high %v12136_v29, %v18776_v3  ;;  %v12174_v40 = vcombine.high %v12149_v50, %v12165_v9  ;;  %v12240_v32 = vrot.slane %v12226_v4, %v16019_v45 }
0x1331   : >> { %v12249_v54 = vrot.slane %v12241_v26, %v16024_v39  ;;  %v12256_v24 = vrot.slane %v12242_v15, %v16024_v39 }
0x1332   : >> { %12357 = vxpose.xlu0.c.b16.start.end [1/1] (short) (narrow) %v12120_v28, 16  ;;  %v12072_v28 = vcombine.high %v12068_v38, %v18776_v3  ;;  %v12181_v63 = vrot.slane %v12173_v52, %v16024_v39  ;;  %v12188_v14 = vrot.slane %v12174_v40, %v16024_v39 }
0x1333   : >> { %v12273_v17 = vcombine.high %v12249_v54, %v18776_v3  ;;  %v12274_v2 = vcombine.high %v12256_v24, %v18776_v3 }
0x1334   : >> { %12373 = vxpose.xlu1.c.b16.start.end [1/1] (short) (narrow) %v12070_v20, 16  ;;  %v12142_v20 = vcombine.high %v11975_v51, %v11991_v25  ;;  %v12205_v5 = vcombine.high %v12181_v63, %v18776_v3  ;;  %v12224_v51 = vrot.slane %v12210_v16, %v16019_v45 }
0x1336   : >> { %12389 = vxpose.xlu0.c.b16.start.end [1/1] (short) (narrow) %v12138_v48, 16  ;;  %v12156_v1 = vrot.slane %v12142_v20, %v16019_v45  ;;  %v12172_v48 = vrot.slane %v12158_v44, %v16019_v45  ;;  %v12257_v8 = vcombine.low %v12224_v51, %v12240_v32  ;;  %v12258_v21 = vcombine.high %v12224_v51, %v12240_v32 }
0x1338   : >> { %12405 = vxpose.xlu1.c.b16.start.end [1/1] (short) (narrow) %v12061_v13, 16  ;;  %v12189_v25 = vcombine.low %v12156_v1, %v12172_v48  ;;  %v12206_v13 = vcombine.high %v12188_v14, %v18776_v3  ;;  %v12265_v6 = vrot.slane %v12257_v8, %v16024_v39  ;;  %v18087_v53 = vrot.slane %v12258_v21, %v16024_v39 }
0x133a   : >> { %12421 = vxpose.xlu0.c.b16.start.end [1/1] (short) (narrow) %v12129_v23, 16  ;;  %v12197_v62 = vrot.slane %v12189_v25, %v16024_v39  ;;  %v12190_v23 = vcombine.high %v12156_v1, %v12172_v48  ;;  %v12275_v11 = vcombine.high %v12265_v6, %v18776_v3 }
0x133c   : >> { %12437 = vxpose.xlu1.c.b16.start.end [1/1] (short) (narrow) %v12071_v0, 16  ;;  %v12207_v30 = vcombine.high %v12197_v62, %v18776_v3  ;;  %v18084_v0 = vrot.slane %v12190_v23, %v16024_v39 }
0x133e   : >> { %12453 = vxpose.xlu0.c.b16.start.end [1/1] (short) (narrow) %v12139_v36, 16 }
0x1340   : >> { %12469 = vxpose.xlu1.c.b16.start.end [1/1] (short) (narrow) %v12068_v38, 16 }
0x1342   : >> { %12485 = vxpose.xlu0.c.b16.start.end [1/1] (short) (narrow) %v12136_v29, 16 }
0x1344   : >> { %12501 = vxpose.xlu1.c.b16.start.end [1/1] (short) (narrow) %v12072_v28, 16 }
0x1346   : >> { %12517 = vxpose.xlu0.c.b16.start.end [1/1] (short) (narrow) %v12140_v57, 16 }
0x1348   : >> { %12533 = vxpose.xlu1.c.b16.start.end [1/1] (short) (narrow) %v12181_v63, 16 }
0x134a   : >> { %12549 = vxpose.xlu0.c.b16.start.end [1/1] (short) (narrow) %v12249_v54, 16 }
0x134c   : >> { %12565 = vxpose.xlu1.c.b16.start.end [1/1] (short) (narrow) %v12205_v5, 16 }
0x134e   : >> { %12581 = vxpose.xlu0.c.b16.start.end [1/1] (short) (narrow) %v12273_v17, 16 }
0x1350   : >> { %12597 = vxpose.xlu1.c.b16.start.end [1/1] (short) (narrow) %v12188_v14, 16 }
0x1352   : >> { %12613 = vxpose.xlu0.c.b16.start.end [1/1] (short) (narrow) %v12256_v24, 16 }
0x1354   : >> { %12629 = vxpose.xlu1.c.b16.start.end [1/1] (short) (narrow) %v12206_v13, 16 }
0x1356   : >> { %12645 = vxpose.xlu0.c.b16.start.end [1/1] (short) (narrow) %v12274_v2, 16 }
0x1358   : >> { %12661 = vxpose.xlu1.c.b16.start.end [1/1] (short) (narrow) %v12197_v62, 16 }
0x135a   : >> { %12677 = vxpose.xlu0.c.b16.start.end [1/1] (short) (narrow) %v12265_v6, 16 }
0x135c   : >> { %12693 = vxpose.xlu1.c.b16.start.end [1/1] (short) (narrow) %v12207_v30, 16 }
0x135e   : >> { %12709 = vxpose.xlu0.c.b16.start.end [1/1] (short) (narrow) %v12275_v11, 16 }
0x1360   : >> { %12725 = vxpose.xlu1.c.b16.start.end [1/1] (short) (narrow) %v18084_v0, 16 }
0x1362   : >> { %12741 = vxpose.xlu0.c.b16.start.end [1/1] (short) (narrow) %v18087_v53, 16 }
0x138e   : >> { %v12285_v41 = vpop.trf.xlu1 }
0x1390   : >> { %v12301_v12 = vpop.trf.xlu0 }
0x1392   : >> { %v12317_v36 = vpop.trf.xlu1 }
0x1394   : >> { %v12333_v46 = vpop.trf.xlu0 }
0x1396   : >> { %v12349_v50 = vpop.trf.xlu1 }
0x1397   : >> { %v12789_v52 = vcombine.low %v12285_v41, %v12349_v50 }
0x1398   : >> { %v12365_v38 = vpop.trf.xlu0 }
0x1399   : >> { %v12839_v28 = vcombine.low %v12301_v12, %v12365_v38  ;;  %v12796_v20 = vrot.slane %v12789_v52, %v16019_v45 }
0x139a   : >> { %v12381_v9 = vpop.trf.xlu1 }
0x139b   : >> { %v12797_v57 = vcombine.low %v12317_v36, %v12381_v9  ;;  %v12846_v44 = vrot.slane %v12839_v28, %v16019_v45 }
0x139c   : >> { %v12397_v59 = vpop.trf.xlu0 }
0x139d   : >> { %v12847_v26 = vcombine.low %v12333_v46, %v12397_v59  ;;  %v12804_v40 = vrot.slane %v12797_v57, %v16019_v45 }
0x139e   : >> { %v12413_v33 = vpop.trf.xlu1 }
0x139f   : >> { %v12854_v5 = vrot.slane %v12847_v26, %v16019_v45  ;;  %v12821_v1 = vcombine.low %v12796_v20, %v12804_v40 }
0x13a0   : >> { %v12429_v29 = vpop.trf.xlu0 }
0x13a1   : >> { %v12871_v48 = vcombine.low %v12846_v44, %v12854_v5  ;;  %v12828_v62 = vrot.slane %v12821_v1, %v16024_v39 }
0x13a2   : >> { %v12445_v63 = vpop.trf.xlu1 }
0x13a3   : >> { %v12878_v6 = vrot.slane %v12871_v48, %v16024_v39 }
0x13a4   : >> { %v12461_v54 = vpop.trf.xlu0 }
0x13a6   : >> { %v12477_v16 = vpop.trf.xlu1 }
0x13a7   : >> { %v12805_v17 = vcombine.low %v12413_v33, %v12477_v16 }
0x13a8   : >> { %v12493_v4 = vpop.trf.xlu0 }
0x13a9   : >> { %v12855_v15 = vcombine.low %v12429_v29, %v12493_v4  ;;  %v12812_v32 = vrot.slane %v12805_v17, %v16019_v45 }
0x13aa   : >> { %v12509_v14 = vpop.trf.xlu1 }
0x13ab   : >> { %v12862_v24 = vrot.slane %v12855_v15, %v16019_v45  ;;  %v12813_v25 = vcombine.low %v12445_v63, %v12509_v14 }
0x13ac   : >> { %v12525_v51 = vpop.trf.xlu0 }
0x13ad   : >> { %v12863_v13 = vcombine.low %v12461_v54, %v12525_v51  ;;  %v12820_v2 = vrot.slane %v12813_v25, %v16019_v45 }
0x13af   : >> { %v12870_v8 = vrot.slane %v12863_v13, %v16019_v45  ;;  %v12829_v23 = vcombine.low %v12812_v32, %v12820_v2  ;;  %v12208_v2 = vcombine.high %v18084_v0, %v18776_v3 }
0x13b1   : >> { %v12879_v30 = vcombine.low %v12862_v24, %v12870_v8  ;;  %v12836_v11 = vrot.slane %v12829_v23, %v16024_v39  ;;  %v12276_v8 = vcombine.high %v18087_v53, %v18776_v3 }
0x13b3   : >> { %v12886_v21 = vrot.slane %v12879_v30, %v16024_v39  ;;  %v12837_v41 = vcombine.low %v12828_v62, %v12836_v11  ;;  %v18103_v12 = vcombine.high %v12828_v62, %v12836_v11  ;;  %v12541_v62 = vpop.trf.xlu1 }
0x13b5   : >> { %v12887_v36 = vcombine.low %v12878_v6, %v12886_v21  ;;  %v18105_v46 = vcombine.high %v12878_v6, %v12886_v21  ;;  %v12992_v50 = vshrl.u32 %v12837_v41, 16  ;;  %v12998_v33 = vshrl.u32 %v18103_v12, 16  ;;  %v12557_v6 = vpop.trf.xlu0 }
0x13b7   : >> { %v12993_v38 = vshrl.u32 %v12887_v36, 16  ;;  %v12991_v9 = vpack.i.b16 %v12887_v36, %v12837_v41  ;;  %v12999_v29 = vshrl.u32 %v18105_v46, 16  ;;  %v12997_v52 = vpack.i.b16 %v18105_v46, %v18103_v12  ;;  %v12573_v23 = vpop.trf.xlu1 }
0x13b9   : >> { %v12994_v59 = vpack.i.b16 %v12993_v38, %v12992_v50  ;;  %14956 = vmatprep.mubr.msk.bf16.mxu0 %vm3604_vm3, %v12991_v9  ;;  %v18113_v28 = vpack.i.b16 %v12999_v29, %v12998_v33  ;;  %v12589_v30 = vpop.trf.xlu0 }
0x13bb   : >> { %14962 = vmatprep.mubr.msk.bf16.mxu1 %vm3604_vm3, %v12994_v59  ;;  %v12605_v11 = vpop.trf.xlu1 }
0x13bd   : >> { %v12621_v21 = vpop.trf.xlu0 }
0x13bf   : >> { %v12637_v41 = vpop.trf.xlu1 }
0x13c1   : >> { %v12653_v36 = vpop.trf.xlu0 }
0x13c3   : >> { %v12669_v50 = vpop.trf.xlu1 }
0x13c5   : >> { %v12685_v38 = vpop.trf.xlu0 }
0x13c7   : >> { %v12701_v9 = vpop.trf.xlu1 }
0x13c9   : >> { %v12717_v59 = vpop.trf.xlu0 }
0x13cb   : >> { %v12733_v33 = vpop.trf.xlu1 }
0x13cd   : >> { %v12749_v29 = vpop.trf.xlu0 }
0x13e4   : >> { %v11634_v57 = vpop.f32.mrb[32].mxu0 }
0x13e5   : >> { %v14928_v26 = vpop.f32.mrb[33].mxu0  ;;  %v11769_v63 = vsel %vm3604_vm3, %v11634_v57, -inf }
0x13e6   : >> { %v11677_v54 = vpop.f32.mrb[60].mxu1  ;;  %11770 = vmax.xlane.f32.xlu1 %v11769_v63  ;;  %v11637_v20 = vpop.f32.mrb[34].mxu0 }
0x13e7   : >> { %v14929_v44 = vpop.f32.mrb[35].mxu0  ;;  %v14936_v40 = vpop.f32.mrb[61].mxu1  ;;  %v11772_v5 = vsel %vm3604_vm3, %v11677_v54, -inf }
0x13e8   : >> { %v11680_v16 = vpop.f32.mrb[62].mxu1  ;;  %11773 = vmax.xlane.f32.xlu0 %v11772_v5  ;;  %v12889_v40 = vcombine.low %v12541_v62, %v12605_v11 }
0x13e9   : >> { %v14937_v4 = vpop.f32.mrb[63].mxu1  ;;  %v12897_v16 = vcombine.low %v12573_v23, %v12637_v41  ;;  %v12955_v23 = vcombine.low %v12685_v38, %v12749_v29 }
0x13eb   : >> { %v12962_v29 = vrot.slane %v12955_v23, %v16019_v45 }
0x13ec   : >> { %v11720_v17 = vpop.f32.mrb[36].mxu0 }
0x13ed   : >> { %v14944_v15 = vpop.f32.mrb[37].mxu0  ;;  %v11775_v1 = vsel %vm3604_vm3, %v11720_v17, -inf }
0x13ee   : >> { %v11763_v48 = vpop.f32.mrb[64].mxu1  ;;  %11776 = vmax.xlane.f32.xlu1 %v11775_v1  ;;  %v11723_v14 = vpop.f32.mrb[38].mxu0  ;;  %v12939_v15 = vcombine.low %v12557_v6, %v12621_v21  ;;  %v12947_v1 = vcombine.low %v12589_v30, %v12653_v36 }
0x13ef   : >> { %v14945_v51 = vpop.f32.mrb[39].mxu0  ;;  %v14952_v32 = vpop.f32.mrb[65].mxu1  ;;  %v11778_v24 = vsel %vm3604_vm3, %v11763_v48, -inf }
0x13f0   : >> { %v11766_v25 = vpop.f32.mrb[66].mxu1  ;;  %11779 = vmax.xlane.f32.xlu0 %v11778_v24  ;;  %v12896_v24 = vrot.slane %v12889_v40, %v16019_v45 }
0x13f1   : >> { %v14953_v13 = vpop.f32.mrb[67].mxu1  ;;  %v12904_v25 = vrot.slane %v12897_v16, %v16019_v45 }
0x13f3   : >> { %v12921_v21 = vcombine.low %v12896_v24, %v12904_v25 }
0x141b   : >> { %12757 = vxpose.xlu1.c.b16.start.end [1/1] (short) (narrow) %v12208_v2, 16  ;;  %v12954_v2 = vrot.slane %v12947_v1, %v16019_v45 }
0x141d   : >> { %12773 = vxpose.xlu0.c.b16.start.end [1/1] (short) (narrow) %v12276_v8, 16 }
0x1473   : >> { %v11771_v0 = vpop.xlane.xlu1 %11770 }
0x1474   : >> { %v11781_v26 = vsub.f32 %v11634_v57, %v11771_v0  ;;  %v12905_v57 = vcombine.low %v12669_v50, %v12733_v33 }
0x1475   : >> { %v11774_v63 = vpop.xlane.xlu0 %11773 }
0x1476   : >> { %v11785_v53 = vmul.f32 1.442695, %v11781_v26  ;;  %v11782_v20 = vsub.f32 %v11677_v54, %v11774_v63  ;;  %v12946_v54 = vrot.slane %v12939_v15, %v16019_v45  ;;  %v12912_v41 = vrot.slane %v12905_v57, %v16019_v45 }
0x1478   : >> { %15140 = vpow2.f32 %v11785_v53  ;;  %v11787_v44 = vmul.f32 1.442695, %v11782_v20  ;;  %v12971_v33 = vcombine.low %v12946_v54, %v12954_v2  ;;  %v12928_v53 = vrot.slane %v12921_v21, %v16024_v39 }
0x147a   : >> { %15142 = vpow2.f32 %v11787_v44 }
0x147b   : >> { %v11777_v5 = vpop.xlane.xlu1 %11776 }
0x147c   : >> { %v11783_v4 = vsub.f32 %v11720_v17, %v11777_v5  ;;  %v12978_v5 = vrot.slane %v12971_v33, %v16024_v39 }
0x147d   : >> { %v11780_v14 = vpop.xlane.xlu0 %11779 }
0x147e   : >> { %v11789_v51 = vmul.f32 1.442695, %v11783_v4  ;;  %v11784_v32 = vsub.f32 %v11763_v48, %v11780_v14 }
0x1480   : >> { %15144 = vpow2.f32 %v11789_v51  ;;  %v11791_v13 = vmul.f32 1.442695, %v11784_v32 }
0x1481   : >> { %v12765_v8 = vpop.trf.xlu1 }
0x1482   : >> { %v15141_v62 = vpop.eup %15140  ;;  %15146 = vpow2.f32 %v11791_v13  ;;  %v12913_v17 = vcombine.low %v12701_v9, %v12765_v8 }
0x1483   : >> { %v12781_v6 = vpop.trf.xlu0  ;;  %v11793_v30 = vsel %vm3604_vm3, %v15141_v62, 0.0  ;;  %v11809_v48 = vpack.c.bf16 %v15141_v62, %v15141_v62 }
0x1484   : >> { %v15143_v11 = vpop.eup %15142  ;;  %v12920_v36 = vrot.slane %v12913_v17, %v16019_v45  ;;  %v12963_v50 = vcombine.low %v12717_v59, %v12781_v6  ;;  %11794 = vadd.xlane.f32.xlu1 %v11793_v30 }
0x1485   : >> { %15006 = vmatprep.subr.msk.bf16.mxu0 %vm3604_vm3, %v11809_v48  ;;  %v11796_v0 = vsel %vm3604_vm3, %v15143_v11, 0.0  ;;  %v13020_v38 = vsel %vm3604_vm3, %v11809_v48, 0  ;;  %v11810_v9 = vpack.c.bf16 %v15143_v11, %v15143_v11 }
0x1486   : >> { %v12929_v26 = vcombine.low %v12912_v41, %v12920_v36  ;;  %v12970_v63 = vrot.slane %v12963_v50, %v16019_v45  ;;  %11797 = vadd.xlane.f32.xlu0 %v11796_v0  ;;  %14955 = vmatpush3.bf16.xpose.msra.mxu0 %v13020_v38 }
0x1487   : >> { %15007 = vmatprep.subr.msk.bf16.mxu1 %vm3604_vm3, %v11810_v9  ;;  %v13078_v59 = vsel %vm3604_vm3, %v11810_v9, 0 }
0x1488   : >> { %v12936_v20 = vrot.slane %v12929_v26, %v16024_v39  ;;  %v12979_v44 = vcombine.low %v12962_v29, %v12970_v63  ;;  %14961 = vmatpush3.bf16.xpose.msra.mxu1 %v13078_v59 }
0x148a   : >> { %v15145_v40 = vpop.eup %15144  ;;  %v12937_v16 = vcombine.low %v12928_v53, %v12936_v20  ;;  %v12986_v4 = vrot.slane %v12979_v44, %v16024_v39  ;;  %v12938_v62 = vcombine.high %v12928_v53, %v12936_v20 }
0x148b   : >> { %v11799_v15 = vsel %vm3604_vm3, %v15145_v40, 0.0  ;;  %v11811_v1 = vpack.c.bf16 %v15145_v40, %v15145_v40 }
0x148c   : >> { %v15147_v14 = vpop.eup %15146  ;;  %v12987_v51 = vcombine.low %v12978_v5, %v12986_v4  ;;  %11800 = vadd.xlane.f32.xlu1 %v11799_v15  ;;  %v13004_v25 = vshrl.u32 %v12937_v16, 16  ;;  %v12988_v54 = vcombine.high %v12978_v5, %v12986_v4  ;;  %v13010_v6 = vshrl.u32 %v12938_v62, 16 }
0x148d   : >> { %15008 = vmatprep.subr.msk.bf16.mxu0 %vm3604_vm3, %v11811_v1  ;;  %v11802_v32 = vsel %vm3604_vm3, %v15147_v14, 0.0  ;;  %v11812_v24 = vpack.c.bf16 %v15147_v14, %v15147_v14  ;;  %v13136_v8 = vsel %vm3604_vm3, %v11811_v1, 0 }
0x148e   : >> { %v13003_v57 = vpack.i.b16 %v12987_v51, %v12937_v16  ;;  %v13005_v13 = vshrl.u32 %v12987_v51, 16  ;;  %11803 = vadd.xlane.f32.xlu0 %v11802_v32  ;;  %v13011_v17 = vshrl.u32 %v12988_v54, 16  ;;  %v13009_v30 = vpack.i.b16 %v12988_v54, %v12938_v62 }
0x148f   : >> { %15009 = vmatprep.subr.msk.bf16.mxu1 %vm3604_vm3, %v11812_v24  ;;  %v13194_v23 = vsel %vm3604_vm3, %v11812_v24, 0 }
0x1490   : >> { %v13006_v2 = vpack.i.b16 %v13005_v13, %v13004_v25  ;;  %14957 = vmatmul.mubr.msk.bf16.vlgmr.msra.gmra.mrb[40].mxu0 %vm3604_vm3, %v13003_v57  ;;  %v13012_v48 = vpack.i.b16 %v13011_v17, %v13010_v6 }
0x1491   : >> { %14967 = vmatpush3.bf16.xpose.msra.mxu0 %v13136_v8  ;;  %14968 = vmatprep.mubr.msk.bf16.mxu0 %vm3604_vm3, %v12997_v52 }
0x1492   : >> { %14963 = vmatmul.mubr.msk.bf16.vlgmr.msra.gmra.mrb[68].mxu1 %vm3604_vm3, %v13006_v2  ;;  %14978 = vmatprep.subr.bf16.mxu0 %v18774_v37 }
0x1493   : >> { %14973 = vmatpush3.bf16.xpose.msra.mxu1 %v13194_v23  ;;  %14974 = vmatprep.mubr.msk.bf16.mxu1 %vm3604_vm3, %v18113_v28 }
0x1498   : >> { %14969 = vmatmul.mubr.msk.bf16.vlgmr.msra.gmra.mrb[44].mxu0 %vm3604_vm3, %v13009_v30 }
0x1499   : >> { %14994 = vmatprep.mubr.msk.bf16.mxu0 %vm15260_vm1, %v18774_v37 }
0x149a   : >> { %14975 = vmatmul.mubr.msk.bf16.vlgmr.msra.gmra.mrb[72].mxu1 %vm3604_vm3, %v13012_v48 }
0x149b   : >> { %13885 = vmatprep.mubr.bf16.mxu1 %v18776_v3 }
0x1511   : >> { %v11795_v12 = vpop.xlane.xlu1 %11794 }
0x1512   : >> { %15148 = vrcp.f32 %v11795_v12 }
0x1513   : >> { %v11798_v46 = vpop.xlane.xlu0 %11797 }
0x1519   : >> { %v11801_v52 = vpop.xlane.xlu1 %11800 }
0x151a   : >> { %15150 = vrcp.f32 %v11801_v52  ;;  %v18944_v52 = vld [vmem:[#allocation120_spill] sm:$0xff] }
0x151b   : >> { %15152 = vrcp.f32 %v11798_v46  ;;  %v11804_v28 = vpop.xlane.xlu0 %11803  ;;  %v18943_v46 = vld [vmem:[#allocation121_spill] sm:$0xff] }
0x151c   : >> { %15154 = vrcp.f32 %v11804_v28  ;;  %v15149_v11 = vpop.eup %15148  ;;  %v14340_v28 = vcombine.low %v18944_v52, %v18943_v46 }
0x151e   : >> { %14979 = vmatpush3.bf16.msra.mxu0 %v14340_v28 }
0x151f   : >> { %14980 = vmatprep.subr.bf16.mxu0 %v18774_v37 }
0x1524   : >> { %v15151_v21 = vpop.eup %15150 }
0x1525   : >> { %v15153_v41 = vpop.eup %15152  ;;  %v13442_v36 = vcombine.high %v15149_v11, %v15151_v21  ;;  %v13441_v50 = vcombine.low %v15149_v11, %v15151_v21  ;;  %v18945_v11 = vld [vmem:[#allocation123_spill] sm:$0xff]  ;;  %v18946_v21 = vld [vmem:[#allocation122_spill] sm:$0xff] }
0x1526   : >> { %v15155_v33 = vpop.eup %15154 }
0x1527   : >> { %v13458_v0 = vcombine.high %v15153_v41, %v15155_v33  ;;  %v13457_v38 = vcombine.low %v15153_v41, %v15155_v33  ;;  %v13456_v9 = vrot.slane %v13442_v36, %v16019_v45  ;;  %v13449_v29 = vrot.slane %v13441_v50, %v16019_v45  ;;  %v18947_v36 = vld [vmem:[#allocation125_spill] sm:$0xff]  ;;  %v18948_v50 = vld [vmem:[#allocation124_spill] sm:$0xff] }
0x1528   : >> { %v14341_v41 = vcombine.low %v18946_v21, %v18945_v11  ;;  %v14342_v33 = vcombine.low %v18948_v50, %v18947_v36 }
0x1529   : >> { %v13472_v3 = vrot.slane %v13458_v0, %v16019_v45  ;;  %v13465_v26 = vrot.slane %v13457_v38, %v16019_v45  ;;  %v18949_v0 = vld [vmem:[#allocation127_spill] sm:$0xff]  ;;  %v18950_v38 = vld [vmem:[#allocation126_spill] sm:$0xff] }
0x152a   : >> { %14981 = vmatpush3.bf16.msra.mxu0 %v14341_v41 }
0x152b   : >> { %v13489_v63 = vcombine.low %v13456_v9, %v13472_v3  ;;  %v13473_v59 = vcombine.low %v13449_v29, %v13465_v26  ;;  %v13490_v44 = vcombine.high %v13456_v9, %v13472_v3  ;;  %v13474_v40 = vcombine.high %v13449_v29, %v13465_v26  ;;  %14982 = vmatprep.subr.bf16.mxu0 %v18774_v37  ;;  %v18951_v3 = vld [vmem:[#allocation129_spill] sm:$0xff]  ;;  %v18952_v29 = vld [vmem:[#allocation128_spill] sm:$0xff] }
0x152c   : >> { %v14343_v9 = vcombine.low %v18950_v38, %v18949_v0  ;;  %v14344_v26 = vcombine.low %v18952_v29, %v18951_v3 }
0x152d   : >> { %v13497_v53 = vrot.slane %v13489_v63, %v16024_v39  ;;  %v13481_v20 = vrot.slane %v13473_v59, %v16024_v39  ;;  %v13504_v5 = vrot.slane %v13490_v44, %v16024_v39  ;;  %v13488_v16 = vrot.slane %v13474_v40, %v16024_v39  ;;  %v18953_v63 = vld [vmem:[#allocation131_spill] sm:$0xff]  ;;  %v18954_v59 = vld [vmem:[#allocation130_spill] sm:$0xff] }
0x152e   : >> { %14983 = vmatpush3.bf16.msra.mxu0 %v14342_v33 }
0x152f   : >> { %13531 = vperm.xlu0 %15102, %v13497_v53   ;;  %13511 = vperm.xlu1 %15103, %v13481_v20   ;;  %v13506_v4 = vcombine.high %v13488_v16, %v18774_v37  ;;  %v13505_v15 = vcombine.high %v13481_v20, %v18774_v37  ;;  %v13507_v1 = vcombine.high %v13497_v53, %v18774_v37 }
0x1530   : >> { %v13508_v14 = vcombine.high %v13504_v5, %v18774_v37  ;;  %14984 = vmatprep.subr.bf16.mxu0 %v18774_v37  ;;  %v14345_v53 = vcombine.low %v18954_v59, %v18953_v63 }
0x1532   : >> { %14985 = vmatpush3.bf16.msra.mxu0 %v14343_v9 }
0x1533   : >> { %13541 = vperm.xlu0 %15102, %v13504_v5   ;;  %13521 = vperm.xlu1 %15103, %v13488_v16  }
0x1534   : >> { %14986 = vmatprep.subr.bf16.mxu0 %v18774_v37 }
0x1536   : >> { %14987 = vmatpush3.bf16.msra.mxu0 %v14344_v26 }
0x1537   : >> { %13526 = vperm.xlu1 %15103, %v13506_v4   ;;  %13516 = vperm.xlu0 %15102, %v13505_v15  }
0x1538   : >> { %14988 = vmatprep.subr.bf16.mxu0 %v18774_v37 }
0x153a   : >> { %14989 = vmatpush3.bf16.msra.mxu0 %v14345_v53  ;;  %v18955_v53 = vld [vmem:[#allocation133_spill] sm:$0xff] }
0x153b   : >> { %13536 = vperm.xlu1 %15103, %v13507_v1   ;;  %14990 = vmatprep.subr.bf16.mxu0 %v18774_v37 }
0x153f   : >> { %13546 = vperm.xlu1 %15103, %v13508_v14  }
0x1563   : >> { %v14958_v51 = vpop.f32.mrb[40].mxu0 }
0x1564   : >> { %v13056_v32 = vpop.f32.mrb[41].mxu0 }
0x1565   : >> { %v14964_v24 = vpop.f32.mrb[68].mxu1  ;;  %13245 = vxpose.xlu0.b32.start [1/4] (short) (narrow) %v13056_v32, 8  ;;  %v14959_v25 = vpop.f32.mrb[42].mxu0 }
0x1566   : >> { %v13059_v57 = vpop.f32.mrb[43].mxu0  ;;  %v13114_v13 = vpop.f32.mrb[69].mxu1 }
0x1567   : >> { %v14965_v54 = vpop.f32.mrb[70].mxu1 }
0x1568   : >> { %v13117_v2 = vpop.f32.mrb[71].mxu1  ;;  %13277 = vxpose.xlu1.b32.start [1/4] (short) (narrow) %v13114_v13, 8 }
0x1569   : >> { %13246 = vxpose.xlu0.b32.cont [2/4] (short) (narrow) %v13059_v57, 8 }
0x156b   : >> { %v14970_v8 = vpop.f32.mrb[44].mxu0 }
0x156c   : >> { %13278 = vxpose.xlu1.b32.cont [2/4] (short) (narrow) %v13117_v2, 8  ;;  %v13172_v62 = vpop.f32.mrb[45].mxu0 }
0x156d   : >> { %v14976_v23 = vpop.f32.mrb[72].mxu1  ;;  %13247 = vxpose.xlu0.b32.cont [3/4] (short) (narrow) %v14958_v51, 8  ;;  %v14971_v17 = vpop.f32.mrb[46].mxu0 }
0x156e   : >> { %v13175_v6 = vpop.f32.mrb[47].mxu0  ;;  %v13230_v30 = vpop.f32.mrb[73].mxu1 }
0x156f   : >> { %v14977_v48 = vpop.f32.mrb[74].mxu1 }
0x1570   : >> { %v13233_v12 = vpop.f32.mrb[75].mxu1  ;;  %13279 = vxpose.xlu1.b32.cont [3/4] (short) (narrow) %v14964_v24, 8 }
0x1571   : >> { %13248 = vxpose.xlu0.b32.end [4/4] (short) (narrow) %v14959_v25, 8 }
0x1574   : >> { %13280 = vxpose.xlu1.b32.end [4/4] (short) (narrow) %v14965_v54, 8 }
0x1575   : >> { %13309 = vxpose.xlu0.b32.start [1/4] (short) (narrow) %v13172_v62, 8 }
0x1578   : >> { %13341 = vxpose.xlu1.b32.start [1/4] (short) (narrow) %v13230_v30, 8 }
0x1579   : >> { %13310 = vxpose.xlu0.b32.cont [2/4] (short) (narrow) %v13175_v6, 8 }
0x157c   : >> { %13342 = vxpose.xlu1.b32.cont [2/4] (short) (narrow) %v13233_v12, 8 }
0x157d   : >> { %13311 = vxpose.xlu0.b32.cont [3/4] (short) (narrow) %v14970_v8, 8 }
0x1580   : >> { %13343 = vxpose.xlu1.b32.cont [3/4] (short) (narrow) %v14976_v23, 8 }
0x1581   : >> { %13312 = vxpose.xlu0.b32.end [4/4] (short) (narrow) %v14971_v17, 8 }
0x1584   : >> { %13344 = vxpose.xlu1.b32.end [4/4] (short) (narrow) %v14977_v48, 8 }
0x15ae   : >> { %v13512_v20 = vpop.permute.xlu1 %13511  ;;  %v13532_v40 = vpop.permute.xlu0 %13531 }
0x15b2   : >> { %v13522_v44 = vpop.permute.xlu1 %13521  ;;  %v13542_v16 = vpop.permute.xlu0 %13541 }
0x15b6   : >> { %v13527_v5 = vpop.permute.xlu1 %13526  ;;  %v13517_v15 = vpop.permute.xlu0 %13516 }
0x15ba   : >> { %v13537_v4 = vpop.permute.xlu1 %13536 }
0x15be   : >> { %v13547_v1 = vpop.permute.xlu1 %13546 }
0x15e5   : >> { %v13261_v14 = vpop.trf.xlu0 }
0x15e8   : >> { %v13293_v51 = vpop.trf.xlu1 }
0x15f5   : >> { %v13325_v32 = vpop.trf.xlu0 }
0x15f6   : >> { %v13373_v24 = vcombine.low %v13261_v14, %v13325_v32  ;;  %v13374_v25 = vcombine.high %v13261_v14, %v13325_v32  ;;  %v18956_v14 = vld [vmem:[#allocation132_spill] sm:$0xff] }
0x15f8   : >> { %v13357_v57 = vpop.trf.xlu1  ;;  %v13381_v2 = vrot.slane %v13373_v24, %v16019_v45  ;;  %v13388_v8 = vrot.slane %v13374_v25, %v16019_v45 }
0x15f9   : >> { %v13389_v13 = vcombine.low %v13293_v51, %v13357_v57  ;;  %v13390_v54 = vcombine.high %v13293_v51, %v13357_v57  ;;  %v14346_v51 = vcombine.low %v18956_v14, %v18955_v53 }
0x15fb   : >> { %v13397_v62 = vrot.slane %v13389_v13, %v16019_v45  ;;  %v13404_v23 = vrot.slane %v13390_v54, %v16019_v45  ;;  %14991 = vmatpush3.bf16.msra.mxu0 %v14346_v51  ;;  %v18964_v51 = vld [vmem:[#allocation149_spill] sm:$0xff] }
0x15fc   : >> { %14992 = vmatprep.subr.bf16.mxu0 %v18774_v37 }
0x15fd   : >> { %v13405_v17 = vcombine.low %v13381_v2, %v13397_v62  ;;  %v13406_v6 = vcombine.high %v13381_v2, %v13397_v62  ;;  %v13421_v30 = vcombine.low %v13388_v8, %v13404_v23  ;;  %v13422_v48 = vcombine.high %v13388_v8, %v13404_v23 }
0x15ff   : >> { %v13413_v12 = vrot.slane %v13405_v17, %v16024_v39  ;;  %v13420_v46 = vrot.slane %v13406_v6, %v16024_v39  ;;  %v13429_v52 = vrot.slane %v13421_v30, %v16024_v39  ;;  %v13436_v28 = vrot.slane %v13422_v48, %v16024_v39 }
0x1601   : >> { %v13437_v11 = vcombine.high %v13413_v12, %v18774_v37  ;;  %v13438_v21 = vcombine.high %v13420_v46, %v18774_v37  ;;  %v13439_v41 = vcombine.high %v13429_v52, %v18774_v37  ;;  %v13440_v36 = vcombine.high %v13436_v28, %v18774_v37 }
0x1602   : >> { %v13549_v50 = vmul.f32 %v13512_v20, %v13413_v12  ;;  %v13551_v33 = vmul.f32 %v13522_v44, %v13420_v46  ;;  %v13553_v0 = vmul.f32 %v13532_v40, %v13429_v52  ;;  %v13555_v38 = vmul.f32 %v13542_v16, %v13436_v28  ;;  %v18957_v40 = vld [vmem:[#allocation135_spill] sm:$0xff] }
0x1603   : >> { %v13550_v9 = vmul.f32 %v13517_v15, %v13437_v11  ;;  %v13552_v3 = vmul.f32 %v13527_v5, %v13438_v21  ;;  %v13554_v29 = vmul.f32 %v13537_v4, %v13439_v41  ;;  %v13556_v26 = vmul.f32 %v13547_v1, %v13440_v36  ;;  %v18958_v5 = vld [vmem:[#allocation134_spill] sm:$0xff]  ;;  %v18959_v41 = vld [vmem:[#allocation143_spill] sm:$0xff] }
0x1604   : >> { %v13557_v63 = vcombine.low %v13549_v50, %v13551_v33  ;;  %v13573_v59 = vcombine.low %v13553_v0, %v13555_v38  ;;  %v14347_v16 = vcombine.low %v18958_v5, %v18957_v40  ;;  %v18966_v40 = vld [vmem:[#allocation151_spill] sm:$0xff]  ;;  %v18967_v5 = vld [vmem:[#allocation150_spill] sm:$0xff] }
0x1605   : >> { %v13565_v32 = vcombine.low %v13550_v9, %v13552_v3  ;;  %v13581_v24 = vcombine.low %v13554_v29, %v13556_v26  ;;  %v18960_v9 = vld [vmem:[#allocation145_spill] sm:$0xff]  ;;  %v18961_v3 = vld [vmem:[#allocation144_spill] sm:$0xff] }
0x1606   : >> { %v13564_v25 = vrot.slane %v13557_v63, %v16019_v45  ;;  %v13580_v20 = vrot.slane %v13573_v59, %v16019_v45  ;;  %14993 = vmatpush3.bf16.msra.mxu0 %v14347_v16  ;;  %v14351_v29 = vcombine.high %v18961_v3, %v18960_v9  ;;  %v14350_v26 = vcombine.low %v18961_v3, %v18960_v9  ;;  %v18962_v63 = vld [vmem:[#allocation147_spill] sm:$0xff]  ;;  %v18963_v59 = vld [vmem:[#allocation146_spill] sm:$0xff] }
0x1607   : >> { %v13572_v57 = vrot.slane %v13565_v32, %v16019_v45  ;;  %v13588_v44 = vrot.slane %v13581_v24, %v16019_v45  ;;  %v14353_v53 = vcombine.high %v18963_v59, %v18962_v63  ;;  %v14352_v14 = vcombine.low %v18963_v59, %v18962_v63  ;;  %v18965_v32 = vld [vmem:[#allocation148_spill] sm:$0xff] }
0x1608   : >> { %13853 = vmatprep.subr.bf16.mxu1 %v14351_v29  ;;  %v14357_v16 = vcombine.high %v18967_v5, %v18966_v40  ;;  %v18982_v29 = vld [vmem:[#allocation164_spill] sm:$0xff] }
0x1609   : >> { %v13590_v4 = vcombine.high %v13564_v25, %v13572_v57  ;;  %v13606_v15 = vcombine.high %v13580_v20, %v13588_v44  ;;  %v13589_v1 = vcombine.low %v13564_v25, %v13572_v57  ;;  %v13605_v13 = vcombine.low %v13580_v20, %v13588_v44  ;;  %13854 = vmatpush1.bf16.msra.mxu1 %v14350_v26  ;;  %v18983_v26 = vld [vmem:[#allocation163_spill] sm:$0xff] }
0x160a   : >> { %13855 = vmatprep.subr.bf16.mxu1 %v14353_v53  ;;  %v14354_v44 = vcombine.low %v18965_v32, %v18964_v51  ;;  %v14368_v53 = vcombine.low %v18983_v26, %v18982_v29 }
0x160b   : >> { %v13604_v54 = vrot.slane %v13590_v4, %v16024_v39  ;;  %v13620_v2 = vrot.slane %v13606_v15, %v16024_v39  ;;  %v13597_v8 = vrot.slane %v13589_v1, %v16024_v39  ;;  %v13613_v62 = vrot.slane %v13605_v13, %v16024_v39  ;;  %v18968_v15 = vld [vmem:[#allocation153_spill] sm:$0xff]  ;;  %v18969_v1 = vld [vmem:[#allocation152_spill] sm:$0xff] }
0x160c   : >> { %v14356_v4 = vcombine.low %v18967_v5, %v18966_v40  ;;  %v14359_v13 = vcombine.high %v18969_v1, %v18968_v15 }
0x160d   : >> { %v13623_v23 = vcombine.low %v13604_v54, %v13620_v2  ;;  %v13622_v17 = vcombine.high %v13597_v8, %v13613_v62  ;;  %v13621_v6 = vcombine.low %v13597_v8, %v13613_v62  ;;  %v13624_v37 = vcombine.high %v13604_v54, %v13620_v2  ;;  %13856 = vmatpush1.bf16.msra.mxu1 %v14352_v14  ;;  %v18970_v2 = vld [vmem:[#allocation155_spill] sm:$0xff]  ;;  %v18971_v8 = vld [vmem:[#allocation154_spill] sm:$0xff] }
0x160e   : >> { %v14358_v54 = vcombine.low %v18969_v1, %v18968_v15  ;;  %v14361_v62 = vcombine.high %v18971_v8, %v18970_v2  ;;  %v18984_v14 = vld [vmem:[#allocation182_spill] sm:$0xff] }
0x160f   : >> { %13630 = vrot.lane.b32.xlu1 %v13623_v23, %s15263_s15  ;;  %13626 = vrot.lane.b32.xlu0 %v13622_v17, %s15261_s24  ;;  %v14360_v23 = vcombine.low %v18971_v8, %v18970_v2  ;;  %v18972_v17 = vld [vmem:[#allocation157_spill] sm:$0xff] }
0x1613   : >> { %13634 = vrot.lane.b32.xlu0 %v13624_v37, %s15262_s18 }
0x1681   : >> { %v13627_v30 = vpop.permute.xlu0 %13626  ;;  %v13631_v48 = vpop.permute.xlu1 %13630 }
0x1682   : >> { %v13637_v12 = vsel %vm3431_vm2, %v13621_v6, %v13627_v30  ;;  %v18973_v6 = vld [vmem:[#allocation156_spill] sm:$0xff] }
0x1683   : >> { %v13638_v52 = vsel %vm5474_vm4, %v13637_v12, %v13631_v48  ;;  %v14363_v37 = vcombine.high %v18973_v6, %v18972_v17  ;;  %v14362_v30 = vcombine.low %v18973_v6, %v18972_v17  ;;  %v18974_v48 = vld [vmem:[#allocation159_spill] sm:$0xff]  ;;  %v18975_v12 = vld [vmem:[#allocation158_spill] sm:$0xff] }
0x1685   : >> { %v13635_v46 = vpop.permute.xlu0 %13634 }
0x1686   : >> { %v13639_v28 = vsel %vm5476_vm5, %v13638_v52, %v13635_v46  ;;  %v14365_v46 = vcombine.high %v18975_v12, %v18974_v48  ;;  %v14364_v52 = vcombine.low %v18975_v12, %v18974_v48 }
0x1687   : >> { %v13640_v11 = vpack.c.bf16 %v13639_v28, %v13639_v28  ;;  %v18976_v28 = vld [vmem:[#allocation178_spill] sm:$0xff] }
0x1689   : >> { %14995 = vmatmul.mubr.bf16.vlgmr.msra.gmra.mrb[48].mxu0 %v13640_v11  ;;  %v18977_v11 = vld [vmem:[#allocation177_spill] sm:$0xff] }
0x175c   : >> { %v13729_v21 = vpop.f32.mrb[48].mxu0 }
0x175d   : >> { %v13730_v36 = vadd.f32 %v18959_v41, %v13729_v21  ;;  %v14996_v50 = vpop.f32.mrb[49].mxu0  ;;  %v14375_v21 = vcombine.low %v18977_v11, %v18976_v28  ;;  %v18978_v41 = vld [vmem:[#allocation162_spill] sm:$0xff]  ;;  %v18995_v28 = vld [vmem:[#allocation169_spill] sm:$0xff] }
0x175e   : >> { %v13732_v33 = vpop.f32.mrb[50].mxu0 }
0x175f   : >> { %v13735_v0 = vadd.f32 %v13730_v36, %v17829_v10  ;;  %v14997_v38 = vpop.f32.mrb[51].mxu0  ;;  %v14355_v10 = vcombine.high %v18965_v32, %v18964_v51  ;;  %v18979_v36 = vld [vmem:[#allocation161_spill] sm:$0xff]  ;;  %v18980_v33 = vld [vmem:[#allocation180_spill] sm:$0xff]  ;;  %14568 = vmatprep.subr.bf16.mxu0 %v14375_v21 }
0x1760   : >> { %v14367_v50 = vcombine.low %v18979_v36, %v18978_v41  ;;  %v18996_v21 = vld [vmem:[#allocation188_spill] sm:$0xff]  ;;  %v18997_v41 = vld [vmem:[#allocation187_spill] sm:$0xff] }
0x1761   : >> { %13736 = vadd.xlane.f32.xlu1 %v13735_v0  ;;  %13857 = vmatprep.subr.bf16.mxu1 %v14355_v10  ;;  %v18985_v10 = vld [vmem:[#allocation181_spill] sm:$0xff]  ;;  %v14380_v36 = vcombine.low %v18997_v41, %v18996_v21 }
0x1762   : >> { %13858 = vmatpush1.bf16.msra.mxu1 %v14354_v44  ;;  %14569 = vmatpush3.bf16.msra.mxu0 %v14367_v50  ;;  %v18998_v50 = vld [vmem:[#allocation172_spill] sm:$0xff] }
0x1763   : >> { %13859 = vmatprep.subr.bf16.mxu1 %v14357_v16  ;;  %v18988_v16 = vld [vmem:[#allocation184_spill] sm:$0xff] }
0x1766   : >> { %13860 = vmatpush1.bf16.msra.mxu1 %v14356_v4  ;;  %v18989_v4 = vld [vmem:[#allocation183_spill] sm:$0xff] }
0x1767   : >> { %13861 = vmatprep.subr.bf16.mxu1 %v14359_v13  ;;  %v14378_v13 = vcombine.low %v18989_v4, %v18988_v16  ;;  %v19002_v16 = vld [vmem:[#allocation190_spill] sm:$0xff]  ;;  %v19003_v4 = vld [vmem:[#allocation189_spill] sm:$0xff] }
0x176a   : >> { %13862 = vmatpush1.bf16.msra.mxu1 %v14358_v54  ;;  %v18990_v54 = vld [vmem:[#allocation168_spill] sm:$0xff] }
0x176b   : >> { %13863 = vmatprep.subr.bf16.mxu1 %v14361_v62  ;;  %v18991_v62 = vld [vmem:[#allocation167_spill] sm:$0xff] }
0x176e   : >> { %13864 = vmatpush1.bf16.msra.mxu1 %v14360_v23  ;;  %v14370_v23 = vcombine.low %v18991_v62, %v18990_v54  ;;  %v19004_v54 = vld [vmem:[#allocation174_spill] sm:$0xff]  ;;  %v19005_v62 = vld [vmem:[#allocation173_spill] sm:$0xff] }
0x176f   : >> { %13865 = vmatprep.subr.bf16.mxu1 %v14363_v37  ;;  %v18992_v37 = vld [vmem:[#allocation186_spill] sm:$0xff] }
0x1772   : >> { %13866 = vmatpush1.bf16.msra.mxu1 %v14362_v30  ;;  %v18993_v30 = vld [vmem:[#allocation185_spill] sm:$0xff] }
0x1773   : >> { %13867 = vmatprep.subr.bf16.mxu1 %v14365_v46  ;;  %v14379_v46 = vcombine.low %v18993_v30, %v18992_v37  ;;  %v19006_v37 = vld [vmem:[#allocation192_spill] sm:$0xff]  ;;  %v19007_v30 = vld [vmem:[#allocation191_spill] sm:$0xff] }
0x1776   : >> { %13868 = vmatpush1.bf16.msra.mxu1 %v14364_v52  ;;  %v18994_v52 = vld [vmem:[#allocation170_spill] sm:$0xff] }
0x1777   : >> { %v14371_v11 = vcombine.low %v18995_v28, %v18994_v52  ;;  %v19008_v52 = vld [vmem:[#allocation176_spill] sm:$0xff]  ;;  %v19009_v28 = vld [vmem:[#allocation175_spill] sm:$0xff] }
0x17ee   : >> { %v13737_v24 = vpop.xlane.xlu1 %13736 }
0x17ef   : >> { %v13738_v25 = vmul.f32 0.0078125, %v13737_v24  ;;  %v14377_v24 = vcombine.low %v18985_v10, %v18984_v14  ;;  %v19000_v10 = vld [vmem:[#allocation196_spill] sm:$0xff] }
0x17f1   : >> { %v13739_v57 = vsub.f32 %v13735_v0, %v13738_v25  ;;  %v18981_v0 = vld [vmem:[#allocation179_spill] sm:$0xff]  ;;  %v18986_v25 = vld [vmem:[#allocation166_spill] sm:$0xff] }
0x17f2   : >> { %v14376_v38 = vcombine.low %v18981_v0, %v18980_v33  ;;  %v18999_v33 = vld [vmem:[#allocation171_spill] sm:$0xff] }
0x17f3   : >> { %v13740_v20 = vmul.f32 %v13739_v57, %v13739_v57  ;;  %v14372_v0 = vcombine.low %v18999_v33, %v18998_v50 }
0x17f4   : >> { %14570 = vmatprep.subr.bf16.mxu0 %v14376_v38 }
0x17f5   : >> { %13741 = vadd.xlane.f32.xlu0 %v13740_v20  ;;  %14571 = vmatpush3.bf16.msra.mxu0 %v14368_v53  ;;  %v18987_v20 = vld [vmem:[#allocation165_spill] sm:$0xff] }
0x17f6   : >> { %v14369_v44 = vcombine.low %v18987_v20, %v18986_v25  ;;  %14572 = vmatprep.subr.bf16.mxu0 %v14377_v24  ;;  %v19001_v25 = vld [vmem:[#allocation200_spill] sm:$0xff] }
0x17f9   : >> { %14573 = vmatpush3.bf16.msra.mxu0 %v14369_v44 }
0x17fa   : >> { %14574 = vmatprep.subr.bf16.mxu0 %v14378_v13  ;;  %v14381_v13 = vcombine.low %v19003_v4, %v19002_v16 }
0x17fd   : >> { %14575 = vmatpush3.bf16.msra.mxu0 %v14370_v23  ;;  %v14373_v23 = vcombine.low %v19005_v62, %v19004_v54 }
0x17fe   : >> { %14576 = vmatprep.subr.bf16.mxu0 %v14379_v46  ;;  %v14382_v46 = vcombine.low %v19007_v30, %v19006_v37 }
0x1801   : >> { %14577 = vmatpush3.bf16.msra.mxu0 %v14371_v11  ;;  %v19010_v11 = vld [vmem:[#allocation202_spill] sm:$0xff] }
0x1802   : >> { %14578 = vmatprep.subr.bf16.mxu0 %v14380_v36  ;;  %v13765_v21 = vsub.s32 0, %v19010_v11  ;;  %v13769_v41 = vsub.s32 1, %v19010_v11  ;;  %v19011_v36 = vld [vmem:[#allocation160_spill] sm:$0xff] }
0x1804   : >> { %v13766_v50 = vrot.slane %v19011_v36, %v13765_v21  ;;  %v13770_v33 = vrot.slane %v19011_v36, %v13769_v41 }
0x1805   : >> { %14579 = vmatpush3.bf16.msra.mxu0 %v14372_v0 }
0x1806   : >> { %14580 = vmatprep.subr.bf16.mxu0 %v14381_v13 }
0x1809   : >> { %14581 = vmatpush3.bf16.msra.mxu0 %v14373_v23  ;;  %v19012_v23 = vld [vmem:[#allocation193_spill] sm:$0xff] }
0x180a   : >> { %14582 = vmatprep.subr.bf16.mxu0 %v14382_v46 }
0x1882   : >> { %v13742_v38 = vpop.xlane.xlu0 %13741 }
0x1883   : >> { %v13743_v29 = vmul.f32 0.0078125, %v13742_v38 }
0x1885   : >> { %v13744_v26 = vadd.f32 1e-05, %v13743_v29 }
0x1887   : >> { %15156 = vrsqrt.f32 %v13744_v26 }
0x1891   : >> { %v15157_v53 = vpop.eup %15156 }
0x1892   : >> { %v13746_v14 = vmul.f32 %v15157_v53, %v13739_v57  ;;  %v14374_v57 = vcombine.low %v19009_v28, %v19008_v52 }
0x1894   : >> { %v13753_v24 = vmul.f32 %v19000_v10, %v13746_v14  ;;  %14583 = vmatpush3.bf16.msra.mxu0 %v14374_v57 }
0x1896   : >> { %v13760_v20 = vadd.f32 %v19001_v25, %v13753_v24 }
0x1898   : >> { %v13761_v44 = vpack.c.bf16 %v13760_v20, %v13760_v20 }
0x189a   : >> { %13886 = vmatmul.mubr.bf16.vlgmr.msra.gmra.mrb[76].mxu1 %v13761_v44 }
0x196d   : >> { %v13887_v0 = vpop.f32.mrb[76].mxu1 }
0x196e   : >> { %v13888_v38 = vadd.f32 %v13887_v0, %v13766_v50  ;;  %v13889_v29 = vpop.f32.mrb[77].mxu1 }
0x196f   : >> { %v13890_v26 = vadd.f32 %v13889_v29, %v13770_v33  ;;  %v13891_v53 = vpop.f32.mrb[78].mxu1 }
0x1970   : >> { %v13894_v14 = vmax.f32 %v13888_v38, 0.0  ;;  %v13892_v10 = vpop.f32.mrb[79].mxu1  ;;  %v19013_v38 = vld [vmem:[#allocation197_spill] sm:$0xff] }
0x1971   : >> { %v13895_v24 = vmax.f32 %v13890_v26, 0.0  ;;  %v19014_v26 = vld [vmem:[#allocation201_spill] sm:$0xff] }
0x1972   : >> { %v13896_v44 = vpack.c.bf16 %v13894_v14, %v13894_v14 }
0x1973   : >> { %v13897_v25 = vpack.c.bf16 %v13895_v24, %v13895_v24 }
0x1975   : >> { %14032 = vmatprep.mubr.bf16.mxu0 %v13897_v25 }
0x1976   : >> { %14033 = vmatmul.mubr.bf16.vlgmr.msra.gmra.mrb[52].mxu0 %v13896_v44 }
0x1a49   : >> { %v14584_v16 = vpop.f32.mrb[52].mxu0 }
0x1a4a   : >> { %v14585_v4 = vpop.f32.mrb[53].mxu0 }
0x1a4b   : >> { %v14586_v13 = vadd.f32 %v14585_v4, %v14584_v16  ;;  %v14587_v54 = vpop.f32.mrb[54].mxu0 }
0x1a4c   : >> { %v14588_v62 = vpop.f32.mrb[55].mxu0 }
0x1a4d   : >> { %v14035_v37 = vadd.f32 %v14586_v13, %v19012_v23 }
0x1a4f   : >> { %v14040_v30 = vadd.f32 %v14035_v37, %v13760_v20 }
0x1a51   : >> { %14041 = vadd.xlane.f32.xlu0 %v14040_v30 }
0x1ade   : >> { %v14042_v46 = vpop.xlane.xlu0 %14041 }
0x1adf   : >> { %v14043_v52 = vmul.f32 0.0078125, %v14042_v46 }
0x1ae1   : >> { %v14044_v28 = vsub.f32 %v14040_v30, %v14043_v52 }
0x1ae3   : >> { %v14045_v57 = vmul.f32 %v14044_v28, %v14044_v28 }
0x1ae5   : >> { %14046 = vadd.xlane.f32.xlu1 %v14045_v57 }
0x1b72   : >> { %v14047_v21 = vpop.xlane.xlu1 %14046 }
0x1b73   : >> { %v14048_v41 = vmul.f32 0.0078125, %v14047_v21 }
0x1b75   : >> { %v14049_v50 = vadd.f32 1e-05, %v14048_v41 }
0x1b77   : >> { %15158 = vrsqrt.f32 %v14049_v50 }
0x1b81   : >> { %v15159_v33 = vpop.eup %15158 }
0x1b82   : >> { %v14051_v0 = vmul.f32 %v15159_v33, %v14044_v28  ;;  %1616 = sbr.rel (!%p1614_p5) target bundleno = 582 (0x246), region = 116 }
0x1b84   : >> { %v14058_v29 = vmul.f32 %v19013_v38, %v14051_v0 }
0x1b86   : >> { %v14065_v53 = vadd.f32 %v19014_v26, %v14058_v29  }
0x1b88   : >> { %v19015_v62 = vmov %v14065_v53  ;;  %14066 = vst [vmem:[%s448_s14] sm:$0xff] (%p1614_p5), %v14065_v53 }
0x1b89 PF: > { %s23_s17 = sadd.s32 1, %s15238_s17  }
0x1b8a   : > { %p20_p10 = scmp.ge.s32.totalorder %s23_s17, 4  }
0x1b8c   :  { %22 = sbr.rel (!%p20_p10) target bundleno = 2 (0x2), region = 127 }
0x1b93   :  { %14086 = vsyncpa [#allocation3], 1 }
0x1b94   :  { %14088 = vsyncpa [#allocation3 + $0x1], 1 }
0x1b95   :  { %14089 = vsyncpa [#allocation5], 1 }

</bundles_post_ra>
